<compile_context>
chip_gen: v7x
topology: tpu7x:2x2x1
jax: 0.10.0
libtpu: 0.0.40
codegen_flags: <defaults>
</compile_context>

<pallas_src>
import functools

import numpy as np
import jax
import jax.numpy as jnp
from jax.experimental import pallas as pl
from jax.experimental.pallas import tpu as pltpu


_ENC_CH = [(1, 16), (16, 32), (32, 64)]
_DEC_CH = [(64, 32), (32, 16), (16, 1)]
_CMAX = 64          # widest channel count -> lane width of the packed param buffer


def _align8(n):
    return (n + 7) // 8 * 8


# ----------------------------- static geometry ------------------------------

def _layer_geometry(H, W):
    """Static per-layer shapes.  Each layer reads a flattened (hp*wp, cin)
    VMEM buffer (already padded / zero-dilated) and produces an (L, cout)
    activation in the 'junk-column' layout  j = oh*wp + ow."""
    layers = []
    h, w = H, W
    for cin, cout in _ENC_CH:
        assert h % 2 == 0 and w % 2 == 0, "spatial dims must stay even"
        hp, wp = h + 2, w + 2                        # Conv2d pad = 1
        oh, ow = h // 2, w // 2
        layers.append(dict(kind="enc", cin=cin, cout=cout, hp=hp, wp=wp,
                           oh=oh, ow=ow, L=(oh - 1) * wp + ow, stride=2))
        h, w = oh, ow
    for cin, cout in _DEC_CH:
        hp, wp = 2 * h + 2, 2 * w + 2                # x2 dilation + pad (lo=1, hi=2)
        oh, ow = 2 * h, 2 * w
        layers.append(dict(kind="dec", cin=cin, cout=cout, hp=hp, wp=wp,
                           oh=oh, ow=ow, L=(oh - 1) * wp + ow, stride=1))
        h, w = oh, ow
    return layers


def _weight_offsets(row_counts):
    """8-aligned row offsets of each layer's (9*cin, cout) weight block inside
    the packed parameter buffer, plus the bias-row offset and total rows."""
    offs, r = [], 0
    for rc in row_counts:
        offs.append(r)
        r = _align8(r + rc)
    return offs, r, r + len(row_counts)


def _placement_matrices(layers):
    """0/1 matrices S_k with  next_buffer = S_k @ relu(layer_k_output).
    Encoder handoff embeds valid rows inside the pad-1 ring; decoder handoff
    realises the x2 zero-dilation + (lo=1, hi=2) padding.  Packed into one
    (rows, max_cols) f32 buffer with 8-aligned row offsets."""
    mats = []
    for li in range(len(layers) - 1):
        cur, nxt = layers[li], layers[li + 1]
        S = np.zeros((nxt["hp"] * nxt["wp"], cur["L"]), np.float32)
        for r in range(cur["oh"]):
            for c in range(cur["ow"]):
                src = r * cur["wp"] + c
                if nxt["kind"] == "enc":
                    dst = (r + 1) * nxt["wp"] + (c + 1)
                else:
                    dst = (1 + 2 * r) * nxt["wp"] + (1 + 2 * c)
                S[dst, src] = 1.0
        mats.append(S)
    offs, r = [], 0
    for S in mats:
        offs.append(r)
        r = _align8(r + S.shape[0])
    maxc = max(S.shape[1] for S in mats)
    buf = np.zeros((r, maxc), np.float32)
    for off, S in zip(offs, mats):
        buf[off:off + S.shape[0], :S.shape[1]] = S
    return jnp.asarray(buf), offs


# ------------------------------- Pallas kernel ------------------------------

def _fused_autoencoder_kernel(layers, woff, brow, soff,
                              x_ref, p_ref, s_ref, o_ref, *bufs):
    """Whole 6-layer forward for ONE image.  All activations stay in VMEM."""
    n_layers = len(layers)
    in_bufs = (x_ref,) + tuple(bufs)                 # layer-i input buffer

    for li, g in enumerate(layers):
        buf = in_bufs[li]
        cin, cout = g["cin"], g["cout"]
        wp, L, stride = g["wp"], g["L"], g["stride"]
        w0 = woff[li]

        # Bias-initialised f32 accumulator (no zeros + separate add pass).
        bias = p_ref[brow + li:brow + li + 1, 0:cout]            # (1, cout)
        acc = jnp.broadcast_to(bias, (L, cout))

        # 3x3 conv = 9 shifted row-slices x (cin, cout) weight taps.
        for dy in range(3):
            for dx in range(3):
                tap = dy * 3 + dx
                start = dy * wp + dx
                if stride == 2:
                    rows = buf[pl.ds(start, L, stride=2), :]     # sublane-strided
                else:
                    rows = buf[pl.ds(start, L), :]               # contiguous
                wt = p_ref[w0 + tap * cin:w0 + (tap + 1) * cin, 0:cout]
                if cin == 1:
                    acc = acc + rows * wt                        # (L,1)*(1,cout) VPU
                else:
                    acc = acc + jnp.dot(rows, wt,
                                        preferred_element_type=jnp.float32)

        if li == n_layers - 1:
            o_ref[pl.ds(0, L), :] = 1.0 / (1.0 + jnp.exp(-acc))  # Sigmoid (exact)
        else:
            h = jnp.maximum(acc, 0.0)                            # ReLU
            nxt = layers[li + 1]
            nrows = nxt["hp"] * nxt["wp"]
            S = s_ref[soff[li]:soff[li] + nrows, 0:L]            # 0/1 placement
            # One matmul performs the pad / zero-dilation placement AND fully
            # rewrites the next layer's input buffer (pad ring & dilation
            # zeros included) -> no zero-fill passes anywhere.
            in_bufs[li + 1][...] = jnp.dot(S, h,
                                           preferred_element_type=jnp.float32)


# ------------------------- one-time parameter prep ---------------------------

def _conv_w_to_mat(w_oihw):
    """PyTorch Conv2d weight (Cout,Cin,3,3) -> (9*Cin, Cout), tap-major rows."""
    w = np.asarray(w_oihw, np.float32)
    cout, cin, kh, kw = w.shape
    return np.transpose(w, (2, 3, 1, 0)).reshape(kh * kw * cin, cout)


def _deconv_w_to_mat(w_iohw):
    """ConvTranspose2d weight (Cin,Cout,3,3) -> equivalent-conv (9*Cin, Cout)."""
    w = np.asarray(w_iohw, np.float32)
    w_eq = np.transpose(w[:, :, ::-1, ::-1], (1, 0, 2, 3))       # flip taps, swap io
    return _conv_w_to_mat(w_eq)


def prepare_params(params):
    """Pack all 6 weights (8-aligned (9*cin, cout) blocks) and the 6 biases
    into ONE (rows, 64) f32 buffer -> a single parameter DMA."""
    mats = [_conv_w_to_mat(w) for w, _ in params["enc"]]
    mats += [_deconv_w_to_mat(w) for w, _ in params["dec"]]
    biases = [np.asarray(b, np.float32) for _, b in params["enc"]]
    biases += [np.asarray(b, np.float32) for _, b in params["dec"]]
    offs, brow, total = _weight_offsets([m.shape[0] for m in mats])
    buf = np.zeros((total, _CMAX), np.float32)
    for off, m in zip(offs, mats):
        buf[off:off + m.shape[0], :m.shape[1]] = m
    for i, b in enumerate(biases):
        buf[brow + i, :b.shape[0]] = b
    return jnp.asarray(buf)


# ------------------------------- public wrapper ------------------------------

def build_autoencoder(N, H, W):
    layers = _layer_geometry(H, W)
    woff, brow, p_rows = _weight_offsets([9 * g["cin"] for g in layers])
    s_buf, soff = _placement_matrices(layers)

    g0, gl = layers[0], layers[-1]
    in_rows = g0["hp"] * g0["wp"]                    # padded input rows / image
    out_rows = gl["oh"] * gl["wp"]                   # >= L of the last layer
    assert out_rows >= gl["L"]

    scratch_shapes = [pltpu.VMEM((g["hp"] * g["wp"], g["cin"]), jnp.float32)
                      for g in layers[1:]]
    kernel = functools.partial(_fused_autoencoder_kernel,
                               layers, woff, brow, soff)

    def forward(x_nchw, p_buf):
        assert p_buf.shape[0] == p_rows
        x = x_nchw.astype(jnp.float32).reshape(N, H, W)
        xp = jnp.pad(x, ((0, 0), (1, 1), (1, 1)))                 # conv pad = 1
        x_flat = xp.reshape(N, in_rows, 1)

        grid_spec = pltpu.PrefetchScalarGridSpec(
            num_scalar_prefetch=0,
            grid=(N,),                                            # one image / step
            in_specs=[
                pl.BlockSpec((None, in_rows, 1), lambda i: (i, 0, 0)),
                pl.BlockSpec(p_buf.shape, lambda i: (0, 0)),      # weights + biases
                pl.BlockSpec(s_buf.shape, lambda i: (0, 0)),      # placement matrices
            ],
            out_specs=pl.BlockSpec((None, out_rows, 1), lambda i: (i, 0, 0)),
            scratch_shapes=scratch_shapes,
        )
        y = pl.pallas_call(
            kernel,
            out_shape=jax.ShapeDtypeStruct((N, out_rows, 1), jnp.float32),
            grid_spec=grid_spec,
            compiler_params=pltpu.CompilerParams(
                dimension_semantics=("parallel",)),               # megacore on v7x
        )(x_flat, p_buf, s_buf)

        # Output row j = oh*wp + ow; drop the junk columns (ow >= W) here.
        y = y.reshape(N, gl["oh"], gl["wp"])[:, :, :gl["ow"]]
        return y[:, None, :, :]                                   # NCHW (C = 1)

    return forward


# -------------------- pure-lax reference (correctness check) ----------------

def _ref_forward(x_nchw, params):
    x = jnp.transpose(x_nchw, (0, 2, 3, 1)).astype(jnp.float32)
    for w, b in params["enc"]:
        w_hwio = jnp.transpose(w, (2, 3, 1, 0))
        y = jax.lax.conv_general_dilated(
            x, w_hwio, window_strides=(2, 2), padding=((1, 1), (1, 1)),
            dimension_numbers=("NHWC", "HWIO", "NHWC")) + b
        x = jnp.maximum(y, 0.0)
    acts = ("relu", "relu", "sigmoid")
    for (w, b), act in zip(params["dec"], acts):
        w_eq = jnp.transpose(jnp.flip(w, axis=(2, 3)), (1, 0, 2, 3))
        w_hwio = jnp.transpose(w_eq, (2, 3, 1, 0))
        y = jax.lax.conv_general_dilated(
            x, w_hwio, window_strides=(1, 1), padding=((1, 2), (1, 2)),
            lhs_dilation=(2, 2),
            dimension_numbers=("NHWC", "HWIO", "NHWC")) + b
        x = jnp.maximum(y, 0.0) if act == "relu" else 1.0 / (1.0 + jnp.exp(-y))
    return jnp.transpose(x, (0, 3, 1, 2))


# ------------------------------- params init --------------------------------

def _init_pair(key, shape_w, fan_in, n_bias):
    k1, k2 = jax.random.split(key)
    bound = 1.0 / np.sqrt(fan_in)
    w = jax.random.uniform(k1, shape_w, jnp.float32, -bound, bound)
    b = jax.random.uniform(k2, (n_bias,), jnp.float32, -bound, bound)
    return w, b


def init_params(key):
    ks = jax.random.split(key, 6)
    enc = [
        _init_pair(ks[0], (16, 1, 3, 3), 1 * 9, 16),     # Conv2d(1,16)
        _init_pair(ks[1], (32, 16, 3, 3), 16 * 9, 32),   # Conv2d(16,32)
        _init_pair(ks[2], (64, 32, 3, 3), 32 * 9, 64),   # Conv2d(32,64)
    ]
    dec = [
        _init_pair(ks[3], (64, 32, 3, 3), 32 * 9, 32),   # ConvT(64,32): (Cin,Cout,3,3)
        _init_pair(ks[4], (32, 16, 3, 3), 16 * 9, 16),   # ConvT(32,16)
        _init_pair(ks[5], (16, 1, 3, 3), 1 * 9, 1),      # ConvT(16,1)
    ]
    return {"enc": enc, "dec": dec}


if __name__ == "__main__":
    N, H, W = 2, 16, 16
    key = jax.random.PRNGKey(0)
    kx, kp = jax.random.split(key)
    params = init_params(kp)
    x = jax.random.uniform(kx, (N, 1, H, W), jnp.float32)

    p_buf = prepare_params(params)                   # one-time weight/bias packing
    forward = jax.jit(build_autoencoder(N, H, W))

    out = jax.block_until_ready(forward(x, p_buf))
    assert out.shape == (N, 1, H, W), out.shape

    ref = jax.block_until_ready(_ref_forward(x, params))
    np.testing.assert_allclose(np.asarray(out), np.asarray(ref),
                               rtol=2e-5, atol=2e-5)

    print("KERNEL_OK")
</pallas_src>

<mosaic_0001>
module attributes {stable_mosaic.version = 11 : i64} {
  func.func @_fused_autoencoder_kernel(%arg0: i32, %arg1: memref<1x324x1xf32, #tpu.memory_space<vmem>>, %arg2: memref<1462x64xf32, #tpu.memory_space<vmem>>, %arg3: memref<616x134xf32, #tpu.memory_space<vmem>>, %arg4: memref<1x288x1xf32, #tpu.memory_space<vmem>>, %arg5: memref<100x16xf32, #tpu.memory_space<vmem>>, %arg6: memref<36x32xf32, #tpu.memory_space<vmem>>, %arg7: memref<36x64xf32, #tpu.memory_space<vmem>>, %arg8: memref<100x32xf32, #tpu.memory_space<vmem>>, %arg9: memref<324x16xf32, #tpu.memory_space<vmem>>) attributes {dimension_semantics = [#tpu.dimension_semantics<parallel>], iteration_bounds = array<i64: 2>, scalar_prefetch = 0 : i64, scratch_operands = 5 : i64, tpu.core_type = #tpu.core_type<tc>, window_params = [{transform_indices = @transform_0, window_bounds = array<i64: 1, 324, 1>}, {pipeline_mode = #tpu.pipeline_mode<synchronous>, transform_indices = @transform_1, window_bounds = array<i64: 1462, 64>}, {pipeline_mode = #tpu.pipeline_mode<synchronous>, transform_indices = @transform_2, window_bounds = array<i64: 616, 134>}, {transform_indices = @transform_3, window_bounds = array<i64: 1, 288, 1>}]} {
    %c1456 = arith.constant 1456 : index
    %c0 = arith.constant 0 : index
    %0 = vector.load %arg2[%c1456, %c0] : memref<1462x64xf32, #tpu.memory_space<vmem>>, vector<1x16xf32>
    %1 = vector.shape_cast %0 : vector<1x16xf32> to vector<1x16xf32>
    %2 = vector.broadcast %1 : vector<1x16xf32> to vector<134x16xf32>
    %c0_0 = arith.constant 0 : index
    %c0_1 = arith.constant 0 : index
    %c0_2 = arith.constant 0 : index
    %3 = tpu.strided_load %arg1[%c0_0, %c0_1, %c0_2] {strides = array<i32: 1, 2, 1>} : memref<1x324x1xf32, #tpu.memory_space<vmem>>, vector<1x134x1xf32>
    %4 = vector.shape_cast %3 : vector<1x134x1xf32> to vector<134x1xf32>
    %c0_3 = arith.constant 0 : index
    %c0_4 = arith.constant 0 : index
    %5 = vector.load %arg2[%c0_3, %c0_4] : memref<1462x64xf32, #tpu.memory_space<vmem>>, vector<1x16xf32>
    %6 = vector.broadcast %4 : vector<134x1xf32> to vector<134x16xf32>
    %7 = vector.broadcast %5 : vector<1x16xf32> to vector<134x16xf32>
    %8 = arith.mulf %6, %7 : vector<134x16xf32>
    %9 = arith.addf %2, %8 : vector<134x16xf32>
    %c0_5 = arith.constant 0 : index
    %c1 = arith.constant 1 : index
    %c0_6 = arith.constant 0 : index
    %10 = tpu.strided_load %arg1[%c0_5, %c1, %c0_6] {strides = array<i32: 1, 2, 1>} : memref<1x324x1xf32, #tpu.memory_space<vmem>>, vector<1x134x1xf32>
    %11 = vector.shape_cast %10 : vector<1x134x1xf32> to vector<134x1xf32>
    %c1_7 = arith.constant 1 : index
    %c0_8 = arith.constant 0 : index
    %12 = vector.load %arg2[%c1_7, %c0_8] : memref<1462x64xf32, #tpu.memory_space<vmem>>, vector<1x16xf32>
    %13 = vector.broadcast %11 : vector<134x1xf32> to vector<134x16xf32>
    %14 = vector.broadcast %12 : vector<1x16xf32> to vector<134x16xf32>
    %15 = arith.mulf %13, %14 : vector<134x16xf32>
    %16 = arith.addf %9, %15 : vector<134x16xf32>
    %c0_9 = arith.constant 0 : index
    %c2 = arith.constant 2 : index
    %c0_10 = arith.constant 0 : index
    %17 = tpu.strided_load %arg1[%c0_9, %c2, %c0_10] {strides = array<i32: 1, 2, 1>} : memref<1x324x1xf32, #tpu.memory_space<vmem>>, vector<1x134x1xf32>
    %18 = vector.shape_cast %17 : vector<1x134x1xf32> to vector<134x1xf32>
    %c2_11 = arith.constant 2 : index
    %c0_12 = arith.constant 0 : index
    %19 = vector.load %arg2[%c2_11, %c0_12] : memref<1462x64xf32, #tpu.memory_space<vmem>>, vector<1x16xf32>
    %20 = vector.broadcast %18 : vector<134x1xf32> to vector<134x16xf32>
    %21 = vector.broadcast %19 : vector<1x16xf32> to vector<134x16xf32>
    %22 = arith.mulf %20, %21 : vector<134x16xf32>
    %23 = arith.addf %16, %22 : vector<134x16xf32>
    %c0_13 = arith.constant 0 : index
    %c18 = arith.constant 18 : index
    %c0_14 = arith.constant 0 : index
    %24 = tpu.strided_load %arg1[%c0_13, %c18, %c0_14] {strides = array<i32: 1, 2, 1>} : memref<1x324x1xf32, #tpu.memory_space<vmem>>, vector<1x134x1xf32>
    %25 = vector.shape_cast %24 : vector<1x134x1xf32> to vector<134x1xf32>
    %c3 = arith.constant 3 : index
    %c0_15 = arith.constant 0 : index
    %26 = vector.load %arg2[%c3, %c0_15] : memref<1462x64xf32, #tpu.memory_space<vmem>>, vector<1x16xf32>
    %27 = vector.broadcast %25 : vector<134x1xf32> to vector<134x16xf32>
    %28 = vector.broadcast %26 : vector<1x16xf32> to vector<134x16xf32>
    %29 = arith.mulf %27, %28 : vector<134x16xf32>
    %30 = arith.addf %23, %29 : vector<134x16xf32>
    %c0_16 = arith.constant 0 : index
    %c19 = arith.constant 19 : index
    %c0_17 = arith.constant 0 : index
    %31 = tpu.strided_load %arg1[%c0_16, %c19, %c0_17] {strides = array<i32: 1, 2, 1>} : memref<1x324x1xf32, #tpu.memory_space<vmem>>, vector<1x134x1xf32>
    %32 = vector.shape_cast %31 : vector<1x134x1xf32> to vector<134x1xf32>
    %c4 = arith.constant 4 : index
    %c0_18 = arith.constant 0 : index
    %33 = vector.load %arg2[%c4, %c0_18] : memref<1462x64xf32, #tpu.memory_space<vmem>>, vector<1x16xf32>
    %34 = vector.broadcast %32 : vector<134x1xf32> to vector<134x16xf32>
    %35 = vector.broadcast %33 : vector<1x16xf32> to vector<134x16xf32>
    %36 = arith.mulf %34, %35 : vector<134x16xf32>
    %37 = arith.addf %30, %36 : vector<134x16xf32>
    %c0_19 = arith.constant 0 : index
    %c20 = arith.constant 20 : index
    %c0_20 = arith.constant 0 : index
    %38 = tpu.strided_load %arg1[%c0_19, %c20, %c0_20] {strides = array<i32: 1, 2, 1>} : memref<1x324x1xf32, #tpu.memory_space<vmem>>, vector<1x134x1xf32>
    %39 = vector.shape_cast %38 : vector<1x134x1xf32> to vector<134x1xf32>
    %c5 = arith.constant 5 : index
    %c0_21 = arith.constant 0 : index
    %40 = vector.load %arg2[%c5, %c0_21] : memref<1462x64xf32, #tpu.memory_space<vmem>>, vector<1x16xf32>
    %41 = vector.broadcast %39 : vector<134x1xf32> to vector<134x16xf32>
    %42 = vector.broadcast %40 : vector<1x16xf32> to vector<134x16xf32>
    %43 = arith.mulf %41, %42 : vector<134x16xf32>
    %44 = arith.addf %37, %43 : vector<134x16xf32>
    %c0_22 = arith.constant 0 : index
    %c36 = arith.constant 36 : index
    %c0_23 = arith.constant 0 : index
    %45 = tpu.strided_load %arg1[%c0_22, %c36, %c0_23] {strides = array<i32: 1, 2, 1>} : memref<1x324x1xf32, #tpu.memory_space<vmem>>, vector<1x134x1xf32>
    %46 = vector.shape_cast %45 : vector<1x134x1xf32> to vector<134x1xf32>
    %c6 = arith.constant 6 : index
    %c0_24 = arith.constant 0 : index
    %47 = vector.load %arg2[%c6, %c0_24] : memref<1462x64xf32, #tpu.memory_space<vmem>>, vector<1x16xf32>
    %48 = vector.broadcast %46 : vector<134x1xf32> to vector<134x16xf32>
    %49 = vector.broadcast %47 : vector<1x16xf32> to vector<134x16xf32>
    %50 = arith.mulf %48, %49 : vector<134x16xf32>
    %51 = arith.addf %44, %50 : vector<134x16xf32>
    %c0_25 = arith.constant 0 : index
    %c37 = arith.constant 37 : index
    %c0_26 = arith.constant 0 : index
    %52 = tpu.strided_load %arg1[%c0_25, %c37, %c0_26] {strides = array<i32: 1, 2, 1>} : memref<1x324x1xf32, #tpu.memory_space<vmem>>, vector<1x134x1xf32>
    %53 = vector.shape_cast %52 : vector<1x134x1xf32> to vector<134x1xf32>
    %c7 = arith.constant 7 : index
    %c0_27 = arith.constant 0 : index
    %54 = vector.load %arg2[%c7, %c0_27] : memref<1462x64xf32, #tpu.memory_space<vmem>>, vector<1x16xf32>
    %55 = vector.broadcast %53 : vector<134x1xf32> to vector<134x16xf32>
    %56 = vector.broadcast %54 : vector<1x16xf32> to vector<134x16xf32>
    %57 = arith.mulf %55, %56 : vector<134x16xf32>
    %58 = arith.addf %51, %57 : vector<134x16xf32>
    %c0_28 = arith.constant 0 : index
    %c38 = arith.constant 38 : index
    %c0_29 = arith.constant 0 : index
    %59 = tpu.strided_load %arg1[%c0_28, %c38, %c0_29] {strides = array<i32: 1, 2, 1>} : memref<1x324x1xf32, #tpu.memory_space<vmem>>, vector<1x134x1xf32>
    %60 = vector.shape_cast %59 : vector<1x134x1xf32> to vector<134x1xf32>
    %c8 = arith.constant 8 : index
    %c0_30 = arith.constant 0 : index
    %61 = vector.load %arg2[%c8, %c0_30] : memref<1462x64xf32, #tpu.memory_space<vmem>>, vector<1x16xf32>
    %62 = vector.broadcast %60 : vector<134x1xf32> to vector<134x16xf32>
    %63 = vector.broadcast %61 : vector<1x16xf32> to vector<134x16xf32>
    %64 = arith.mulf %62, %63 : vector<134x16xf32>
    %65 = arith.addf %58, %64 : vector<134x16xf32>
    %cst = arith.constant 0.000000e+00 : f32
    %66 = vector.broadcast %cst : f32 to vector<134x16xf32>
    %67 = arith.maximumf %65, %66 : vector<134x16xf32>
    %c0_31 = arith.constant 0 : index
    %c0_32 = arith.constant 0 : index
    %68 = vector.load %arg3[%c0_31, %c0_32] : memref<616x134xf32, #tpu.memory_space<vmem>>, vector<100x134xf32>
    %cst_33 = arith.constant dense<0.000000e+00> : vector<100x16xf32>
    %69 = tpu.matmul %68, %67, %cst_33 {dimension_numbers = #tpu.dot_dimension_numbers<[1], [0], [0], [1], [0, 0, 1, 1], [], []>} : vector<100x134xf32>, vector<134x16xf32>, vector<100x16xf32> -> vector<100x16xf32>
    %c0_34 = arith.constant 0 : index
    %c0_35 = arith.constant 0 : index
    %70 = vector.load %arg5[%c0_34, %c0_35] : memref<100x16xf32, #tpu.memory_space<vmem>>, vector<100x16xf32>
    tpu.vector_store %arg5[%c0_34, %c0_35], %69 {strides = array<i32>} : memref<100x16xf32, #tpu.memory_space<vmem>>, vector<100x16xf32>,
    %c1457 = arith.constant 1457 : index
    %c0_36 = arith.constant 0 : index
    %71 = vector.load %arg2[%c1457, %c0_36] : memref<1462x64xf32, #tpu.memory_space<vmem>>, vector<1x32xf32>
    %72 = vector.shape_cast %71 : vector<1x32xf32> to vector<1x32xf32>
    %73 = vector.broadcast %72 : vector<1x32xf32> to vector<34x32xf32>
    %c0_37 = arith.constant 0 : index
    %c0_38 = arith.constant 0 : index
    %74 = tpu.strided_load %arg5[%c0_37, %c0_38] {strides = array<i32: 2, 1>} : memref<100x16xf32, #tpu.memory_space<vmem>>, vector<34x16xf32>
    %c16 = arith.constant 16 : index
    %c0_39 = arith.constant 0 : index
    %75 = vector.load %arg2[%c16, %c0_39] : memref<1462x64xf32, #tpu.memory_space<vmem>>, vector<16x32xf32>
    %cst_40 = arith.constant dense<0.000000e+00> : vector<34x32xf32>
    %76 = tpu.matmul %74, %75, %cst_40 {dimension_numbers = #tpu.dot_dimension_numbers<[1], [0], [0], [1], [0, 0, 1, 1], [], []>} : vector<34x16xf32>, vector<16x32xf32>, vector<34x32xf32> -> vector<34x32xf32>
    %77 = arith.addf %73, %76 : vector<34x32xf32>
    %c1_41 = arith.constant 1 : index
    %c0_42 = arith.constant 0 : index
    %78 = tpu.strided_load %arg5[%c1_41, %c0_42] {strides = array<i32: 2, 1>} : memref<100x16xf32, #tpu.memory_space<vmem>>, vector<34x16xf32>
    %c32 = arith.constant 32 : index
    %c0_43 = arith.constant 0 : index
    %79 = vector.load %arg2[%c32, %c0_43] : memref<1462x64xf32, #tpu.memory_space<vmem>>, vector<16x32xf32>
    %cst_44 = arith.constant dense<0.000000e+00> : vector<34x32xf32>
    %80 = tpu.matmul %78, %79, %cst_44 {dimension_numbers = #tpu.dot_dimension_numbers<[1], [0], [0], [1], [0, 0, 1, 1], [], []>} : vector<34x16xf32>, vector<16x32xf32>, vector<34x32xf32> -> vector<34x32xf32>
    %81 = arith.addf %77, %80 : vector<34x32xf32>
    %c2_45 = arith.constant 2 : index
    %c0_46 = arith.constant 0 : index
    %82 = tpu.strided_load %arg5[%c2_45, %c0_46] {strides = array<i32: 2, 1>} : memref<100x16xf32, #tpu.memory_space<vmem>>, vector<34x16xf32>
    %c48 = arith.constant 48 : index
    %c0_47 = arith.constant 0 : index
    %83 = vector.load %arg2[%c48, %c0_47] : memref<1462x64xf32, #tpu.memory_space<vmem>>, vector<16x32xf32>
    %cst_48 = arith.constant dense<0.000000e+00> : vector<34x32xf32>
    %84 = tpu.matmul %82, %83, %cst_48 {dimension_numbers = #tpu.dot_dimension_numbers<[1], [0], [0], [1], [0, 0, 1, 1], [], []>} : vector<34x16xf32>, vector<16x32xf32>, vector<34x32xf32> -> vector<34x32xf32>
    %85 = arith.addf %81, %84 : vector<34x32xf32>
    %c10 = arith.constant 10 : index
    %c0_49 = arith.constant 0 : index
    %86 = tpu.strided_load %arg5[%c10, %c0_49] {strides = array<i32: 2, 1>} : memref<100x16xf32, #tpu.memory_space<vmem>>, vector<34x16xf32>
    %c64 = arith.constant 64 : index
    %c0_50 = arith.constant 0 : index
    %87 = vector.load %arg2[%c64, %c0_50] : memref<1462x64xf32, #tpu.memory_space<vmem>>, vector<16x32xf32>
    %cst_51 = arith.constant dense<0.000000e+00> : vector<34x32xf32>
    %88 = tpu.matmul %86, %87, %cst_51 {dimension_numbers = #tpu.dot_dimension_numbers<[1], [0], [0], [1], [0, 0, 1, 1], [], []>} : vector<34x16xf32>, vector<16x32xf32>, vector<34x32xf32> -> vector<34x32xf32>
    %89 = arith.addf %85, %88 : vector<34x32xf32>
    %c11 = arith.constant 11 : index
    %c0_52 = arith.constant 0 : index
    %90 = tpu.strided_load %arg5[%c11, %c0_52] {strides = array<i32: 2, 1>} : memref<100x16xf32, #tpu.memory_space<vmem>>, vector<34x16xf32>
    %c80 = arith.constant 80 : index
    %c0_53 = arith.constant 0 : index
    %91 = vector.load %arg2[%c80, %c0_53] : memref<1462x64xf32, #tpu.memory_space<vmem>>, vector<16x32xf32>
    %cst_54 = arith.constant dense<0.000000e+00> : vector<34x32xf32>
    %92 = tpu.matmul %90, %91, %cst_54 {dimension_numbers = #tpu.dot_dimension_numbers<[1], [0], [0], [1], [0, 0, 1, 1], [], []>} : vector<34x16xf32>, vector<16x32xf32>, vector<34x32xf32> -> vector<34x32xf32>
    %93 = arith.addf %89, %92 : vector<34x32xf32>
    %c12 = arith.constant 12 : index
    %c0_55 = arith.constant 0 : index
    %94 = tpu.strided_load %arg5[%c12, %c0_55] {strides = array<i32: 2, 1>} : memref<100x16xf32, #tpu.memory_space<vmem>>, vector<34x16xf32>
    %c96 = arith.constant 96 : index
    %c0_56 = arith.constant 0 : index
    %95 = vector.load %arg2[%c96, %c0_56] : memref<1462x64xf32, #tpu.memory_space<vmem>>, vector<16x32xf32>
    %cst_57 = arith.constant dense<0.000000e+00> : vector<34x32xf32>
    %96 = tpu.matmul %94, %95, %cst_57 {dimension_numbers = #tpu.dot_dimension_numbers<[1], [0], [0], [1], [0, 0, 1, 1], [], []>} : vector<34x16xf32>, vector<16x32xf32>, vector<34x32xf32> -> vector<34x32xf32>
    %97 = arith.addf %93, %96 : vector<34x32xf32>
    %c20_58 = arith.constant 20 : index
    %c0_59 = arith.constant 0 : index
    %98 = tpu.strided_load %arg5[%c20_58, %c0_59] {strides = array<i32: 2, 1>} : memref<100x16xf32, #tpu.memory_space<vmem>>, vector<34x16xf32>
    %c112 = arith.constant 112 : index
    %c0_60 = arith.constant 0 : index
    %99 = vector.load %arg2[%c112, %c0_60] : memref<1462x64xf32, #tpu.memory_space<vmem>>, vector<16x32xf32>
    %cst_61 = arith.constant dense<0.000000e+00> : vector<34x32xf32>
    %100 = tpu.matmul %98, %99, %cst_61 {dimension_numbers = #tpu.dot_dimension_numbers<[1], [0], [0], [1], [0, 0, 1, 1], [], []>} : vector<34x16xf32>, vector<16x32xf32>, vector<34x32xf32> -> vector<34x32xf32>
    %101 = arith.addf %97, %100 : vector<34x32xf32>
    %c21 = arith.constant 21 : index
    %c0_62 = arith.constant 0 : index
    %102 = tpu.strided_load %arg5[%c21, %c0_62] {strides = array<i32: 2, 1>} : memref<100x16xf32, #tpu.memory_space<vmem>>, vector<34x16xf32>
    %c128 = arith.constant 128 : index
    %c0_63 = arith.constant 0 : index
    %103 = vector.load %arg2[%c128, %c0_63] : memref<1462x64xf32, #tpu.memory_space<vmem>>, vector<16x32xf32>
    %cst_64 = arith.constant dense<0.000000e+00> : vector<34x32xf32>
    %104 = tpu.matmul %102, %103, %cst_64 {dimension_numbers = #tpu.dot_dimension_numbers<[1], [0], [0], [1], [0, 0, 1, 1], [], []>} : vector<34x16xf32>, vector<16x32xf32>, vector<34x32xf32> -> vector<34x32xf32>
    %105 = arith.addf %101, %104 : vector<34x32xf32>
    %c22 = arith.constant 22 : index
    %c0_65 = arith.constant 0 : index
    %106 = tpu.strided_load %arg5[%c22, %c0_65] {strides = array<i32: 2, 1>} : memref<100x16xf32, #tpu.memory_space<vmem>>, vector<34x16xf32>
    %c144 = arith.constant 144 : index
    %c0_66 = arith.constant 0 : index
    %107 = vector.load %arg2[%c144, %c0_66] : memref<1462x64xf32, #tpu.memory_space<vmem>>, vector<16x32xf32>
    %cst_67 = arith.constant dense<0.000000e+00> : vector<34x32xf32>
    %108 = tpu.matmul %106, %107, %cst_67 {dimension_numbers = #tpu.dot_dimension_numbers<[1], [0], [0], [1], [0, 0, 1, 1], [], []>} : vector<34x16xf32>, vector<16x32xf32>, vector<34x32xf32> -> vector<34x32xf32>
    %109 = arith.addf %105, %108 : vector<34x32xf32>
    %cst_68 = arith.constant 0.000000e+00 : f32
    %110 = vector.broadcast %cst_68 : f32 to vector<34x32xf32>
    %111 = arith.maximumf %109, %110 : vector<34x32xf32>
    %c104 = arith.constant 104 : index
    %c0_69 = arith.constant 0 : index
    %112 = vector.load %arg3[%c104, %c0_69] : memref<616x134xf32, #tpu.memory_space<vmem>>, vector<36x34xf32>
    %cst_70 = arith.constant dense<0.000000e+00> : vector<36x32xf32>
    %113 = tpu.matmul %112, %111, %cst_70 {dimension_numbers = #tpu.dot_dimension_numbers<[1], [0], [0], [1], [0, 0, 1, 1], [], []>} : vector<36x34xf32>, vector<34x32xf32>, vector<36x32xf32> -> vector<36x32xf32>
    %c0_71 = arith.constant 0 : index
    %c0_72 = arith.constant 0 : index
    %114 = vector.load %arg6[%c0_71, %c0_72] : memref<36x32xf32, #tpu.memory_space<vmem>>, vector<36x32xf32>
    tpu.vector_store %arg6[%c0_71, %c0_72], %113 {strides = array<i32>} : memref<36x32xf32, #tpu.memory_space<vmem>>, vector<36x32xf32>,
    %c1458 = arith.constant 1458 : index
    %c0_73 = arith.constant 0 : index
    %115 = vector.load %arg2[%c1458, %c0_73] : memref<1462x64xf32, #tpu.memory_space<vmem>>, vector<1x64xf32>
    %116 = vector.shape_cast %115 : vector<1x64xf32> to vector<1x64xf32>
    %117 = vector.broadcast %116 : vector<1x64xf32> to vector<8x64xf32>
    %c0_74 = arith.constant 0 : index
    %c0_75 = arith.constant 0 : index
    %118 = tpu.strided_load %arg6[%c0_74, %c0_75] {strides = array<i32: 2, 1>} : memref<36x32xf32, #tpu.memory_space<vmem>>, vector<8x32xf32>
    %c160 = arith.constant 160 : index
    %c0_76 = arith.constant 0 : index
    %119 = vector.load %arg2[%c160, %c0_76] : memref<1462x64xf32, #tpu.memory_space<vmem>>, vector<32x64xf32>
    %cst_77 = arith.constant dense<0.000000e+00> : vector<8x64xf32>
    %120 = tpu.matmul %118, %119, %cst_77 {dimension_numbers = #tpu.dot_dimension_numbers<[1], [0], [0], [1], [0, 0, 1, 1], [], []>} : vector<8x32xf32>, vector<32x64xf32>, vector<8x64xf32> -> vector<8x64xf32>
    %121 = arith.addf %117, %120 : vector<8x64xf32>
    %c1_78 = arith.constant 1 : index
    %c0_79 = arith.constant 0 : index
    %122 = tpu.strided_load %arg6[%c1_78, %c0_79] {strides = array<i32: 2, 1>} : memref<36x32xf32, #tpu.memory_space<vmem>>, vector<8x32xf32>
    %c192 = arith.constant 192 : index
    %c0_80 = arith.constant 0 : index
    %123 = vector.load %arg2[%c192, %c0_80] : memref<1462x64xf32, #tpu.memory_space<vmem>>, vector<32x64xf32>
    %cst_81 = arith.constant dense<0.000000e+00> : vector<8x64xf32>
    %124 = tpu.matmul %122, %123, %cst_81 {dimension_numbers = #tpu.dot_dimension_numbers<[1], [0], [0], [1], [0, 0, 1, 1], [], []>} : vector<8x32xf32>, vector<32x64xf32>, vector<8x64xf32> -> vector<8x64xf32>
    %125 = arith.addf %121, %124 : vector<8x64xf32>
    %c2_82 = arith.constant 2 : index
    %c0_83 = arith.constant 0 : index
    %126 = tpu.strided_load %arg6[%c2_82, %c0_83] {strides = array<i32: 2, 1>} : memref<36x32xf32, #tpu.memory_space<vmem>>, vector<8x32xf32>
    %c224 = arith.constant 224 : index
    %c0_84 = arith.constant 0 : index
    %127 = vector.load %arg2[%c224, %c0_84] : memref<1462x64xf32, #tpu.memory_space<vmem>>, vector<32x64xf32>
    %cst_85 = arith.constant dense<0.000000e+00> : vector<8x64xf32>
    %128 = tpu.matmul %126, %127, %cst_85 {dimension_numbers = #tpu.dot_dimension_numbers<[1], [0], [0], [1], [0, 0, 1, 1], [], []>} : vector<8x32xf32>, vector<32x64xf32>, vector<8x64xf32> -> vector<8x64xf32>
    %129 = arith.addf %125, %128 : vector<8x64xf32>
    %c6_86 = arith.constant 6 : index
    %c0_87 = arith.constant 0 : index
    %130 = tpu.strided_load %arg6[%c6_86, %c0_87] {strides = array<i32: 2, 1>} : memref<36x32xf32, #tpu.memory_space<vmem>>, vector<8x32xf32>
    %c256 = arith.constant 256 : index
    %c0_88 = arith.constant 0 : index
    %131 = vector.load %arg2[%c256, %c0_88] : memref<1462x64xf32, #tpu.memory_space<vmem>>, vector<32x64xf32>
    %cst_89 = arith.constant dense<0.000000e+00> : vector<8x64xf32>
    %132 = tpu.matmul %130, %131, %cst_89 {dimension_numbers = #tpu.dot_dimension_numbers<[1], [0], [0], [1], [0, 0, 1, 1], [], []>} : vector<8x32xf32>, vector<32x64xf32>, vector<8x64xf32> -> vector<8x64xf32>
    %133 = arith.addf %129, %132 : vector<8x64xf32>
    %c7_90 = arith.constant 7 : index
    %c0_91 = arith.constant 0 : index
    %134 = tpu.strided_load %arg6[%c7_90, %c0_91] {strides = array<i32: 2, 1>} : memref<36x32xf32, #tpu.memory_space<vmem>>, vector<8x32xf32>
    %c288 = arith.constant 288 : index
    %c0_92 = arith.constant 0 : index
    %135 = vector.load %arg2[%c288, %c0_92] : memref<1462x64xf32, #tpu.memory_space<vmem>>, vector<32x64xf32>
    %cst_93 = arith.constant dense<0.000000e+00> : vector<8x64xf32>
    %136 = tpu.matmul %134, %135, %cst_93 {dimension_numbers = #tpu.dot_dimension_numbers<[1], [0], [0], [1], [0, 0, 1, 1], [], []>} : vector<8x32xf32>, vector<32x64xf32>, vector<8x64xf32> -> vector<8x64xf32>
    %137 = arith.addf %133, %136 : vector<8x64xf32>
    %c8_94 = arith.constant 8 : index
    %c0_95 = arith.constant 0 : index
    %138 = tpu.strided_load %arg6[%c8_94, %c0_95] {strides = array<i32: 2, 1>} : memref<36x32xf32, #tpu.memory_space<vmem>>, vector<8x32xf32>
    %c320 = arith.constant 320 : index
    %c0_96 = arith.constant 0 : index
    %139 = vector.load %arg2[%c320, %c0_96] : memref<1462x64xf32, #tpu.memory_space<vmem>>, vector<32x64xf32>
    %cst_97 = arith.constant dense<0.000000e+00> : vector<8x64xf32>
    %140 = tpu.matmul %138, %139, %cst_97 {dimension_numbers = #tpu.dot_dimension_numbers<[1], [0], [0], [1], [0, 0, 1, 1], [], []>} : vector<8x32xf32>, vector<32x64xf32>, vector<8x64xf32> -> vector<8x64xf32>
    %141 = arith.addf %137, %140 : vector<8x64xf32>
    %c12_98 = arith.constant 12 : index
    %c0_99 = arith.constant 0 : index
    %142 = tpu.strided_load %arg6[%c12_98, %c0_99] {strides = array<i32: 2, 1>} : memref<36x32xf32, #tpu.memory_space<vmem>>, vector<8x32xf32>
    %c352 = arith.constant 352 : index
    %c0_100 = arith.constant 0 : index
    %143 = vector.load %arg2[%c352, %c0_100] : memref<1462x64xf32, #tpu.memory_space<vmem>>, vector<32x64xf32>
    %cst_101 = arith.constant dense<0.000000e+00> : vector<8x64xf32>
    %144 = tpu.matmul %142, %143, %cst_101 {dimension_numbers = #tpu.dot_dimension_numbers<[1], [0], [0], [1], [0, 0, 1, 1], [], []>} : vector<8x32xf32>, vector<32x64xf32>, vector<8x64xf32> -> vector<8x64xf32>
    %145 = arith.addf %141, %144 : vector<8x64xf32>
    %c13 = arith.constant 13 : index
    %c0_102 = arith.constant 0 : index
    %146 = tpu.strided_load %arg6[%c13, %c0_102] {strides = array<i32: 2, 1>} : memref<36x32xf32, #tpu.memory_space<vmem>>, vector<8x32xf32>
    %c384 = arith.constant 384 : index
    %c0_103 = arith.constant 0 : index
    %147 = vector.load %arg2[%c384, %c0_103] : memref<1462x64xf32, #tpu.memory_space<vmem>>, vector<32x64xf32>
    %cst_104 = arith.constant dense<0.000000e+00> : vector<8x64xf32>
    %148 = tpu.matmul %146, %147, %cst_104 {dimension_numbers = #tpu.dot_dimension_numbers<[1], [0], [0], [1], [0, 0, 1, 1], [], []>} : vector<8x32xf32>, vector<32x64xf32>, vector<8x64xf32> -> vector<8x64xf32>
    %149 = arith.addf %145, %148 : vector<8x64xf32>
    %c14 = arith.constant 14 : index
    %c0_105 = arith.constant 0 : index
    %150 = tpu.strided_load %arg6[%c14, %c0_105] {strides = array<i32: 2, 1>} : memref<36x32xf32, #tpu.memory_space<vmem>>, vector<8x32xf32>
    %c416 = arith.constant 416 : index
    %c0_106 = arith.constant 0 : index
    %151 = vector.load %arg2[%c416, %c0_106] : memref<1462x64xf32, #tpu.memory_space<vmem>>, vector<32x64xf32>
    %cst_107 = arith.constant dense<0.000000e+00> : vector<8x64xf32>
    %152 = tpu.matmul %150, %151, %cst_107 {dimension_numbers = #tpu.dot_dimension_numbers<[1], [0], [0], [1], [0, 0, 1, 1], [], []>} : vector<8x32xf32>, vector<32x64xf32>, vector<8x64xf32> -> vector<8x64xf32>
    %153 = arith.addf %149, %152 : vector<8x64xf32>
    %cst_108 = arith.constant 0.000000e+00 : f32
    %154 = vector.broadcast %cst_108 : f32 to vector<8x64xf32>
    %155 = arith.maximumf %153, %154 : vector<8x64xf32>
    %c144_109 = arith.constant 144 : index
    %c0_110 = arith.constant 0 : index
    %156 = vector.load %arg3[%c144_109, %c0_110] : memref<616x134xf32, #tpu.memory_space<vmem>>, vector<36x8xf32>
    %cst_111 = arith.constant dense<0.000000e+00> : vector<36x64xf32>
    %157 = tpu.matmul %156, %155, %cst_111 {dimension_numbers = #tpu.dot_dimension_numbers<[1], [0], [0], [1], [0, 0, 1, 1], [], []>} : vector<36x8xf32>, vector<8x64xf32>, vector<36x64xf32> -> vector<36x64xf32>
    %c0_112 = arith.constant 0 : index
    %c0_113 = arith.constant 0 : index
    %158 = vector.load %arg7[%c0_112, %c0_113] : memref<36x64xf32, #tpu.memory_space<vmem>>, vector<36x64xf32>
    tpu.vector_store %arg7[%c0_112, %c0_113], %157 {strides = array<i32>} : memref<36x64xf32, #tpu.memory_space<vmem>>, vector<36x64xf32>,
    %c1459 = arith.constant 1459 : index
    %c0_114 = arith.constant 0 : index
    %159 = vector.load %arg2[%c1459, %c0_114] : memref<1462x64xf32, #tpu.memory_space<vmem>>, vector<1x32xf32>
    %160 = vector.shape_cast %159 : vector<1x32xf32> to vector<1x32xf32>
    %161 = vector.broadcast %160 : vector<1x32xf32> to vector<22x32xf32>
    %c0_115 = arith.constant 0 : index
    %c0_116 = arith.constant 0 : index
    %162 = vector.load %arg7[%c0_115, %c0_116] : memref<36x64xf32, #tpu.memory_space<vmem>>, vector<22x64xf32>
    %c448 = arith.constant 448 : index
    %c0_117 = arith.constant 0 : index
    %163 = vector.load %arg2[%c448, %c0_117] : memref<1462x64xf32, #tpu.memory_space<vmem>>, vector<64x32xf32>
    %cst_118 = arith.constant dense<0.000000e+00> : vector<22x32xf32>
    %164 = tpu.matmul %162, %163, %cst_118 {dimension_numbers = #tpu.dot_dimension_numbers<[1], [0], [0], [1], [0, 0, 1, 1], [], []>} : vector<22x64xf32>, vector<64x32xf32>, vector<22x32xf32> -> vector<22x32xf32>
    %165 = arith.addf %161, %164 : vector<22x32xf32>
    %c1_119 = arith.constant 1 : index
    %c0_120 = arith.constant 0 : index
    %166 = vector.load %arg7[%c1_119, %c0_120] : memref<36x64xf32, #tpu.memory_space<vmem>>, vector<22x64xf32>
    %c512 = arith.constant 512 : index
    %c0_121 = arith.constant 0 : index
    %167 = vector.load %arg2[%c512, %c0_121] : memref<1462x64xf32, #tpu.memory_space<vmem>>, vector<64x32xf32>
    %cst_122 = arith.constant dense<0.000000e+00> : vector<22x32xf32>
    %168 = tpu.matmul %166, %167, %cst_122 {dimension_numbers = #tpu.dot_dimension_numbers<[1], [0], [0], [1], [0, 0, 1, 1], [], []>} : vector<22x64xf32>, vector<64x32xf32>, vector<22x32xf32> -> vector<22x32xf32>
    %169 = arith.addf %165, %168 : vector<22x32xf32>
    %c2_123 = arith.constant 2 : index
    %c0_124 = arith.constant 0 : index
    %170 = vector.load %arg7[%c2_123, %c0_124] : memref<36x64xf32, #tpu.memory_space<vmem>>, vector<22x64xf32>
    %c576 = arith.constant 576 : index
    %c0_125 = arith.constant 0 : index
    %171 = vector.load %arg2[%c576, %c0_125] : memref<1462x64xf32, #tpu.memory_space<vmem>>, vector<64x32xf32>
    %cst_126 = arith.constant dense<0.000000e+00> : vector<22x32xf32>
    %172 = tpu.matmul %170, %171, %cst_126 {dimension_numbers = #tpu.dot_dimension_numbers<[1], [0], [0], [1], [0, 0, 1, 1], [], []>} : vector<22x64xf32>, vector<64x32xf32>, vector<22x32xf32> -> vector<22x32xf32>
    %173 = arith.addf %169, %172 : vector<22x32xf32>
    %c6_127 = arith.constant 6 : index
    %c0_128 = arith.constant 0 : index
    %174 = vector.load %arg7[%c6_127, %c0_128] : memref<36x64xf32, #tpu.memory_space<vmem>>, vector<22x64xf32>
    %c640 = arith.constant 640 : index
    %c0_129 = arith.constant 0 : index
    %175 = vector.load %arg2[%c640, %c0_129] : memref<1462x64xf32, #tpu.memory_space<vmem>>, vector<64x32xf32>
    %cst_130 = arith.constant dense<0.000000e+00> : vector<22x32xf32>
    %176 = tpu.matmul %174, %175, %cst_130 {dimension_numbers = #tpu.dot_dimension_numbers<[1], [0], [0], [1], [0, 0, 1, 1], [], []>} : vector<22x64xf32>, vector<64x32xf32>, vector<22x32xf32> -> vector<22x32xf32>
    %177 = arith.addf %173, %176 : vector<22x32xf32>
    %c7_131 = arith.constant 7 : index
    %c0_132 = arith.constant 0 : index
    %178 = vector.load %arg7[%c7_131, %c0_132] : memref<36x64xf32, #tpu.memory_space<vmem>>, vector<22x64xf32>
    %c704 = arith.constant 704 : index
    %c0_133 = arith.constant 0 : index
    %179 = vector.load %arg2[%c704, %c0_133] : memref<1462x64xf32, #tpu.memory_space<vmem>>, vector<64x32xf32>
    %cst_134 = arith.constant dense<0.000000e+00> : vector<22x32xf32>
    %180 = tpu.matmul %178, %179, %cst_134 {dimension_numbers = #tpu.dot_dimension_numbers<[1], [0], [0], [1], [0, 0, 1, 1], [], []>} : vector<22x64xf32>, vector<64x32xf32>, vector<22x32xf32> -> vector<22x32xf32>
    %181 = arith.addf %177, %180 : vector<22x32xf32>
    %c8_135 = arith.constant 8 : index
    %c0_136 = arith.constant 0 : index
    %182 = vector.load %arg7[%c8_135, %c0_136] : memref<36x64xf32, #tpu.memory_space<vmem>>, vector<22x64xf32>
    %c768 = arith.constant 768 : index
    %c0_137 = arith.constant 0 : index
    %183 = vector.load %arg2[%c768, %c0_137] : memref<1462x64xf32, #tpu.memory_space<vmem>>, vector<64x32xf32>
    %cst_138 = arith.constant dense<0.000000e+00> : vector<22x32xf32>
    %184 = tpu.matmul %182, %183, %cst_138 {dimension_numbers = #tpu.dot_dimension_numbers<[1], [0], [0], [1], [0, 0, 1, 1], [], []>} : vector<22x64xf32>, vector<64x32xf32>, vector<22x32xf32> -> vector<22x32xf32>
    %185 = arith.addf %181, %184 : vector<22x32xf32>
    %c12_139 = arith.constant 12 : index
    %c0_140 = arith.constant 0 : index
    %186 = vector.load %arg7[%c12_139, %c0_140] : memref<36x64xf32, #tpu.memory_space<vmem>>, vector<22x64xf32>
    %c832 = arith.constant 832 : index
    %c0_141 = arith.constant 0 : index
    %187 = vector.load %arg2[%c832, %c0_141] : memref<1462x64xf32, #tpu.memory_space<vmem>>, vector<64x32xf32>
    %cst_142 = arith.constant dense<0.000000e+00> : vector<22x32xf32>
    %188 = tpu.matmul %186, %187, %cst_142 {dimension_numbers = #tpu.dot_dimension_numbers<[1], [0], [0], [1], [0, 0, 1, 1], [], []>} : vector<22x64xf32>, vector<64x32xf32>, vector<22x32xf32> -> vector<22x32xf32>
    %189 = arith.addf %185, %188 : vector<22x32xf32>
    %c13_143 = arith.constant 13 : index
    %c0_144 = arith.constant 0 : index
    %190 = vector.load %arg7[%c13_143, %c0_144] : memref<36x64xf32, #tpu.memory_space<vmem>>, vector<22x64xf32>
    %c896 = arith.constant 896 : index
    %c0_145 = arith.constant 0 : index
    %191 = vector.load %arg2[%c896, %c0_145] : memref<1462x64xf32, #tpu.memory_space<vmem>>, vector<64x32xf32>
    %cst_146 = arith.constant dense<0.000000e+00> : vector<22x32xf32>
    %192 = tpu.matmul %190, %191, %cst_146 {dimension_numbers = #tpu.dot_dimension_numbers<[1], [0], [0], [1], [0, 0, 1, 1], [], []>} : vector<22x64xf32>, vector<64x32xf32>, vector<22x32xf32> -> vector<22x32xf32>
    %193 = arith.addf %189, %192 : vector<22x32xf32>
    %c14_147 = arith.constant 14 : index
    %c0_148 = arith.constant 0 : index
    %194 = vector.load %arg7[%c14_147, %c0_148] : memref<36x64xf32, #tpu.memory_space<vmem>>, vector<22x64xf32>
    %c960 = arith.constant 960 : index
    %c0_149 = arith.constant 0 : index
    %195 = vector.load %arg2[%c960, %c0_149] : memref<1462x64xf32, #tpu.memory_space<vmem>>, vector<64x32xf32>
    %cst_150 = arith.constant dense<0.000000e+00> : vector<22x32xf32>
    %196 = tpu.matmul %194, %195, %cst_150 {dimension_numbers = #tpu.dot_dimension_numbers<[1], [0], [0], [1], [0, 0, 1, 1], [], []>} : vector<22x64xf32>, vector<64x32xf32>, vector<22x32xf32> -> vector<22x32xf32>
    %197 = arith.addf %193, %196 : vector<22x32xf32>
    %cst_151 = arith.constant 0.000000e+00 : f32
    %198 = vector.broadcast %cst_151 : f32 to vector<22x32xf32>
    %199 = arith.maximumf %197, %198 : vector<22x32xf32>
    %c184 = arith.constant 184 : index
    %c0_152 = arith.constant 0 : index
    %200 = vector.load %arg3[%c184, %c0_152] : memref<616x134xf32, #tpu.memory_space<vmem>>, vector<100x22xf32>
    %cst_153 = arith.constant dense<0.000000e+00> : vector<100x32xf32>
    %201 = tpu.matmul %200, %199, %cst_153 {dimension_numbers = #tpu.dot_dimension_numbers<[1], [0], [0], [1], [0, 0, 1, 1], [], []>} : vector<100x22xf32>, vector<22x32xf32>, vector<100x32xf32> -> vector<100x32xf32>
    %c0_154 = arith.constant 0 : index
    %c0_155 = arith.constant 0 : index
    %202 = vector.load %arg8[%c0_154, %c0_155] : memref<100x32xf32, #tpu.memory_space<vmem>>, vector<100x32xf32>
    tpu.vector_store %arg8[%c0_154, %c0_155], %201 {strides = array<i32>} : memref<100x32xf32, #tpu.memory_space<vmem>>, vector<100x32xf32>,
    %c1460 = arith.constant 1460 : index
    %c0_156 = arith.constant 0 : index
    %203 = vector.load %arg2[%c1460, %c0_156] : memref<1462x64xf32, #tpu.memory_space<vmem>>, vector<1x16xf32>
    %204 = vector.shape_cast %203 : vector<1x16xf32> to vector<1x16xf32>
    %205 = vector.broadcast %204 : vector<1x16xf32> to vector<78x16xf32>
    %c0_157 = arith.constant 0 : index
    %c0_158 = arith.constant 0 : index
    %206 = vector.load %arg8[%c0_157, %c0_158] : memref<100x32xf32, #tpu.memory_space<vmem>>, vector<78x32xf32>
    %c1024 = arith.constant 1024 : index
    %c0_159 = arith.constant 0 : index
    %207 = vector.load %arg2[%c1024, %c0_159] : memref<1462x64xf32, #tpu.memory_space<vmem>>, vector<32x16xf32>
    %cst_160 = arith.constant dense<0.000000e+00> : vector<78x16xf32>
    %208 = tpu.matmul %206, %207, %cst_160 {dimension_numbers = #tpu.dot_dimension_numbers<[1], [0], [0], [1], [0, 0, 1, 1], [], []>} : vector<78x32xf32>, vector<32x16xf32>, vector<78x16xf32> -> vector<78x16xf32>
    %209 = arith.addf %205, %208 : vector<78x16xf32>
    %c1_161 = arith.constant 1 : index
    %c0_162 = arith.constant 0 : index
    %210 = vector.load %arg8[%c1_161, %c0_162] : memref<100x32xf32, #tpu.memory_space<vmem>>, vector<78x32xf32>
    %c1056 = arith.constant 1056 : index
    %c0_163 = arith.constant 0 : index
    %211 = vector.load %arg2[%c1056, %c0_163] : memref<1462x64xf32, #tpu.memory_space<vmem>>, vector<32x16xf32>
    %cst_164 = arith.constant dense<0.000000e+00> : vector<78x16xf32>
    %212 = tpu.matmul %210, %211, %cst_164 {dimension_numbers = #tpu.dot_dimension_numbers<[1], [0], [0], [1], [0, 0, 1, 1], [], []>} : vector<78x32xf32>, vector<32x16xf32>, vector<78x16xf32> -> vector<78x16xf32>
    %213 = arith.addf %209, %212 : vector<78x16xf32>
    %c2_165 = arith.constant 2 : index
    %c0_166 = arith.constant 0 : index
    %214 = vector.load %arg8[%c2_165, %c0_166] : memref<100x32xf32, #tpu.memory_space<vmem>>, vector<78x32xf32>
    %c1088 = arith.constant 1088 : index
    %c0_167 = arith.constant 0 : index
    %215 = vector.load %arg2[%c1088, %c0_167] : memref<1462x64xf32, #tpu.memory_space<vmem>>, vector<32x16xf32>
    %cst_168 = arith.constant dense<0.000000e+00> : vector<78x16xf32>
    %216 = tpu.matmul %214, %215, %cst_168 {dimension_numbers = #tpu.dot_dimension_numbers<[1], [0], [0], [1], [0, 0, 1, 1], [], []>} : vector<78x32xf32>, vector<32x16xf32>, vector<78x16xf32> -> vector<78x16xf32>
    %217 = arith.addf %213, %216 : vector<78x16xf32>
    %c10_169 = arith.constant 10 : index
    %c0_170 = arith.constant 0 : index
    %218 = vector.load %arg8[%c10_169, %c0_170] : memref<100x32xf32, #tpu.memory_space<vmem>>, vector<78x32xf32>
    %c1120 = arith.constant 1120 : index
    %c0_171 = arith.constant 0 : index
    %219 = vector.load %arg2[%c1120, %c0_171] : memref<1462x64xf32, #tpu.memory_space<vmem>>, vector<32x16xf32>
    %cst_172 = arith.constant dense<0.000000e+00> : vector<78x16xf32>
    %220 = tpu.matmul %218, %219, %cst_172 {dimension_numbers = #tpu.dot_dimension_numbers<[1], [0], [0], [1], [0, 0, 1, 1], [], []>} : vector<78x32xf32>, vector<32x16xf32>, vector<78x16xf32> -> vector<78x16xf32>
    %221 = arith.addf %217, %220 : vector<78x16xf32>
    %c11_173 = arith.constant 11 : index
    %c0_174 = arith.constant 0 : index
    %222 = vector.load %arg8[%c11_173, %c0_174] : memref<100x32xf32, #tpu.memory_space<vmem>>, vector<78x32xf32>
    %c1152 = arith.constant 1152 : index
    %c0_175 = arith.constant 0 : index
    %223 = vector.load %arg2[%c1152, %c0_175] : memref<1462x64xf32, #tpu.memory_space<vmem>>, vector<32x16xf32>
    %cst_176 = arith.constant dense<0.000000e+00> : vector<78x16xf32>
    %224 = tpu.matmul %222, %223, %cst_176 {dimension_numbers = #tpu.dot_dimension_numbers<[1], [0], [0], [1], [0, 0, 1, 1], [], []>} : vector<78x32xf32>, vector<32x16xf32>, vector<78x16xf32> -> vector<78x16xf32>
    %225 = arith.addf %221, %224 : vector<78x16xf32>
    %c12_177 = arith.constant 12 : index
    %c0_178 = arith.constant 0 : index
    %226 = vector.load %arg8[%c12_177, %c0_178] : memref<100x32xf32, #tpu.memory_space<vmem>>, vector<78x32xf32>
    %c1184 = arith.constant 1184 : index
    %c0_179 = arith.constant 0 : index
    %227 = vector.load %arg2[%c1184, %c0_179] : memref<1462x64xf32, #tpu.memory_space<vmem>>, vector<32x16xf32>
    %cst_180 = arith.constant dense<0.000000e+00> : vector<78x16xf32>
    %228 = tpu.matmul %226, %227, %cst_180 {dimension_numbers = #tpu.dot_dimension_numbers<[1], [0], [0], [1], [0, 0, 1, 1], [], []>} : vector<78x32xf32>, vector<32x16xf32>, vector<78x16xf32> -> vector<78x16xf32>
    %229 = arith.addf %225, %228 : vector<78x16xf32>
    %c20_181 = arith.constant 20 : index
    %c0_182 = arith.constant 0 : index
    %230 = vector.load %arg8[%c20_181, %c0_182] : memref<100x32xf32, #tpu.memory_space<vmem>>, vector<78x32xf32>
    %c1216 = arith.constant 1216 : index
    %c0_183 = arith.constant 0 : index
    %231 = vector.load %arg2[%c1216, %c0_183] : memref<1462x64xf32, #tpu.memory_space<vmem>>, vector<32x16xf32>
    %cst_184 = arith.constant dense<0.000000e+00> : vector<78x16xf32>
    %232 = tpu.matmul %230, %231, %cst_184 {dimension_numbers = #tpu.dot_dimension_numbers<[1], [0], [0], [1], [0, 0, 1, 1], [], []>} : vector<78x32xf32>, vector<32x16xf32>, vector<78x16xf32> -> vector<78x16xf32>
    %233 = arith.addf %229, %232 : vector<78x16xf32>
    %c21_185 = arith.constant 21 : index
    %c0_186 = arith.constant 0 : index
    %234 = vector.load %arg8[%c21_185, %c0_186] : memref<100x32xf32, #tpu.memory_space<vmem>>, vector<78x32xf32>
    %c1248 = arith.constant 1248 : index
    %c0_187 = arith.constant 0 : index
    %235 = vector.load %arg2[%c1248, %c0_187] : memref<1462x64xf32, #tpu.memory_space<vmem>>, vector<32x16xf32>
    %cst_188 = arith.constant dense<0.000000e+00> : vector<78x16xf32>
    %236 = tpu.matmul %234, %235, %cst_188 {dimension_numbers = #tpu.dot_dimension_numbers<[1], [0], [0], [1], [0, 0, 1, 1], [], []>} : vector<78x32xf32>, vector<32x16xf32>, vector<78x16xf32> -> vector<78x16xf32>
    %237 = arith.addf %233, %236 : vector<78x16xf32>
    %c22_189 = arith.constant 22 : index
    %c0_190 = arith.constant 0 : index
    %238 = vector.load %arg8[%c22_189, %c0_190] : memref<100x32xf32, #tpu.memory_space<vmem>>, vector<78x32xf32>
    %c1280 = arith.constant 1280 : index
    %c0_191 = arith.constant 0 : index
    %239 = vector.load %arg2[%c1280, %c0_191] : memref<1462x64xf32, #tpu.memory_space<vmem>>, vector<32x16xf32>
    %cst_192 = arith.constant dense<0.000000e+00> : vector<78x16xf32>
    %240 = tpu.matmul %238, %239, %cst_192 {dimension_numbers = #tpu.dot_dimension_numbers<[1], [0], [0], [1], [0, 0, 1, 1], [], []>} : vector<78x32xf32>, vector<32x16xf32>, vector<78x16xf32> -> vector<78x16xf32>
    %241 = arith.addf %237, %240 : vector<78x16xf32>
    %cst_193 = arith.constant 0.000000e+00 : f32
    %242 = vector.broadcast %cst_193 : f32 to vector<78x16xf32>
    %243 = arith.maximumf %241, %242 : vector<78x16xf32>
    %c288_194 = arith.constant 288 : index
    %c0_195 = arith.constant 0 : index
    %244 = vector.load %arg3[%c288_194, %c0_195] : memref<616x134xf32, #tpu.memory_space<vmem>>, vector<324x78xf32>
    %cst_196 = arith.constant dense<0.000000e+00> : vector<324x16xf32>
    %245 = tpu.matmul %244, %243, %cst_196 {dimension_numbers = #tpu.dot_dimension_numbers<[1], [0], [0], [1], [0, 0, 1, 1], [], []>} : vector<324x78xf32>, vector<78x16xf32>, vector<324x16xf32> -> vector<324x16xf32>
    %c0_197 = arith.constant 0 : index
    %c0_198 = arith.constant 0 : index
    %246 = vector.load %arg9[%c0_197, %c0_198] : memref<324x16xf32, #tpu.memory_space<vmem>>, vector<324x16xf32>
    tpu.vector_store %arg9[%c0_197, %c0_198], %245 {strides = array<i32>} : memref<324x16xf32, #tpu.memory_space<vmem>>, vector<324x16xf32>,
    %c1461 = arith.constant 1461 : index
    %c0_199 = arith.constant 0 : index
    %247 = vector.load %arg2[%c1461, %c0_199] : memref<1462x64xf32, #tpu.memory_space<vmem>>, vector<1x1xf32>
    %248 = vector.shape_cast %247 : vector<1x1xf32> to vector<1x1xf32>
    %249 = vector.broadcast %248 : vector<1x1xf32> to vector<286x1xf32>
    %c0_200 = arith.constant 0 : index
    %c0_201 = arith.constant 0 : index
    %250 = vector.load %arg9[%c0_200, %c0_201] : memref<324x16xf32, #tpu.memory_space<vmem>>, vector<286x16xf32>
    %c1312 = arith.constant 1312 : index
    %c0_202 = arith.constant 0 : index
    %251 = vector.load %arg2[%c1312, %c0_202] : memref<1462x64xf32, #tpu.memory_space<vmem>>, vector<16x1xf32>
    %cst_203 = arith.constant dense<0.000000e+00> : vector<286x1xf32>
    %252 = tpu.matmul %250, %251, %cst_203 {dimension_numbers = #tpu.dot_dimension_numbers<[1], [0], [0], [1], [0, 0, 1, 1], [], []>} : vector<286x16xf32>, vector<16x1xf32>, vector<286x1xf32> -> vector<286x1xf32>
    %253 = arith.addf %249, %252 : vector<286x1xf32>
    %c1_204 = arith.constant 1 : index
    %c0_205 = arith.constant 0 : index
    %254 = vector.load %arg9[%c1_204, %c0_205] : memref<324x16xf32, #tpu.memory_space<vmem>>, vector<286x16xf32>
    %c1328 = arith.constant 1328 : index
    %c0_206 = arith.constant 0 : index
    %255 = vector.load %arg2[%c1328, %c0_206] : memref<1462x64xf32, #tpu.memory_space<vmem>>, vector<16x1xf32>
    %cst_207 = arith.constant dense<0.000000e+00> : vector<286x1xf32>
    %256 = tpu.matmul %254, %255, %cst_207 {dimension_numbers = #tpu.dot_dimension_numbers<[1], [0], [0], [1], [0, 0, 1, 1], [], []>} : vector<286x16xf32>, vector<16x1xf32>, vector<286x1xf32> -> vector<286x1xf32>
    %257 = arith.addf %253, %256 : vector<286x1xf32>
    %c2_208 = arith.constant 2 : index
    %c0_209 = arith.constant 0 : index
    %258 = vector.load %arg9[%c2_208, %c0_209] : memref<324x16xf32, #tpu.memory_space<vmem>>, vector<286x16xf32>
    %c1344 = arith.constant 1344 : index
    %c0_210 = arith.constant 0 : index
    %259 = vector.load %arg2[%c1344, %c0_210] : memref<1462x64xf32, #tpu.memory_space<vmem>>, vector<16x1xf32>
    %cst_211 = arith.constant dense<0.000000e+00> : vector<286x1xf32>
    %260 = tpu.matmul %258, %259, %cst_211 {dimension_numbers = #tpu.dot_dimension_numbers<[1], [0], [0], [1], [0, 0, 1, 1], [], []>} : vector<286x16xf32>, vector<16x1xf32>, vector<286x1xf32> -> vector<286x1xf32>
    %261 = arith.addf %257, %260 : vector<286x1xf32>
    %c18_212 = arith.constant 18 : index
    %c0_213 = arith.constant 0 : index
    %262 = vector.load %arg9[%c18_212, %c0_213] : memref<324x16xf32, #tpu.memory_space<vmem>>, vector<286x16xf32>
    %c1360 = arith.constant 1360 : index
    %c0_214 = arith.constant 0 : index
    %263 = vector.load %arg2[%c1360, %c0_214] : memref<1462x64xf32, #tpu.memory_space<vmem>>, vector<16x1xf32>
    %cst_215 = arith.constant dense<0.000000e+00> : vector<286x1xf32>
    %264 = tpu.matmul %262, %263, %cst_215 {dimension_numbers = #tpu.dot_dimension_numbers<[1], [0], [0], [1], [0, 0, 1, 1], [], []>} : vector<286x16xf32>, vector<16x1xf32>, vector<286x1xf32> -> vector<286x1xf32>
    %265 = arith.addf %261, %264 : vector<286x1xf32>
    %c19_216 = arith.constant 19 : index
    %c0_217 = arith.constant 0 : index
    %266 = vector.load %arg9[%c19_216, %c0_217] : memref<324x16xf32, #tpu.memory_space<vmem>>, vector<286x16xf32>
    %c1376 = arith.constant 1376 : index
    %c0_218 = arith.constant 0 : index
    %267 = vector.load %arg2[%c1376, %c0_218] : memref<1462x64xf32, #tpu.memory_space<vmem>>, vector<16x1xf32>
    %cst_219 = arith.constant dense<0.000000e+00> : vector<286x1xf32>
    %268 = tpu.matmul %266, %267, %cst_219 {dimension_numbers = #tpu.dot_dimension_numbers<[1], [0], [0], [1], [0, 0, 1, 1], [], []>} : vector<286x16xf32>, vector<16x1xf32>, vector<286x1xf32> -> vector<286x1xf32>
    %269 = arith.addf %265, %268 : vector<286x1xf32>
    %c20_220 = arith.constant 20 : index
    %c0_221 = arith.constant 0 : index
    %270 = vector.load %arg9[%c20_220, %c0_221] : memref<324x16xf32, #tpu.memory_space<vmem>>, vector<286x16xf32>
    %c1392 = arith.constant 1392 : index
    %c0_222 = arith.constant 0 : index
    %271 = vector.load %arg2[%c1392, %c0_222] : memref<1462x64xf32, #tpu.memory_space<vmem>>, vector<16x1xf32>
    %cst_223 = arith.constant dense<0.000000e+00> : vector<286x1xf32>
    %272 = tpu.matmul %270, %271, %cst_223 {dimension_numbers = #tpu.dot_dimension_numbers<[1], [0], [0], [1], [0, 0, 1, 1], [], []>} : vector<286x16xf32>, vector<16x1xf32>, vector<286x1xf32> -> vector<286x1xf32>
    %273 = arith.addf %269, %272 : vector<286x1xf32>
    %c36_224 = arith.constant 36 : index
    %c0_225 = arith.constant 0 : index
    %274 = vector.load %arg9[%c36_224, %c0_225] : memref<324x16xf32, #tpu.memory_space<vmem>>, vector<286x16xf32>
    %c1408 = arith.constant 1408 : index
    %c0_226 = arith.constant 0 : index
    %275 = vector.load %arg2[%c1408, %c0_226] : memref<1462x64xf32, #tpu.memory_space<vmem>>, vector<16x1xf32>
    %cst_227 = arith.constant dense<0.000000e+00> : vector<286x1xf32>
    %276 = tpu.matmul %274, %275, %cst_227 {dimension_numbers = #tpu.dot_dimension_numbers<[1], [0], [0], [1], [0, 0, 1, 1], [], []>} : vector<286x16xf32>, vector<16x1xf32>, vector<286x1xf32> -> vector<286x1xf32>
    %277 = arith.addf %273, %276 : vector<286x1xf32>
    %c37_228 = arith.constant 37 : index
    %c0_229 = arith.constant 0 : index
    %278 = vector.load %arg9[%c37_228, %c0_229] : memref<324x16xf32, #tpu.memory_space<vmem>>, vector<286x16xf32>
    %c1424 = arith.constant 1424 : index
    %c0_230 = arith.constant 0 : index
    %279 = vector.load %arg2[%c1424, %c0_230] : memref<1462x64xf32, #tpu.memory_space<vmem>>, vector<16x1xf32>
    %cst_231 = arith.constant dense<0.000000e+00> : vector<286x1xf32>
    %280 = tpu.matmul %278, %279, %cst_231 {dimension_numbers = #tpu.dot_dimension_numbers<[1], [0], [0], [1], [0, 0, 1, 1], [], []>} : vector<286x16xf32>, vector<16x1xf32>, vector<286x1xf32> -> vector<286x1xf32>
    %281 = arith.addf %277, %280 : vector<286x1xf32>
    %c38_232 = arith.constant 38 : index
    %c0_233 = arith.constant 0 : index
    %282 = vector.load %arg9[%c38_232, %c0_233] : memref<324x16xf32, #tpu.memory_space<vmem>>, vector<286x16xf32>
    %c1440 = arith.constant 1440 : index
    %c0_234 = arith.constant 0 : index
    %283 = vector.load %arg2[%c1440, %c0_234] : memref<1462x64xf32, #tpu.memory_space<vmem>>, vector<16x1xf32>
    %cst_235 = arith.constant dense<0.000000e+00> : vector<286x1xf32>
    %284 = tpu.matmul %282, %283, %cst_235 {dimension_numbers = #tpu.dot_dimension_numbers<[1], [0], [0], [1], [0, 0, 1, 1], [], []>} : vector<286x16xf32>, vector<16x1xf32>, vector<286x1xf32> -> vector<286x1xf32>
    %285 = arith.addf %281, %284 : vector<286x1xf32>
    %cst_236 = arith.constant 0.000000e+00 : f32
    %286 = vector.broadcast %cst_236 : f32 to vector<286x1xf32>
    %287 = arith.subf %286, %285 : vector<286x1xf32>
    %288 = math.exp %287 : vector<286x1xf32>
    %cst_237 = arith.constant 1.000000e+00 : f32
    %289 = vector.broadcast %cst_237 : f32 to vector<286x1xf32>
    %290 = arith.addf %289, %288 : vector<286x1xf32>
    %cst_238 = arith.constant 1.000000e+00 : f32
    %291 = vector.broadcast %cst_238 : f32 to vector<286x1xf32>
    %292 = arith.divf %291, %290 : vector<286x1xf32>
    %c0_239 = arith.constant 0 : index
    %c0_240 = arith.constant 0 : index
    %c0_241 = arith.constant 0 : index
    %293 = vector.load %arg4[%c0_239, %c0_240, %c0_241] : memref<1x288x1xf32, #tpu.memory_space<vmem>>, vector<1x286x1xf32>
    %294 = vector.shape_cast %293 : vector<1x286x1xf32> to vector<286x1xf32>
    %295 = vector.shape_cast %292 : vector<286x1xf32> to vector<1x286x1xf32>
    tpu.vector_store %arg4[%c0_239, %c0_240, %c0_241], %295 {strides = array<i32>} : memref<1x288x1xf32, #tpu.memory_space<vmem>>, vector<1x286x1xf32>,
    return
  }
  func.func @transform_0(%arg0: i32) -> (i32, i32, i32) {
    %c0_i32 = arith.constant 0 : i32
    %c0_i32_0 = arith.constant 0 : i32
    %c0_i32_1 = arith.constant 0 : i32
    return %arg0, %c0_i32, %c0_i32_0 : i32, i32, i32
  }
  func.func @transform_1(%arg0: i32) -> (i32, i32) {
    %c0_i32 = arith.constant 0 : i32
    %c0_i32_0 = arith.constant 0 : i32
    %c0_i32_1 = arith.constant 0 : i32
    return %c0_i32, %c0_i32_0 : i32, i32
  }
  func.func @transform_2(%arg0: i32) -> (i32, i32) {
    %c0_i32 = arith.constant 0 : i32
    %c0_i32_0 = arith.constant 0 : i32
    %c0_i32_1 = arith.constant 0 : i32
    return %c0_i32, %c0_i32_0 : i32, i32
  }
  func.func @transform_3(%arg0: i32) -> (i32, i32, i32) {
    %c0_i32 = arith.constant 0 : i32
    %c0_i32_0 = arith.constant 0 : i32
    %c0_i32_1 = arith.constant 0 : i32
    return %arg0, %c0_i32, %c0_i32_0 : i32, i32, i32
  }
}

</mosaic_0001>

<bundles_post_ra>
// kernel: forward.1
= control target key start
LH: loop header
LB: loop body
LE: loop exit
PB: predicated region body
PF: predicated region fallthrough
CT: control target
= control target key end

     0   :  { %s15257_s12 = smov 0   ;;  %s18238_s0 = inlined_call_operand.vmem [shape: f32[2,324,1], index: 0, kind: input, shape index: {}]   ;;  %s18239_s1 = inlined_call_operand.vmem [shape: f32[1462,64], index: 1, kind: input, shape index: {}]   ;;  %s18240_s2 = inlined_call_operand.vmem [shape: f32[616,134], index: 2, kind: input, shape index: {}]   ;;  %s18241_s3 = inlined_call_operand.vmem [shape: f32[2,288,1], index: 3, kind: output, shape index: {}]  }
   0x1 LB: > { %s11175_s13 = sadd.s32 4294967295, %s15230_s12   ;;  %p11179_p0 = scmp.ge.s32.totalorder %s15230_s12, 1  ;;  %s15230_s12 = sphi %s15257_s12, %s13_s12  }
   0x2   : > { %p137_p1 = scmp.lt.s32.totalorder %s15230_s12, 3 }
   0x4   : > { %p138_p2 = pnand %p11179_p0, %p137_p1 }
   0x5   : > { %p161_p3 = scmp.lt.s32.totalorder (!%p138_p2), %s11175_s13, 1  ;;  %v15232_v0 = vmov (!%p138_p2), 0   ;;  %v18242_v55 = vmov (!%p138_p2), 0.0|0.0   ;;  %vm1608_vm0 = vcmask (!%p138_p2), 48128   ;;  %vm1648_vm1 = vcmask (!%p138_p2), 1045504  }
   0x6   : > { %141 = sbr.rel (%p138_p2) target bundleno = 3781 (0xec5), region = 32  ;;  %15070 = vset.pattern.permute.xlu1 (!%p138_p2), %v15232_v0  ;;  %15069 = vset.pattern.permute.xlu0 (!%p138_p2), %v15232_v0  ;;  %vm15235_vm2 = vmmov (!%p138_p2), 0   ;;  %vm1782_vm3 = vcmask (!%p138_p2), 130048   ;;  %vm1795_vm4 = vcmask (!%p138_p2), 125952   ;;  %vm2925_vm5 = vcmask (!%p138_p2), 1041408  }
   0x7   : > { %14139 = vmatprep.subr.bf16.mxu1 (!%p138_p2), %v18242_v55  ;;  %14190 = vmatprep.subr.bf16.mxu0 (!%p138_p2), %v18242_v55  ;;  %vm2909_vm6 = vcmask (!%p138_p2), 277504   ;;  %vm3019_vm7 = vcmask (!%p138_p2), 261120   ;;  %vm3024_vm8 = vcmask (!%p138_p2), 257024   ;;  %vm3756_vm9 = vcmask (!%p138_p2), 64512  }
   0x8   : > { %vm3862_vm10 = vcmask (!%p138_p2), 523264   ;;  %vm3867_vm11 = vcmask (!%p138_p2), 519168   ;;  %vm4817_vm12 = vcmask (!%p138_p2), 179200   ;;  %vm15236_vm13 = vmmov (!%p138_p2), 1  }
   0x9   : > { %vm14447_vm14 = vmpackc.low (!%p138_p2), %vm1648_vm1, %vm15236_vm13  ;;  %vm6580_vm15 = vcmask (!%p138_p2), 637952  }
   0xd   : > { %s18246_s13 = smov (!%p161_p3, %s11175_s13), 1 }
   0xe   : > { %s15054_s14 = smul.u32 328, %s18246_s13 }
   0xf   : > { %s15055_s4 = smul.u32 288, %s18246_s13 }
  0x10   : > { %s15271_s17 = scalar_lea.vmem %s18238_s0, %s15054_s14 }
  0x11   : > { %v11200_v1 = vld [vmem:[%s15271_s17 + $0x1] ss:$2 sm:$0xff]  ;;  %v176_v2 = vld [vmem:[%s15271_s17] ss:$2 sm:$0xff]  ;;  %v11201_v3 = vld [vmem:[%s15271_s17 + $0x11] ss:$2 sm:$0xff]  ;;  %s18122_s6 = scalar_lea.vmem %s18241_s3, %s15055_s4 }
  0x12   : > { %370 = vperm.xlu1 %15070, %v11200_v1   ;;  %212 = vperm.xlu0 %15069, %v176_v2   ;;  %v11183_v4 = vld [vmem:[%s15271_s17 + $0x10] ss:$2 sm:$0xff]  ;;  %v11184_v6 = vld [vmem:[%s15271_s17 + $0x20] ss:$2 sm:$0xff]  ;;  %v11203_v9 = vld [vmem:[%s15271_s17 + $0x31] ss:$2 sm:$0xff] }
  0x13   : > { %v11185_v5 = vld [vmem:[%s15271_s17 + $0x30] ss:$2 sm:$0xff]  ;;  %v11202_v10 = vld [vmem:[%s15271_s17 + $0x21] ss:$2 sm:$0xff]  ;;  %v11186_v14 = vld [vmem:[%s15271_s17 + $0x40] ss:$2 sm:$0xff] }
  0x14   : > { %v11219_v7 = vld [vmem:[%s15271_s17 + $0x12] ss:$2 sm:$0xff]  ;;  %v11218_v8 = vld [vmem:[%s15271_s17 + $0x2] ss:$2 sm:$0xff]  ;;  %v11255_v17 = vld [vmem:[%s15271_s17 + $0x23] ss:$2 sm:$0xff] }
  0x15   : > { %v11237_v11 = vld [vmem:[%s15271_s17 + $0x22] ss:$2 sm:$0xff]  ;;  %v11236_v12 = vld [vmem:[%s15271_s17 + $0x12] ss:$2 sm:$0xff]  ;;  %v11254_v18 = vld [vmem:[%s15271_s17 + $0x13] ss:$2 sm:$0xff] }
  0x16   : > { %375 = vperm.xlu1 %15070, %v11201_v3   ;;  %217 = vperm.xlu0 %15069, %v11183_v4   ;;  %v11187_v13 = vld [vmem:[%s15271_s17 + $0x50] ss:$2 sm:$0xff]  ;;  %v11205_v19 = vld [vmem:[%s15271_s17 + $0x51] ss:$2 sm:$0xff]  ;;  %v11204_v20 = vld [vmem:[%s15271_s17 + $0x41] ss:$2 sm:$0xff] }
  0x17   : > { %v11221_v15 = vld [vmem:[%s15271_s17 + $0x32] ss:$2 sm:$0xff]  ;;  %v11220_v16 = vld [vmem:[%s15271_s17 + $0x22] ss:$2 sm:$0xff]  ;;  %v11257_v29 = vld [vmem:[%s15271_s17 + $0x43] ss:$2 sm:$0xff] }
  0x18   : > { %v11239_v21 = vld [vmem:[%s15271_s17 + $0x42] ss:$2 sm:$0xff]  ;;  %v11238_v22 = vld [vmem:[%s15271_s17 + $0x32] ss:$2 sm:$0xff]  ;;  %v11256_v30 = vld [vmem:[%s15271_s17 + $0x33] ss:$2 sm:$0xff] }
  0x19   : > { %v11273_v23 = vld [vmem:[%s15271_s17 + $0x24] ss:$2 sm:$0xff]  ;;  %v11272_v24 = vld [vmem:[%s15271_s17 + $0x14] ss:$2 sm:$0xff]  ;;  %v11207_v33 = vld [vmem:[%s15271_s17 + $0x71] ss:$2 sm:$0xff] }
  0x1a   : > { %227 = vperm.xlu1 %15070, %v11185_v5   ;;  %222 = vperm.xlu0 %15069, %v11184_v6   ;;  %v11189_v25 = vld [vmem:[%s15271_s17 + $0x70] ss:$2 sm:$0xff]  ;;  %v11188_v26 = vld [vmem:[%s15271_s17 + $0x60] ss:$2 sm:$0xff]  ;;  %v11206_v34 = vld [vmem:[%s15271_s17 + $0x61] ss:$2 sm:$0xff] }
  0x1b   : > { %v11223_v27 = vld [vmem:[%s15271_s17 + $0x52] ss:$2 sm:$0xff]  ;;  %v11222_v28 = vld [vmem:[%s15271_s17 + $0x42] ss:$2 sm:$0xff]  ;;  %v11309_v39 = vld [vmem:[%s15271_s17 + $0x35] ss:$2 sm:$0xff] }
  0x1c   : > { %v11291_v31 = vld [vmem:[%s15271_s17 + $0x34] ss:$2 sm:$0xff]  ;;  %v11290_v32 = vld [vmem:[%s15271_s17 + $0x24] ss:$2 sm:$0xff]  ;;  %v11308_v40 = vld [vmem:[%s15271_s17 + $0x25] ss:$2 sm:$0xff] }
  0x1d   : > { %v11241_v35 = vld [vmem:[%s15271_s17 + $0x62] ss:$2 sm:$0xff]  ;;  %v11240_v36 = vld [vmem:[%s15271_s17 + $0x52] ss:$2 sm:$0xff]  ;;  %v11259_v45 = vld [vmem:[%s15271_s17 + $0x63] ss:$2 sm:$0xff] }
  0x1e   : > { %533 = vperm.xlu1 %15070, %v11219_v7   ;;  %528 = vperm.xlu0 %15069, %v11218_v8   ;;  %v11275_v37 = vld [vmem:[%s15271_s17 + $0x44] ss:$2 sm:$0xff]  ;;  %v11274_v38 = vld [vmem:[%s15271_s17 + $0x34] ss:$2 sm:$0xff]  ;;  %v11258_v46 = vld [vmem:[%s15271_s17 + $0x53] ss:$2 sm:$0xff] }
  0x1f   : > { %v11191_v41 = vld [vmem:[%s15271_s17 + $0x90] ss:$2 sm:$0xff]  ;;  %v11190_v42 = vld [vmem:[%s15271_s17 + $0x80] ss:$2 sm:$0xff]  ;;  %v11209_v51 = vld [vmem:[%s15271_s17 + $0x91] ss:$2 sm:$0xff] }
  0x20   : > { %v11225_v43 = vld [vmem:[%s15271_s17 + $0x72] ss:$2 sm:$0xff]  ;;  %v11224_v44 = vld [vmem:[%s15271_s17 + $0x62] ss:$2 sm:$0xff]  ;;  %v11208_v52 = vld [vmem:[%s15271_s17 + $0x81] ss:$2 sm:$0xff] }
  0x21   : > { %v11293_v47 = vld [vmem:[%s15271_s17 + $0x54] ss:$2 sm:$0xff]  ;;  %v11292_v48 = vld [vmem:[%s15271_s17 + $0x44] ss:$2 sm:$0xff]  ;;  %v11311_v58 = vld [vmem:[%s15271_s17 + $0x55] ss:$2 sm:$0xff] }
  0x22   : > { %385 = vperm.xlu1 %15070, %v11203_v9   ;;  %380 = vperm.xlu0 %15069, %v11202_v10   ;;  %v11327_v49 = vld [vmem:[%s15271_s17 + $0x36] ss:$2 sm:$0xff]  ;;  %v11326_v50 = vld [vmem:[%s15271_s17 + $0x26] ss:$2 sm:$0xff]  ;;  %v11310_v59 = vld [vmem:[%s15271_s17 + $0x45] ss:$2 sm:$0xff] }
  0x23   : > { %v11243_v53 = vld [vmem:[%s15271_s17 + $0x82] ss:$2 sm:$0xff]  ;;  %v11242_v54 = vld [vmem:[%s15271_s17 + $0x72] ss:$2 sm:$0xff]  ;;  %v11261_v0 = vld [vmem:[%s15271_s17 + $0x83] ss:$2 sm:$0xff] }
  0x24   : > { %v11277_v56 = vld [vmem:[%s15271_s17 + $0x64] ss:$2 sm:$0xff]  ;;  %v11276_v57 = vld [vmem:[%s15271_s17 + $0x54] ss:$2 sm:$0xff]  ;;  %v11260_v1 = vld [vmem:[%s15271_s17 + $0x73] ss:$2 sm:$0xff] }
  0x25   : > { %v11193_v60 = vld [vmem:[%s15271_s17 + $0xb0] ss:$2 sm:$0xff]  ;;  %v11192_v61 = vld [vmem:[%s15271_s17 + $0xa0] ss:$2 sm:$0xff]  ;;  %v11211_v10 = vld [vmem:[%s15271_s17 + $0xb1] ss:$2 sm:$0xff] }
  0x26   : > { %675 = vperm.xlu1 %15070, %v11237_v11   ;;  %670 = vperm.xlu0 %15069, %v11236_v12   ;;  %v11227_v62 = vld [vmem:[%s15271_s17 + $0x92] ss:$2 sm:$0xff]  ;;  %v11226_v63 = vld [vmem:[%s15271_s17 + $0x82] ss:$2 sm:$0xff]  ;;  %v11210_v11 = vld [vmem:[%s15271_s17 + $0xa1] ss:$2 sm:$0xff] }
  0x27   : > { %v11295_v2 = vld [vmem:[%s15271_s17 + $0x74] ss:$2 sm:$0xff]  ;;  %v11294_v3 = vld [vmem:[%s15271_s17 + $0x64] ss:$2 sm:$0xff] }
  0x28   : > { %v11329_v6 = vld [vmem:[%s15271_s17 + $0x56] ss:$2 sm:$0xff]  ;;  %v11328_v7 = vld [vmem:[%s15271_s17 + $0x46] ss:$2 sm:$0xff] }
  0x2a   : > { %237 = vperm.xlu1 %15070, %v11187_v13   ;;  %232 = vperm.xlu0 %15069, %v11186_v14   ;;  %v11245_v14 = vld [vmem:[%s15271_s17 + $0xa2] ss:$2 sm:$0xff] }
  0x2e   : > { %543 = vperm.xlu1 %15070, %v11221_v15   ;;  %538 = vperm.xlu0 %15069, %v11220_v16   ;;  %v11244_v15 = vld [vmem:[%s15271_s17 + $0x92] ss:$2 sm:$0xff] }
  0x32   : > { %833 = vperm.xlu1 %15070, %v11255_v17   ;;  %828 = vperm.xlu0 %15069, %v11254_v18   ;;  %v11279_v18 = vld [vmem:[%s15271_s17 + $0x84] ss:$2 sm:$0xff] }
  0x36   : > { %395 = vperm.xlu1 %15070, %v11205_v19   ;;  %390 = vperm.xlu0 %15069, %v11204_v20   ;;  %v11278_v19 = vld [vmem:[%s15271_s17 + $0x74] ss:$2 sm:$0xff] }
  0x3a   : > { %685 = vperm.xlu1 %15070, %v11239_v21   ;;  %680 = vperm.xlu0 %15069, %v11238_v22   ;;  %v11313_v22 = vld [vmem:[%s15271_s17 + $0x75] ss:$2 sm:$0xff] }
  0x3e   : > { %991 = vperm.xlu1 %15070, %v11273_v23   ;;  %986 = vperm.xlu0 %15069, %v11272_v24   ;;  %v11312_v23 = vld [vmem:[%s15271_s17 + $0x65] ss:$2 sm:$0xff] }
  0x42   : > { %247 = vperm.xlu1 %15070, %v11189_v25   ;;  %242 = vperm.xlu0 %15069, %v11188_v26   ;;  %v11195_v26 = vld [vmem:[%s15271_s17 + $0xd0] ss:$2 sm:$0xff] }
  0x46   : > { %553 = vperm.xlu1 %15070, %v11223_v27   ;;  %548 = vperm.xlu0 %15069, %v11222_v28   ;;  %v11194_v27 = vld [vmem:[%s15271_s17 + $0xc0] ss:$2 sm:$0xff] }
  0x4a   : > { %843 = vperm.xlu1 %15070, %v11257_v29   ;;  %838 = vperm.xlu0 %15069, %v11256_v30   ;;  %v11229_v30 = vld [vmem:[%s15271_s17 + $0xb2] ss:$2 sm:$0xff] }
  0x4e   : > { %1133 = vperm.xlu1 %15070, %v11291_v31   ;;  %1128 = vperm.xlu0 %15069, %v11290_v32   ;;  %v11228_v31 = vld [vmem:[%s15271_s17 + $0xa2] ss:$2 sm:$0xff] }
  0x52   : > { %405 = vperm.xlu1 %15070, %v11207_v33   ;;  %400 = vperm.xlu0 %15069, %v11206_v34   ;;  %v11263_v34 = vld [vmem:[%s15271_s17 + $0xa3] ss:$2 sm:$0xff] }
  0x56   : > { %695 = vperm.xlu1 %15070, %v11241_v35   ;;  %690 = vperm.xlu0 %15069, %v11240_v36   ;;  %v11262_v35 = vld [vmem:[%s15271_s17 + $0x93] ss:$2 sm:$0xff] }
  0x5a   : > { %1001 = vperm.xlu1 %15070, %v11275_v37   ;;  %996 = vperm.xlu0 %15069, %v11274_v38   ;;  %v11297_v38 = vld [vmem:[%s15271_s17 + $0x94] ss:$2 sm:$0xff] }
  0x5e   : > { %1291 = vperm.xlu1 %15070, %v11309_v39   ;;  %1286 = vperm.xlu0 %15069, %v11308_v40   ;;  %v11296_v39 = vld [vmem:[%s15271_s17 + $0x84] ss:$2 sm:$0xff] }
  0x62   : > { %257 = vperm.xlu1 %15070, %v11191_v41   ;;  %252 = vperm.xlu0 %15069, %v11190_v42   ;;  %v11331_v42 = vld [vmem:[%s15271_s17 + $0x76] ss:$2 sm:$0xff] }
  0x66   : > { %563 = vperm.xlu1 %15070, %v11225_v43   ;;  %558 = vperm.xlu0 %15069, %v11224_v44   ;;  %v11330_v43 = vld [vmem:[%s15271_s17 + $0x66] ss:$2 sm:$0xff] }
  0x6a   : > { %853 = vperm.xlu1 %15070, %v11259_v45   ;;  %848 = vperm.xlu0 %15069, %v11258_v46   ;;  %v11213_v46 = vld [vmem:[%s15271_s17 + $0xd1] ss:$2 sm:$0xff] }
  0x6e   : > { %1143 = vperm.xlu1 %15070, %v11293_v47   ;;  %1138 = vperm.xlu0 %15069, %v11292_v48   ;;  %v11212_v47 = vld [vmem:[%s15271_s17 + $0xc1] ss:$2 sm:$0xff] }
  0x72   : > { %1449 = vperm.xlu1 %15070, %v11327_v49   ;;  %1444 = vperm.xlu0 %15069, %v11326_v50   ;;  %v11247_v50 = vld [vmem:[%s15271_s17 + $0xc2] ss:$2 sm:$0xff] }
  0x76   : > { %415 = vperm.xlu1 %15070, %v11209_v51   ;;  %410 = vperm.xlu0 %15069, %v11208_v52   ;;  %v11246_v51 = vld [vmem:[%s15271_s17 + $0xb2] ss:$2 sm:$0xff] }
  0x7a   : > { %705 = vperm.xlu1 %15070, %v11243_v53   ;;  %700 = vperm.xlu0 %15069, %v11242_v54   ;;  %v11281_v54 = vld [vmem:[%s15271_s17 + $0xa4] ss:$2 sm:$0xff] }
  0x7e   : > { %1011 = vperm.xlu1 %15070, %v11277_v56   ;;  %1006 = vperm.xlu0 %15069, %v11276_v57   ;;  %v11280_v56 = vld [vmem:[%s15271_s17 + $0x94] ss:$2 sm:$0xff] }
  0x82   : > { %1301 = vperm.xlu1 %15070, %v11311_v58   ;;  %1296 = vperm.xlu0 %15069, %v11310_v59   ;;  %v11315_v59 = vld [vmem:[%s15271_s17 + $0x95] ss:$2 sm:$0xff] }
  0x86   : > { %267 = vperm.xlu1 %15070, %v11193_v60   ;;  %262 = vperm.xlu0 %15069, %v11192_v61   ;;  %v11314_v60 = vld [vmem:[%s15271_s17 + $0x85] ss:$2 sm:$0xff] }
  0x8a   : > { %573 = vperm.xlu1 %15070, %v11227_v62   ;;  %568 = vperm.xlu0 %15069, %v11226_v63   ;;  %v11197_v63 = vld [vmem:[%s15271_s17 + $0xf0] ss:$2 sm:$0xff] }
  0x8e   : > { %863 = vperm.xlu1 %15070, %v11261_v0   ;;  %858 = vperm.xlu0 %15069, %v11260_v1   ;;  %v11196_v0 = vld [vmem:[%s15271_s17 + $0xe0] ss:$2 sm:$0xff] }
  0x91   : > { %v15341_v4 = vpop.permute.xlu1 %370  ;;  %v15343_v5 = vpop.permute.xlu0 %212 }
  0x92   : > { %1153 = vperm.xlu1 %15070, %v11295_v2   ;;  %1148 = vperm.xlu0 %15069, %v11294_v3   ;;  %v11231_v3 = vld [vmem:[%s15271_s17 + $0xd2] ss:$2 sm:$0xff] }
  0x95   : > { %v15347_v8 = vpop.permute.xlu1 %375  ;;  %v15349_v9 = vpop.permute.xlu0 %217 }
  0x96   : > { %1459 = vperm.xlu1 %15070, %v11329_v6   ;;  %1454 = vperm.xlu0 %15069, %v11328_v7   ;;  %v11230_v6 = vld [vmem:[%s15271_s17 + $0xc2] ss:$2 sm:$0xff] }
  0x99   : > { %v15353_v12 = vpop.permute.xlu1 %227  ;;  %v15355_v13 = vpop.permute.xlu0 %222 }
  0x9a   : > { %425 = vperm.xlu1 %15070, %v11211_v10   ;;  %420 = vperm.xlu0 %15069, %v11210_v11   ;;  %v11265_v11 = vld [vmem:[%s15271_s17 + $0xc3] ss:$2 sm:$0xff] }
  0x9d   : > { %v15359_v16 = vpop.permute.xlu1 %533  ;;  %v15361_v17 = vpop.permute.xlu0 %528 }
  0x9e   : > { %715 = vperm.xlu1 %15070, %v11245_v14   ;;  %710 = vperm.xlu0 %15069, %v11244_v15   ;;  %v11264_v14 = vld [vmem:[%s15271_s17 + $0xb3] ss:$2 sm:$0xff] }
  0xa1   : > { %v15365_v20 = vpop.permute.xlu1 %385  ;;  %v15367_v21 = vpop.permute.xlu0 %380 }
  0xa2   : > { %1021 = vperm.xlu1 %15070, %v11279_v18   ;;  %1016 = vperm.xlu0 %15069, %v11278_v19   ;;  %v11299_v19 = vld [vmem:[%s15271_s17 + $0xb4] ss:$2 sm:$0xff] }
  0xa5   : > { %v15371_v24 = vpop.permute.xlu1 %675  ;;  %v15373_v25 = vpop.permute.xlu0 %670 }
  0xa6   : > { %1311 = vperm.xlu1 %15070, %v11313_v22   ;;  %1306 = vperm.xlu0 %15069, %v11312_v23   ;;  %v11298_v22 = vld [vmem:[%s15271_s17 + $0xa4] ss:$2 sm:$0xff] }
  0xa9   : > { %v15377_v28 = vpop.permute.xlu1 %237  ;;  %v15379_v29 = vpop.permute.xlu0 %232 }
  0xaa   : > { %277 = vperm.xlu1 %15070, %v11195_v26   ;;  %272 = vperm.xlu0 %15069, %v11194_v27   ;;  %v15456_v27 = vld [vmem:[%s18239_s1] ss:$0 sm:$0xff] }
  0xad   : > { %v15383_v32 = vpop.permute.xlu1 %543  ;;  %v15385_v33 = vpop.permute.xlu0 %538 }
  0xae   : > { %583 = vperm.xlu1 %15070, %v11229_v30   ;;  %578 = vperm.xlu0 %15069, %v11228_v31   ;;  %v11333_v30 = vld [vmem:[%s15271_s17 + $0x96] ss:$2 sm:$0xff]  ;;  %v11332_v31 = vld [vmem:[%s15271_s17 + $0x86] ss:$2 sm:$0xff] }
  0xb1   : > { %v15389_v36 = vpop.permute.xlu1 %833  ;;  %v15391_v37 = vpop.permute.xlu0 %828 }
  0xb2   : > { %873 = vperm.xlu1 %15070, %v11263_v34   ;;  %868 = vperm.xlu0 %15069, %v11262_v35   ;;  %v300_v34 = vmul.f32 %v15456_v27, %v15349_v9  ;;  %v11215_v9 = vld [vmem:[%s15271_s17 + $0xf1] ss:$2 sm:$0xff] }
  0xb5   : > { %v15395_v40 = vpop.permute.xlu1 %395  ;;  %v15397_v41 = vpop.permute.xlu0 %390 }
  0xb6   : > { %1163 = vperm.xlu1 %15070, %v11297_v38   ;;  %1158 = vperm.xlu0 %15069, %v11296_v39   ;;  %v15465_v39 = vld [vmem:[%s18239_s1 + $0x1] ss:$0 sm:$0xff] }
  0xb9   : > { %v15401_v44 = vpop.permute.xlu1 %685  ;;  %v15403_v45 = vpop.permute.xlu0 %680 }
  0xba   : > { %1469 = vperm.xlu1 %15070, %v11331_v42   ;;  %1464 = vperm.xlu0 %15069, %v11330_v43   ;;  %v299_v42 = vmul.f32 %v15456_v27, %v15343_v5  ;;  %v15472_v43 = vld [vmem:[%s18239_s1 + $0x5b0] ss:$0 sm:$0xff] }
  0xbd   : > { %v15407_v48 = vpop.permute.xlu1 %991  ;;  %v15409_v49 = vpop.permute.xlu0 %986 }
  0xbe   : > { %435 = vperm.xlu1 %15070, %v11213_v46   ;;  %430 = vperm.xlu0 %15069, %v11212_v47   ;;  %v11214_v46 = vld [vmem:[%s15271_s17 + $0xe1] ss:$2 sm:$0xff]  ;;  %v15479_v47 = vld [vmem:[%s18239_s1 + $0x2] ss:$0 sm:$0xff] }
  0xc1   : > { %v15413_v52 = vpop.permute.xlu1 %247  ;;  %v15415_v53 = vpop.permute.xlu0 %242 }
  0xc2   : > { %725 = vperm.xlu1 %15070, %v11247_v50   ;;  %720 = vperm.xlu0 %15069, %v11246_v51   ;;  %v317_v50 = vadd.f32 %v15472_v43, %v300_v34  ;;  %v11282_v34 = vld [vmem:[%s15271_s17 + $0xb4] ss:$2 sm:$0xff] }
  0xc5   : > { %v15419_v57 = vpop.permute.xlu1 %553  ;;  %v15421_v58 = vpop.permute.xlu0 %548 }
  0xc6   : > { %1031 = vperm.xlu1 %15070, %v11281_v54   ;;  %1026 = vperm.xlu0 %15069, %v11280_v56   ;;  %v457_v54 = vmul.f32 %v15465_v39, %v15341_v4  ;;  %v316_v56 = vadd.f32 %v15472_v43, %v299_v42  ;;  %v615_v4 = vmul.f32 %v15479_v47, %v15361_v17  ;;  %v15518_v17 = vld [vmem:[%s18239_s1 + $0x5] ss:$0 sm:$0xff] }
  0xc9   : > { %v15425_v61 = vpop.permute.xlu1 %843  ;;  %v15427_v62 = vpop.permute.xlu0 %838 }
  0xca   : > { %1321 = vperm.xlu1 %15070, %v11315_v59   ;;  %1316 = vperm.xlu0 %15069, %v11314_v60   ;;  %v15492_v59 = vld [vmem:[%s18239_s1 + $0x3] ss:$0 sm:$0xff]  ;;  %v458_v60 = vmul.f32 %v15465_v39, %v15347_v8 }
  0xcd   : > { %v15431_v1 = vpop.permute.xlu1 %1133  ;;  %v15433_v2 = vpop.permute.xlu0 %1128 }
  0xce   : > { %287 = vperm.xlu1 %15070, %v11197_v63   ;;  %282 = vperm.xlu0 %15069, %v11196_v0   ;;  %v616_v63 = vmul.f32 %v15479_v47, %v15359_v16  ;;  %v11249_v0 = vld [vmem:[%s15271_s17 + $0xe2] ss:$2 sm:$0xff]  ;;  %v474_v16 = vadd.f32 %v457_v54, %v316_v56 }
  0xd0   : > { %v632_v42 = vadd.f32 %v615_v4, %v474_v16 }
  0xd1   : > { %v15437_v7 = vpop.permute.xlu1 %405  ;;  %v15439_v10 = vpop.permute.xlu0 %400 }
  0xd2   : > { %593 = vperm.xlu1 %15070, %v11231_v3   ;;  %588 = vperm.xlu0 %15069, %v11230_v6   ;;  %v11248_v3 = vld [vmem:[%s15271_s17 + $0xd2] ss:$2 sm:$0xff]  ;;  %v15505_v6 = vld [vmem:[%s18239_s1 + $0x4] ss:$0 sm:$0xff] }
  0xd5   : > { %v15443_v15 = vpop.permute.xlu1 %695  ;;  %v15445_v18 = vpop.permute.xlu0 %690 }
  0xd6   : > { %883 = vperm.xlu1 %15070, %v11265_v11   ;;  %878 = vperm.xlu0 %15069, %v11264_v14   ;;  %v475_v11 = vadd.f32 %v458_v60, %v317_v50  ;;  %v758_v14 = vmul.f32 %v15492_v59, %v15371_v24  ;;  %v11283_v24 = vld [vmem:[%s15271_s17 + $0xc4] ss:$2 sm:$0xff]  ;;  %v1074_v50 = vmul.f32 %v15518_v17, %v15407_v48 }
  0xd7   : > { %v1073_v60 = vmul.f32 %v15518_v17, %v15409_v49 }
  0xd9   : > { %v15449_v23 = vpop.permute.xlu1 %1001  ;;  %v15451_v26 = vpop.permute.xlu0 %996 }
  0xda   : > { %1173 = vperm.xlu1 %15070, %v11299_v19   ;;  %1168 = vperm.xlu0 %15069, %v11298_v22   ;;  %v757_v22 = vmul.f32 %v15492_v59, %v15373_v25  ;;  %v15529_v25 = vld [vmem:[%s18239_s1 + $0x6] ss:$0 sm:$0xff] }
  0xdb   : > { %v1216_v48 = vmul.f32 %v15529_v25, %v15431_v1 }
  0xdc   : > { %v774_v56 = vadd.f32 %v757_v22, %v632_v42 }
  0xdd   : > { %v1292_v35 = vpop.permute.xlu1 %1291  ;;  %v1287_v38 = vpop.permute.xlu0 %1286 }
  0xde   : > { %1479 = vperm.xlu1 %15070, %v11333_v30   ;;  %1474 = vperm.xlu0 %15069, %v11332_v31   ;;  %v633_v30 = vadd.f32 %v616_v63, %v475_v11  ;;  %v916_v31 = vmul.f32 %v15505_v6, %v15389_v36  ;;  %v1215_v11 = vmul.f32 %v15529_v25, %v15433_v2  ;;  %v11233_v2 = vld [vmem:[%s15271_s17 + $0xf2] ss:$2 sm:$0xff] }
  0xe1   : > { %v15482_v51 = vpop.permute.xlu1 %257  ;;  %v15484_v5 = vpop.permute.xlu0 %252 }
  0xe2   : > { %445 = vperm.xlu1 %15070, %v11215_v9   ;;  %440 = vperm.xlu0 %15069, %v11214_v46   ;;  %v915_v9 = vmul.f32 %v15505_v6, %v15391_v37  ;;  %v775_v46 = vadd.f32 %v758_v14, %v633_v30  ;;  %v15542_v37 = vld [vmem:[%s18239_s1 + $0x7] ss:$0 sm:$0xff] }
  0xe3   : > { %v1374_v14 = vmul.f32 %v15542_v37, %v1292_v35 }
  0xe4   : > { %v933_v63 = vadd.f32 %v916_v31, %v775_v46  ;;  %v932_v4 = vadd.f32 %v915_v9, %v774_v56  ;;  %v1373_v31 = vmul.f32 %v15542_v37, %v1287_v38 }
  0xe5   : > { %v15509_v8 = vpop.permute.xlu1 %563  ;;  %v15511_v19 = vpop.permute.xlu0 %558 }
  0xe6   : > { %735 = vperm.xlu1 %15070, %v11249_v0   ;;  %730 = vperm.xlu0 %15069, %v11248_v3   ;;  %v11317_v0 = vld [vmem:[%s15271_s17 + $0xb5] ss:$2 sm:$0xff]  ;;  %v11316_v3 = vld [vmem:[%s15271_s17 + $0xa5] ss:$2 sm:$0xff]  ;;  %v1091_v49 = vadd.f32 %v1074_v50, %v933_v63  ;;  %v1090_v30 = vadd.f32 %v1073_v60, %v932_v4 }
  0xe7   : > { %v11267_v60 = vld [vmem:[%s15271_s17 + $0xe3] ss:$2 sm:$0xff]  ;;  %v11266_v63 = vld [vmem:[%s15271_s17 + $0xd3] ss:$2 sm:$0xff] }
  0xe8   : > { %v1233_v1 = vadd.f32 %v1216_v48, %v1091_v49  ;;  %v1232_v35 = vadd.f32 %v1215_v11, %v1090_v30  ;;  %v11300_v30 = vld [vmem:[%s15271_s17 + $0xc4] ss:$2 sm:$0xff] }
  0xe9   : > { %v15533_v54 = vpop.permute.xlu1 %853  ;;  %v15535_v36 = vpop.permute.xlu0 %848 }
  0xea   : > { %1041 = vperm.xlu1 %15070, %v11283_v24   ;;  %1036 = vperm.xlu0 %15069, %v11282_v34   ;;  %v15559_v24 = vld [vmem:[%s18239_s1 + $0x8] ss:$0 sm:$0xff]  ;;  %v1391_v42 = vadd.f32 %v1374_v14, %v1233_v1  ;;  %v1390_v50 = vadd.f32 %v1373_v31, %v1232_v35  ;;  %v11301_v14 = vld [vmem:[%s15271_s17 + $0xd4] ss:$2 sm:$0xff] }
  0xeb   : > { %v11232_v34 = vld [vmem:[%s15271_s17 + $0xe2] ss:$2 sm:$0xff] }
  0xec   : > { %v11334_v35 = vld [vmem:[%s15271_s17 + $0xa6] ss:$2 sm:$0xff] }
  0xed   : > { %v15551_v16 = vpop.permute.xlu1 %1143  ;;  %v15553_v22 = vpop.permute.xlu0 %1138 }
  0xee   : > { %1331 = vperm.xlu1 %15070, %v11317_v0   ;;  %1326 = vperm.xlu0 %15069, %v11316_v3  }
  0xf1   : > { %v1450_v9 = vpop.permute.xlu1 %1449  ;;  %v1445_v46 = vpop.permute.xlu0 %1444 }
  0xf2   : > { %v1532_v38 = vmul.f32 %v15559_v24, %v1450_v9  ;;  %v1531_v56 = vmul.f32 %v15559_v24, %v1445_v46  ;;  %603 = vperm.xlu1 %15070, %v11233_v2   ;;  %598 = vperm.xlu0 %15069, %v11232_v34   ;;  %v11335_v34 = vld [vmem:[%s15271_s17 + $0xb6] ss:$2 sm:$0xff] }
  0xf3   : > { %v11250_v46 = vld [vmem:[%s15271_s17 + $0xf2] ss:$2 sm:$0xff] }
  0xf4   : > { %v1549_v48 = vadd.f32 %v1532_v38, %v1391_v42  ;;  %v1548_v0 = vadd.f32 %v1531_v56, %v1390_v50  ;;  %v11198_v50 = vld [vmem:[%s15271_s17 + $0x100] ss:$2 sm:$0x3f] }
  0xf5   : > { %v15567_v3 = vpop.permute.xlu1 %415  ;;  %v15569_v4 = vpop.permute.xlu0 %410 }
  0xf6   : > { %893 = vperm.xlu1 %15070, %v11267_v60   ;;  %888 = vperm.xlu0 %15069, %v11266_v63   ;;  %v1565_v11 = vmax.f32 %v1548_v0, 0.0  ;;  %v1566_v49 = vmax.f32 %v1549_v48, 0.0  ;;  %v302_v60 = vmul.f32 %v15456_v27, %v15353_v12  ;;  %v11284_v63 = vld [vmem:[%s15271_s17 + $0xd4] ss:$2 sm:$0xff]  ;;  %v301_v0 = vmul.f32 %v15456_v27, %v15355_v13 }
  0xf7   : > { %v11251_v48 = vld [vmem:[%s15271_s17 + $0x102] ss:$2 sm:$0xff]  ;;  %v618_v12 = vmul.f32 %v15479_v47, %v15383_v32 }
  0xf8   : > { %v14140_v31 = vpack.c.bf16 %v1566_v49, %v1565_v11  ;;  %v460_v11 = vmul.f32 %v15465_v39, %v15365_v20  ;;  %v318_v13 = vadd.f32 %v15472_v43, %v301_v0  ;;  %v617_v20 = vmul.f32 %v15479_v47, %v15385_v33  ;;  %v11319_v33 = vld [vmem:[%s15271_s17 + $0xd5] ss:$2 sm:$0xff] }
  0xf9   : > { %v15573_v1 = vpop.permute.xlu1 %705  ;;  %v15575_v2 = vpop.permute.xlu0 %700  ;;  %v918_v0 = vmul.f32 %v15505_v6, %v15425_v61 }
  0xfa   : > { %1183 = vperm.xlu1 %15070, %v11301_v14   ;;  %1178 = vperm.xlu0 %15069, %v11300_v30   ;;  %v459_v30 = vmul.f32 %v15465_v39, %v15367_v21  ;;  %v760_v21 = vmul.f32 %v15492_v59, %v15401_v44  ;;  %v917_v44 = vmul.f32 %v15505_v6, %v15427_v62  ;;  %v11269_v62 = vld [vmem:[%s15271_s17 + $0x103] ss:$2 sm:$0xff] }
  0xfb   : > { %14141 = vmatpush1.bf16.msra.mxu1 %v14140_v31  ;;  %v319_v31 = vadd.f32 %v15472_v43, %v302_v60  ;;  %v759_v60 = vmul.f32 %v15492_v59, %v15403_v45 }
  0xfc   : > { %14142 = vmatprep.subr.bf16.mxu1 %v18242_v55  ;;  %v11216_v55 = vld [vmem:[%s15271_s17 + $0x101] ss:$2 sm:$0x3f] }
  0xfd   : > { %v15580_v42 = vpop.permute.xlu1 %1011  ;;  %v15582_v9 = vpop.permute.xlu0 %1006 }
  0xfe   : > { %1489 = vperm.xlu1 %15070, %v11335_v34   ;;  %1484 = vperm.xlu0 %15069, %v11334_v35   ;;  %v11318_v34 = vld [vmem:[%s15271_s17 + $0xc5] ss:$2 sm:$0xff]  ;;  %v11285_v35 = vld [vmem:[%s15271_s17 + $0xe4] ss:$2 sm:$0xff] }
 0x101   : > { %v1302_v38 = vpop.permute.xlu1 %1301  ;;  %v1297_v56 = vpop.permute.xlu0 %1296 }
 0x102   : > { %740 = vperm.xlu1 %15070, %v11250_v46   ;;  %292 = vperm.xlu0 %15069, %v11198_v50   ;;  %v477_v46 = vadd.f32 %v460_v11, %v319_v31 }
 0x104   : > { %v635_v32 = vadd.f32 %v618_v12, %v477_v46 }
 0x105   : > { %v268_v49 = vpop.permute.xlu1 %267  ;;  %v263_v14 = vpop.permute.xlu0 %262 }
 0x106   : > { %1046 = vperm.xlu1 %15070, %v11284_v63   ;;  %745 = vperm.xlu0 %15069, %v11251_v48   ;;  %v476_v48 = vadd.f32 %v459_v30, %v318_v13  ;;  %v777_v31 = vadd.f32 %v760_v21, %v635_v32  ;;  %v1076_v30 = vmul.f32 %v15518_v17, %v15449_v23 }
 0x107   : > { %v1217_v23 = vmul.f32 %v15529_v25, %v15553_v22  ;;  %v1375_v32 = vmul.f32 %v15542_v37, %v1297_v56  ;;  %v307_v22 = vmul.f32 %v15456_v27, %v15484_v5  ;;  %v466_v5 = vmul.f32 %v15465_v39, %v15567_v3 }
 0x108   : > { %v634_v11 = vadd.f32 %v617_v20, %v476_v48  ;;  %v935_v61 = vadd.f32 %v918_v0, %v777_v31  ;;  %v11268_v20 = vld [vmem:[%s15271_s17 + $0xf3] ss:$2 sm:$0xff]  ;;  %v1376_v48 = vmul.f32 %v15542_v37, %v1302_v38  ;;  %v310_v31 = vmul.f32 %v15456_v27, %v268_v49 }
 0x109   : > { %v574_v50 = vpop.permute.xlu1 %573  ;;  %v569_v63 = vpop.permute.xlu0 %568  ;;  %v324_v49 = vadd.f32 %v15472_v43, %v307_v22 }
 0x10a   : > { %1336 = vperm.xlu1 %15070, %v11318_v34   ;;  %1051 = vperm.xlu0 %15069, %v11285_v35   ;;  %v776_v12 = vadd.f32 %v759_v60, %v634_v11  ;;  %v1075_v34 = vmul.f32 %v15518_v17, %v15451_v26  ;;  %v1218_v35 = vmul.f32 %v15529_v25, %v15551_v16  ;;  %v11302_v11 = vld [vmem:[%s15271_s17 + $0xe4] ss:$2 sm:$0xff] }
 0x10b   : > { %v1093_v21 = vadd.f32 %v1076_v30, %v935_v61  ;;  %v308_v16 = vmul.f32 %v15456_v27, %v15482_v51  ;;  %v309_v30 = vmul.f32 %v15456_v27, %v263_v14  ;;  %v465_v14 = vmul.f32 %v15465_v39, %v15569_v4 }
 0x10c   : > { %v934_v46 = vadd.f32 %v917_v44, %v776_v12 }
 0x10d   : > { %v15616_v13 = vpop.permute.xlu1 %863  ;;  %v15618_v45 = vpop.permute.xlu0 %858  ;;  %v1235_v0 = vadd.f32 %v1218_v35, %v1093_v21  ;;  %v325_v35 = vadd.f32 %v15472_v43, %v308_v16  ;;  %v327_v21 = vadd.f32 %v15472_v43, %v310_v31  ;;  %v482_v31 = vadd.f32 %v465_v14, %v324_v49 }
 0x10e   : > { %450 = vperm.xlu1 %15070, %v11216_v55   ;;  %1341 = vperm.xlu0 %15069, %v11319_v33   ;;  %v1092_v55 = vadd.f32 %v1075_v34, %v934_v46  ;;  %v11303_v33 = vld [vmem:[%s15271_s17 + $0xf4] ss:$2 sm:$0xff]  ;;  %v18244_v14 = vmov 0.0|0.0  }
 0x10f   : > { %v1393_v44 = vadd.f32 %v1376_v48, %v1235_v0  ;;  %v326_v48 = vadd.f32 %v15472_v43, %v309_v30  ;;  %v483_v22 = vadd.f32 %v466_v5, %v325_v35  ;;  %v11320_v35 = vld [vmem:[%s15271_s17 + $0xe5] ss:$2 sm:$0xff]  ;;  %v11287_v5 = vld [vmem:[%s15271_s17 + $0x104] ss:$2 sm:$0xff] }
 0x110   : > { %v1234_v38 = vadd.f32 %v1217_v23, %v1092_v55  ;;  %v624_v55 = vmul.f32 %v15479_v47, %v574_v50 }
 0x111   : > { %v15629_v60 = vpop.permute.xlu1 %1153  ;;  %v15631_v26 = vpop.permute.xlu0 %1148 }
 0x112   : > { %903 = vperm.xlu1 %15070, %v11269_v62   ;;  %898 = vperm.xlu0 %15069, %v11268_v20   ;;  %v1392_v34 = vadd.f32 %v1375_v32, %v1234_v38  ;;  %v11337_v62 = vld [vmem:[%s15271_s17 + $0xd6] ss:$2 sm:$0xff]  ;;  %v11336_v20 = vld [vmem:[%s15271_s17 + $0xc6] ss:$2 sm:$0xff]  ;;  %v623_v32 = vmul.f32 %v15479_v47, %v569_v63  ;;  %v641_v63 = vadd.f32 %v624_v55, %v483_v22 }
 0x113   : > { %v11286_v38 = vld [vmem:[%s15271_s17 + $0xf4] ss:$2 sm:$0xff] }
 0x115   : > { %v1460_v56 = vpop.permute.xlu1 %1459  ;;  %v1455_v12 = vpop.permute.xlu0 %1454 }
 0x116   : > { %v1534_v61 = vmul.f32 %v15559_v24, %v1460_v56  ;;  %v1533_v51 = vmul.f32 %v15559_v24, %v1455_v12  ;;  %1193 = vperm.xlu1 %15070, %v11303_v33   ;;  %1188 = vperm.xlu0 %15069, %v11302_v11  }
 0x118   : > { %v1551_v46 = vadd.f32 %v1534_v61, %v1393_v44  ;;  %v1550_v23 = vadd.f32 %v1533_v51, %v1392_v34  ;;  %v11234_v44 = vld [vmem:[%s15271_s17 + $0x102] ss:$2 sm:$0x3f]  ;;  %v640_v61 = vadd.f32 %v623_v32, %v482_v31 }
 0x119   : > { %v426_v3 = vpop.permute.xlu1 %425  ;;  %v421_v16 = vpop.permute.xlu0 %420 }
 0x11a   : > { %v1568_v0 = vmax.f32 %v1551_v46, 0.0  ;;  %v1567_v33 = vmax.f32 %v1550_v23, 0.0  ;;  %v468_v11 = vmul.f32 %v15465_v39, %v426_v3  ;;  %v467_v4 = vmul.f32 %v15465_v39, %v421_v16  ;;  %1499 = vperm.xlu1 %15070, %v11337_v62   ;;  %1494 = vperm.xlu0 %15069, %v11336_v20  }
 0x11b   : > { %v304_v3 = vmul.f32 %v15456_v27, %v15377_v28  ;;  %v303_v16 = vmul.f32 %v15456_v27, %v15379_v29  ;;  %v620_v28 = vmul.f32 %v15479_v47, %v15419_v57  ;;  %v619_v29 = vmul.f32 %v15479_v47, %v15421_v58 }
 0x11c   : > { %v485_v30 = vadd.f32 %v468_v11, %v327_v21  ;;  %v484_v50 = vadd.f32 %v467_v4, %v326_v48  ;;  %v14143_v56 = vpack.c.bf16 %v1568_v0, %v1567_v33  ;;  %v11252_v21 = vld [vmem:[%s15271_s17 + $0x112] ss:$2 sm:$0x3f]  ;;  %v11321_v48 = vld [vmem:[%s15271_s17 + $0xf5] ss:$2 sm:$0xff]  ;;  %v462_v11 = vmul.f32 %v15465_v39, %v15395_v40 }
 0x11d   : > { %v716_v12 = vpop.permute.xlu1 %715  ;;  %v711_v34 = vpop.permute.xlu0 %710  ;;  %v11305_v0 = vld [vmem:[%s15271_s17 + $0x114] ss:$2 sm:$0xff]  ;;  %v11304_v33 = vld [vmem:[%s15271_s17 + $0x104] ss:$2 sm:$0xff]  ;;  %v461_v4 = vmul.f32 %v15465_v39, %v15397_v41  ;;  %v320_v31 = vadd.f32 %v15472_v43, %v303_v16 }
 0x11e   : > { %v766_v51 = vmul.f32 %v15492_v59, %v716_v12  ;;  %v765_v62 = vmul.f32 %v15492_v59, %v711_v34  ;;  %1056 = vperm.xlu1 %15070, %v11286_v38   ;;  %608 = vperm.xlu0 %15069, %v11234_v44   ;;  %v321_v44 = vadd.f32 %v15472_v43, %v304_v3  ;;  %v11338_v40 = vld [vmem:[%s15271_s17 + $0xe6] ss:$2 sm:$0xff] }
 0x11f   : > { %14144 = vmatpush1.bf16.msra.mxu1 %v14143_v56  ;;  %v11339_v56 = vld [vmem:[%s15271_s17 + $0xf6] ss:$2 sm:$0xff]  ;;  %v478_v41 = vadd.f32 %v461_v4, %v320_v31  ;;  %v762_v12 = vmul.f32 %v15492_v59, %v15443_v15  ;;  %v761_v34 = vmul.f32 %v15492_v59, %v15445_v18  ;;  %v919_v15 = vmul.f32 %v15505_v6, %v15535_v36 }
 0x120   : > { %v15664_v20 = vadd.f32 %v766_v51, %v641_v63  ;;  %v15666_v49 = vadd.f32 %v765_v62, %v640_v61  ;;  %14145 = vmatprep.subr.bf16.mxu1 %v18244_v14  ;;  %v479_v63 = vadd.f32 %v462_v11, %v321_v44 }
 0x121   : > { %v15669_v46 = vpop.permute.xlu1 %1021  ;;  %v15671_v23 = vpop.permute.xlu0 %1016 }
 0x122   : > { %1346 = vperm.xlu1 %15070, %v11320_v35   ;;  %1061 = vperm.xlu0 %15069, %v11287_v5   ;;  %v637_v58 = vadd.f32 %v620_v28, %v479_v63  ;;  %v636_v35 = vadd.f32 %v619_v29, %v478_v41  ;;  %v920_v5 = vmul.f32 %v15505_v6, %v15533_v54  ;;  %v11323_v28 = vld [vmem:[%s15271_s17 + $0x115] ss:$2 sm:$0xff] }
 0x123   : > { %v1077_v54 = vmul.f32 %v15518_v17, %v15582_v9  ;;  %v1219_v29 = vmul.f32 %v15529_v25, %v15631_v26 }
 0x124   : > { %v779_v16 = vadd.f32 %v762_v12, %v637_v58 }
 0x125   : > { %v1312_v55 = vpop.permute.xlu1 %1311  ;;  %v1307_v32 = vpop.permute.xlu0 %1306 }
 0x126   : > { %750 = vperm.xlu1 %15070, %v11252_v21   ;;  %1351 = vperm.xlu0 %15069, %v11321_v48   ;;  %v11322_v21 = vld [vmem:[%s15271_s17 + $0x105] ss:$2 sm:$0xff]  ;;  %v937_v36 = vadd.f32 %v920_v5, %v779_v16  ;;  %v1378_v63 = vmul.f32 %v15542_v37, %v1312_v55 }
 0x127   : > { %v11270_v48 = vld [vmem:[%s15271_s17 + $0x113] ss:$2 sm:$0x3f] }
 0x129   : > { %v278_v22 = vpop.permute.xlu1 %277  ;;  %v273_v38 = vpop.permute.xlu0 %272 }
 0x12a   : > { %1203 = vperm.xlu1 %15070, %v11305_v0   ;;  %1198 = vperm.xlu0 %15069, %v11304_v33   ;;  %v778_v0 = vadd.f32 %v761_v34, %v636_v35  ;;  %v1078_v33 = vmul.f32 %v15518_v17, %v15580_v42  ;;  %v1377_v34 = vmul.f32 %v15542_v37, %v1307_v32 }
 0x12b   : > { %v311_v55 = vmul.f32 %v15456_v27, %v273_v38 }
 0x12c   : > { %v936_v42 = vadd.f32 %v919_v15, %v778_v0 }
 0x12d   : > { %v584_v61 = vpop.permute.xlu1 %583  ;;  %v579_v51 = vpop.permute.xlu0 %578 }
 0x12e   : > { %v626_v62 = vmul.f32 %v15479_v47, %v584_v61  ;;  %v625_v57 = vmul.f32 %v15479_v47, %v579_v51  ;;  %1509 = vperm.xlu1 %15070, %v11339_v56   ;;  %1504 = vperm.xlu0 %15069, %v11338_v40   ;;  %v1095_v40 = vadd.f32 %v1078_v33, %v937_v36  ;;  %v11340_v61 = vld [vmem:[%s15271_s17 + $0x106] ss:$2 sm:$0xff] }
 0x12f   : > { %v1094_v12 = vadd.f32 %v1077_v54, %v936_v42 }
 0x130   : > { %v15705_v18 = vadd.f32 %v626_v62, %v485_v30  ;;  %v15707_v3 = vadd.f32 %v625_v57, %v484_v50  ;;  %v1220_v30 = vmul.f32 %v15529_v25, %v15629_v60  ;;  %v11288_v50 = vld [vmem:[%s15271_s17 + $0x114] ss:$2 sm:$0x3f]  ;;  %v312_v62 = vmul.f32 %v15456_v27, %v278_v22 }
 0x131   : > { %v874_v11 = vpop.permute.xlu1 %873  ;;  %v869_v4 = vpop.permute.xlu0 %868  ;;  %v1236_v51 = vadd.f32 %v1219_v29, %v1094_v12  ;;  %v328_v22 = vadd.f32 %v15472_v43, %v311_v55 }
 0x132   : > { %v924_v44 = vmul.f32 %v15505_v6, %v874_v11  ;;  %v923_v31 = vmul.f32 %v15505_v6, %v869_v4  ;;  %1356 = vperm.xlu1 %15070, %v11322_v21   ;;  %908 = vperm.xlu0 %15069, %v11270_v48   ;;  %v1237_v26 = vadd.f32 %v1220_v30, %v1095_v40  ;;  %v11324_v21 = vld [vmem:[%s15271_s17 + $0x125] ss:$2 sm:$0x3f]  ;;  %v11306_v48 = vld [vmem:[%s15271_s17 + $0x124] ss:$2 sm:$0x3f] }
 0x133   : > { %v1394_v35 = vadd.f32 %v1377_v34, %v1236_v51  ;;  %v329_v0 = vadd.f32 %v15472_v43, %v312_v62  ;;  %v463_v62 = vmul.f32 %v15465_v39, %v15439_v10  ;;  %v763_v10 = vmul.f32 %v15492_v59, %v15575_v2 }
 0x134   : > { %v15722_v9 = vadd.f32 %v924_v44, %v15664_v20  ;;  %v15725_v56 = vadd.f32 %v923_v31, %v15666_v49  ;;  %v11341_v20 = vld [vmem:[%s15271_s17 + $0x116] ss:$2 sm:$0xff]  ;;  %v1395_v49 = vadd.f32 %v1378_v63, %v1237_v26  ;;  %v11342_v31 = vld [vmem:[%s15271_s17 + $0x126] ss:$2 sm:$0x3f] }
 0x135   : > { %v15728_v41 = vpop.permute.xlu1 %1163  ;;  %v15730_v60 = vpop.permute.xlu0 %1158 }
 0x136   : > { %1066 = vperm.xlu1 %15070, %v11288_v50   ;;  %1361 = vperm.xlu0 %15069, %v11323_v28  }
 0x139   : > { %v1470_v57 = vpop.permute.xlu1 %1469  ;;  %v1465_v58 = vpop.permute.xlu0 %1464 }
 0x13a   : > { %v1536_v5 = vmul.f32 %v15559_v24, %v1470_v57  ;;  %v1535_v32 = vmul.f32 %v15559_v24, %v1465_v58  ;;  %1519 = vperm.xlu1 %15070, %v11341_v20   ;;  %1514 = vperm.xlu0 %15069, %v11340_v61   ;;  %v1583_v20 = vld [vmem:[%s18240_s2 + $0x8] sm:$0xff] }
 0x13b   : > { %11345 = vmatprep.mubr.msk.f32.mxu1 %vm1608_vm0, %v1583_v20 }
 0x13c   : > { %v1553_v15 = vadd.f32 %v1536_v5, %v1395_v49  ;;  %v1552_v16 = vadd.f32 %v1535_v32, %v1394_v35  ;;  %v464_v49 = vmul.f32 %v15465_v39, %v15437_v7  ;;  %v622_v5 = vmul.f32 %v15479_v47, %v15509_v8 }
 0x13d   : > { %v436_v33 = vpop.permute.xlu1 %435  ;;  %v431_v38 = vpop.permute.xlu0 %430  ;;  %v764_v7 = vmul.f32 %v15492_v59, %v15573_v1  ;;  %v922_v8 = vmul.f32 %v15505_v6, %v15616_v13 }
 0x13e   : > { %v1570_v11 = vmax.f32 %v1553_v15, 0.0  ;;  %v1569_v4 = vmax.f32 %v1552_v16, 0.0  ;;  %v470_v54 = vmul.f32 %v15465_v39, %v436_v33  ;;  %v469_v44 = vmul.f32 %v15465_v39, %v431_v38  ;;  %1366 = vperm.xlu1 %15070, %v11324_v21   ;;  %1208 = vperm.xlu0 %15069, %v11306_v48  }
 0x140   : > { %v487_v36 = vadd.f32 %v470_v54, %v329_v0  ;;  %v486_v30 = vadd.f32 %v469_v44, %v328_v22  ;;  %v14146_v50 = vpack.c.bf16 %v1570_v11, %v1569_v4  ;;  %v1080_v54 = vmul.f32 %v15518_v17, %v15669_v46 }
 0x141   : > { %v726_v28 = vpop.permute.xlu1 %725  ;;  %v721_v42 = vpop.permute.xlu0 %720  ;;  %v1079_v44 = vmul.f32 %v15518_v17, %v15671_v23 }
 0x142   : > { %v768_v29 = vmul.f32 %v15492_v59, %v726_v28  ;;  %v767_v40 = vmul.f32 %v15492_v59, %v721_v42  ;;  %1524 = vperm.xlu0 %15069, %v11342_v31   ;;  %14147 = vmatpush1.bf16.msra.mxu1 %v14146_v50 }
 0x143   : > { %14148 = vmatprep.subr.bf16.mxu1 %v18244_v14 }
 0x144   : > { %v15750_v63 = vadd.f32 %v768_v29, %v15705_v18  ;;  %v15753_v12 = vadd.f32 %v767_v40, %v15707_v3  ;;  %v306_v18 = vmul.f32 %v15456_v27, %v15413_v52  ;;  %v305_v3 = vmul.f32 %v15456_v27, %v15415_v53 }
 0x145   : > { %v15755_v34 = vpop.permute.xlu1 %1031  ;;  %v15757_v26 = vpop.permute.xlu0 %1026  ;;  %v621_v52 = vmul.f32 %v15479_v47, %v15511_v19  ;;  %v921_v19 = vmul.f32 %v15505_v6, %v15618_v45  ;;  %v1222_v45 = vmul.f32 %v15529_v25, %v15728_v41 }
 0x146   : > { %v323_v58 = vadd.f32 %v15472_v43, %v306_v18  ;;  %v322_v35 = vadd.f32 %v15472_v43, %v305_v3 }
 0x148   : > { %v481_v32 = vadd.f32 %v464_v49, %v323_v58  ;;  %v480_v53 = vadd.f32 %v463_v62, %v322_v35 }
 0x149   : > { %v1322_v61 = vpop.permute.xlu1 %1321  ;;  %v1317_v51 = vpop.permute.xlu0 %1316 }
 0x14a   : > { %v639_v0 = vadd.f32 %v622_v5, %v481_v32  ;;  %v638_v22 = vadd.f32 %v621_v52, %v480_v53  ;;  %v1380_v29 = vmul.f32 %v15542_v37, %v1322_v61  ;;  %v1379_v40 = vmul.f32 %v15542_v37, %v1317_v51 }
 0x14c   : > { %v781_v2 = vadd.f32 %v764_v7, %v639_v0  ;;  %v780_v4 = vadd.f32 %v763_v10, %v638_v22 }
 0x14d   : > { %v288_v55 = vpop.permute.xlu1 %287  ;;  %v283_v57 = vpop.permute.xlu0 %282 }
 0x14e   : > { %v939_v13 = vadd.f32 %v922_v8, %v781_v2  ;;  %v938_v31 = vadd.f32 %v921_v19, %v780_v4  ;;  %v314_v23 = vmul.f32 %v15456_v27, %v288_v55  ;;  %v313_v18 = vmul.f32 %v15456_v27, %v283_v57 }
 0x14f   : > { %v1082_v4 = vmul.f32 %v15518_v17, %v15755_v34 }
 0x150   : > { %v1097_v28 = vadd.f32 %v1080_v54, %v939_v13  ;;  %v1096_v42 = vadd.f32 %v1079_v44, %v938_v31  ;;  %v331_v61 = vadd.f32 %v15472_v43, %v314_v23  ;;  %v330_v51 = vadd.f32 %v15472_v43, %v313_v18 }
 0x151   : > { %v594_v21 = vpop.permute.xlu1 %593  ;;  %v589_v48 = vpop.permute.xlu0 %588  ;;  %v1081_v54 = vmul.f32 %v15518_v17, %v15757_v26 }
 0x152   : > { %v628_v15 = vmul.f32 %v15479_v47, %v594_v21  ;;  %v627_v16 = vmul.f32 %v15479_v47, %v589_v48  ;;  %v1239_v46 = vadd.f32 %v1222_v45, %v1097_v28 }
 0x153   : > { %v1098_v28 = vadd.f32 %v1081_v54, %v15725_v56 }
 0x154   : > { %v15787_v33 = vadd.f32 %v628_v15, %v487_v36  ;;  %v15789_v38 = vadd.f32 %v627_v16, %v486_v30  ;;  %v1221_v36 = vmul.f32 %v15529_v25, %v15730_v60  ;;  %v1397_v41 = vadd.f32 %v1380_v29, %v1239_v46 }
 0x155   : > { %v15791_v1 = vpop.permute.xlu1 %883  ;;  %v15793_v11 = vpop.permute.xlu0 %878 }
 0x156   : > { %v1238_v20 = vadd.f32 %v1221_v36, %v1096_v42  ;;  %v1099_v36 = vadd.f32 %v1082_v4, %v15722_v9 }
 0x158   : > { %v1396_v62 = vadd.f32 %v1379_v40, %v1238_v20 }
 0x159   : > { %v1174_v30 = vpop.permute.xlu1 %1173  ;;  %v1169_v50 = vpop.permute.xlu0 %1168 }
 0x15a   : > { %v1224_v44 = vmul.f32 %v15529_v25, %v1174_v30  ;;  %v1223_v13 = vmul.f32 %v15529_v25, %v1169_v50 }
 0x15c   : > { %v1241_v40 = vadd.f32 %v1224_v44, %v1099_v36  ;;  %v1240_v46 = vadd.f32 %v1223_v13, %v1098_v28 }
 0x15d   : > { %v1480_v3 = vpop.permute.xlu1 %1479  ;;  %v1475_v49 = vpop.permute.xlu0 %1474 }
 0x15e   : > { %v1538_v60 = vmul.f32 %v15559_v24, %v1480_v3  ;;  %v1537_v58 = vmul.f32 %v15559_v24, %v1475_v49 }
 0x160   : > { %v1555_v35 = vadd.f32 %v1538_v60, %v1397_v41  ;;  %v1554_v5 = vadd.f32 %v1537_v58, %v1396_v62 }
 0x161   : > { %v446_v52 = vpop.permute.xlu1 %445  ;;  %v441_v32 = vpop.permute.xlu0 %440 }
 0x162   : > { %v1572_v53 = vmax.f32 %v1555_v35, 0.0  ;;  %v1571_v55 = vmax.f32 %v1554_v5, 0.0  ;;  %v472_v27 = vmul.f32 %v15465_v39, %v446_v52  ;;  %v471_v57 = vmul.f32 %v15465_v39, %v441_v32 }
 0x163   : > { %v926_v52 = vmul.f32 %v15505_v6, %v15791_v1  ;;  %v925_v32 = vmul.f32 %v15505_v6, %v15793_v11 }
 0x164   : > { %v15813_v21 = vadd.f32 %v472_v27, %v331_v61  ;;  %v15815_v48 = vadd.f32 %v471_v57, %v330_v51  ;;  %v14149_v7 = vpack.c.bf16 %v1572_v53, %v1571_v55 }
 0x165   : > { %v15817_v10 = vpop.permute.xlu1 %735  ;;  %v15819_v15 = vpop.permute.xlu0 %730 }
 0x166   : > { %14150 = vmatpush1.bf16.msra.mxu1 %v14149_v7  ;;  %v943_v7 = vadd.f32 %v926_v52, %v15750_v63 }
 0x167   : > { %14151 = vmatprep.subr.bf16.mxu1 %v18244_v14 }
 0x169   : > { %v1042_v43 = vpop.permute.xlu1 %1041  ;;  %v1037_v16 = vpop.permute.xlu0 %1036 }
 0x16a   : > { %v1084_v27 = vmul.f32 %v15518_v17, %v1042_v43  ;;  %v1083_v57 = vmul.f32 %v15518_v17, %v1037_v16 }
 0x16c   : > { %v1101_v44 = vadd.f32 %v1084_v27, %v943_v7 }
 0x16d   : > { %v1332_v0 = vpop.permute.xlu1 %1331  ;;  %v1327_v22 = vpop.permute.xlu0 %1326 }
 0x16e   : > { %v1382_v42 = vmul.f32 %v15542_v37, %v1332_v0  ;;  %v1381_v29 = vmul.f32 %v15542_v37, %v1327_v22  ;;  %v942_v0 = vadd.f32 %v925_v32, %v15753_v12 }
 0x170   : > { %v1399_v23 = vadd.f32 %v1382_v42, %v1241_v40  ;;  %v1398_v26 = vadd.f32 %v1381_v29, %v1240_v46  ;;  %v1100_v11 = vadd.f32 %v1083_v57, %v942_v0 }
 0x171   : > { %v15822_v8 = vpop.permute.xlu1 %603  ;;  %v15824_v19 = vpop.permute.xlu0 %598 }
 0x175   : > { %v15826_v39 = vpop.permute.xlu1 %893  ;;  %v15828_v2 = vpop.permute.xlu0 %888 }
 0x179   : > { %v1184_v31 = vpop.permute.xlu1 %1183  ;;  %v1179_v45 = vpop.permute.xlu0 %1178 }
 0x17a   : > { %v1226_v22 = vmul.f32 %v15529_v25, %v1184_v31  ;;  %v1225_v4 = vmul.f32 %v15529_v25, %v1179_v45 }
 0x17c   : > { %v1243_v28 = vadd.f32 %v1226_v22, %v1101_v44  ;;  %v1242_v43 = vadd.f32 %v1225_v4, %v1100_v11 }
 0x17d   : > { %v1490_v34 = vpop.permute.xlu1 %1489  ;;  %v1485_v20 = vpop.permute.xlu0 %1484 }
 0x17e   : > { %v1540_v30 = vmul.f32 %v15559_v24, %v1490_v34  ;;  %v1539_v50 = vmul.f32 %v15559_v24, %v1485_v20 }
 0x180   : > { %v1557_v18 = vadd.f32 %v1540_v30, %v1399_v23  ;;  %v1556_v3 = vadd.f32 %v1539_v50, %v1398_v26 }
 0x181   : > { %v15842_v49 = vpop.permute.xlu1 %740  ;;  %v15844_v9 = vpop.permute.xlu0 %292 }
 0x182   : > { %v1574_v56 = vmax.f32 %v1557_v18, 0.0  ;;  %v1573_v41 = vmax.f32 %v1556_v3, 0.0  ;;  %v770_v18 = vmul.f32 %v15492_v59, %v15817_v10  ;;  %v769_v3 = vmul.f32 %v15492_v59, %v15819_v15 }
 0x184   : > { %v14152_v62 = vpack.c.bf16 %v1574_v56, %v1573_v41  ;;  %v928_v56 = vmul.f32 %v15505_v6, %v15826_v39  ;;  %v927_v41 = vmul.f32 %v15505_v6, %v15828_v2  ;;  %v786_v52 = vadd.f32 %v769_v3, %v15789_v38 }
 0x185   : > { %v1047_v60 = vpop.permute.xlu1 %1046  ;;  %v15846_v58 = vpop.permute.xlu0 %745  ;;  %v629_v38 = vmul.f32 %v15479_v47, %v15824_v19 }
 0x186   : > { %14153 = vmatpush1.bf16.msra.mxu1 %v14152_v62  ;;  %v1085_v10 = vmul.f32 %v15518_v17, %v1047_v60  ;;  %v944_v27 = vadd.f32 %v927_v41, %v786_v52  ;;  %v630_v60 = vmul.f32 %v15479_v47, %v15822_v8  ;;  %v15215_v47 = vld [vmem:[%s18239_s1] ss:$0 sm:$0xff] }
 0x187   : > { %14154 = vmatprep.subr.bf16.mxu1 %v18244_v14  ;;  %v646_v19 = vadd.f32 %v629_v38, %v15815_v48  ;;  %v315_v8 = vmul.f32 %v15215_v47, %v15844_v9  ;;  %v15216_v48 = vld [vmem:[%s18239_s1 + $0x1] ss:$0 sm:$0xff] }
 0x188   : > { %v1102_v22 = vadd.f32 %v1085_v10, %v944_v27  ;;  %v15220_v27 = vld [vmem:[%s18239_s1 + $0x4] ss:$0 sm:$0xff] }
 0x189   : > { %v1337_v35 = vpop.permute.xlu1 %1336  ;;  %v1052_v5 = vpop.permute.xlu0 %1051 }
 0x18a   : > { %v1383_v13 = vmul.f32 %v15542_v37, %v1337_v35  ;;  %v1086_v32 = vmul.f32 %v15518_v17, %v1052_v5 }
 0x18c   : > { %v1400_v29 = vadd.f32 %v1383_v13, %v1242_v43 }
 0x18d   : > { %v15849_v61 = vpop.permute.xlu1 %450  ;;  %v1342_v51 = vpop.permute.xlu0 %1341 }
 0x18e   : > { %v1384_v36 = vmul.f32 %v15542_v37, %v1342_v51  ;;  %v787_v51 = vadd.f32 %v770_v18, %v15787_v33 }
 0x190   : > { %v1401_v63 = vadd.f32 %v1384_v36, %v1243_v28  ;;  %v945_v15 = vadd.f32 %v928_v56, %v787_v51  ;;  %v15219_v56 = vld [vmem:[%s18239_s1 + $0x3] ss:$0 sm:$0xff] }
 0x191   : > { %v15855_v53 = vpop.permute.xlu1 %903  ;;  %v15857_v55 = vpop.permute.xlu0 %898 }
 0x192   : > { %v1103_v2 = vadd.f32 %v1086_v32, %v945_v15 }
 0x195   : > { %v1194_v1 = vpop.permute.xlu1 %1193  ;;  %v1189_v54 = vpop.permute.xlu0 %1188 }
 0x196   : > { %v1228_v57 = vmul.f32 %v15529_v25, %v1194_v1  ;;  %v1227_v7 = vmul.f32 %v15529_v25, %v1189_v54  ;;  %v771_v1 = vmul.f32 %v15492_v59, %v15842_v49  ;;  %v772_v54 = vmul.f32 %v15492_v59, %v15846_v58 }
 0x197   : > { %v929_v49 = vmul.f32 %v15505_v6, %v15857_v55  ;;  %v647_v59 = vadd.f32 %v630_v60, %v15813_v21  ;;  %v930_v58 = vmul.f32 %v15505_v6, %v15855_v53  ;;  %v15217_v6 = vld [vmem:[%s18239_s1 + $0x5b0] ss:$0 sm:$0xff] }
 0x198   : > { %v1245_v5 = vadd.f32 %v1228_v57, %v1103_v2  ;;  %v1244_v44 = vadd.f32 %v1227_v7, %v1102_v22  ;;  %v332_v53 = vadd.f32 %v15217_v6, %v315_v8  ;;  %v15221_v22 = vld [vmem:[%s18239_s1 + $0x5] ss:$0 sm:$0xff] }
 0x199   : > { %v1500_v42 = vpop.permute.xlu1 %1499  ;;  %v1495_v16 = vpop.permute.xlu0 %1494  ;;  %v1590_v6 = vld [vmem:[%s18240_s2 + $0x40] sm:$0xff] }
 0x19a   : > { %v1542_v12 = vmul.f32 %v15559_v24, %v1500_v42  ;;  %v1541_v31 = vmul.f32 %v15559_v24, %v1495_v16 }
 0x19c   : > { %v1559_v40 = vadd.f32 %v1542_v12, %v1401_v63  ;;  %v1558_v45 = vadd.f32 %v1541_v31, %v1400_v29  ;;  %v788_v63 = vadd.f32 %v771_v1, %v646_v19  ;;  %v473_v12 = vmul.f32 %v15216_v48, %v15849_v61 }
 0x19d   : > { %v1057_v46 = vpop.permute.xlu1 %1056  ;;  %v609_v34 = vpop.permute.xlu0 %608 }
 0x19e   : > { %v1576_v20 = vmax.f32 %v1559_v40, 0.0  ;;  %v1575_v23 = vmax.f32 %v1558_v45, 0.0  ;;  %v1087_v31 = vmul.f32 %v15518_v17, %v1057_v46  ;;  %v789_v45 = vadd.f32 %v772_v54, %v647_v59 }
 0x1a0   : > { %v14155_v26 = vpack.c.bf16 %v1576_v20, %v1575_v23  ;;  %v946_v23 = vadd.f32 %v929_v49, %v788_v63 }
 0x1a1   : > { %v1347_v30 = vpop.permute.xlu1 %1346  ;;  %v1062_v50 = vpop.permute.xlu0 %1061 }
 0x1a2   : > { %14156 = vmatpush1.bf16.msra.mxu1 %v14155_v26  ;;  %v1385_v4 = vmul.f32 %v15542_v37, %v1347_v30  ;;  %v1088_v55 = vmul.f32 %v15518_v17, %v1062_v50  ;;  %v15218_v26 = vld [vmem:[%s18239_s1 + $0x2] ss:$0 sm:$0xff]  ;;  %v947_v30 = vadd.f32 %v930_v58, %v789_v45  ;;  %v490_v17 = vadd.f32 %v473_v12, %v332_v53  ;;  %v1593_v53 = vld [vmem:[%s18240_s2 + $0x58] sm:$0xff] }
 0x1a3   : > { %14157 = vmatprep.subr.bf16.mxu1 %v18244_v14  ;;  %v631_v61 = vmul.f32 %v15218_v26, %v609_v34  ;;  %v1104_v50 = vadd.f32 %v1087_v31, %v946_v23  ;;  %v15234_v58 = vmov 0.0   ;;  %v1582_v12 = vld [vmem:[%s18240_s2] sm:$0xff]  ;;  %v1585_v31 = vld [vmem:[%s18240_s2 + $0x18] sm:$0xff]  ;;  %v1592_v23 = vld [vmem:[%s18240_s2 + $0x50] sm:$0xff] }
 0x1a4   : > { %v1402_v36 = vadd.f32 %v1385_v4, %v1244_v44  ;;  %v1105_v10 = vadd.f32 %v1088_v55, %v947_v30  ;;  %v1586_v45 = vld [vmem:[%s18240_s2 + $0x20] sm:$0xff]  ;;  %v1589_v55 = vld [vmem:[%s18240_s2 + $0x38] sm:$0xff]  ;;  %v1595_v26 = vld [vmem:[%s18240_s2 + $0x68] sm:$0xff]  ;;  %12866 = vmatprep.mubr.msk.f32.mxu0 %vm15235_vm2, %v15234_v58 }
 0x1a5   : > { %v751_v62 = vpop.permute.xlu1 %750  ;;  %v1352_v35 = vpop.permute.xlu0 %1351  ;;  %v648_v32 = vadd.f32 %v631_v61, %v490_v17  ;;  %v1594_v61 = vld [vmem:[%s18240_s2 + $0x60] sm:$0xff]  ;;  %v1596_v30 = vld [vmem:[%s18240_s2 + $0x70] sm:$0xff]  ;;  %v1601_v17 = vld [vmem:[%s18240_s2 + $0x98] sm:$0xff] }
 0x1a6   : > { %v1386_v33 = vmul.f32 %v15542_v37, %v1352_v35  ;;  %v773_v41 = vmul.f32 %v15219_v56, %v751_v62  ;;  %v1603_v56 = vld [vmem:[%s18240_s2 + $0xa8] sm:$0xff] }
 0x1a8   : > { %v1403_v28 = vadd.f32 %v1386_v33, %v1245_v5  ;;  %v790_v7 = vadd.f32 %v773_v41, %v648_v32  ;;  %v1602_v41 = vld [vmem:[%s18240_s2 + $0xa0] sm:$0xff] }
 0x1a9   : > { %v1204_v39 = vpop.permute.xlu1 %1203  ;;  %v1199_v0 = vpop.permute.xlu0 %1198 }
 0x1aa   : > { %v1229_v46 = vmul.f32 %v15529_v25, %v1199_v0  ;;  %v1230_v18 = vmul.f32 %v15529_v25, %v1204_v39 }
 0x1ac   : > { %v1246_v15 = vadd.f32 %v1229_v46, %v1104_v50  ;;  %v1247_v25 = vadd.f32 %v1230_v18, %v1105_v10  ;;  %v1597_v46 = vld [vmem:[%s18240_s2 + $0x78] sm:$0xff]  ;;  %v1599_v18 = vld [vmem:[%s18240_s2 + $0x88] sm:$0xff]  ;;  %v1600_v50 = vld [vmem:[%s18240_s2 + $0x90] sm:$0xff] }
 0x1ad   : > { %v1510_v11 = vpop.permute.xlu1 %1509  ;;  %v1505_v13 = vpop.permute.xlu0 %1504  ;;  %v1606_v10 = vld [vmem:[%s18240_s2 + $0xc0] sm:$0xf] }
 0x1ae   : > { %v1544_v43 = vmul.f32 %v15559_v24, %v1510_v11  ;;  %v1543_v42 = vmul.f32 %v15559_v24, %v1505_v13 }
 0x1b0   : > { %v1561_v16 = vadd.f32 %v1544_v43, %v1403_v28  ;;  %v1560_v29 = vadd.f32 %v1543_v42, %v1402_v36  ;;  %v15222_v36 = vld [vmem:[%s18239_s1 + $0x6] ss:$0 sm:$0xff]  ;;  %v15223_v43 = vld [vmem:[%s18239_s1 + $0x7] ss:$0 sm:$0xff] }
 0x1b1   : > { %v1357_v9 = vpop.permute.xlu1 %1356  ;;  %v909_v40 = vpop.permute.xlu0 %908 }
 0x1b2   : > { %v1578_v21 = vmax.f32 %v1561_v16, 0.0  ;;  %v1577_v20 = vmax.f32 %v1560_v29, 0.0  ;;  %v1387_v35 = vmul.f32 %v15542_v37, %v1357_v9  ;;  %v931_v57 = vmul.f32 %v15220_v27, %v909_v40  ;;  %v1811_v16 = vld [vmem:[%s18239_s1 + $0x10] sm:$0xff]  ;;  %v1812_v29 = vld [vmem:[%s18239_s1 + $0x18] sm:$0xff]  ;;  %v1587_v40 = vld [vmem:[%s18240_s2 + $0x28] sm:$0xff] }
 0x1b3   : > { %v1584_v9 = vld [vmem:[%s18240_s2 + $0x10] sm:$0xff]  ;;  %v1933_v27 = vld [vmem:[%s18239_s1 + $0x20] sm:$0xff] }
 0x1b4   : > { %v14158_v3 = vpack.c.bf16 %v1578_v21, %v1577_v20  ;;  %v1404_v62 = vadd.f32 %v1387_v35, %v1246_v15  ;;  %v948_v38 = vadd.f32 %v931_v57, %v790_v7  ;;  %v1588_v21 = vld [vmem:[%s18240_s2 + $0x30] sm:$0xff]  ;;  %v1591_v20 = vld [vmem:[%s18240_s2 + $0x48] sm:$0xff]  ;;  %v1605_v35 = vld [vmem:[%s18240_s2 + $0xb8] sm:$0xff] }
 0x1b5   : > { %v1067_v51 = vpop.permute.xlu1 %1066  ;;  %v1362_v52 = vpop.permute.xlu0 %1361  ;;  %v1934_v57 = vld [vmem:[%s18239_s1 + $0x28] sm:$0xff] }
 0x1b6   : > { %v1388_v34 = vmul.f32 %v15542_v37, %v1362_v52  ;;  %14159 = vmatpush1.bf16.msra.mxu1 %v14158_v3  ;;  %v1089_v37 = vmul.f32 %v15221_v22, %v1067_v51  ;;  %v1598_v3 = vld [vmem:[%s18240_s2 + $0x80] sm:$0xff]  ;;  %v1604_v51 = vld [vmem:[%s18240_s2 + $0xb0] sm:$0xff]  ;;  %v1607_v52 = vld [vmem:[%s18240_s2 + $0xc8] sm:$0xf] }
 0x1b7   : > { %14160 = vmatprep.subr.bf16.mxu1 %v18244_v14 }
 0x1b8   : > { %v1405_v2 = vadd.f32 %v1388_v34, %v1247_v25  ;;  %v1106_v54 = vadd.f32 %v1089_v37, %v948_v38 }
 0x1b9   : > { %v1520_v39 = vpop.permute.xlu1 %1519  ;;  %v1515_v0 = vpop.permute.xlu0 %1514 }
 0x1ba   : > { %v1546_v4 = vmul.f32 %v15559_v24, %v1520_v39  ;;  %v1545_v33 = vmul.f32 %v15559_v24, %v1515_v0  ;;  %v14167_v39 = vpack.c.bf16 %v1934_v57, %v1933_v27  ;;  %v2544_v27 = vld [vmem:[%s18239_s1 + $0x78] sm:$0xff] }
 0x1bc   : > { %v1563_v60 = vadd.f32 %v1546_v4, %v1405_v2  ;;  %v1562_v5 = vadd.f32 %v1545_v33, %v1404_v62 }
 0x1bd   : > { %v1367_v44 = vpop.permute.xlu1 %1366  ;;  %v1209_v1 = vpop.permute.xlu0 %1208 }
 0x1be   : > { %v1580_v11 = vmax.f32 %v1563_v60, 0.0  ;;  %v1579_v13 = vmax.f32 %v1562_v5, 0.0  ;;  %v1231_v28 = vmul.f32 %v15222_v36, %v1209_v1  ;;  %v1389_v42 = vmul.f32 %v15223_v43, %v1367_v44 }
 0x1c0   : > { %v1248_v19 = vadd.f32 %v1231_v28, %v1106_v54  ;;  %v14161_v47 = vpack.c.bf16 %v1580_v11, %v1579_v13 }
 0x1c1   : > { %v1525_v8 = vpop.permute.xlu0 %1524 }
 0x1c2   : > { %v1406_v49 = vadd.f32 %v1389_v42, %v1248_v19  ;;  %v1547_v59 = vmul.f32 %v15559_v24, %v1525_v8  ;;  %14162 = vmatpush1.bf16.msra.mxu1 %v14161_v47  ;;  %v14164_v24 = vpack.c.bf16 %v1812_v29, %v1811_v16  ;;  %v2055_v19 = vld [vmem:[%s18239_s1 + $0x30] sm:$0xff]  ;;  %v2056_v47 = vld [vmem:[%s18239_s1 + $0x38] sm:$0xff] }
 0x1c3   : > { %1684 = vmatprep.subr.mxu1 %v15234_v58 }
 0x1c4   : > { %v1564_v63 = vadd.f32 %v1547_v59, %v1406_v49  ;;  %v14170_v59 = vpack.c.bf16 %v2056_v47, %v2055_v19 }
 0x1c6   : > { %v1581_v48 = vmax.f32 %v1564_v63, 0.0 }
 0x1c8   : > { %11344 = vmatpush1.msk.msra.mxu1 %vm1648_vm1, %v1581_v48 }
 0x1c9   : > { %1717 = vmatmul.mubr.f32.vlgmr.msra.gmra.mrb[0].mxu1 %v1582_v12  ;;  %14163 = vmatprep.subr.bf16.mxu1 %v18244_v14 }
 0x1ca   : > { %11346 = vmatprep.mubr.msk.f32.mxu1 %vm1608_vm0, %v1585_v31  ;;  %14165 = vmatpush3.bf16.msra.mxu1 %v14164_v24 }
 0x1cb   : > { %14166 = vmatprep.subr.bf16.mxu1 %v18244_v14 }
 0x1cd   : > { %1722 = vmatmul.mubr.f32.gmra.mrb[2].mxu1 %v1584_v9  ;;  %v2177_v9 = vld [vmem:[%s18239_s1 + $0x40] sm:$0xff] }
 0x1ce   : > { %11347 = vmatprep.mubr.msk.f32.mxu1 %vm1608_vm0, %v1587_v40  ;;  %v2178_v40 = vld [vmem:[%s18239_s1 + $0x48] sm:$0xff] }
 0x1d1   : > { %1727 = vmatmul.mubr.f32.gmra.mrb[4].mxu1 %v1586_v45 }
 0x1d2   : > { %11348 = vmatprep.mubr.msk.f32.mxu1 %vm1608_vm0, %v1589_v55  ;;  %v14173_v55 = vpack.c.bf16 %v2178_v40, %v2177_v9 }
 0x1d5   : > { %1732 = vmatmul.mubr.f32.gmra.mrb[6].mxu1 %v1588_v21 }
 0x1d6   : > { %11349 = vmatprep.mubr.msk.f32.mxu1 %vm1608_vm0, %v1591_v20 }
 0x1d9   : > { %1737 = vmatmul.mubr.f32.gmra.mrb[8].mxu1 %v1590_v6 }
 0x1da   : > { %11350 = vmatprep.mubr.msk.f32.mxu1 %vm1608_vm0, %v1593_v53 }
 0x1dd   : > { %1742 = vmatmul.mubr.f32.gmra.mrb[10].mxu1 %v1592_v23  ;;  %v2299_v23 = vld [vmem:[%s18239_s1 + $0x50] sm:$0xff] }
 0x1de   : > { %11351 = vmatprep.mubr.msk.f32.mxu1 %vm1608_vm0, %v1595_v26  ;;  %v2300_v26 = vld [vmem:[%s18239_s1 + $0x58] sm:$0xff] }
 0x1e1   : > { %1747 = vmatmul.mubr.f32.gmra.mrb[12].mxu1 %v1594_v61 }
 0x1e2   : > { %11352 = vmatprep.mubr.msk.f32.mxu1 %vm1608_vm0, %v1597_v46  ;;  %v14176_v46 = vpack.c.bf16 %v2300_v26, %v2299_v23 }
 0x1e5   : > { %1752 = vmatmul.mubr.f32.gmra.mrb[14].mxu1 %v1596_v30 }
 0x1e6   : > { %11353 = vmatprep.mubr.msk.f32.mxu1 %vm1608_vm0, %v1599_v18 }
 0x1e9   : > { %1757 = vmatmul.mubr.f32.gmra.mrb[16].mxu1 %v1598_v3 }
 0x1ea   : > { %11354 = vmatprep.mubr.msk.f32.mxu1 %vm1608_vm0, %v1601_v17 }
 0x1ed   : > { %1762 = vmatmul.mubr.f32.gmra.mrb[18].mxu1 %v1600_v50 }
 0x1ee   : > { %11355 = vmatprep.mubr.msk.f32.mxu1 %vm1608_vm0, %v1603_v56 }
 0x1f1   : > { %1767 = vmatmul.mubr.f32.gmra.mrb[20].mxu1 %v1602_v41  ;;  %v2421_v41 = vld [vmem:[%s18239_s1 + $0x60] sm:$0xff] }
 0x1f2   : > { %11356 = vmatprep.mubr.msk.f32.mxu1 %vm1608_vm0, %v1605_v35  ;;  %v2422_v35 = vld [vmem:[%s18239_s1 + $0x68] sm:$0xff] }
 0x1f5   : > { %1772 = vmatmul.mubr.f32.gmra.mrb[22].mxu1 %v1604_v51 }
 0x1f6   : > { %11357 = vmatprep.mubr.msk.f32.mxu1 %vm1608_vm0, %v1607_v52  ;;  %v14179_v52 = vpack.c.bf16 %v2422_v35, %v2421_v41  ;;  %v2905_v41 = vld [vmem:[%s18240_s2 + $0xe0] sm:$0xff]  ;;  %v2906_v35 = vld [vmem:[%s18240_s2 + $0xf0] sm:$0xff]  ;;  %vm11082_vm0 = vcmask 7168  }
 0x1f9   : > { %1777 = vmatmul.mubr.f32.gmra.mrb[24].mxu1 %v1606_v10 }
 0x1fa   : > { %12689 = vmatprep.mubr.msk.f32.mxu1 %vm15235_vm2, %v15234_v58 }
 0x29c   : > { %v1718_v34 = vpop.f32.mrb[0].mxu1 }
 0x29d   : > { %1783 = vst.msk [vmem:[#allocation2] sm:$0xff] %vm1782_vm3, %v1718_v34  ;;  %v1720_v32 = vpop.f32.mrb[1].mxu1 }
 0x2a0   : > { %v1723_v15 = vpop.f32.mrb[2].mxu1 }
 0x2a1   : > { %1784 = vst.msk [vmem:[#allocation2 + $0x8] sm:$0xff] %vm1782_vm3, %v1723_v15  ;;  %v1725_v25 = vpop.f32.mrb[3].mxu1 }
 0x2a2   : > { %v2543_v25 = vld [vmem:[%s18239_s1 + $0x70] sm:$0xff] }
 0x2a4   : > { %v1728_v7 = vpop.f32.mrb[4].mxu1 }
 0x2a5   : > { %1785 = vst.msk [vmem:[#allocation2 + $0x10] sm:$0xff] %vm1782_vm3, %v1728_v7  ;;  %v1730_v62 = vpop.f32.mrb[5].mxu1  ;;  %v14182_v7 = vpack.c.bf16 %v2544_v27, %v2543_v25  ;;  %v3035_v25 = vld [vmem:[%s18239_s1 + $0xb8] sm:$0xff] }
 0x2a8   : > { %v1733_v0 = vpop.f32.mrb[6].mxu1  ;;  %v1802_v22 = vld [vmem:[#allocation2] ss:$2 sm:$0xff]  ;;  %v1924_v29 = vld [vmem:[#allocation2 + $0x1] ss:$2 sm:$0xff] }
 0x2a9   : > { %1786 = vst.msk [vmem:[#allocation2 + $0x18] sm:$0xff] %vm1782_vm3, %v1733_v0  ;;  %v1735_v37 = vpop.f32.mrb[7].mxu1  ;;  %12690 = vmatmul.mubr.msk.f32.vlgmr.msra.gmra.mrb[26].mxu1 %vm1782_vm3, %v1802_v22 }
 0x2aa   : > { %12692 = vmatprep.mubr.msk.f32.mxu1 %vm15235_vm2, %v15234_v58  ;;  %14168 = vmatpush3.bf16.msra.mxu1 %v14167_v39  ;;  %v2665_v37 = vld [vmem:[%s18239_s1 + $0x80] sm:$0xff] }
 0x2ab   : > { %14169 = vmatprep.subr.bf16.mxu1 %v18244_v14 }
 0x2ac   : > { %v1738_v2 = vpop.f32.mrb[8].mxu1  ;;  %v2046_v21 = vld [vmem:[#allocation2 + $0x2] ss:$2 sm:$0xff] }
 0x2ad   : > { %1787 = vst.msk [vmem:[#allocation2 + $0x20] sm:$0xff] %vm1782_vm3, %v1738_v2  ;;  %v1740_v4 = vpop.f32.mrb[9].mxu1  ;;  %v2666_v2 = vld [vmem:[%s18239_s1 + $0x88] sm:$0xff] }
 0x2b0   : > { %v1743_v33 = vpop.f32.mrb[10].mxu1  ;;  %v1804_v38 = vld [vmem:[#allocation2 + $0x10] ss:$2 sm:$0xff]  ;;  %v1926_v12 = vld [vmem:[#allocation2 + $0x11] ss:$2 sm:$0xff] }
 0x2b1   : > { %1788 = vst.msk [vmem:[#allocation2 + $0x28] sm:$0xff] %vm1782_vm3, %v1743_v33  ;;  %v1745_v60 = vpop.f32.mrb[11].mxu1  ;;  %12693 = vmatmul.mubr.msk.f32.gmra.mrb[28].mxu1 %vm1782_vm3, %v1804_v38  ;;  %v2168_v30 = vld [vmem:[#allocation2 + $0xa] ss:$2 sm:$0xff]  ;;  %v2290_v10 = vld [vmem:[#allocation2 + $0xb] ss:$2 sm:$0xff]  ;;  %v14185_v33 = vpack.c.bf16 %v2666_v2, %v2665_v37 }
 0x2b2   : > { %12695 = vmatprep.mubr.msk.f32.mxu1 %vm15235_vm2, %v15234_v58  ;;  %v2412_v62 = vld [vmem:[#allocation2 + $0xc] ss:$2 sm:$0xff] }
 0x2b4   : > { %v1748_v5 = vpop.f32.mrb[12].mxu1  ;;  %v2048_v20 = vld [vmem:[#allocation2 + $0x12] ss:$2 sm:$0xff] }
 0x2b5   : > { %1789 = vst.msk [vmem:[#allocation2 + $0x30] sm:$0xff] %vm1782_vm3, %v1748_v5  ;;  %v1750_v44 = vpop.f32.mrb[13].mxu1  ;;  %v2534_v38 = vld [vmem:[#allocation2 + $0x14] ss:$2 sm:$0xff] }
 0x2b6   : > { %v2778_v47 = vld [vmem:[#allocation2 + $0x16] ss:$2 sm:$0xff] }
 0x2b8   : > { %v1753_v1 = vpop.f32.mrb[14].mxu1  ;;  %v1806_v54 = vld [vmem:[#allocation2 + $0x20] ss:$2 sm:$0xff]  ;;  %v1928_v24 = vld [vmem:[#allocation2 + $0x21] ss:$2 sm:$0xff] }
 0x2b9   : > { %1790 = vst.msk [vmem:[#allocation2 + $0x38] sm:$0xff] %vm1782_vm3, %v1753_v1  ;;  %v1755_v11 = vpop.f32.mrb[15].mxu1  ;;  %12696 = vmatmul.mubr.msk.f32.gmra.mrb[30].mxu1 %vm1782_vm3, %v1806_v54  ;;  %v2170_v18 = vld [vmem:[#allocation2 + $0x1a] ss:$2 sm:$0xff]  ;;  %v2292_v34 = vld [vmem:[#allocation2 + $0x1b] ss:$2 sm:$0xff] }
 0x2ba   : > { %12698 = vmatprep.mubr.msk.f32.mxu1 %vm15235_vm2, %v15234_v58  ;;  %v2414_v39 = vld [vmem:[#allocation2 + $0x1c] ss:$2 sm:$0xff]  ;;  %v2787_v1 = vld [vmem:[%s18239_s1 + $0x90] sm:$0xff] }
 0x2bb   : > { %v2788_v54 = vld [vmem:[%s18239_s1 + $0x98] sm:$0xff] }
 0x2bc   : > { %v1758_v13 = vpop.f32.mrb[16].mxu1  ;;  %v2050_v6 = vld [vmem:[#allocation2 + $0x22] ss:$2 sm:$0xff] }
 0x2bd   : > { %1791 = vst.msk [vmem:[#allocation2 + $0x40] sm:$0xff] %vm1782_vm3, %v1758_v13  ;;  %v1760_v36 = vpop.f32.mrb[17].mxu1  ;;  %v2536_v60 = vld [vmem:[#allocation2 + $0x24] ss:$2 sm:$0xff]  ;;  %v14188_v13 = vpack.c.bf16 %v2788_v54, %v2787_v1 }
 0x2be   : > { %v2656_v36 = vld [vmem:[#allocation2 + $0x15] ss:$2 sm:$0xff] }
 0x2bf   : > { %v3192_v54 = vld [vmem:[%s18239_s1 + $0xe0] sm:$0xff] }
 0x2c0   : > { %v1763_v28 = vpop.f32.mrb[18].mxu1  ;;  %v1808_v43 = vld [vmem:[#allocation2 + $0x30] ss:$2 sm:$0xff]  ;;  %v1930_v31 = vld [vmem:[#allocation2 + $0x31] ss:$2 sm:$0xff] }
 0x2c1   : > { %1792 = vst.msk [vmem:[#allocation2 + $0x48] sm:$0xff] %vm1782_vm3, %v1763_v28  ;;  %12699 = vmatmul.mubr.msk.f32.gmra.mrb[32].mxu1 %vm1782_vm3, %v1808_v43  ;;  %v1765_v42 = vpop.f32.mrb[19].mxu1  ;;  %v2172_v3 = vld [vmem:[#allocation2 + $0x2a] ss:$2 sm:$0xff]  ;;  %v2294_v32 = vld [vmem:[#allocation2 + $0x2b] ss:$2 sm:$0xff] }
 0x2c2   : > { %12701 = vmatprep.mubr.msk.f32.mxu1 %vm15235_vm2, %v15234_v58  ;;  %v2416_v0 = vld [vmem:[#allocation2 + $0x2c] ss:$2 sm:$0xff]  ;;  %v2658_v28 = vld [vmem:[#allocation2 + $0x25] ss:$2 sm:$0xff] }
 0x2c4   : > { %v1768_v8 = vpop.f32.mrb[20].mxu1  ;;  %v1810_v49 = vld [vmem:[#allocation2 + $0x40] ss:$2 sm:$0x3]  ;;  %v2660_v43 = vld [vmem:[#allocation2 + $0x35] ss:$2 sm:$0xff] }
 0x2c5   : > { %1793 = vst.msk [vmem:[#allocation2 + $0x50] sm:$0xff] %vm1782_vm3, %v1768_v8  ;;  %12702 = vmatmul.mubr.msk.f32.gmra.mrb[34].mxu1 %vm1782_vm3, %v1810_v49  ;;  %v1770_v16 = vpop.f32.mrb[21].mxu1  ;;  %v1932_v45 = vld [vmem:[#allocation2 + $0x41] ss:$2 sm:$0x3] }
 0x2c6   : > { %12708 = vmatprep.mubr.msk.f32.mxu1 %vm15235_vm2, %v15234_v58  ;;  %v2052_v53 = vld [vmem:[#allocation2 + $0x32] ss:$2 sm:$0xff]  ;;  %v2054_v61 = vld [vmem:[#allocation2 + $0x42] ss:$2 sm:$0x3] }
 0x2c7   : > { %v2538_v5 = vld [vmem:[#allocation2 + $0x34] ss:$2 sm:$0xff] }
 0x2c8   : > { %v1773_v63 = vpop.f32.mrb[22].mxu1  ;;  %v2174_v56 = vld [vmem:[#allocation2 + $0x3a] ss:$2 sm:$0xff]  ;;  %v2176_v51 = vld [vmem:[#allocation2 + $0x4a] ss:$2 sm:$0x3] }
 0x2c9   : > { %12709 = vmatmul.mubr.msk.f32.vlgmr.msra.gmra.mrb[26].mxu1 %vm1782_vm3, %v1924_v29  ;;  %1794 = vst.msk [vmem:[#allocation2 + $0x58] sm:$0xff] %vm1782_vm3, %v1773_v63  ;;  %v1775_v48 = vpop.f32.mrb[23].mxu1  ;;  %v2296_v15 = vld [vmem:[#allocation2 + $0x3b] ss:$2 sm:$0xff]  ;;  %v2418_v22 = vld [vmem:[#allocation2 + $0x3c] ss:$2 sm:$0xff] }
 0x2ca   : > { %12711 = vmatprep.mubr.msk.f32.mxu1 %vm15235_vm2, %v15234_v58  ;;  %14171 = vmatpush3.bf16.msra.mxu1 %v14170_v59  ;;  %v2298_v57 = vld [vmem:[#allocation2 + $0x4b] ss:$2 sm:$0x3]  ;;  %v2420_v4 = vld [vmem:[#allocation2 + $0x4c] ss:$2 sm:$0x3] }
 0x2cb   : > { %14172 = vmatprep.subr.bf16.mxu1 %v18244_v14  ;;  %v2780_v8 = vld [vmem:[#allocation2 + $0x26] ss:$2 sm:$0xff]  ;;  %v2782_v49 = vld [vmem:[#allocation2 + $0x36] ss:$2 sm:$0xff]  ;;  %v11358_v29 = vld [vmem:[%s18239_s1 + $0x5b1] ss:$0 sm:$0xff] }
 0x2cc   : > { %v1778_v17 = vpop.f32.mrb[24].mxu1  ;;  %v2540_v44 = vld [vmem:[#allocation2 + $0x44] ss:$2 sm:$0xff]  ;;  %v2542_v11 = vld [vmem:[#allocation2 + $0x54] ss:$2 sm:$0x3] }
 0x2cd   : > { %12712 = vmatmul.mubr.msk.f32.gmra.mrb[28].mxu1 %vm1782_vm3, %v1926_v12  ;;  %v1780_v50 = vpop.f32.mrb[25].mxu1  ;;  %v2662_v42 = vld [vmem:[#allocation2 + $0x45] ss:$2 sm:$0xff]  ;;  %v2664_v19 = vld [vmem:[#allocation2 + $0x55] ss:$2 sm:$0x3] }
 0x2ce   : > { %12714 = vmatprep.mubr.msk.f32.mxu1 %vm15235_vm2, %v15234_v58  ;;  %v2784_v59 = vld [vmem:[#allocation2 + $0x46] ss:$2 sm:$0xff] }
 0x2d0   : > { %v2786_v16 = vld [vmem:[#allocation2 + $0x56] ss:$2 sm:$0x3] }
 0x2d1   : > { %12715 = vmatmul.mubr.msk.f32.gmra.mrb[30].mxu1 %vm1782_vm3, %v1928_v24 }
 0x2d2   : > { %12717 = vmatprep.mubr.msk.f32.mxu1 %vm15235_vm2, %v15234_v58 }
 0x2d5   : > { %12718 = vmatmul.mubr.msk.f32.gmra.mrb[32].mxu1 %vm1782_vm3, %v1930_v31 }
 0x2d6   : > { %12720 = vmatprep.mubr.msk.f32.mxu1 %vm15235_vm2, %v15234_v58 }
 0x2d9   : > { %12721 = vmatmul.mubr.msk.f32.gmra.mrb[34].mxu1 %vm1782_vm3, %v1932_v45 }
 0x2da   : > { %12727 = vmatprep.mubr.msk.f32.mxu1 %vm15235_vm2, %v15234_v58 }
 0x2dd   : > { %12728 = vmatmul.mubr.msk.f32.vlgmr.msra.gmra.mrb[26].mxu1 %vm1782_vm3, %v2046_v21 }
 0x2de   : > { %12730 = vmatprep.mubr.msk.f32.mxu1 %vm15235_vm2, %v15234_v58  ;;  %14174 = vmatpush3.bf16.msra.mxu1 %v14173_v55 }
 0x2df   : > { %14175 = vmatprep.subr.bf16.mxu1 %v18244_v14 }
 0x2e1   : > { %12731 = vmatmul.mubr.msk.f32.gmra.mrb[28].mxu1 %vm1782_vm3, %v2048_v20 }
 0x2e2   : > { %12733 = vmatprep.mubr.msk.f32.mxu1 %vm15235_vm2, %v15234_v58 }
 0x2e5   : > { %12734 = vmatmul.mubr.msk.f32.gmra.mrb[30].mxu1 %vm1782_vm3, %v2050_v6 }
 0x2e6   : > { %12736 = vmatprep.mubr.msk.f32.mxu1 %vm15235_vm2, %v15234_v58 }
 0x2e9   : > { %12737 = vmatmul.mubr.msk.f32.gmra.mrb[32].mxu1 %vm1782_vm3, %v2052_v53 }
 0x2ea   : > { %12739 = vmatprep.mubr.msk.f32.mxu1 %vm15235_vm2, %v15234_v58 }
 0x2ed   : > { %12740 = vmatmul.mubr.msk.f32.gmra.mrb[34].mxu1 %vm1782_vm3, %v2054_v61 }
 0x2ee   : > { %12746 = vmatprep.mubr.msk.f32.mxu1 %vm15235_vm2, %v15234_v58 }
 0x2f1   : > { %12747 = vmatmul.mubr.msk.f32.vlgmr.msra.gmra.mrb[26].mxu1 %vm1782_vm3, %v2168_v30 }
 0x2f2   : > { %12749 = vmatprep.mubr.msk.f32.mxu1 %vm15235_vm2, %v15234_v58  ;;  %14177 = vmatpush3.bf16.msra.mxu1 %v14176_v46 }
 0x2f3   : > { %14178 = vmatprep.subr.bf16.mxu1 %v18244_v14 }
 0x2f5   : > { %12750 = vmatmul.mubr.msk.f32.gmra.mrb[28].mxu1 %vm1782_vm3, %v2170_v18 }
 0x2f6   : > { %12752 = vmatprep.mubr.msk.f32.mxu1 %vm15235_vm2, %v15234_v58 }
 0x2f9   : > { %12753 = vmatmul.mubr.msk.f32.gmra.mrb[30].mxu1 %vm1782_vm3, %v2172_v3 }
 0x2fa   : > { %12755 = vmatprep.mubr.msk.f32.mxu1 %vm15235_vm2, %v15234_v58 }
 0x2fd   : > { %12756 = vmatmul.mubr.msk.f32.gmra.mrb[32].mxu1 %vm1782_vm3, %v2174_v56  ;;  %v2904_v56 = vld [vmem:[%s18240_s2 + $0xd0] sm:$0xff] }
 0x2fe   : > { %12758 = vmatprep.mubr.msk.f32.mxu1 %vm15235_vm2, %v15234_v58 }
 0x301   : > { %12759 = vmatmul.mubr.msk.f32.gmra.mrb[34].mxu1 %vm1782_vm3, %v2176_v51  ;;  %v2907_v51 = vld [vmem:[%s18240_s2 + $0x100] sm:$0xff] }
 0x302   : > { %12765 = vmatprep.mubr.msk.f32.mxu1 %vm15235_vm2, %v15234_v58 }
 0x305   : > { %12766 = vmatmul.mubr.msk.f32.vlgmr.msra.gmra.mrb[26].mxu1 %vm1782_vm3, %v2290_v10  ;;  %v3033_v10 = vld [vmem:[%s18239_s1 + $0xa8] sm:$0xff] }
 0x306   : > { %12768 = vmatprep.mubr.msk.f32.mxu1 %vm15235_vm2, %v15234_v58  ;;  %14180 = vmatpush3.bf16.msra.mxu1 %v14179_v52  ;;  %v3032_v52 = vld [vmem:[%s18239_s1 + $0xa0] sm:$0xff] }
 0x307   : > { %14181 = vmatprep.subr.bf16.mxu1 %v18244_v14 }
 0x309   : > { %12769 = vmatmul.mubr.msk.f32.gmra.mrb[28].mxu1 %vm1782_vm3, %v2292_v34  ;;  %v14197_v34 = vpack.c.bf16 %v3033_v10, %v3032_v52 }
 0x30a   : > { %12771 = vmatprep.mubr.msk.f32.mxu1 %vm15235_vm2, %v15234_v58 }
 0x30d   : > { %12772 = vmatmul.mubr.msk.f32.gmra.mrb[30].mxu1 %vm1782_vm3, %v2294_v32  ;;  %v2908_v32 = vld [vmem:[%s18240_s2 + $0x110] sm:$0xf] }
 0x30e   : > { %12774 = vmatprep.mubr.msk.f32.mxu1 %vm15235_vm2, %v15234_v58 }
 0x311   : > { %12775 = vmatmul.mubr.msk.f32.gmra.mrb[32].mxu1 %vm1782_vm3, %v2296_v15  ;;  %v3034_v15 = vld [vmem:[%s18239_s1 + $0xb0] sm:$0xff] }
 0x312   : > { %12777 = vmatprep.mubr.msk.f32.mxu1 %vm15235_vm2, %v15234_v58  ;;  %v14200_v27 = vpack.c.bf16 %v3035_v25, %v3034_v15  ;;  %v3674_v25 = vld [vmem:[%s18239_s1 + $0x1b0] sm:$0xff] }
 0x315   : > { %12778 = vmatmul.mubr.msk.f32.gmra.mrb[34].mxu1 %vm1782_vm3, %v2298_v57 }
 0x316   : > { %12784 = vmatprep.mubr.msk.f32.mxu1 %vm15235_vm2, %v15234_v58 }
 0x319   : > { %12785 = vmatmul.mubr.msk.f32.vlgmr.msra.gmra.mrb[26].mxu1 %vm1782_vm3, %v2412_v62 }
 0x31a   : > { %12787 = vmatprep.mubr.msk.f32.mxu1 %vm15235_vm2, %v15234_v58  ;;  %14183 = vmatpush3.bf16.msra.mxu1 %v14182_v7 }
 0x31b   : > { %14184 = vmatprep.subr.bf16.mxu1 %v18244_v14 }
 0x31d   : > { %12788 = vmatmul.mubr.msk.f32.gmra.mrb[28].mxu1 %vm1782_vm3, %v2414_v39 }
 0x31e   : > { %12790 = vmatprep.mubr.msk.f32.mxu1 %vm15235_vm2, %v15234_v58 }
 0x321   : > { %12791 = vmatmul.mubr.msk.f32.gmra.mrb[30].mxu1 %vm1782_vm3, %v2416_v0  ;;  %v3112_v0 = vld [vmem:[%s18239_s1 + $0xc0] sm:$0xff] }
 0x322   : > { %12793 = vmatprep.mubr.msk.f32.mxu1 %vm15235_vm2, %v15234_v58 }
 0x325   : > { %12794 = vmatmul.mubr.msk.f32.gmra.mrb[32].mxu1 %vm1782_vm3, %v2418_v22  ;;  %v3113_v22 = vld [vmem:[%s18239_s1 + $0xc8] sm:$0xff] }
 0x326   : > { %12796 = vmatprep.mubr.msk.f32.mxu1 %vm15235_vm2, %v15234_v58 }
 0x329   : > { %12797 = vmatmul.mubr.msk.f32.gmra.mrb[34].mxu1 %vm1782_vm3, %v2420_v4  ;;  %v14203_v4 = vpack.c.bf16 %v3113_v22, %v3112_v0  ;;  %v3877_v22 = vld [vmem:[%s18239_s1 + $0x1c0] sm:$0xff] }
 0x32a   : > { %12803 = vmatprep.mubr.msk.f32.mxu1 %vm15235_vm2, %v15234_v58 }
 0x32d   : > { %12804 = vmatmul.mubr.msk.f32.vlgmr.msra.gmra.mrb[26].mxu1 %vm1782_vm3, %v2534_v38  ;;  %v3115_v38 = vld [vmem:[%s18239_s1 + $0xd8] sm:$0xff] }
 0x32e   : > { %12806 = vmatprep.mubr.msk.f32.mxu1 %vm15235_vm2, %v15234_v58  ;;  %14186 = vmatpush3.bf16.msra.mxu1 %v14185_v33  ;;  %v3114_v33 = vld [vmem:[%s18239_s1 + $0xd0] sm:$0xff] }
 0x32f   : > { %14187 = vmatprep.subr.bf16.mxu1 %v18244_v14  ;;  %v14206_v1 = vpack.c.bf16 %v3115_v38, %v3114_v33  ;;  %v3880_v33 = vld [vmem:[%s18239_s1 + $0x1d8] sm:$0xff] }
 0x331   : > { %12807 = vmatmul.mubr.msk.f32.gmra.mrb[28].mxu1 %vm1782_vm3, %v2536_v60 }
 0x332   : > { %12809 = vmatprep.mubr.msk.f32.mxu1 %vm15235_vm2, %v15234_v58 }
 0x335   : > { %12810 = vmatmul.mubr.msk.f32.gmra.mrb[30].mxu1 %vm1782_vm3, %v2538_v5 }
 0x336   : > { %12812 = vmatprep.mubr.msk.f32.mxu1 %vm15235_vm2, %v15234_v58 }
 0x339   : > { %12813 = vmatmul.mubr.msk.f32.gmra.mrb[32].mxu1 %vm1782_vm3, %v2540_v44 }
 0x33a   : > { %12815 = vmatprep.mubr.msk.f32.mxu1 %vm15235_vm2, %v15234_v58 }
 0x33d   : > { %12816 = vmatmul.mubr.msk.f32.gmra.mrb[34].mxu1 %vm1782_vm3, %v2542_v11  ;;  %v3193_v11 = vld [vmem:[%s18239_s1 + $0xe8] sm:$0xff] }
 0x33e   : > { %12822 = vmatprep.mubr.msk.f32.mxu1 %vm15235_vm2, %v15234_v58 }
 0x341   : > { %12823 = vmatmul.mubr.msk.f32.vlgmr.msra.gmra.mrb[26].mxu1 %vm1782_vm3, %v2656_v36  ;;  %v3194_v36 = vld [vmem:[%s18239_s1 + $0xf0] sm:$0xff] }
 0x342   : > { %12825 = vmatprep.mubr.msk.f32.mxu1 %vm15235_vm2, %v15234_v58  ;;  %14189 = vmatpush3.bf16.msra.mxu1 %v14188_v13  ;;  %v14209_v13 = vpack.c.bf16 %v3193_v11, %v3192_v54  ;;  %v3751_v11 = vld [vmem:[%s18240_s2 + $0x120] sm:$0xff] }
 0x343   : > { %14250 = vmatprep.subr.bf16.mxu1 %v18244_v14 }
 0x345   : > { %12826 = vmatmul.mubr.msk.f32.gmra.mrb[28].mxu1 %vm1782_vm3, %v2658_v28  ;;  %v3195_v28 = vld [vmem:[%s18239_s1 + $0xf8] sm:$0xff] }
 0x346   : > { %12828 = vmatprep.mubr.msk.f32.mxu1 %vm15235_vm2, %v15234_v58 }
 0x349   : > { %12829 = vmatmul.mubr.msk.f32.gmra.mrb[30].mxu1 %vm1782_vm3, %v2660_v43 }
 0x34a   : > { %12831 = vmatprep.mubr.msk.f32.mxu1 %vm15235_vm2, %v15234_v58 }
 0x34d   : > { %12832 = vmatmul.mubr.msk.f32.gmra.mrb[32].mxu1 %vm1782_vm3, %v2662_v42  ;;  %v14212_v42 = vpack.c.bf16 %v3195_v28, %v3194_v36  ;;  %v3753_v36 = vld [vmem:[%s18240_s2 + $0x140] sm:$0xff]  ;;  %v3754_v28 = vld [vmem:[%s18240_s2 + $0x150] sm:$0xff] }
 0x34e   : > { %12834 = vmatprep.mubr.msk.f32.mxu1 %vm15235_vm2, %v15234_v58 }
 0x351   : > { %12835 = vmatmul.mubr.msk.f32.gmra.mrb[34].mxu1 %vm1782_vm3, %v2664_v19  ;;  %v3272_v19 = vld [vmem:[%s18239_s1 + $0x100] sm:$0xff] }
 0x352   : > { %12841 = vmatprep.mubr.msk.f32.mxu1 %vm15235_vm2, %v15234_v58 }
 0x355   : > { %12842 = vmatmul.mubr.msk.f32.vlgmr.msra.gmra.mrb[26].mxu1 %vm1782_vm3, %v2778_v47  ;;  %v3273_v47 = vld [vmem:[%s18239_s1 + $0x108] sm:$0xff] }
 0x356   : > { %12844 = vmatprep.mubr.msk.f32.mxu1 %vm15235_vm2, %v15234_v58 }
 0x359   : > { %12845 = vmatmul.mubr.msk.f32.gmra.mrb[28].mxu1 %vm1782_vm3, %v2780_v8  ;;  %v14215_v8 = vpack.c.bf16 %v3273_v47, %v3272_v19  ;;  %v3882_v19 = vld [vmem:[%s18239_s1 + $0x1e8] sm:$0xff] }
 0x35a   : > { %12847 = vmatprep.mubr.msk.f32.mxu1 %vm15235_vm2, %v15234_v58 }
 0x35d   : > { %12848 = vmatmul.mubr.msk.f32.gmra.mrb[30].mxu1 %vm1782_vm3, %v2782_v49  ;;  %v3274_v49 = vld [vmem:[%s18239_s1 + $0x110] sm:$0xff] }
 0x35e   : > { %12850 = vmatprep.mubr.msk.f32.mxu1 %vm15235_vm2, %v15234_v58 }
 0x361   : > { %12851 = vmatmul.mubr.msk.f32.gmra.mrb[32].mxu1 %vm1782_vm3, %v2784_v59  ;;  %v3275_v59 = vld [vmem:[%s18239_s1 + $0x118] sm:$0xff] }
 0x362   : > { %12853 = vmatprep.mubr.msk.f32.mxu1 %vm15235_vm2, %v15234_v58 }
 0x365   : > { %12854 = vmatmul.mubr.msk.f32.gmra.mrb[34].mxu1 %vm1782_vm3, %v2786_v16 }
 0x366   : > { %13013 = vmatprep.mubr.msk.f32.mxu1 %vm15235_vm2, %v15234_v58 }
 0x428   : > { %v2870_v63 = vpop.f32.mrb[26].mxu1 }
 0x429   : > { %v12843_v48 = vpop.f32.mrb[27].mxu1  ;;  %v14487_v12 = vadd.f32 %v11358_v29, %v2870_v63  ;;  %v3352_v63 = vld [vmem:[%s18239_s1 + $0x120] sm:$0xff] }
 0x42a   : > { %v3353_v48 = vld [vmem:[%s18239_s1 + $0x128] sm:$0xff] }
 0x42b   : > { %v2899_v40 = vmax.f32 %v14487_v12, 0.0  ;;  %v14221_v12 = vpack.c.bf16 %v3353_v48, %v3352_v63  ;;  %v3980_v63 = vld [vmem:[%s18239_s1 + $0x200] sm:$0xff]  ;;  %v3981_v48 = vld [vmem:[%s18239_s1 + $0x208] sm:$0xff] }
 0x42c   : > { %v2875_v24 = vpop.f32.mrb[28].mxu1 }
 0x42d   : > { %v14488_v31 = vadd.f32 %v11358_v29, %v2875_v24  ;;  %v12846_v9 = vpop.f32.mrb[29].mxu1  ;;  %v3354_v24 = vld [vmem:[%s18239_s1 + $0x130] sm:$0xff] }
 0x42f   : > { %v2900_v45 = vmax.f32 %v14488_v31, 0.0  ;;  %v3355_v31 = vld [vmem:[%s18239_s1 + $0x138] sm:$0xff] }
 0x430   : > { %v2880_v55 = vpop.f32.mrb[30].mxu1 }
 0x431   : > { %v12849_v21 = vpop.f32.mrb[31].mxu1  ;;  %v14191_v20 = vpack.c.bf16 %v2900_v45, %v2899_v40  ;;  %v14489_v6 = vadd.f32 %v11358_v29, %v2880_v55  ;;  %v14224_v40 = vpack.c.bf16 %v3355_v31, %v3354_v24  ;;  %v3432_v45 = vld [vmem:[%s18239_s1 + $0x140] sm:$0xff]  ;;  %v3433_v55 = vld [vmem:[%s18239_s1 + $0x148] sm:$0xff]  ;;  %v14263_v31 = vpack.c.bf16 %v3981_v48, %v3980_v63 }
 0x432   : > { %v14227_v21 = vpack.c.bf16 %v3433_v55, %v3432_v45 }
 0x433   : > { %14192 = vmatpush3.bf16.msra.mxu0 %v14191_v20  ;;  %v2901_v61 = vmax.f32 %v14489_v6, 0.0  ;;  %v3434_v20 = vld [vmem:[%s18239_s1 + $0x150] sm:$0xff]  ;;  %v3435_v6 = vld [vmem:[%s18239_s1 + $0x158] sm:$0xff] }
 0x434   : > { %v2885_v53 = vpop.f32.mrb[32].mxu1  ;;  %14193 = vmatprep.subr.bf16.mxu0 %v18244_v14 }
 0x435   : > { %v14490_v23 = vadd.f32 %v11358_v29, %v2885_v53  ;;  %v12852_v26 = vpop.f32.mrb[33].mxu1 }
 0x436   : > { %v3512_v26 = vld [vmem:[%s18239_s1 + $0x160] sm:$0xff] }
 0x437   : > { %v2902_v46 = vmax.f32 %v14490_v23, 0.0  ;;  %v14230_v23 = vpack.c.bf16 %v3435_v6, %v3434_v20  ;;  %v3984_v6 = vld [vmem:[%s18239_s1 + $0x220] sm:$0xff] }
 0x438   : > { %v2890_v30 = vpop.f32.mrb[34].mxu1 }
 0x439   : > { %v14194_v18 = vpack.c.bf16 %v2902_v46, %v2901_v61  ;;  %v14491_v3 = vadd.f32 %v11358_v29, %v2890_v30  ;;  %v12855_v17 = vpop.f32.mrb[35].mxu1  ;;  %v14218_v29 = vpack.c.bf16 %v3275_v59, %v3274_v49  ;;  %v3513_v61 = vld [vmem:[%s18239_s1 + $0x168] sm:$0xff]  ;;  %v3514_v30 = vld [vmem:[%s18239_s1 + $0x170] sm:$0xff]  ;;  %v3884_v49 = vld [vmem:[%s18239_s1 + $0x1f8] sm:$0xff] }
 0x43a   : > { %v14233_v46 = vpack.c.bf16 %v3513_v61, %v3512_v26 }
 0x43b   : > { %14195 = vmatpush3.bf16.msra.mxu0 %v14194_v18  ;;  %v2903_v50 = vmax.f32 %v14491_v3, 0.0  ;;  %v3515_v18 = vld [vmem:[%s18239_s1 + $0x178] sm:$0xff] }
 0x43c   : > { %12864 = vmatprep.subr.mxu0 %v15234_v58  ;;  %v14236_v17 = vpack.c.bf16 %v3515_v18, %v3514_v30  ;;  %v3986_v30 = vld [vmem:[%s18239_s1 + $0x230] sm:$0xff]  ;;  %v3987_v18 = vld [vmem:[%s18239_s1 + $0x238] sm:$0xff] }
 0x43f   : > { %12865 = vmatpush3.msk.msra.mxu0 %vm2925_vm5, %v2903_v50  ;;  %v3592_v50 = vld [vmem:[%s18239_s1 + $0x180] sm:$0xff] }
 0x440   : > { %12867 = vmatmul.mubr.msk.f32.vlgmr.msra.gmra.mrb[0].mxu0 %vm2909_vm6, %v2904_v56  ;;  %14196 = vmatprep.subr.bf16.mxu0 %v18244_v14  ;;  %v3593_v56 = vld [vmem:[%s18239_s1 + $0x188] sm:$0xff] }
 0x441   : > { %12869 = vmatprep.mubr.msk.f32.mxu0 %vm15235_vm2, %v15234_v58  ;;  %14198 = vmatpush3.bf16.msra.mxu0 %v14197_v34  ;;  %v3672_v34 = vld [vmem:[%s18239_s1 + $0x1a0] sm:$0xff] }
 0x442   : > { %14199 = vmatprep.subr.bf16.mxu0 %v18244_v14 }
 0x444   : > { %12870 = vmatmul.mubr.msk.f32.gmra.mrb[2].mxu0 %vm2909_vm6, %v2905_v41  ;;  %v14239_v41 = vpack.c.bf16 %v3593_v56, %v3592_v50  ;;  %v14272_v56 = vpack.c.bf16 %v3987_v18, %v3986_v30  ;;  %v4398_v18 = vld [vmem:[%s18239_s1 + $0x330] sm:$0xff] }
 0x445   : > { %12872 = vmatprep.mubr.msk.f32.mxu0 %vm15235_vm2, %v15234_v58  ;;  %14201 = vmatpush3.bf16.msra.mxu0 %v14200_v27  ;;  %v3675_v27 = vld [vmem:[%s18239_s1 + $0x1b8] sm:$0xff] }
 0x446   : > { %14202 = vmatprep.subr.bf16.mxu0 %v18244_v14 }
 0x448   : > { %12873 = vmatmul.mubr.msk.f32.gmra.mrb[4].mxu0 %vm2909_vm6, %v2906_v35  ;;  %v3594_v35 = vld [vmem:[%s18239_s1 + $0x190] sm:$0xff] }
 0x449   : > { %12875 = vmatprep.mubr.msk.f32.mxu0 %vm15235_vm2, %v15234_v58 }
 0x44c   : > { %12876 = vmatmul.mubr.msk.f32.gmra.mrb[6].mxu0 %vm2909_vm6, %v2907_v51  ;;  %v3595_v51 = vld [vmem:[%s18239_s1 + $0x198] sm:$0xff] }
 0x44d   : > { %12878 = vmatprep.mubr.msk.f32.mxu0 %vm15235_vm2, %v15234_v58  ;;  %v14242_v10 = vpack.c.bf16 %v3595_v51, %v3594_v35  ;;  %v4084_v35 = vld [vmem:[%s18239_s1 + $0x248] sm:$0xff] }
 0x450   : > { %12879 = vmatmul.mubr.msk.f32.gmra.mrb[8].mxu0 %vm2909_vm6, %v2908_v32  ;;  %v3673_v32 = vld [vmem:[%s18239_s1 + $0x1a8] sm:$0xff] }
 0x451   : > { %12889 = vmatprep.mubr.msk.f32.mxu0 %vm15235_vm2, %v15234_v58  ;;  %v14245_v15 = vpack.c.bf16 %v3673_v32, %v3672_v34 }
 0x513   : > { %v2995_v57 = vpop.f32.mrb[0].mxu0 }
 0x514   : > { %3020 = vst.msk [vmem:[#allocation3] sm:$0xff] %vm3019_vm7, %v2995_v57  ;;  %v12868_v7 = vpop.f32.mrb[1].mxu0 }
 0x515   : > { %v14248_v7 = vpack.c.bf16 %v3675_v27, %v3674_v25  ;;  %v4088_v25 = vld [vmem:[%s18239_s1 + $0x268] sm:$0xff] }
 0x517   : > { %v3000_v62 = vpop.f32.mrb[2].mxu0 }
 0x518   : > { %3021 = vst.msk [vmem:[#allocation3 + $0x8] sm:$0xff] %vm3019_vm7, %v3000_v62  ;;  %v12871_v39 = vpop.f32.mrb[3].mxu0 }
 0x51b   : > { %v3005_v37 = vpop.f32.mrb[4].mxu0 }
 0x51c   : > { %3022 = vst.msk [vmem:[#allocation3 + $0x10] sm:$0xff] %vm3019_vm7, %v3005_v37  ;;  %v12874_v2 = vpop.f32.mrb[5].mxu0  ;;  %v3878_v37 = vld [vmem:[%s18239_s1 + $0x1c8] sm:$0xff] }
 0x51d   : > { %v3879_v2 = vld [vmem:[%s18239_s1 + $0x1d0] sm:$0xff] }
 0x51e   : > { %v14254_v38 = vpack.c.bf16 %v3880_v33, %v3879_v2  ;;  %v4189_v33 = vld [vmem:[%s18239_s1 + $0x298] sm:$0xff] }
 0x51f   : > { %v3010_v60 = vpop.f32.mrb[6].mxu0  ;;  %v3031_v5 = vld [vmem:[#allocation3] ss:$2 sm:$0xff]  ;;  %v3111_v43 = vld [vmem:[#allocation3 + $0x1] ss:$2 sm:$0xff] }
 0x520   : > { %3023 = vst.msk [vmem:[#allocation3 + $0x18] sm:$0xff] %vm3019_vm7, %v3010_v60  ;;  %12890 = vmatmul.mubr.msk.f32.vlgmr.msra.gmra.mrb[10].mxu0 %vm3019_vm7, %v3031_v5  ;;  %v12877_v44 = vpop.f32.mrb[7].mxu0  ;;  %v11410_v60 = vld [vmem:[%s18239_s1 + $0x5b2] ss:$0 sm:$0xff] }
 0x521   : > { %14204 = vmatpush3.bf16.msra.mxu0 %v14203_v4  ;;  %12900 = vmatprep.mubr.msk.f32.mxu0 %vm15235_vm2, %v15234_v58  ;;  %v14251_v4 = vpack.c.bf16 %v3878_v37, %v3877_v22  ;;  %v4186_v22 = vld [vmem:[%s18239_s1 + $0x280] sm:$0xff]  ;;  %v4187_v37 = vld [vmem:[%s18239_s1 + $0x288] sm:$0xff] }
 0x522   : > { %14205 = vmatprep.subr.bf16.mxu0 %v18244_v14  ;;  %v14287_v2 = vpack.c.bf16 %v4187_v37, %v4186_v22  ;;  %v4600_v22 = vld [vmem:[%s18239_s1 + $0x390] sm:$0xff]  ;;  %v4601_v37 = vld [vmem:[%s18239_s1 + $0x398] sm:$0xff] }
 0x523   : > { %v3191_v16 = vld [vmem:[#allocation3 + $0x2] ss:$2 sm:$0xff]  ;;  %v3351_v53 = vld [vmem:[#allocation3 + $0x7] ss:$2 sm:$0xff]  ;;  %v3015_v39 = vpop.f32.mrb[8].mxu0  ;;  %14252 = vmatpush3.bf16.msra.mxu1 %v14251_v4 }
 0x524   : > { %v3271_v9 = vld [vmem:[#allocation3 + $0x6] ss:$2 sm:$0xff]  ;;  %v12880_v0 = vpop.f32.mrb[9].mxu0  ;;  %14253 = vmatprep.subr.bf16.mxu1 %v18244_v14 }
 0x525   : > { %14207 = vmatpush3.bf16.msra.mxu0 %v14206_v1  ;;  %v3431_v3 = vld [vmem:[#allocation3 + $0x8] ss:$2 sm:$0xff] }
 0x526   : > { %14208 = vmatprep.subr.bf16.mxu0 %v18244_v14  ;;  %v4188_v4 = vld [vmem:[%s18239_s1 + $0x290] sm:$0xff] }
 0x527   : > { %v3511_v52 = vld [vmem:[#allocation3 + $0xc] ss:$2 sm:$0xff]  ;;  %v3591_v57 = vld [vmem:[#allocation3 + $0xd] ss:$2 sm:$0xff]  ;;  %14255 = vmatpush3.bf16.msra.mxu1 %v14254_v38 }
 0x528   : > { %12901 = vmatmul.mubr.msk.f32.vlgmr.msra.gmra.mrb[10].mxu0 %vm3019_vm7, %v3111_v43  ;;  %v3671_v62 = vld [vmem:[#allocation3 + $0xe] ss:$2 sm:$0xff]  ;;  %14256 = vmatprep.subr.bf16.mxu1 %v18244_v14 }
 0x529   : > { %14210 = vmatpush3.bf16.msra.mxu0 %v14209_v13  ;;  %12911 = vmatprep.mubr.msk.f32.mxu0 %vm15235_vm2, %v15234_v58  ;;  %v3752_v13 = vld [vmem:[%s18240_s2 + $0x130] sm:$0xff]  ;;  %v3755_v43 = vld [vmem:[%s18240_s2 + $0x160] sm:$0xf] }
 0x52a   : > { %14211 = vmatprep.subr.bf16.mxu0 %v18244_v14 }
 0x52d   : > { %14213 = vmatpush3.bf16.msra.mxu0 %v14212_v42  ;;  %v3881_v42 = vld [vmem:[%s18239_s1 + $0x1e0] sm:$0xff] }
 0x52e   : > { %14214 = vmatprep.subr.bf16.mxu0 %v18244_v14  ;;  %v14257_v47 = vpack.c.bf16 %v3882_v19, %v3881_v42  ;;  %v4290_v42 = vld [vmem:[%s18239_s1 + $0x2c8] sm:$0xff] }
 0x530   : > { %12912 = vmatmul.mubr.msk.f32.vlgmr.msra.gmra.mrb[10].mxu0 %vm3019_vm7, %v3191_v16  ;;  %14258 = vmatpush3.bf16.msra.mxu1 %v14257_v47  ;;  %v4291_v47 = vld [vmem:[%s18239_s1 + $0x2d0] sm:$0xff] }
 0x531   : > { %14216 = vmatpush3.bf16.msra.mxu0 %v14215_v8  ;;  %12922 = vmatprep.mubr.msk.f32.mxu0 %vm15235_vm2, %v15234_v58  ;;  %v3883_v8 = vld [vmem:[%s18239_s1 + $0x1f0] sm:$0xff] }
 0x532   : > { %14217 = vmatprep.subr.bf16.mxu0 %v18244_v14  ;;  %14259 = vmatprep.subr.bf16.mxu1 %v18244_v14  ;;  %v14260_v59 = vpack.c.bf16 %v3884_v49, %v3883_v8  ;;  %v4292_v8 = vld [vmem:[%s18239_s1 + $0x2d8] sm:$0xff] }
 0x534   : > { %14261 = vmatpush3.bf16.msra.mxu1 %v14260_v59  ;;  %v14302_v59 = vpack.c.bf16 %v4292_v8, %v4291_v47  ;;  %v4705_v8 = vld [vmem:[%s18239_s1 + $0x3e0] sm:$0xff] }
 0x535   : > { %14219 = vmatpush3.bf16.msra.mxu0 %v14218_v29  ;;  %14262 = vmatprep.subr.bf16.mxu1 %v18244_v14 }
 0x536   : > { %14220 = vmatprep.subr.bf16.mxu0 %v18244_v14 }
 0x538   : > { %12923 = vmatmul.mubr.msk.f32.vlgmr.msra.gmra.mrb[10].mxu0 %vm3019_vm7, %v3271_v9  ;;  %v3982_v9 = vld [vmem:[%s18239_s1 + $0x210] sm:$0xff] }
 0x539   : > { %14222 = vmatpush3.bf16.msra.mxu0 %v14221_v12  ;;  %12933 = vmatprep.mubr.msk.f32.mxu0 %vm15235_vm2, %v15234_v58 }
 0x53a   : > { %14223 = vmatprep.subr.bf16.mxu0 %v18244_v14 }
 0x53d   : > { %14225 = vmatpush3.bf16.msra.mxu0 %v14224_v40  ;;  %v3983_v40 = vld [vmem:[%s18239_s1 + $0x218] sm:$0xff] }
 0x53e   : > { %14226 = vmatprep.subr.bf16.mxu0 %v18244_v14  ;;  %v14266_v20 = vpack.c.bf16 %v3983_v40, %v3982_v9  ;;  %v4392_v40 = vld [vmem:[%s18239_s1 + $0x300] sm:$0xff] }
 0x540   : > { %12934 = vmatmul.mubr.msk.f32.vlgmr.msra.gmra.mrb[10].mxu0 %vm3019_vm7, %v3351_v53  ;;  %v3985_v53 = vld [vmem:[%s18239_s1 + $0x228] sm:$0xff] }
 0x541   : > { %14228 = vmatpush3.bf16.msra.mxu0 %v14227_v21  ;;  %12944 = vmatprep.mubr.msk.f32.mxu0 %vm15235_vm2, %v15234_v58 }
 0x542   : > { %14229 = vmatprep.subr.bf16.mxu0 %v18244_v14 }
 0x545   : > { %14231 = vmatpush3.bf16.msra.mxu0 %v14230_v23 }
 0x546   : > { %14232 = vmatprep.subr.bf16.mxu0 %v18244_v14 }
 0x548   : > { %12945 = vmatmul.mubr.msk.f32.vlgmr.msra.gmra.mrb[10].mxu0 %vm3019_vm7, %v3431_v3 }
 0x549   : > { %14234 = vmatpush3.bf16.msra.mxu0 %v14233_v46  ;;  %12955 = vmatprep.mubr.msk.f32.mxu0 %vm15235_vm2, %v15234_v58  ;;  %v14269_v46 = vpack.c.bf16 %v3985_v53, %v3984_v6 }
 0x54a   : > { %14235 = vmatprep.subr.bf16.mxu0 %v18244_v14 }
 0x54d   : > { %14237 = vmatpush3.bf16.msra.mxu0 %v14236_v17 }
 0x54e   : > { %14238 = vmatprep.subr.bf16.mxu0 %v18244_v14 }
 0x550   : > { %12956 = vmatmul.mubr.msk.f32.vlgmr.msra.gmra.mrb[10].mxu0 %vm3019_vm7, %v3511_v52  ;;  %v4085_v52 = vld [vmem:[%s18239_s1 + $0x250] sm:$0xff] }
 0x551   : > { %14240 = vmatpush3.bf16.msra.mxu0 %v14239_v41  ;;  %12966 = vmatprep.mubr.msk.f32.mxu0 %vm15235_vm2, %v15234_v58  ;;  %v4083_v41 = vld [vmem:[%s18239_s1 + $0x240] sm:$0xff] }
 0x552   : > { %14241 = vmatprep.subr.bf16.mxu0 %v18244_v14  ;;  %v14275_v51 = vpack.c.bf16 %v4084_v35, %v4083_v41  ;;  %v4496_v41 = vld [vmem:[%s18239_s1 + $0x348] sm:$0xff] }
 0x555   : > { %14243 = vmatpush3.bf16.msra.mxu0 %v14242_v10  ;;  %v4086_v10 = vld [vmem:[%s18239_s1 + $0x258] sm:$0xff] }
 0x556   : > { %14244 = vmatprep.subr.bf16.mxu0 %v18244_v14  ;;  %v14278_v32 = vpack.c.bf16 %v4086_v10, %v4085_v52  ;;  %v4498_v52 = vld [vmem:[%s18239_s1 + $0x358] sm:$0xff] }
 0x558   : > { %12967 = vmatmul.mubr.msk.f32.vlgmr.msra.gmra.mrb[10].mxu0 %vm3019_vm7, %v3591_v57 }
 0x559   : > { %14246 = vmatpush3.bf16.msra.mxu0 %v14245_v15  ;;  %12977 = vmatprep.mubr.msk.f32.mxu0 %vm15235_vm2, %v15234_v58  ;;  %v4087_v15 = vld [vmem:[%s18239_s1 + $0x260] sm:$0xff] }
 0x55a   : > { %14247 = vmatprep.subr.bf16.mxu0 %v18244_v14  ;;  %v14281_v57 = vpack.c.bf16 %v4088_v25, %v4087_v15  ;;  %v4501_v25 = vld [vmem:[%s18239_s1 + $0x370] sm:$0xff] }
 0x55d   : > { %14249 = vmatpush3.bf16.msra.mxu0 %v14248_v7  ;;  %v4089_v7 = vld [vmem:[%s18239_s1 + $0x270] sm:$0xff] }
 0x55e   : > { %12980 = vmatprep.subr.mxu0 %v15234_v58 }
 0x560   : > { %12978 = vmatmul.mubr.msk.f32.vlgmr.msra.gmra.mrb[10].mxu0 %vm3019_vm7, %v3671_v62  ;;  %v4090_v62 = vld [vmem:[%s18239_s1 + $0x278] sm:$0xff] }
 0x561   : > { %12982 = vmatprep.mubr.msk.f32.mxu0 %vm15235_vm2, %v15234_v58  ;;  %v14284_v0 = vpack.c.bf16 %v4090_v62, %v4089_v7  ;;  %v4598_v62 = vld [vmem:[%s18239_s1 + $0x380] sm:$0xff] }
 0x633   : > { %v3745_v5 = vpop.f32.mrb[10].mxu0 }
 0x634   : > { %v14492_v44 = vadd.f32 %v11410_v60, %v3745_v5  ;;  %v12979_v1 = vpop.f32.mrb[11].mxu0  ;;  %v14290_v60 = vpack.c.bf16 %v4189_v33, %v4188_v4  ;;  %v4190_v5 = vld [vmem:[%s18239_s1 + $0x2a0] sm:$0xff]  ;;  %v14338_v4 = vpack.c.bf16 %v4601_v37, %v4600_v22  ;;  %v5188_v37 = vld [vmem:[%s18239_s1 + $0x428] sm:$0xff] }
 0x635   : > { %v4602_v33 = vld [vmem:[%s18239_s1 + $0x3a0] sm:$0xff] }
 0x636   : > { %v3750_v54 = vmax.f32 %v14492_v44, 0.0  ;;  %v4191_v44 = vld [vmem:[%s18239_s1 + $0x2a8] sm:$0xff]  ;;  %v5187_v22 = vld [vmem:[%s18239_s1 + $0x420] sm:$0xff] }
 0x638   : > { %12981 = vmatpush3.msra.mxu0 %v3750_v54  ;;  %v14293_v54 = vpack.c.bf16 %v4191_v44, %v4190_v5  ;;  %v4604_v44 = vld [vmem:[%s18239_s1 + $0x3b0] sm:$0xff] }
 0x639   : > { %12983 = vmatmul.mubr.msk.f32.vlgmr.msra.gmra.mrb[12].mxu0 %vm3756_vm9, %v3751_v11  ;;  %14358 = vmatprep.subr.bf16.mxu0 %v18244_v14  ;;  %v4192_v11 = vld [vmem:[%s18239_s1 + $0x2b0] sm:$0xff] }
 0x63a   : > { %12985 = vmatprep.mubr.msk.f32.mxu0 %vm15235_vm2, %v15234_v58 }
 0x63d   : > { %12986 = vmatmul.mubr.msk.f32.gmra.mrb[14].mxu0 %vm3756_vm9, %v3752_v13  ;;  %v4193_v13 = vld [vmem:[%s18239_s1 + $0x2b8] sm:$0xff] }
 0x63e   : > { %12988 = vmatprep.mubr.msk.f32.mxu0 %vm15235_vm2, %v15234_v58 }
 0x641   : > { %12989 = vmatmul.mubr.msk.f32.gmra.mrb[16].mxu0 %vm3756_vm9, %v3753_v36 }
 0x642   : > { %12991 = vmatprep.mubr.msk.f32.mxu0 %vm15235_vm2, %v15234_v58 }
 0x645   : > { %12992 = vmatmul.mubr.msk.f32.gmra.mrb[18].mxu0 %vm3756_vm9, %v3754_v28  ;;  %v14296_v28 = vpack.c.bf16 %v4193_v13, %v4192_v11  ;;  %v4701_v13 = vld [vmem:[%s18239_s1 + $0x3c0] sm:$0xff] }
 0x646   : > { %12994 = vmatprep.mubr.msk.f32.mxu0 %vm15235_vm2, %v15234_v58 }
 0x649   : > { %12995 = vmatmul.mubr.msk.f32.gmra.mrb[20].mxu0 %vm3756_vm9, %v3755_v43  ;;  %v4289_v43 = vld [vmem:[%s18239_s1 + $0x2c0] sm:$0xff] }
 0x64a   : > { %13228 = vmatprep.mubr.msk.f32.mxu0 %vm15235_vm2, %v15234_v58  ;;  %v14299_v19 = vpack.c.bf16 %v4290_v42, %v4289_v43  ;;  %v4703_v43 = vld [vmem:[%s18239_s1 + $0x3d0] sm:$0xff]  ;;  %v4704_v42 = vld [vmem:[%s18239_s1 + $0x3d8] sm:$0xff] }
 0x64b   : > { %v14350_v47 = vpack.c.bf16 %v4704_v42, %v4703_v43  ;;  %v5356_v43 = vld [vmem:[%s18239_s1 + $0x440] sm:$0xff]  ;;  %v5357_v42 = vld [vmem:[%s18239_s1 + $0x448] sm:$0xff] }
 0x70c   : > { %v3838_v16 = vpop.f32.mrb[12].mxu0 }
 0x70d   : > { %3863 = vst.msk [vmem:[#allocation4] sm:$0xff] %vm3862_vm10, %v3838_v16  ;;  %v12984_v29 = vpop.f32.mrb[13].mxu0  ;;  %v4293_v16 = vld [vmem:[%s18239_s1 + $0x2e0] sm:$0xff] }
 0x70e   : > { %v4294_v29 = vld [vmem:[%s18239_s1 + $0x2e8] sm:$0xff] }
 0x70f   : > { %v14305_v48 = vpack.c.bf16 %v4294_v29, %v4293_v16  ;;  %v4707_v29 = vld [vmem:[%s18239_s1 + $0x3f0] sm:$0xff] }
 0x710   : > { %v3843_v12 = vpop.f32.mrb[14].mxu0 }
 0x711   : > { %3864 = vst.msk [vmem:[#allocation4 + $0x8] sm:$0xff] %vm3862_vm10, %v3843_v12  ;;  %v12987_v24 = vpop.f32.mrb[15].mxu0  ;;  %v4295_v12 = vld [vmem:[%s18239_s1 + $0x2f0] sm:$0xff] }
 0x712   : > { %v4296_v24 = vld [vmem:[%s18239_s1 + $0x2f8] sm:$0xff] }
 0x713   : > { %v14308_v9 = vpack.c.bf16 %v4296_v24, %v4295_v12 }
 0x714   : > { %v3848_v45 = vpop.f32.mrb[16].mxu0  ;;  %v3874_v55 = vld [vmem:[#allocation4] sm:$0xff] }
 0x715   : > { %3865 = vst.msk [vmem:[#allocation4 + $0x10] sm:$0xff] %vm3862_vm10, %v3848_v45  ;;  %13014 = vmatmul.mubr.msk.f32.vlgmr.msra.gmra.mrb[36].mxu1 %vm3862_vm10, %v3874_v55  ;;  %v12990_v21 = vpop.f32.mrb[17].mxu0  ;;  %v4393_v45 = vld [vmem:[%s18239_s1 + $0x308] sm:$0xff] }
 0x716   : > { %14264 = vmatpush3.bf16.msra.mxu1 %v14263_v31  ;;  %13016 = vmatprep.mubr.msk.f32.mxu1 %vm15235_vm2, %v15234_v58  ;;  %v14311_v55 = vpack.c.bf16 %v4393_v45, %v4392_v40  ;;  %v4394_v21 = vld [vmem:[%s18239_s1 + $0x310] sm:$0xff] }
 0x717   : > { %14265 = vmatprep.subr.bf16.mxu1 %v18244_v14  ;;  %v11425_v40 = vld [vmem:[%s18239_s1 + $0x5b3] ss:$0 sm:$0xff] }
 0x718   : > { %v3853_v23 = vpop.f32.mrb[18].mxu0  ;;  %v16520_v26 = vld [vmem:[#allocation4 + $0x8] sm:$0xff] }
 0x719   : > { %3866 = vst.msk [vmem:[#allocation4 + $0x18] sm:$0xff] %vm3862_vm10, %v3853_v23  ;;  %13017 = vmatmul.mubr.msk.f32.gmra.mrb[38].mxu1 %vm3862_vm10, %v16520_v26  ;;  %v12993_v61 = vpop.f32.mrb[19].mxu0  ;;  %v3977_v34 = vld [vmem:[#allocation4 + $0x1] sm:$0xff]  ;;  %v4396_v23 = vld [vmem:[%s18239_s1 + $0x320] sm:$0xff] }
 0x71a   : > { %14267 = vmatpush3.bf16.msra.mxu1 %v14266_v20  ;;  %13019 = vmatprep.mubr.msk.f32.mxu1 %vm15235_vm2, %v15234_v58  ;;  %v4080_v38 = vld [vmem:[#allocation4 + $0x2] sm:$0xff]  ;;  %v4397_v61 = vld [vmem:[%s18239_s1 + $0x328] sm:$0xff] }
 0x71b   : > { %14268 = vmatprep.subr.bf16.mxu1 %v18244_v14  ;;  %v4183_v49 = vld [vmem:[#allocation4 + $0x6] sm:$0xff]  ;;  %v14317_v30 = vpack.c.bf16 %v4397_v61, %v4396_v23 }
 0x71c   : > { %v3876_v3 = vld [vmem:[#allocation4 + $0x10] sm:$0x3f]  ;;  %v3858_v17 = vpop.f32.mrb[20].mxu0  ;;  %v4395_v20 = vld [vmem:[%s18239_s1 + $0x318] sm:$0xff] }
 0x71d   : > { %13020 = vmatmul.mubr.msk.f32.gmra.mrb[40].mxu1 %vm3862_vm10, %v3876_v3  ;;  %3868 = vst.msk [vmem:[#allocation4 + $0x20] sm:$0xf] %vm3867_vm11, %v3858_v17  ;;  %v12996_v50 = vpop.f32.mrb[21].mxu0  ;;  %v3978_v27 = vld [vmem:[#allocation4 + $0x9] sm:$0xff]  ;;  %v3979_v39 = vld [vmem:[#allocation4 + $0x11] sm:$0x3f]  ;;  %v14314_v53 = vpack.c.bf16 %v4395_v20, %v4394_v21 }
 0x71e   : > { %14270 = vmatpush3.bf16.msra.mxu1 %v14269_v46  ;;  %13038 = vmatprep.mubr.msk.f32.mxu1 %vm15235_vm2, %v15234_v58  ;;  %v4081_v1 = vld [vmem:[#allocation4 + $0xa] sm:$0xff]  ;;  %v4082_v36 = vld [vmem:[#allocation4 + $0x12] sm:$0x3f] }
 0x71f   : > { %14271 = vmatprep.subr.bf16.mxu1 %v18244_v14  ;;  %v16635_v63 = vld [vmem:[#allocation4 + $0xe] sm:$0xff] }
 0x720   : > { %v4185_v31 = vld [vmem:[#allocation4 + $0x16] sm:$0x3f]  ;;  %v4286_v6 = vld [vmem:[#allocation4 + $0x7] sm:$0xff] }
 0x721   : > { %v4287_v46 = vld [vmem:[#allocation4 + $0xf] sm:$0xff]  ;;  %v4288_v17 = vld [vmem:[#allocation4 + $0x17] sm:$0x3f] }
 0x722   : > { %14273 = vmatpush3.bf16.msra.mxu1 %v14272_v56  ;;  %v4399_v3 = vld [vmem:[%s18239_s1 + $0x338] sm:$0xff]  ;;  %v4495_v56 = vld [vmem:[%s18239_s1 + $0x340] sm:$0xff] }
 0x723   : > { %14274 = vmatprep.subr.bf16.mxu1 %v18244_v14  ;;  %v14320_v50 = vpack.c.bf16 %v4399_v3, %v4398_v18  ;;  %v14323_v35 = vpack.c.bf16 %v4496_v41, %v4495_v56  ;;  %v4390_v15 = vld [vmem:[#allocation4 + $0x10] sm:$0xff]  ;;  %v4804_v41 = vld [vmem:[%s18240_s2 + $0x170] sm:$0xff] }
 0x724   : > { %v4597_v12 = vld [vmem:[#allocation4 + $0x1d] sm:$0x3f]  ;;  %v5018_v3 = vld [vmem:[%s18239_s1 + $0x400] sm:$0xff] }
 0x725   : > { %13039 = vmatmul.mubr.msk.f32.vlgmr.msra.gmra.mrb[36].mxu1 %vm3862_vm10, %v3977_v34  ;;  %v4499_v34 = vld [vmem:[%s18239_s1 + $0x360] sm:$0xff] }
 0x726   : > { %14276 = vmatpush3.bf16.msra.mxu1 %v14275_v51  ;;  %13041 = vmatprep.mubr.msk.f32.mxu1 %vm15235_vm2, %v15234_v58  ;;  %v4497_v51 = vld [vmem:[%s18239_s1 + $0x350] sm:$0xff] }
 0x727   : > { %14277 = vmatprep.subr.bf16.mxu1 %v18244_v14  ;;  %v14326_v10 = vpack.c.bf16 %v4498_v52, %v4497_v51  ;;  %v4806_v51 = vld [vmem:[%s18240_s2 + $0x190] sm:$0xff]  ;;  %v4807_v52 = vld [vmem:[%s18240_s2 + $0x1a0] sm:$0xff] }
 0x729   : > { %13042 = vmatmul.mubr.msk.f32.gmra.mrb[38].mxu1 %vm3862_vm10, %v3978_v27  ;;  %v4502_v27 = vld [vmem:[%s18239_s1 + $0x378] sm:$0xff] }
 0x72a   : > { %14279 = vmatpush3.bf16.msra.mxu1 %v14278_v32  ;;  %13044 = vmatprep.mubr.msk.f32.mxu1 %vm15235_vm2, %v15234_v58  ;;  %v4500_v32 = vld [vmem:[%s18239_s1 + $0x368] sm:$0xff]  ;;  %v14332_v7 = vpack.c.bf16 %v4502_v27, %v4501_v25  ;;  %v4813_v25 = vld [vmem:[%s18240_s2 + $0x200] sm:$0xff]  ;;  %v4814_v27 = vld [vmem:[%s18240_s2 + $0x210] sm:$0xff] }
 0x72b   : > { %14280 = vmatprep.subr.bf16.mxu1 %v18244_v14 }
 0x72d   : > { %13045 = vmatmul.mubr.msk.f32.gmra.mrb[40].mxu1 %vm3862_vm10, %v3979_v39  ;;  %v4599_v39 = vld [vmem:[%s18239_s1 + $0x388] sm:$0xff] }
 0x72e   : > { %14282 = vmatpush3.bf16.msra.mxu1 %v14281_v57  ;;  %13063 = vmatprep.mubr.msk.f32.mxu1 %vm15235_vm2, %v15234_v58  ;;  %v4391_v57 = vld [vmem:[#allocation4 + $0x18] sm:$0x3f] }
 0x72f   : > { %14283 = vmatprep.subr.bf16.mxu1 %v18244_v14 }
 0x732   : > { %14285 = vmatpush3.bf16.msra.mxu1 %v14284_v0  ;;  %v14335_v0 = vpack.c.bf16 %v4599_v39, %v4598_v62  ;;  %v5020_v62 = vld [vmem:[%s18239_s1 + $0x410] sm:$0xff]  ;;  %v5021_v39 = vld [vmem:[%s18239_s1 + $0x418] sm:$0xff] }
 0x733   : > { %14286 = vmatprep.subr.bf16.mxu1 %v18244_v14 }
 0x735   : > { %13064 = vmatmul.mubr.msk.f32.vlgmr.msra.gmra.mrb[36].mxu1 %vm3862_vm10, %v4080_v38  ;;  %v4603_v38 = vld [vmem:[%s18239_s1 + $0x3a8] sm:$0xff] }
 0x736   : > { %14288 = vmatpush3.bf16.msra.mxu1 %v14287_v2  ;;  %13066 = vmatprep.mubr.msk.f32.mxu1 %vm15235_vm2, %v15234_v58  ;;  %v4492_v2 = vld [vmem:[#allocation4 + $0xc] sm:$0xff]  ;;  %v14341_v5 = vpack.c.bf16 %v4603_v38, %v4602_v33 }
 0x737   : > { %14289 = vmatprep.subr.bf16.mxu1 %v18244_v14 }
 0x739   : > { %13067 = vmatmul.mubr.msk.f32.gmra.mrb[38].mxu1 %vm3862_vm10, %v4081_v1  ;;  %v4605_v1 = vld [vmem:[%s18239_s1 + $0x3b8] sm:$0xff] }
 0x73a   : > { %14291 = vmatpush3.bf16.msra.mxu1 %v14290_v60  ;;  %13069 = vmatprep.mubr.msk.f32.mxu1 %vm15235_vm2, %v15234_v58  ;;  %v4493_v60 = vld [vmem:[#allocation4 + $0x14] sm:$0xff]  ;;  %v14344_v11 = vpack.c.bf16 %v4605_v1, %v4604_v44  ;;  %v5189_v1 = vld [vmem:[%s18239_s1 + $0x430] sm:$0xff] }
 0x73b   : > { %14292 = vmatprep.subr.bf16.mxu1 %v18244_v14 }
 0x73d   : > { %13070 = vmatmul.mubr.msk.f32.gmra.mrb[40].mxu1 %vm3862_vm10, %v4082_v36  ;;  %v4702_v36 = vld [vmem:[%s18239_s1 + $0x3c8] sm:$0xff] }
 0x73e   : > { %14294 = vmatpush3.bf16.msra.mxu1 %v14293_v54  ;;  %13088 = vmatprep.mubr.msk.f32.mxu1 %vm15235_vm2, %v15234_v58  ;;  %v4494_v54 = vld [vmem:[#allocation4 + $0x1c] sm:$0x3f] }
 0x73f   : > { %14295 = vmatprep.subr.bf16.mxu1 %v18244_v14 }
 0x742   : > { %14297 = vmatpush3.bf16.msra.mxu1 %v14296_v28  ;;  %v14347_v28 = vpack.c.bf16 %v4702_v36, %v4701_v13 }
 0x743   : > { %14298 = vmatprep.subr.bf16.mxu1 %v18244_v14 }
 0x745   : > { %13089 = vmatmul.mubr.msk.f32.vlgmr.msra.gmra.mrb[36].mxu1 %vm3862_vm10, %v4183_v49  ;;  %v4706_v49 = vld [vmem:[%s18239_s1 + $0x3e8] sm:$0xff] }
 0x746   : > { %14300 = vmatpush3.bf16.msra.mxu1 %v14299_v19  ;;  %13091 = vmatprep.mubr.msk.f32.mxu1 %vm15235_vm2, %v15234_v58  ;;  %v4595_v19 = vld [vmem:[#allocation4 + $0xd] sm:$0xff]  ;;  %v14353_v16 = vpack.c.bf16 %v4706_v49, %v4705_v8 }
 0x747   : > { %14301 = vmatprep.subr.bf16.mxu1 %v18244_v14 }
 0x749   : > { %13092 = vmatmul.mubr.msk.f32.gmra.mrb[38].mxu1 %vm3862_vm10, %v16635_v63 }
 0x74a   : > { %14303 = vmatpush3.bf16.msra.mxu1 %v14302_v59  ;;  %13094 = vmatprep.mubr.msk.f32.mxu1 %vm15235_vm2, %v15234_v58  ;;  %v4596_v59 = vld [vmem:[#allocation4 + $0x15] sm:$0xff] }
 0x74b   : > { %14304 = vmatprep.subr.bf16.mxu1 %v18244_v14 }
 0x74d   : > { %13095 = vmatmul.mubr.msk.f32.gmra.mrb[40].mxu1 %vm3862_vm10, %v4185_v31  ;;  %v4699_v31 = vld [vmem:[#allocation4 + $0x16] sm:$0xff] }
 0x74e   : > { %14306 = vmatpush3.bf16.msra.mxu1 %v14305_v48  ;;  %13113 = vmatprep.mubr.msk.f32.mxu1 %vm15235_vm2, %v15234_v58  ;;  %v4708_v48 = vld [vmem:[%s18239_s1 + $0x3f8] sm:$0xff] }
 0x74f   : > { %14307 = vmatprep.subr.bf16.mxu1 %v18244_v14  ;;  %v14356_v24 = vpack.c.bf16 %v4708_v48, %v4707_v29 }
 0x752   : > { %14309 = vmatpush3.bf16.msra.mxu1 %v14308_v9  ;;  %v4700_v9 = vld [vmem:[#allocation4 + $0x1e] sm:$0x3f] }
 0x753   : > { %14310 = vmatprep.subr.bf16.mxu1 %v18244_v14 }
 0x755   : > { %13114 = vmatmul.mubr.msk.f32.vlgmr.msra.gmra.mrb[36].mxu1 %vm3862_vm10, %v4286_v6 }
 0x756   : > { %14312 = vmatpush3.bf16.msra.mxu1 %v14311_v55  ;;  %13116 = vmatprep.mubr.msk.f32.mxu1 %vm15235_vm2, %v15234_v58 }
 0x757   : > { %14313 = vmatprep.subr.bf16.mxu1 %v18244_v14 }
 0x759   : > { %13117 = vmatmul.mubr.msk.f32.gmra.mrb[38].mxu1 %vm3862_vm10, %v4287_v46 }
 0x75a   : > { %14315 = vmatpush3.bf16.msra.mxu1 %v14314_v53  ;;  %13119 = vmatprep.mubr.msk.f32.mxu1 %vm15235_vm2, %v15234_v58 }
 0x75b   : > { %14316 = vmatprep.subr.bf16.mxu1 %v18244_v14 }
 0x75d   : > { %13120 = vmatmul.mubr.msk.f32.gmra.mrb[40].mxu1 %vm3862_vm10, %v4288_v17  ;;  %v5019_v17 = vld [vmem:[%s18239_s1 + $0x408] sm:$0xff] }
 0x75e   : > { %14318 = vmatpush3.bf16.msra.mxu1 %v14317_v30  ;;  %13138 = vmatprep.mubr.msk.f32.mxu1 %vm15235_vm2, %v15234_v58 }
 0x75f   : > { %14319 = vmatprep.subr.bf16.mxu1 %v18244_v14 }
 0x762   : > { %14321 = vmatpush3.bf16.msra.mxu1 %v14320_v50  ;;  %v14361_v50 = vpack.c.bf16 %v5019_v17, %v5018_v3  ;;  %v5359_v3 = vld [vmem:[%s18239_s1 + $0x458] sm:$0xff] }
 0x763   : > { %14322 = vmatprep.subr.bf16.mxu1 %v18244_v14 }
 0x765   : > { %13139 = vmatmul.mubr.msk.f32.vlgmr.msra.gmra.mrb[36].mxu1 %vm3862_vm10, %v16520_v26  ;;  %v14329_v26 = vpack.c.bf16 %v4500_v32, %v4499_v34  ;;  %v4809_v34 = vld [vmem:[%s18240_s2 + $0x1c0] sm:$0xff]  ;;  %v4810_v32 = vld [vmem:[%s18240_s2 + $0x1d0] sm:$0xff] }
 0x766   : > { %14324 = vmatpush3.bf16.msra.mxu1 %v14323_v35  ;;  %13141 = vmatprep.mubr.msk.f32.mxu1 %vm15235_vm2, %v15234_v58  ;;  %v4805_v35 = vld [vmem:[%s18240_s2 + $0x180] sm:$0xff] }
 0x767   : > { %14325 = vmatprep.subr.bf16.mxu1 %v18244_v14 }
 0x769   : > { %13142 = vmatmul.mubr.msk.f32.gmra.mrb[38].mxu1 %vm3862_vm10, %v4390_v15  ;;  %v4811_v15 = vld [vmem:[%s18240_s2 + $0x1e0] sm:$0xff] }
 0x76a   : > { %14327 = vmatpush3.bf16.msra.mxu1 %v14326_v10  ;;  %13144 = vmatprep.mubr.msk.f32.mxu1 %vm15235_vm2, %v15234_v58  ;;  %v4808_v10 = vld [vmem:[%s18240_s2 + $0x1b0] sm:$0xff] }
 0x76b   : > { %14328 = vmatprep.subr.bf16.mxu1 %v18244_v14 }
 0x76d   : > { %13145 = vmatmul.mubr.msk.f32.gmra.mrb[40].mxu1 %vm3862_vm10, %v4391_v57  ;;  %v4815_v57 = vld [vmem:[%s18240_s2 + $0x220] sm:$0xff] }
 0x76e   : > { %14330 = vmatpush3.bf16.msra.mxu1 %v14329_v26  ;;  %13163 = vmatprep.mubr.msk.f32.mxu1 %vm15235_vm2, %v15234_v58  ;;  %v4812_v26 = vld [vmem:[%s18240_s2 + $0x1f0] sm:$0xff] }
 0x76f   : > { %14331 = vmatprep.subr.bf16.mxu1 %v18244_v14 }
 0x772   : > { %14333 = vmatpush3.bf16.msra.mxu1 %v14332_v7  ;;  %v4816_v7 = vld [vmem:[%s18240_s2 + $0x230] sm:$0xf] }
 0x773   : > { %14334 = vmatprep.subr.bf16.mxu1 %v18244_v14 }
 0x775   : > { %13164 = vmatmul.mubr.msk.f32.vlgmr.msra.gmra.mrb[36].mxu1 %vm3862_vm10, %v4492_v2  ;;  %v14369_v2 = vpack.c.bf16 %v5188_v37, %v5187_v22  ;;  %v5528_v22 = vld [vmem:[%s18239_s1 + $0x478] sm:$0xff] }
 0x776   : > { %14336 = vmatpush3.bf16.msra.mxu1 %v14335_v0  ;;  %13166 = vmatprep.mubr.msk.f32.mxu1 %vm15235_vm2, %v15234_v58  ;;  %v14365_v0 = vpack.c.bf16 %v5021_v39, %v5020_v62 }
 0x777   : > { %14337 = vmatprep.subr.bf16.mxu1 %v18244_v14 }
 0x779   : > { %13167 = vmatmul.mubr.msk.f32.gmra.mrb[38].mxu1 %vm3862_vm10, %v4493_v60 }
 0x77a   : > { %14339 = vmatpush3.bf16.msra.mxu1 %v14338_v4  ;;  %13169 = vmatprep.mubr.msk.f32.mxu1 %vm15235_vm2, %v15234_v58 }
 0x77b   : > { %14340 = vmatprep.subr.bf16.mxu1 %v18244_v14 }
 0x77d   : > { %13170 = vmatmul.mubr.msk.f32.gmra.mrb[40].mxu1 %vm3862_vm10, %v4494_v54  ;;  %v5190_v54 = vld [vmem:[%s18239_s1 + $0x438] sm:$0xff] }
 0x77e   : > { %14342 = vmatpush3.bf16.msra.mxu1 %v14341_v5  ;;  %13188 = vmatprep.mubr.msk.f32.mxu1 %vm15235_vm2, %v15234_v58  ;;  %v14373_v13 = vpack.c.bf16 %v5190_v54, %v5189_v1 }
 0x77f   : > { %14343 = vmatprep.subr.bf16.mxu1 %v18244_v14 }
 0x782   : > { %14345 = vmatpush3.bf16.msra.mxu1 %v14344_v11 }
 0x783   : > { %14346 = vmatprep.subr.bf16.mxu1 %v18244_v14 }
 0x785   : > { %13189 = vmatmul.mubr.msk.f32.vlgmr.msra.gmra.mrb[36].mxu1 %vm3862_vm10, %v4595_v19 }
 0x786   : > { %14348 = vmatpush3.bf16.msra.mxu1 %v14347_v28  ;;  %13191 = vmatprep.mubr.msk.f32.mxu1 %vm15235_vm2, %v15234_v58 }
 0x787   : > { %14349 = vmatprep.subr.bf16.mxu1 %v18244_v14 }
 0x789   : > { %13192 = vmatmul.mubr.msk.f32.gmra.mrb[38].mxu1 %vm3862_vm10, %v4596_v59 }
 0x78a   : > { %14351 = vmatpush3.bf16.msra.mxu1 %v14350_v47  ;;  %13194 = vmatprep.mubr.msk.f32.mxu1 %vm15235_vm2, %v15234_v58  ;;  %v14377_v47 = vpack.c.bf16 %v5357_v42, %v5356_v43  ;;  %v5696_v43 = vld [vmem:[%s18239_s1 + $0x490] sm:$0xff]  ;;  %v5697_v42 = vld [vmem:[%s18239_s1 + $0x498] sm:$0xff] }
 0x78b   : > { %14352 = vmatprep.subr.bf16.mxu1 %v18244_v14 }
 0x78d   : > { %13195 = vmatmul.mubr.msk.f32.gmra.mrb[40].mxu1 %vm3862_vm10, %v4597_v12 }
 0x78e   : > { %14354 = vmatpush3.bf16.msra.mxu1 %v14353_v16  ;;  %13213 = vmatprep.mubr.msk.f32.mxu1 %vm15235_vm2, %v15234_v58 }
 0x78f   : > { %14355 = vmatprep.subr.bf16.mxu1 %v18244_v14 }
 0x792   : > { %14357 = vmatpush3.bf16.msra.mxu1 %v14356_v24 }
 0x793   : > { %14433 = vmatprep.subr.bf16.mxu1 %v18244_v14 }
 0x795   : > { %13214 = vmatmul.mubr.msk.f32.vlgmr.msra.gmra.mrb[36].mxu1 %vm3862_vm10, %v16635_v63 }
 0x796   : > { %13216 = vmatprep.mubr.msk.f32.mxu1 %vm15235_vm2, %v15234_v58 }
 0x799   : > { %13217 = vmatmul.mubr.msk.f32.gmra.mrb[38].mxu1 %vm3862_vm10, %v4699_v31 }
 0x79a   : > { %13219 = vmatprep.mubr.msk.f32.mxu1 %vm15235_vm2, %v15234_v58 }
 0x79d   : > { %13220 = vmatmul.mubr.msk.f32.gmra.mrb[40].mxu1 %vm3862_vm10, %v4700_v9 }
 0x79e   : > { %13494 = vmatprep.mubr.msk.f32.mxu1 %vm15235_vm2, %v15234_v58 }
 0x868   : > { %v4784_v63 = vpop.f32.mrb[36].mxu1 }
 0x869   : > { %v13215_v45 = vpop.f32.mrb[37].mxu1  ;;  %v14493_v55 = vadd.f32 %v11425_v40, %v4784_v63 }
 0x86b   : > { %v4801_v53 = vmax.f32 %v14493_v55, 0.0 }
 0x86c   : > { %v4789_v21 = vpop.f32.mrb[38].mxu1 }
 0x86d   : > { %v14494_v20 = vadd.f32 %v11425_v40, %v4789_v21  ;;  %v13218_v6 = vpop.f32.mrb[39].mxu1 }
 0x86f   : > { %v4802_v23 = vmax.f32 %v14494_v20, 0.0 }
 0x870   : > { %v4794_v61 = vpop.f32.mrb[40].mxu1 }
 0x871   : > { %v14359_v46 = vpack.c.bf16 %v4802_v23, %v4801_v53  ;;  %v14495_v30 = vadd.f32 %v11425_v40, %v4794_v61  ;;  %v13221_v18 = vpop.f32.mrb[41].mxu1 }
 0x872   : > { %v5358_v18 = vld [vmem:[%s18239_s1 + $0x450] sm:$0xff] }
 0x873   : > { %14360 = vmatpush3.bf16.msra.mxu0 %v14359_v46  ;;  %v4803_v56 = vmax.f32 %v14495_v30, 0.0 }
 0x874   : > { %13226 = vmatprep.subr.mxu0 %v15234_v58 }
 0x877   : > { %13227 = vmatpush3.msk.msra.mxu0 %vm1648_vm1, %v4803_v56  ;;  %vm11118_vm1 = vcmask 5120  }
 0x878   : > { %13229 = vmatmul.mubr.msk.f32.vlgmr.msra.gmra.mrb[22].mxu0 %vm4817_vm12, %v4804_v41  ;;  %14362 = vmatprep.subr.bf16.mxu0 %v14361_v50  ;;  %v14381_v41 = vpack.c.bf16 %v5359_v3, %v5358_v18 }
 0x879   : > { %13231 = vmatprep.mubr.msk.f32.mxu0 %vm15235_vm2, %v15234_v58  ;;  %14364 = vmatpush3.bf16.msra.mxu0 %v14361_v50 }
 0x87a   : > { %14366 = vmatprep.subr.bf16.mxu0 %v14365_v0 }
 0x87c   : > { %13232 = vmatmul.mubr.msk.f32.gmra.mrb[24].mxu0 %vm4817_vm12, %v4805_v35 }
 0x87d   : > { %13234 = vmatprep.mubr.msk.f32.mxu0 %vm15235_vm2, %v15234_v58  ;;  %14368 = vmatpush3.bf16.msra.mxu0 %v14365_v0  ;;  %v5527_v0 = vld [vmem:[%s18239_s1 + $0x470] sm:$0xff] }
 0x87e   : > { %14370 = vmatprep.subr.bf16.mxu0 %v14369_v2 }
 0x880   : > { %13235 = vmatmul.mubr.msk.f32.gmra.mrb[26].mxu0 %vm4817_vm12, %v4806_v51  ;;  %v5525_v51 = vld [vmem:[%s18239_s1 + $0x460] sm:$0xff] }
 0x881   : > { %13237 = vmatprep.mubr.msk.f32.mxu0 %vm15235_vm2, %v15234_v58 }
 0x884   : > { %13238 = vmatmul.mubr.msk.f32.gmra.mrb[28].mxu0 %vm4817_vm12, %v4807_v52  ;;  %v5526_v52 = vld [vmem:[%s18239_s1 + $0x468] sm:$0xff] }
 0x885   : > { %13240 = vmatprep.mubr.msk.f32.mxu0 %vm15235_vm2, %v15234_v58 }
 0x888   : > { %13241 = vmatmul.mubr.msk.f32.gmra.mrb[30].mxu0 %vm4817_vm12, %v4808_v10 }
 0x889   : > { %13243 = vmatprep.mubr.msk.f32.mxu0 %vm15235_vm2, %v15234_v58 }
 0x88c   : > { %13244 = vmatmul.mubr.msk.f32.gmra.mrb[32].mxu0 %vm4817_vm12, %v4809_v34 }
 0x88d   : > { %13246 = vmatprep.mubr.msk.f32.mxu0 %vm15235_vm2, %v15234_v58 }
 0x890   : > { %13247 = vmatmul.mubr.msk.f32.gmra.mrb[34].mxu0 %vm4817_vm12, %v4810_v32 }
 0x891   : > { %13249 = vmatprep.mubr.msk.f32.mxu0 %vm15235_vm2, %v15234_v58 }
 0x894   : > { %13250 = vmatmul.mubr.msk.f32.gmra.mrb[36].mxu0 %vm4817_vm12, %v4811_v15  ;;  %v14385_v15 = vpack.c.bf16 %v5526_v52, %v5525_v51 }
 0x895   : > { %13252 = vmatprep.mubr.msk.f32.mxu0 %vm15235_vm2, %v15234_v58 }
 0x898   : > { %13253 = vmatmul.mubr.msk.f32.gmra.mrb[38].mxu0 %vm4817_vm12, %v4812_v26 }
 0x899   : > { %13255 = vmatprep.mubr.msk.f32.mxu0 %vm15235_vm2, %v15234_v58 }
 0x89c   : > { %13256 = vmatmul.mubr.msk.f32.gmra.mrb[40].mxu0 %vm4817_vm12, %v4813_v25 }
 0x89d   : > { %13258 = vmatprep.mubr.msk.f32.mxu0 %vm15235_vm2, %v15234_v58 }
 0x8a0   : > { %13259 = vmatmul.mubr.msk.f32.gmra.mrb[42].mxu0 %vm4817_vm12, %v4814_v27 }
 0x8a1   : > { %13261 = vmatprep.mubr.msk.f32.mxu0 %vm15235_vm2, %v15234_v58 }
 0x8a4   : > { %13262 = vmatmul.mubr.msk.f32.gmra.mrb[44].mxu0 %vm4817_vm12, %v4815_v57 }
 0x8a5   : > { %13264 = vmatprep.mubr.msk.f32.mxu0 %vm15235_vm2, %v15234_v58 }
 0x8a8   : > { %13265 = vmatmul.mubr.msk.f32.gmra.mrb[46].mxu0 %vm4817_vm12, %v4816_v7 }
 0x94b   : > { %v4926_v4 = vpop.f32.mrb[22].mxu0 }
 0x94c   : > { %4990 = vst.msk [vmem:[#allocation5] sm:$0xff] %vm3019_vm7, %v4926_v4  ;;  %v13230_v33 = vpop.f32.mrb[23].mxu0 }
 0x94d   : > { %v5694_v33 = vld [vmem:[%s18239_s1 + $0x480] sm:$0xff] }
 0x94f   : > { %v4931_v38 = vpop.f32.mrb[24].mxu0 }
 0x950   : > { %4991 = vst.msk [vmem:[#allocation5 + $0x8] sm:$0xff] %vm3019_vm7, %v4931_v38  ;;  %v13233_v60 = vpop.f32.mrb[25].mxu0  ;;  %v5695_v38 = vld [vmem:[%s18239_s1 + $0x488] sm:$0xff] }
 0x953   : > { %v4936_v5 = vpop.f32.mrb[26].mxu0  ;;  %v5008_v44 = vld [vmem:[#allocation5] sm:$0xff] }
 0x954   : > { %4992 = vst.msk [vmem:[#allocation5 + $0x10] sm:$0xff] %vm3019_vm7, %v4936_v5  ;;  %v13236_v11 = vpop.f32.mrb[27].mxu0  ;;  %13275 = vmatprep.mubr.msk.f32.mxu0 %vm3019_vm7, %v5008_v44  ;;  %v14393_v5 = vpack.c.bf16 %v5695_v38, %v5694_v33 }
 0x957   : > { %v4941_v36 = vpop.f32.mrb[28].mxu0  ;;  %v5009_v28 = vld [vmem:[#allocation5 + $0x8] sm:$0xff] }
 0x958   : > { %4993 = vst.msk [vmem:[#allocation5 + $0x18] sm:$0xff] %vm3019_vm7, %v4941_v36  ;;  %v13239_v19 = vpop.f32.mrb[29].mxu0  ;;  %13276 = vmatmul.mubr.msk.f32.vlgmr.msra.gmra.mrb[48].mxu0 %vm3019_vm7, %v5009_v28  ;;  %v5177_v50 = vld [vmem:[#allocation5 + $0x1] sm:$0xff] }
 0x959   : > { %14372 = vmatpush3.bf16.msra.mxu0 %v14369_v2  ;;  %v5346_v37 = vld [vmem:[#allocation5 + $0x2] sm:$0xff]  ;;  %v14389_v2 = vpack.c.bf16 %v5528_v22, %v5527_v0  ;;  %v14397_v19 = vpack.c.bf16 %v5697_v42, %v5696_v43 }
 0x95a   : > { %14374 = vmatprep.subr.bf16.mxu0 %v14373_v13 }
 0x95b   : > { %v4946_v8 = vpop.f32.mrb[30].mxu0  ;;  %v5010_v49 = vld [vmem:[#allocation5 + $0x10] sm:$0xff] }
 0x95c   : > { %4994 = vst.msk [vmem:[#allocation5 + $0x20] sm:$0xff] %vm3019_vm7, %v4946_v8  ;;  %v13242_v59 = vpop.f32.mrb[31].mxu0  ;;  %13278 = vmatprep.mubr.msk.f32.mxu0 %vm3019_vm7, %v5010_v49  ;;  %v5178_v35 = vld [vmem:[#allocation5 + $0x9] sm:$0xff] }
 0x95d   : > { %14376 = vmatpush3.bf16.msra.mxu0 %v14373_v13  ;;  %v5347_v4 = vld [vmem:[#allocation5 + $0xa] sm:$0xff] }
 0x95e   : > { %14378 = vmatprep.subr.bf16.mxu0 %v14377_v47  ;;  %v5864_v8 = vld [vmem:[%s18239_s1 + $0x4a8] sm:$0xff] }
 0x95f   : > { %v4951_v16 = vpop.f32.mrb[32].mxu0  ;;  %v5011_v29 = vld [vmem:[#allocation5 + $0x18] sm:$0xff]  ;;  %v5853_v18 = vld [vmem:[#allocation5 + $0xc] sm:$0xff] }
 0x960   : > { %4995 = vst.msk [vmem:[#allocation5 + $0x28] sm:$0xff] %vm3019_vm7, %v4951_v16  ;;  %v13245_v48 = vpop.f32.mrb[33].mxu0  ;;  %13279 = vmatmul.mubr.msk.f32.gmra.mrb[50].mxu0 %vm3019_vm7, %v5011_v29  ;;  %v5179_v34 = vld [vmem:[#allocation5 + $0x11] sm:$0xff] }
 0x961   : > { %v5348_v60 = vld [vmem:[#allocation5 + $0x12] sm:$0xff]  ;;  %v5866_v48 = vld [vmem:[%s18239_s1 + $0x4b8] sm:$0xff] }
 0x962   : > { %v5865_v29 = vld [vmem:[%s18239_s1 + $0x4b0] sm:$0xff] }
 0x963   : > { %v4956_v12 = vpop.f32.mrb[34].mxu0  ;;  %v5012_v24 = vld [vmem:[#allocation5 + $0x20] sm:$0xff] }
 0x964   : > { %4996 = vst.msk [vmem:[#allocation5 + $0x30] sm:$0xff] %vm3019_vm7, %v4956_v12  ;;  %v13248_v31 = vpop.f32.mrb[35].mxu0  ;;  %13281 = vmatprep.mubr.msk.f32.mxu0 %vm3019_vm7, %v5012_v24  ;;  %v5180_v26 = vld [vmem:[#allocation5 + $0x19] sm:$0xff]  ;;  %v5684_v12 = vld [vmem:[#allocation5 + $0xb] sm:$0xff]  ;;  %v14405_v24 = vpack.c.bf16 %v5866_v48, %v5865_v29 }
 0x965   : > { %v5349_v44 = vld [vmem:[#allocation5 + $0x1a] sm:$0xff] }
 0x966   : > { %v5685_v31 = vld [vmem:[#allocation5 + $0x13] sm:$0xff]  ;;  %v6192_v38 = vld [vmem:[#allocation5 + $0x1d] sm:$0xff]  ;;  %v11467_v48 = vld [vmem:[%s18239_s1 + $0x5b4] ss:$0 sm:$0xff] }
 0x967   : > { %v4961_v9 = vpop.f32.mrb[36].mxu0  ;;  %v5013_v40 = vld [vmem:[#allocation5 + $0x28] sm:$0xff]  ;;  %v6361_v43 = vld [vmem:[#allocation5 + $0x1e] sm:$0xff] }
 0x968   : > { %4997 = vst.msk [vmem:[#allocation5 + $0x38] sm:$0xff] %vm3019_vm7, %v4961_v9  ;;  %v13251_v63 = vpop.f32.mrb[37].mxu0  ;;  %13282 = vmatmul.mubr.msk.f32.gmra.mrb[52].mxu0 %vm3019_vm7, %v5013_v40  ;;  %v5181_v25 = vld [vmem:[#allocation5 + $0x21] sm:$0xff]  ;;  %v6033_v40 = vld [vmem:[%s18239_s1 + $0x4c8] sm:$0xff] }
 0x969   : > { %v5350_v1 = vld [vmem:[#allocation5 + $0x22] sm:$0xff] }
 0x96a   : > { %v6032_v9 = vld [vmem:[%s18239_s1 + $0x4c0] sm:$0xff]  ;;  %v5686_v63 = vld [vmem:[#allocation5 + $0x1b] sm:$0xff] }
 0x96b   : > { %v4966_v45 = vpop.f32.mrb[38].mxu0  ;;  %v5014_v55 = vld [vmem:[#allocation5 + $0x30] sm:$0xff]  ;;  %v5856_v51 = vld [vmem:[#allocation5 + $0x24] sm:$0xff] }
 0x96c   : > { %4998 = vst.msk [vmem:[#allocation5 + $0x40] sm:$0xff] %vm3019_vm7, %v4966_v45  ;;  %v13254_v21 = vpop.f32.mrb[39].mxu0  ;;  %13284 = vmatprep.mubr.msk.f32.mxu0 %vm3019_vm7, %v5014_v55  ;;  %v5182_v27 = vld [vmem:[#allocation5 + $0x29] sm:$0xff]  ;;  %v14409_v45 = vpack.c.bf16 %v6033_v40, %v6032_v9 }
 0x96d   : > { %v5351_v54 = vld [vmem:[#allocation5 + $0x2a] sm:$0xff] }
 0x96e   : > { %v5687_v55 = vld [vmem:[#allocation5 + $0x23] sm:$0xff]  ;;  %v5688_v21 = vld [vmem:[#allocation5 + $0x2b] sm:$0xff] }
 0x96f   : > { %v4971_v20 = vpop.f32.mrb[40].mxu0  ;;  %v5015_v6 = vld [vmem:[#allocation5 + $0x38] sm:$0xff]  ;;  %v5857_v52 = vld [vmem:[#allocation5 + $0x2c] sm:$0xff] }
 0x970   : > { %4999 = vst.msk [vmem:[#allocation5 + $0x48] sm:$0xff] %vm3019_vm7, %v4971_v20  ;;  %13285 = vmatmul.mubr.msk.f32.gmra.mrb[54].mxu0 %vm3019_vm7, %v5015_v6  ;;  %v13257_v53 = vpop.f32.mrb[41].mxu0  ;;  %v5183_v57 = vld [vmem:[#allocation5 + $0x31] sm:$0xff]  ;;  %v6362_v42 = vld [vmem:[#allocation5 + $0x26] sm:$0xff] }
 0x971   : > { %v5352_v11 = vld [vmem:[#allocation5 + $0x32] sm:$0xff] }
 0x972   : > { %v5689_v20 = vld [vmem:[#allocation5 + $0x33] sm:$0xff] }
 0x973   : > { %v5016_v23 = vld [vmem:[#allocation5 + $0x40] sm:$0xff]  ;;  %v4976_v61 = vpop.f32.mrb[42].mxu0 }
 0x974   : > { %13287 = vmatprep.mubr.msk.f32.mxu0 %vm3019_vm7, %v5016_v23  ;;  %5000 = vst.msk [vmem:[#allocation5 + $0x50] sm:$0xff] %vm3019_vm7, %v4976_v61  ;;  %v13260_v46 = vpop.f32.mrb[43].mxu0  ;;  %v5184_v7 = vld [vmem:[#allocation5 + $0x39] sm:$0xff] }
 0x975   : > { %v5353_v13 = vld [vmem:[#allocation5 + $0x3a] sm:$0xff] }
 0x976   : > { %v5690_v6 = vld [vmem:[#allocation5 + $0x3b] sm:$0xff] }
 0x977   : > { %v5017_v30 = vld [vmem:[#allocation5 + $0x48] sm:$0x3f]  ;;  %v4981_v17 = vpop.f32.mrb[44].mxu0  ;;  %v6034_v46 = vld [vmem:[%s18239_s1 + $0x4d0] sm:$0xff] }
 0x978   : > { %13288 = vmatmul.mubr.msk.f32.gmra.mrb[56].mxu0 %vm3019_vm7, %v5017_v30  ;;  %5001 = vst.msk [vmem:[#allocation5 + $0x58] sm:$0xff] %vm3019_vm7, %v4981_v17  ;;  %v13263_v56 = vpop.f32.mrb[45].mxu0  ;;  %v5185_v62 = vld [vmem:[#allocation5 + $0x41] sm:$0xff]  ;;  %v5186_v39 = vld [vmem:[#allocation5 + $0x49] sm:$0x3f]  ;;  %v5854_v17 = vld [vmem:[#allocation5 + $0x14] sm:$0xff] }
 0x979   : > { %13298 = vmatprep.mubr.msk.f32.mxu0 %vm3019_vm7, %v5177_v50  ;;  %v5354_v36 = vld [vmem:[#allocation5 + $0x42] sm:$0xff]  ;;  %v5355_v28 = vld [vmem:[#allocation5 + $0x4a] sm:$0x3f]  ;;  %v6202_v56 = vld [vmem:[%s18239_s1 + $0x4e8] sm:$0xff] }
 0x97a   : > { %v5691_v53 = vld [vmem:[#allocation5 + $0x43] sm:$0xff] }
 0x97b   : > { %v4986_v10 = vpop.f32.mrb[46].mxu0  ;;  %v5523_v59 = vld [vmem:[#allocation5 + $0x4a] sm:$0xff]  ;;  %v5524_v16 = vld [vmem:[#allocation5 + $0x52] sm:$0x3f]  ;;  %v6035_v30 = vld [vmem:[%s18239_s1 + $0x4d8] sm:$0xff] }
 0x97c   : > { %13299 = vmatmul.mubr.msk.f32.vlgmr.msra.gmra.mrb[48].mxu0 %vm3019_vm7, %v5178_v35  ;;  %5002 = vst.msk [vmem:[#allocation5 + $0x60] sm:$0xf] %vm3024_vm8, %v4986_v10  ;;  %v13266_v32 = vpop.f32.mrb[47].mxu0  ;;  %v5692_v23 = vld [vmem:[#allocation5 + $0x4b] sm:$0xff]  ;;  %v14413_v3 = vpack.c.bf16 %v6035_v30, %v6034_v46  ;;  %v5858_v10 = vld [vmem:[#allocation5 + $0x34] sm:$0xff] }
 0x97d   : > { %13301 = vmatprep.mubr.msk.f32.mxu0 %vm3019_vm7, %v5179_v34  ;;  %14380 = vmatpush3.bf16.msra.mxu0 %v14377_v47  ;;  %v5863_v47 = vld [vmem:[%s18239_s1 + $0x4a0] sm:$0xff]  ;;  %v5859_v34 = vld [vmem:[#allocation5 + $0x3c] sm:$0xff] }
 0x97e   : > { %14382 = vmatprep.subr.bf16.mxu0 %v14381_v41  ;;  %v14401_v49 = vpack.c.bf16 %v5864_v8, %v5863_v47  ;;  %v6201_v50 = vld [vmem:[%s18239_s1 + $0x4e0] sm:$0xff]  ;;  %v6364_v47 = vld [vmem:[#allocation5 + $0x36] sm:$0xff]  ;;  %v6365_v8 = vld [vmem:[#allocation5 + $0x3e] sm:$0xff] }
 0x97f   : > { %v5693_v61 = vld [vmem:[#allocation5 + $0x53] sm:$0x3f]  ;;  %v14417_v35 = vpack.c.bf16 %v6202_v56, %v6201_v50  ;;  %v5860_v32 = vld [vmem:[#allocation5 + $0x44] sm:$0xff] }
 0x980   : > { %13302 = vmatmul.mubr.msk.f32.gmra.mrb[50].mxu0 %vm3019_vm7, %v5180_v26  ;;  %v5862_v26 = vld [vmem:[#allocation5 + $0x54] sm:$0x3f] }
 0x981   : > { %13304 = vmatprep.mubr.msk.f32.mxu0 %vm3019_vm7, %v5181_v25  ;;  %14384 = vmatpush3.bf16.msra.mxu0 %v14381_v41  ;;  %v5855_v41 = vld [vmem:[#allocation5 + $0x1c] sm:$0xff]  ;;  %v6030_v0 = vld [vmem:[#allocation5 + $0x54] sm:$0xff] }
 0x982   : > { %14386 = vmatprep.subr.bf16.mxu0 %v14385_v15  ;;  %v6203_v25 = vld [vmem:[%s18239_s1 + $0x4f0] sm:$0xff] }
 0x983   : > { %v6031_v22 = vld [vmem:[#allocation5 + $0x5c] sm:$0x3f] }
 0x984   : > { %13305 = vmatmul.mubr.msk.f32.gmra.mrb[52].mxu0 %vm3019_vm7, %v5182_v27  ;;  %v6204_v27 = vld [vmem:[%s18239_s1 + $0x4f8] sm:$0xff] }
 0x985   : > { %13307 = vmatprep.mubr.msk.f32.mxu0 %vm3019_vm7, %v5183_v57  ;;  %v14421_v57 = vpack.c.bf16 %v6204_v27, %v6203_v25  ;;  %v6369_v29 = vld [vmem:[#allocation5 + $0x5e] sm:$0x3f] }
 0x988   : > { %13308 = vmatmul.mubr.msk.f32.gmra.mrb[54].mxu0 %vm3019_vm7, %v5184_v7  ;;  %v6370_v7 = vld [vmem:[%s18239_s1 + $0x500] sm:$0xff] }
 0x989   : > { %13310 = vmatprep.mubr.msk.f32.mxu0 %vm3019_vm7, %v5185_v62  ;;  %v6371_v62 = vld [vmem:[%s18239_s1 + $0x508] sm:$0xff] }
 0x98c   : > { %13311 = vmatmul.mubr.msk.f32.gmra.mrb[56].mxu0 %vm3019_vm7, %v5186_v39  ;;  %v14425_v39 = vpack.c.bf16 %v6371_v62, %v6370_v7 }
 0x98d   : > { %13321 = vmatprep.mubr.msk.f32.mxu0 %vm3019_vm7, %v5346_v37  ;;  %v6372_v37 = vld [vmem:[%s18239_s1 + $0x510] sm:$0xff] }
 0x990   : > { %13322 = vmatmul.mubr.msk.f32.vlgmr.msra.gmra.mrb[48].mxu0 %vm3019_vm7, %v5347_v4 }
 0x991   : > { %13324 = vmatprep.mubr.msk.f32.mxu0 %vm3019_vm7, %v5348_v60  ;;  %14388 = vmatpush3.bf16.msra.mxu0 %v14385_v15  ;;  %v5861_v15 = vld [vmem:[#allocation5 + $0x4c] sm:$0xff] }
 0x992   : > { %14390 = vmatprep.subr.bf16.mxu0 %v14389_v2 }
 0x994   : > { %13325 = vmatmul.mubr.msk.f32.gmra.mrb[50].mxu0 %vm3019_vm7, %v5349_v44 }
 0x995   : > { %13327 = vmatprep.mubr.msk.f32.mxu0 %vm3019_vm7, %v5350_v1  ;;  %14392 = vmatpush3.bf16.msra.mxu0 %v14389_v2  ;;  %v6373_v2 = vld [vmem:[%s18239_s1 + $0x518] sm:$0xff] }
 0x996   : > { %14394 = vmatprep.subr.bf16.mxu0 %v14393_v5  ;;  %v14429_v33 = vpack.c.bf16 %v6373_v2, %v6372_v37  ;;  %v6543_v37 = vld [vmem:[%s18240_s2 + $0x280] sm:$0xff]  ;;  %v6544_v2 = vld [vmem:[%s18240_s2 + $0x290] sm:$0xff] }
 0x998   : > { %13328 = vmatmul.mubr.msk.f32.gmra.mrb[52].mxu0 %vm3019_vm7, %v5351_v54 }
 0x999   : > { %13330 = vmatprep.mubr.msk.f32.mxu0 %vm3019_vm7, %v5352_v11 }
 0x99c   : > { %13331 = vmatmul.mubr.msk.f32.gmra.mrb[54].mxu0 %vm3019_vm7, %v5353_v13 }
 0x99d   : > { %13333 = vmatprep.mubr.msk.f32.mxu0 %vm3019_vm7, %v5354_v36 }
 0x9a0   : > { %13334 = vmatmul.mubr.msk.f32.gmra.mrb[56].mxu0 %vm3019_vm7, %v5355_v28  ;;  %v6360_v28 = vld [vmem:[#allocation5 + $0x16] sm:$0xff] }
 0x9a1   : > { %13344 = vmatprep.mubr.msk.f32.mxu0 %vm3019_vm7, %v5347_v4  ;;  %v6191_v4 = vld [vmem:[#allocation5 + $0x15] sm:$0xff] }
 0x9a4   : > { %13345 = vmatmul.mubr.msk.f32.vlgmr.msra.gmra.mrb[48].mxu0 %vm3019_vm7, %v5348_v60  ;;  %v6193_v60 = vld [vmem:[#allocation5 + $0x25] sm:$0xff] }
 0x9a5   : > { %13347 = vmatprep.mubr.msk.f32.mxu0 %vm3019_vm7, %v5349_v44  ;;  %14396 = vmatpush3.bf16.msra.mxu0 %v14393_v5  ;;  %v6194_v5 = vld [vmem:[#allocation5 + $0x2d] sm:$0xff]  ;;  %v6195_v44 = vld [vmem:[#allocation5 + $0x35] sm:$0xff] }
 0x9a6   : > { %14398 = vmatprep.subr.bf16.mxu0 %v14397_v19 }
 0x9a8   : > { %13348 = vmatmul.mubr.msk.f32.gmra.mrb[50].mxu0 %vm3019_vm7, %v5350_v1  ;;  %v6196_v1 = vld [vmem:[#allocation5 + $0x3d] sm:$0xff] }
 0x9a9   : > { %13350 = vmatprep.mubr.msk.f32.mxu0 %vm3019_vm7, %v5351_v54  ;;  %14400 = vmatpush3.bf16.msra.mxu0 %v14397_v19  ;;  %v6197_v54 = vld [vmem:[#allocation5 + $0x45] sm:$0xff]  ;;  %v6363_v19 = vld [vmem:[#allocation5 + $0x2e] sm:$0xff] }
 0x9aa   : > { %14402 = vmatprep.subr.bf16.mxu0 %v14401_v49 }
 0x9ac   : > { %13351 = vmatmul.mubr.msk.f32.gmra.mrb[52].mxu0 %vm3019_vm7, %v5352_v11  ;;  %v6198_v11 = vld [vmem:[#allocation5 + $0x4d] sm:$0xff] }
 0x9ad   : > { %13353 = vmatprep.mubr.msk.f32.mxu0 %vm3019_vm7, %v5353_v13  ;;  %v6199_v13 = vld [vmem:[#allocation5 + $0x55] sm:$0xff] }
 0x9b0   : > { %13354 = vmatmul.mubr.msk.f32.gmra.mrb[54].mxu0 %vm3019_vm7, %v5354_v36  ;;  %v6200_v36 = vld [vmem:[#allocation5 + $0x5d] sm:$0x3f] }
 0x9b1   : > { %13356 = vmatprep.mubr.msk.f32.mxu0 %vm3019_vm7, %v5523_v59  ;;  %v6367_v59 = vld [vmem:[#allocation5 + $0x4e] sm:$0xff] }
 0x9b4   : > { %13357 = vmatmul.mubr.msk.f32.gmra.mrb[56].mxu0 %vm3019_vm7, %v5524_v16  ;;  %v6368_v16 = vld [vmem:[#allocation5 + $0x56] sm:$0xff] }
 0x9b5   : > { %13367 = vmatprep.mubr.msk.f32.mxu0 %vm3019_vm7, %v5684_v12 }
 0x9b8   : > { %13368 = vmatmul.mubr.msk.f32.vlgmr.msra.gmra.mrb[48].mxu0 %vm3019_vm7, %v5685_v31 }
 0x9b9   : > { %13370 = vmatprep.mubr.msk.f32.mxu0 %vm3019_vm7, %v5686_v63  ;;  %14404 = vmatpush3.bf16.msra.mxu0 %v14401_v49  ;;  %v6366_v49 = vld [vmem:[#allocation5 + $0x46] sm:$0xff] }
 0x9ba   : > { %14406 = vmatprep.subr.bf16.mxu0 %v14405_v24 }
 0x9bc   : > { %13371 = vmatmul.mubr.msk.f32.gmra.mrb[50].mxu0 %vm3019_vm7, %v5687_v55 }
 0x9bd   : > { %13373 = vmatprep.mubr.msk.f32.mxu0 %vm3019_vm7, %v5688_v21  ;;  %14408 = vmatpush3.bf16.msra.mxu0 %v14405_v24 }
 0x9be   : > { %14410 = vmatprep.subr.bf16.mxu0 %v14409_v45 }
 0x9c0   : > { %13374 = vmatmul.mubr.msk.f32.gmra.mrb[52].mxu0 %vm3019_vm7, %v5689_v20 }
 0x9c1   : > { %13376 = vmatprep.mubr.msk.f32.mxu0 %vm3019_vm7, %v5690_v6 }
 0x9c4   : > { %13377 = vmatmul.mubr.msk.f32.gmra.mrb[54].mxu0 %vm3019_vm7, %v5691_v53 }
 0x9c5   : > { %13379 = vmatprep.mubr.msk.f32.mxu0 %vm3019_vm7, %v5692_v23 }
 0x9c8   : > { %13380 = vmatmul.mubr.msk.f32.gmra.mrb[56].mxu0 %vm3019_vm7, %v5693_v61 }
 0x9c9   : > { %13390 = vmatprep.mubr.msk.f32.mxu0 %vm3019_vm7, %v5853_v18 }
 0x9cc   : > { %13391 = vmatmul.mubr.msk.f32.vlgmr.msra.gmra.mrb[48].mxu0 %vm3019_vm7, %v5854_v17 }
 0x9cd   : > { %13393 = vmatprep.mubr.msk.f32.mxu0 %vm3019_vm7, %v5855_v41  ;;  %14412 = vmatpush3.bf16.msra.mxu0 %v14409_v45 }
 0x9ce   : > { %14414 = vmatprep.subr.bf16.mxu0 %v14413_v3 }
 0x9d0   : > { %13394 = vmatmul.mubr.msk.f32.gmra.mrb[50].mxu0 %vm3019_vm7, %v5856_v51 }
 0x9d1   : > { %13396 = vmatprep.mubr.msk.f32.mxu0 %vm3019_vm7, %v5857_v52  ;;  %14416 = vmatpush3.bf16.msra.mxu0 %v14413_v3 }
 0x9d2   : > { %14418 = vmatprep.subr.bf16.mxu0 %v14417_v35 }
 0x9d4   : > { %13397 = vmatmul.mubr.msk.f32.gmra.mrb[52].mxu0 %vm3019_vm7, %v5858_v10 }
 0x9d5   : > { %13399 = vmatprep.mubr.msk.f32.mxu0 %vm3019_vm7, %v5859_v34 }
 0x9d8   : > { %13400 = vmatmul.mubr.msk.f32.gmra.mrb[54].mxu0 %vm3019_vm7, %v5860_v32 }
 0x9d9   : > { %13402 = vmatprep.mubr.msk.f32.mxu0 %vm3019_vm7, %v5861_v15 }
 0x9dc   : > { %13403 = vmatmul.mubr.msk.f32.gmra.mrb[56].mxu0 %vm3019_vm7, %v5862_v26 }
 0x9dd   : > { %13413 = vmatprep.mubr.msk.f32.mxu0 %vm3019_vm7, %v5854_v17 }
 0x9e0   : > { %13414 = vmatmul.mubr.msk.f32.vlgmr.msra.gmra.mrb[48].mxu0 %vm3019_vm7, %v5855_v41 }
 0x9e1   : > { %13416 = vmatprep.mubr.msk.f32.mxu0 %vm3019_vm7, %v5856_v51  ;;  %14420 = vmatpush3.bf16.msra.mxu0 %v14417_v35 }
 0x9e2   : > { %14422 = vmatprep.subr.bf16.mxu0 %v14421_v57 }
 0x9e4   : > { %13417 = vmatmul.mubr.msk.f32.gmra.mrb[50].mxu0 %vm3019_vm7, %v5857_v52 }
 0x9e5   : > { %13419 = vmatprep.mubr.msk.f32.mxu0 %vm3019_vm7, %v5858_v10  ;;  %14424 = vmatpush3.bf16.msra.mxu0 %v14421_v57 }
 0x9e6   : > { %14426 = vmatprep.subr.bf16.mxu0 %v14425_v39 }
 0x9e8   : > { %13420 = vmatmul.mubr.msk.f32.gmra.mrb[52].mxu0 %vm3019_vm7, %v5859_v34 }
 0x9e9   : > { %13422 = vmatprep.mubr.msk.f32.mxu0 %vm3019_vm7, %v5860_v32 }
 0x9ec   : > { %13423 = vmatmul.mubr.msk.f32.gmra.mrb[54].mxu0 %vm3019_vm7, %v5861_v15 }
 0x9ed   : > { %13425 = vmatprep.mubr.msk.f32.mxu0 %vm3019_vm7, %v6030_v0  ;;  %v6540_v0 = vld [vmem:[%s18240_s2 + $0x250] sm:$0xff] }
 0x9f0   : > { %13426 = vmatmul.mubr.msk.f32.gmra.mrb[56].mxu0 %vm3019_vm7, %v6031_v22  ;;  %v6542_v22 = vld [vmem:[%s18240_s2 + $0x270] sm:$0xff] }
 0x9f1   : > { %13436 = vmatprep.mubr.msk.f32.mxu0 %vm3019_vm7, %v6191_v4  ;;  %v6545_v4 = vld [vmem:[%s18240_s2 + $0x2a0] sm:$0xff] }
 0x9f4   : > { %13437 = vmatmul.mubr.msk.f32.vlgmr.msra.gmra.mrb[48].mxu0 %vm3019_vm7, %v6192_v38  ;;  %v6547_v38 = vld [vmem:[%s18240_s2 + $0x2c0] sm:$0xff] }
 0x9f5   : > { %13439 = vmatprep.mubr.msk.f32.mxu0 %vm3019_vm7, %v6193_v60  ;;  %14428 = vmatpush3.bf16.msra.mxu0 %v14425_v39  ;;  %v6539_v39 = vld [vmem:[%s18240_s2 + $0x240] sm:$0xff]  ;;  %v6548_v60 = vld [vmem:[%s18240_s2 + $0x2d0] sm:$0xff] }
 0x9f6   : > { %14430 = vmatprep.subr.bf16.mxu0 %v14429_v33 }
 0x9f8   : > { %13440 = vmatmul.mubr.msk.f32.gmra.mrb[50].mxu0 %vm3019_vm7, %v6194_v5  ;;  %v6549_v5 = vld [vmem:[%s18240_s2 + $0x2e0] sm:$0xff] }
 0x9f9   : > { %13442 = vmatprep.mubr.msk.f32.mxu0 %vm3019_vm7, %v6195_v44  ;;  %14432 = vmatpush3.bf16.msra.mxu0 %v14429_v33  ;;  %v6546_v33 = vld [vmem:[%s18240_s2 + $0x2b0] sm:$0xff] }
 0x9fa   : > { %v6550_v44 = vld [vmem:[%s18240_s2 + $0x2f0] sm:$0xff] }
 0x9fc   : > { %13443 = vmatmul.mubr.msk.f32.gmra.mrb[52].mxu0 %vm3019_vm7, %v6196_v1  ;;  %v6551_v1 = vld [vmem:[%s18240_s2 + $0x300] sm:$0xff] }
 0x9fd   : > { %13445 = vmatprep.mubr.msk.f32.mxu0 %vm3019_vm7, %v6197_v54  ;;  %v6552_v54 = vld [vmem:[%s18240_s2 + $0x310] sm:$0xff] }
 0xa00   : > { %13446 = vmatmul.mubr.msk.f32.gmra.mrb[54].mxu0 %vm3019_vm7, %v6198_v11  ;;  %v6553_v11 = vld [vmem:[%s18240_s2 + $0x320] sm:$0xff] }
 0xa01   : > { %13448 = vmatprep.mubr.msk.f32.mxu0 %vm3019_vm7, %v6199_v13  ;;  %v6554_v13 = vld [vmem:[%s18240_s2 + $0x330] sm:$0xff] }
 0xa04   : > { %13449 = vmatmul.mubr.msk.f32.gmra.mrb[56].mxu0 %vm3019_vm7, %v6200_v36  ;;  %v6555_v36 = vld [vmem:[%s18240_s2 + $0x340] sm:$0xff] }
 0xa05   : > { %13459 = vmatprep.mubr.msk.f32.mxu0 %vm3019_vm7, %v6360_v28  ;;  %v6556_v28 = vld [vmem:[%s18240_s2 + $0x350] sm:$0xff] }
 0xa08   : > { %13460 = vmatmul.mubr.msk.f32.vlgmr.msra.gmra.mrb[48].mxu0 %vm3019_vm7, %v6361_v43  ;;  %v6557_v43 = vld [vmem:[%s18240_s2 + $0x360] sm:$0xff] }
 0xa09   : > { %13462 = vmatprep.mubr.msk.f32.mxu0 %vm3019_vm7, %v6362_v42  ;;  %v6558_v42 = vld [vmem:[%s18240_s2 + $0x370] sm:$0xff] }
 0xa0c   : > { %13463 = vmatmul.mubr.msk.f32.gmra.mrb[50].mxu0 %vm3019_vm7, %v6363_v19  ;;  %v6559_v19 = vld [vmem:[%s18240_s2 + $0x380] sm:$0xff] }
 0xa0d   : > { %13465 = vmatprep.mubr.msk.f32.mxu0 %vm3019_vm7, %v6364_v47  ;;  %v6560_v47 = vld [vmem:[%s18240_s2 + $0x390] sm:$0xff] }
 0xa10   : > { %13466 = vmatmul.mubr.msk.f32.gmra.mrb[52].mxu0 %vm3019_vm7, %v6365_v8  ;;  %v6561_v8 = vld [vmem:[%s18240_s2 + $0x3a0] sm:$0xff] }
 0xa11   : > { %13468 = vmatprep.mubr.msk.f32.mxu0 %vm3019_vm7, %v6366_v49  ;;  %v6562_v49 = vld [vmem:[%s18240_s2 + $0x3b0] sm:$0xff] }
 0xa14   : > { %13469 = vmatmul.mubr.msk.f32.gmra.mrb[54].mxu0 %vm3019_vm7, %v6367_v59  ;;  %v7059_v59 = vld [vmem:[%s18239_s1 + $0x520] sm:$0xff] }
 0xa15   : > { %13471 = vmatprep.mubr.msk.f32.mxu0 %vm3019_vm7, %v6368_v16  ;;  %v7060_v16 = vld [vmem:[%s18239_s1 + $0x528] sm:$0xff] }
 0xa18   : > { %13472 = vmatmul.mubr.msk.f32.gmra.mrb[56].mxu0 %vm3019_vm7, %v6369_v29  ;;  %v14449_v29 = vpack.c.bf16 %v7060_v16, %v7059_v59 }
 0xadb   : > { %v13461_v12 = vpop.f32.mrb[48].mxu0 }
 0xadc   : > { %v14496_v24 = vadd.f32 %v13461_v12, %v11467_v48  ;;  %v6470_v31 = vpop.f32.mrb[49].mxu0  ;;  %v7913_v12 = vld [vmem:[%s18239_s1 + $0x540] sm:$0xff] }
 0xadd   : > { %v14497_v9 = vadd.f32 %v11467_v48, %v6470_v31 }
 0xade   : > { %v6530_v40 = vmax.f32 %v14496_v24, 0.0  ;;  %v7914_v24 = vld [vmem:[%s18239_s1 + $0x548] sm:$0xff] }
 0xadf   : > { %v6529_v63 = vmax.f32 %v14497_v9, 0.0  ;;  %v13464_v45 = vpop.f32.mrb[50].mxu0  ;;  %v17272_v31 = vpack.c.bf16 %v7914_v24, %v7913_v12  ;;  %v6564_v9 = vld [vmem:[%s18240_s2 + $0x3d0] sm:$0xff] }
 0xae0   : > { %v14498_v55 = vadd.f32 %v13464_v45, %v11467_v48  ;;  %v6480_v21 = vpop.f32.mrb[51].mxu0  ;;  %v8341_v45 = vld [vmem:[%s18239_s1 + $0x558] sm:$0xff] }
 0xae1   : > { %v14434_v20 = vpack.c.bf16 %v6530_v40, %v6529_v63  ;;  %v14499_v6 = vadd.f32 %v11467_v48, %v6480_v21  ;;  %14458 = vmatprep.subr.bf16.mxu0 %v17272_v31  ;;  %v6565_v40 = vld [vmem:[%s18240_s2 + $0x3e0] sm:$0xff]  ;;  %v8340_v63 = vld [vmem:[%s18239_s1 + $0x550] sm:$0xff] }
 0xae2   : > { %v6532_v53 = vmax.f32 %v14498_v55, 0.0  ;;  %14460 = vmatpush3.bf16.msra.mxu0 %v17272_v31  ;;  %v17294_v55 = vpack.c.bf16 %v8341_v45, %v8340_v63  ;;  %v6566_v21 = vld [vmem:[%s18240_s2 + $0x3f0] sm:$0xff] }
 0xae3   : > { %v6531_v23 = vmax.f32 %v14499_v6, 0.0  ;;  %v13467_v61 = vpop.f32.mrb[52].mxu0  ;;  %14435 = vmatpush3.bf16.msra.mxu1 %v14434_v20  ;;  %v6567_v20 = vld [vmem:[%s18240_s2 + $0x400] sm:$0xff]  ;;  %v6568_v6 = vld [vmem:[%s18240_s2 + $0x410] sm:$0xff] }
 0xae4   : > { %v14500_v46 = vadd.f32 %v13467_v61, %v11467_v48  ;;  %v6490_v30 = vpop.f32.mrb[53].mxu0  ;;  %14436 = vmatprep.subr.bf16.mxu1 %v18244_v14  ;;  %14462 = vmatprep.subr.bf16.mxu0 %v17294_v55  ;;  %v6571_v61 = vld [vmem:[%s18240_s2 + $0x440] sm:$0xff] }
 0xae5   : > { %v14437_v18 = vpack.c.bf16 %v6532_v53, %v6531_v23  ;;  %v14501_v3 = vadd.f32 %v11467_v48, %v6490_v30  ;;  %v6569_v53 = vld [vmem:[%s18240_s2 + $0x420] sm:$0xff]  ;;  %v6570_v23 = vld [vmem:[%s18240_s2 + $0x430] sm:$0xff] }
 0xae6   : > { %v6534_v17 = vmax.f32 %v14500_v46, 0.0  ;;  %v6572_v46 = vld [vmem:[%s18240_s2 + $0x450] sm:$0xff]  ;;  %v6573_v30 = vld [vmem:[%s18240_s2 + $0x460] sm:$0xff] }
 0xae7   : > { %v6533_v50 = vmax.f32 %v14501_v3, 0.0  ;;  %v13470_v56 = vpop.f32.mrb[54].mxu0  ;;  %14438 = vmatpush3.bf16.msra.mxu1 %v14437_v18  ;;  %v6574_v18 = vld [vmem:[%s18240_s2 + $0x470] sm:$0xff]  ;;  %v6575_v3 = vld [vmem:[%s18240_s2 + $0x480] sm:$0xff] }
 0xae8   : > { %v14502_v41 = vadd.f32 %v13470_v56, %v11467_v48  ;;  %v6500_v35 = vpop.f32.mrb[55].mxu0  ;;  %14439 = vmatprep.subr.bf16.mxu1 %v18244_v14  ;;  %v6578_v56 = vld [vmem:[%s18240_s2 + $0x4b0] sm:$0xff] }
 0xae9   : > { %v14440_v51 = vpack.c.bf16 %v6534_v17, %v6533_v50  ;;  %v14503_v52 = vadd.f32 %v11467_v48, %v6500_v35  ;;  %v6576_v17 = vld [vmem:[%s18240_s2 + $0x490] sm:$0xff]  ;;  %v6577_v50 = vld [vmem:[%s18240_s2 + $0x4a0] sm:$0xff] }
 0xaea   : > { %v6536_v10 = vmax.f32 %v14502_v41, 0.0  ;;  %v6579_v41 = vld [vmem:[%s18240_s2 + $0x4c0] sm:$0xf] }
 0xaeb   : > { %v6535_v34 = vmax.f32 %v14503_v52, 0.0  ;;  %v13473_v32 = vpop.f32.mrb[56].mxu0  ;;  %14441 = vmatpush3.bf16.msra.mxu1 %v14440_v51 }
 0xaec   : > { %v14504_v15 = vadd.f32 %v13473_v32, %v11467_v48  ;;  %v6510_v26 = vpop.f32.mrb[57].mxu0  ;;  %14442 = vmatprep.subr.bf16.mxu1 %v18244_v14 }
 0xaed   : > { %v14443_v25 = vpack.c.bf16 %v6536_v10, %v6535_v34  ;;  %v14505_v27 = vadd.f32 %v11467_v48, %v6510_v26  ;;  %v6563_v48 = vld [vmem:[%s18240_s2 + $0x3c0] sm:$0xff] }
 0xaee   : > { %v6538_v57 = vmax.f32 %v14504_v15, 0.0 }
 0xaef   : > { %v6537_v7 = vmax.f32 %v14505_v27, 0.0  ;;  %14444 = vmatpush3.bf16.msra.mxu1 %v14443_v25 }
 0xaf0   : > { %14445 = vmatprep.subr.bf16.mxu1 %v18244_v14  ;;  %v6541_v14 = vld [vmem:[%s18240_s2 + $0x260] sm:$0xff] }
 0xaf1   : > { %v14446_v62 = vpack.c.bf16 %v6538_v57, %v6537_v7  ;;  %v8768_v57 = vld [vmem:[%s18239_s1 + $0x568] sm:$0xff] }
 0xaf3   : > { %14448 = vmatpush3.bf16.msk.msra.mxu1 %vm14447_vm14, %v14446_v62 }
 0xaf4   : > { %14450 = vmatprep.subr.bf16.mxu1 %v14449_v29 }
 0xaf6   : > { %13495 = vmatmul.mubr.msk.f32.vlgmr.msra.gmra.mrb[42].mxu1 %vm6580_vm15, %v6539_v39 }
 0xaf7   : > { %13497 = vmatprep.mubr.msk.f32.mxu1 %vm15235_vm2, %v15234_v58  ;;  %14452 = vmatpush3.bf16.msra.mxu1 %v14449_v29 }
 0xafa   : > { %13498 = vmatmul.mubr.msk.f32.gmra.mrb[44].mxu1 %vm6580_vm15, %v6540_v0 }
 0xafb   : > { %13500 = vmatprep.mubr.msk.f32.mxu1 %vm15235_vm2, %v15234_v58 }
 0xafe   : > { %13501 = vmatmul.mubr.msk.f32.gmra.mrb[46].mxu1 %vm6580_vm15, %v6541_v14 }
 0xaff   : > { %13503 = vmatprep.mubr.msk.f32.mxu1 %vm15235_vm2, %v15234_v58 }
 0xb02   : > { %13504 = vmatmul.mubr.msk.f32.gmra.mrb[48].mxu1 %vm6580_vm15, %v6542_v22 }
 0xb03   : > { %13506 = vmatprep.mubr.msk.f32.mxu1 %vm15235_vm2, %v15234_v58 }
 0xb06   : > { %13507 = vmatmul.mubr.msk.f32.gmra.mrb[50].mxu1 %vm6580_vm15, %v6543_v37 }
 0xb07   : > { %13509 = vmatprep.mubr.msk.f32.mxu1 %vm15235_vm2, %v15234_v58 }
 0xb0a   : > { %13510 = vmatmul.mubr.msk.f32.gmra.mrb[52].mxu1 %vm6580_vm15, %v6544_v2 }
 0xb0b   : > { %13512 = vmatprep.mubr.msk.f32.mxu1 %vm15235_vm2, %v15234_v58 }
 0xb0e   : > { %13513 = vmatmul.mubr.msk.f32.gmra.mrb[54].mxu1 %vm6580_vm15, %v6545_v4 }
 0xb0f   : > { %13515 = vmatprep.mubr.msk.f32.mxu1 %vm15235_vm2, %v15234_v58 }
 0xb12   : > { %13516 = vmatmul.mubr.msk.f32.gmra.mrb[56].mxu1 %vm6580_vm15, %v6546_v33  ;;  %v7486_v33 = vld [vmem:[%s18239_s1 + $0x530] sm:$0xff] }
 0xb13   : > { %13518 = vmatprep.mubr.msk.f32.mxu1 %vm15235_vm2, %v15234_v58 }
 0xb16   : > { %13519 = vmatmul.mubr.msk.f32.gmra.mrb[58].mxu1 %vm6580_vm15, %v6547_v38 }
 0xb17   : > { %13521 = vmatprep.mubr.msk.f32.mxu1 %vm15235_vm2, %v15234_v58 }
 0xb1a   : > { %13522 = vmatmul.mubr.msk.f32.gmra.mrb[60].mxu1 %vm6580_vm15, %v6548_v60  ;;  %v7487_v60 = vld [vmem:[%s18239_s1 + $0x538] sm:$0xff] }
 0xb1b   : > { %13524 = vmatprep.mubr.msk.f32.mxu1 %vm15235_vm2, %v15234_v58 }
 0xb1e   : > { %13525 = vmatmul.mubr.msk.f32.gmra.mrb[62].mxu1 %vm6580_vm15, %v6549_v5  ;;  %v14453_v5 = vpack.c.bf16 %v7487_v60, %v7486_v33 }
 0xb1f   : > { %13527 = vmatprep.mubr.msk.f32.mxu1 %vm15235_vm2, %v15234_v58 }
 0xb20   : > { %14454 = vmatprep.subr.bf16.mxu1 %v14453_v5 }
 0xb22   : > { %13528 = vmatmul.mubr.msk.f32.gmra.mrb[64].mxu1 %vm6580_vm15, %v6550_v44 }
 0xb23   : > { %13530 = vmatprep.mubr.msk.f32.mxu1 %vm15235_vm2, %v15234_v58 }
 0xb26   : > { %13531 = vmatmul.mubr.msk.f32.gmra.mrb[66].mxu1 %vm6580_vm15, %v6551_v1 }
 0xb27   : > { %13533 = vmatprep.mubr.msk.f32.mxu1 %vm15235_vm2, %v15234_v58 }
 0xb2a   : > { %13534 = vmatmul.mubr.msk.f32.gmra.mrb[68].mxu1 %vm6580_vm15, %v6552_v54 }
 0xb2b   : > { %13536 = vmatprep.mubr.msk.f32.mxu1 %vm15235_vm2, %v15234_v58 }
 0xb2e   : > { %13537 = vmatmul.mubr.msk.f32.gmra.mrb[70].mxu1 %vm6580_vm15, %v6553_v11 }
 0xb2f   : > { %13539 = vmatprep.mubr.msk.f32.mxu1 %vm15235_vm2, %v15234_v58 }
 0xb32   : > { %13540 = vmatmul.mubr.msk.f32.gmra.mrb[72].mxu1 %vm6580_vm15, %v6554_v13 }
 0xb33   : > { %13542 = vmatprep.mubr.msk.f32.mxu1 %vm15235_vm2, %v15234_v58 }
 0xb36   : > { %13543 = vmatmul.mubr.msk.f32.gmra.mrb[74].mxu1 %vm6580_vm15, %v6555_v36 }
 0xb37   : > { %13545 = vmatprep.mubr.msk.f32.mxu1 %vm15235_vm2, %v15234_v58 }
 0xb3a   : > { %13546 = vmatmul.mubr.msk.f32.gmra.mrb[76].mxu1 %vm6580_vm15, %v6556_v28 }
 0xb3b   : > { %13548 = vmatprep.mubr.msk.f32.mxu1 %vm15235_vm2, %v15234_v58 }
 0xb3e   : > { %13549 = vmatmul.mubr.msk.f32.gmra.mrb[78].mxu1 %vm6580_vm15, %v6557_v43 }
 0xb3f   : > { %13551 = vmatprep.mubr.msk.f32.mxu1 %vm15235_vm2, %v15234_v58 }
 0xb42   : > { %13552 = vmatmul.mubr.msk.f32.gmra.mrb[80].mxu1 %vm6580_vm15, %v6558_v42 }
 0xb43   : > { %13554 = vmatprep.mubr.msk.f32.mxu1 %vm15235_vm2, %v15234_v58 }
 0xb46   : > { %13555 = vmatmul.mubr.msk.f32.gmra.mrb[82].mxu1 %vm6580_vm15, %v6559_v19 }
 0xb47   : > { %13557 = vmatprep.mubr.msk.f32.mxu1 %vm15235_vm2, %v15234_v58 }
 0xb4a   : > { %13558 = vmatmul.mubr.msk.f32.gmra.mrb[84].mxu1 %vm6580_vm15, %v6560_v47 }
 0xb4b   : > { %13560 = vmatprep.mubr.msk.f32.mxu1 %vm15235_vm2, %v15234_v58 }
 0xb4e   : > { %13561 = vmatmul.mubr.msk.f32.gmra.mrb[86].mxu1 %vm6580_vm15, %v6561_v8 }
 0xb4f   : > { %13563 = vmatprep.mubr.msk.f32.mxu1 %vm15235_vm2, %v15234_v58 }
 0xb52   : > { %13564 = vmatmul.mubr.msk.f32.gmra.mrb[88].mxu1 %vm6580_vm15, %v6562_v49 }
 0xb53   : > { %13566 = vmatprep.mubr.msk.f32.mxu1 %vm15235_vm2, %v15234_v58 }
 0xb56   : > { %13567 = vmatmul.mubr.msk.f32.gmra.mrb[90].mxu1 %vm6580_vm15, %v6563_v48 }
 0xb57   : > { %13569 = vmatprep.mubr.msk.f32.mxu1 %vm15235_vm2, %v15234_v58 }
 0xb5a   : > { %13570 = vmatmul.mubr.msk.f32.gmra.mrb[92].mxu1 %vm6580_vm15, %v6564_v9 }
 0xb5b   : > { %13572 = vmatprep.mubr.msk.f32.mxu1 %vm15235_vm2, %v15234_v58 }
 0xb5e   : > { %13573 = vmatmul.mubr.msk.f32.gmra.mrb[94].mxu1 %vm6580_vm15, %v6565_v40 }
 0xb5f   : > { %13575 = vmatprep.mubr.msk.f32.mxu1 %vm15235_vm2, %v15234_v58 }
 0xb62   : > { %13576 = vmatmul.mubr.msk.f32.gmra.mrb[96].mxu1 %vm6580_vm15, %v6566_v21  ;;  %v9194_v21 = vld [vmem:[%s18239_s1 + $0x570] sm:$0xff] }
 0xb63   : > { %13578 = vmatprep.mubr.msk.f32.mxu1 %vm15235_vm2, %v15234_v58 }
 0xb66   : > { %13579 = vmatmul.mubr.msk.f32.gmra.mrb[98].mxu1 %vm6580_vm15, %v6567_v20  ;;  %v9195_v20 = vld [vmem:[%s18239_s1 + $0x578] sm:$0xff] }
 0xb67   : > { %13581 = vmatprep.mubr.msk.f32.mxu1 %vm15235_vm2, %v15234_v58 }
 0xb6a   : > { %13582 = vmatmul.mubr.msk.f32.gmra.mrb[100].mxu1 %vm6580_vm15, %v6568_v6 }
 0xb6b   : > { %13584 = vmatprep.mubr.msk.f32.mxu1 %vm15235_vm2, %v15234_v58 }
 0xb6e   : > { %13585 = vmatmul.mubr.msk.f32.gmra.mrb[102].mxu1 %vm6580_vm15, %v6569_v53 }
 0xb6f   : > { %13587 = vmatprep.mubr.msk.f32.mxu1 %vm15235_vm2, %v15234_v58 }
 0xb72   : > { %13588 = vmatmul.mubr.msk.f32.gmra.mrb[104].mxu1 %vm6580_vm15, %v6570_v23 }
 0xb73   : > { %13590 = vmatprep.mubr.msk.f32.mxu1 %vm15235_vm2, %v15234_v58 }
 0xb76   : > { %13591 = vmatmul.mubr.msk.f32.gmra.mrb[106].mxu1 %vm6580_vm15, %v6571_v61  ;;  %v17455_v61 = vpack.c.bf16 %v9195_v20, %v9194_v21 }
 0xb77   : > { %13593 = vmatprep.mubr.msk.f32.mxu1 %vm15235_vm2, %v15234_v58 }
 0xb7a   : > { %13594 = vmatmul.mubr.msk.f32.gmra.mrb[108].mxu1 %vm6580_vm15, %v6572_v46 }
 0xb7b   : > { %13596 = vmatprep.mubr.msk.f32.mxu1 %vm15235_vm2, %v15234_v58 }
 0xb7e   : > { %13597 = vmatmul.mubr.msk.f32.gmra.mrb[110].mxu1 %vm6580_vm15, %v6573_v30 }
 0xb7f   : > { %13599 = vmatprep.mubr.msk.f32.mxu1 %vm15235_vm2, %v15234_v58 }
 0xb82   : > { %13600 = vmatmul.mubr.msk.f32.gmra.mrb[112].mxu1 %vm6580_vm15, %v6574_v18 }
 0xb83   : > { %13602 = vmatprep.mubr.msk.f32.mxu1 %vm15235_vm2, %v15234_v58 }
 0xb86   : > { %13603 = vmatmul.mubr.msk.f32.gmra.mrb[114].mxu1 %vm6580_vm15, %v6575_v3 }
 0xb87   : > { %13605 = vmatprep.mubr.msk.f32.mxu1 %vm15235_vm2, %v15234_v58 }
 0xb8a   : > { %13606 = vmatmul.mubr.msk.f32.gmra.mrb[116].mxu1 %vm6580_vm15, %v6576_v17 }
 0xb8b   : > { %13608 = vmatprep.mubr.msk.f32.mxu1 %vm15235_vm2, %v15234_v58 }
 0xb8e   : > { %13609 = vmatmul.mubr.msk.f32.gmra.mrb[118].mxu1 %vm6580_vm15, %v6577_v50 }
 0xb8f   : > { %13611 = vmatprep.mubr.msk.f32.mxu1 %vm15235_vm2, %v15234_v58 }
 0xb92   : > { %13612 = vmatmul.mubr.msk.f32.gmra.mrb[120].mxu1 %vm6580_vm15, %v6578_v56 }
 0xb93   : > { %13614 = vmatprep.mubr.msk.f32.mxu1 %vm15235_vm2, %v15234_v58  ;;  %v8767_v58 = vld [vmem:[%s18239_s1 + $0x560] sm:$0xff] }
 0xb94   : > { %v14465_v62 = vpack.c.bf16 %v8768_v57, %v8767_v58 }
 0xb96   : > { %13615 = vmatmul.mubr.msk.f32.gmra.mrb[122].mxu1 %vm6580_vm15, %v6579_v41 }
 0xbc9   : > { %v6773_v35 = vpop.f32.mrb[42].mxu1 }
 0xbca   : > { %6977 = vst.msk [vmem:[#allocation6] sm:$0xff] %vm1782_vm3, %v6773_v35  ;;  %v13496_v51 = vpop.f32.mrb[43].mxu1 }
 0xbcd   : > { %v6778_v52 = vpop.f32.mrb[44].mxu1 }
 0xbce   : > { %6978 = vst.msk [vmem:[#allocation6 + $0x8] sm:$0xff] %vm1782_vm3, %v6778_v52  ;;  %v13499_v10 = vpop.f32.mrb[45].mxu1 }
 0xbd1   : > { %v6783_v34 = vpop.f32.mrb[46].mxu1  ;;  %v7023_v32 = vld [vmem:[#allocation6] sm:$0xff] }
 0xbd2   : > { %6979 = vst.msk [vmem:[#allocation6 + $0x10] sm:$0xff] %vm1782_vm3, %v6783_v34  ;;  %v13502_v15 = vpop.f32.mrb[47].mxu1  ;;  %13621 = vmatprep.mubr.msk.f32.mxu1 %vm1782_vm3, %v7023_v32 }
 0xbd5   : > { %v6788_v26 = vpop.f32.mrb[48].mxu1  ;;  %v7877_v25 = vld [vmem:[#allocation6 + $0x2] sm:$0xff] }
 0xbd6   : > { %v7024_v27 = vld [vmem:[#allocation6 + $0x8] sm:$0xff]  ;;  %6980 = vst.msk [vmem:[#allocation6 + $0x18] sm:$0xff] %vm1782_vm3, %v6788_v26  ;;  %13737 = vmatprep.mubr.msk.f32.mxu0 %vm1782_vm3, %v7877_v25  ;;  %v13505_v7 = vpop.f32.mrb[49].mxu1 }
 0xbd7   : > { %13622 = vmatmul.mubr.msk.f32.vlgmr.msra.gmra.mrb[124].mxu1 %vm1782_vm3, %v7024_v27 }
 0xbd8   : > { %14456 = vmatpush3.bf16.msra.mxu1 %v14453_v5 }
 0xbd9   : > { %v6793_v39 = vpop.f32.mrb[50].mxu1  ;;  %v7878_v0 = vld [vmem:[#allocation6 + $0xa] sm:$0xff]  ;;  %14485 = vmatprep.subr.bf16.mxu1 %v17272_v31 }
 0xbda   : > { %v7025_v14 = vld [vmem:[#allocation6 + $0x10] sm:$0xff]  ;;  %6981 = vst.msk [vmem:[#allocation6 + $0x20] sm:$0xff] %vm1782_vm3, %v6793_v39  ;;  %13738 = vmatmul.mubr.msk.f32.vlgmr.msra.gmra.mrb[58].mxu0 %vm1782_vm3, %v7878_v0  ;;  %v13508_v22 = vpop.f32.mrb[51].mxu1 }
 0xbdb   : > { %13624 = vmatprep.mubr.msk.f32.mxu1 %vm1782_vm3, %v7025_v14  ;;  %14464 = vmatpush3.bf16.msra.mxu0 %v17294_v55 }
 0xbdc   : > { %14466 = vmatprep.subr.bf16.mxu0 %v14465_v62 }
 0xbdd   : > { %v6798_v37 = vpop.f32.mrb[52].mxu1  ;;  %v17398_v2 = vld [vmem:[#allocation6 + $0x12] sm:$0xff] }
 0xbde   : > { %v7026_v4 = vld [vmem:[#allocation6 + $0x18] sm:$0xff]  ;;  %6982 = vst.msk [vmem:[#allocation6 + $0x28] sm:$0xff] %vm1782_vm3, %v6798_v37  ;;  %13795 = vmatprep.mubr.msk.f32.mxu0 %vm1782_vm3, %v17398_v2  ;;  %v13511_v38 = vpop.f32.mrb[53].mxu1 }
 0xbdf   : > { %13625 = vmatmul.mubr.msk.f32.gmra.mrb[126].mxu1 %vm1782_vm3, %v7026_v4 }
 0xbe1   : > { %v6803_v44 = vpop.f32.mrb[54].mxu1  ;;  %v17410_v1 = vld [vmem:[#allocation6 + $0x1a] sm:$0xff] }
 0xbe2   : > { %v7027_v54 = vld [vmem:[#allocation6 + $0x20] sm:$0xff]  ;;  %6983 = vst.msk [vmem:[#allocation6 + $0x30] sm:$0xff] %vm1782_vm3, %v6803_v44  ;;  %13796 = vmatmul.mubr.msk.f32.vlgmr.msra.gmra.mrb[58].mxu0 %vm1782_vm3, %v17410_v1  ;;  %v13514_v11 = vpop.f32.mrb[55].mxu1 }
 0xbe3   : > { %13627 = vmatprep.mubr.msk.f32.mxu1 %vm1782_vm3, %v7027_v54  ;;  %14468 = vmatpush3.bf16.msra.mxu0 %v14465_v62 }
 0xbe4   : > { %14470 = vmatprep.subr.bf16.mxu0 %v17455_v61 }
 0xbe5   : > { %v6808_v13 = vpop.f32.mrb[56].mxu1  ;;  %v17417_v36 = vld [vmem:[#allocation6 + $0x22] sm:$0xff] }
 0xbe6   : > { %v7028_v28 = vld [vmem:[#allocation6 + $0x28] sm:$0xff]  ;;  %6984 = vst.msk [vmem:[#allocation6 + $0x38] sm:$0xff] %vm1782_vm3, %v6808_v13  ;;  %13798 = vmatprep.mubr.msk.f32.mxu0 %vm1782_vm3, %v17417_v36  ;;  %v13517_v43 = vpop.f32.mrb[57].mxu1 }
 0xbe7   : > { %13628 = vmatmul.mubr.msk.f32.gmra.mrb[128].mxu1 %vm1782_vm3, %v7028_v28 }
 0xbe9   : > { %v6813_v42 = vpop.f32.mrb[58].mxu1  ;;  %v17423_v19 = vld [vmem:[#allocation6 + $0x2a] sm:$0xff] }
 0xbea   : > { %v7029_v47 = vld [vmem:[#allocation6 + $0x30] sm:$0xff]  ;;  %6985 = vst.msk [vmem:[#allocation6 + $0x40] sm:$0xff] %vm1782_vm3, %v6813_v42  ;;  %13799 = vmatmul.mubr.msk.f32.gmra.mrb[60].mxu0 %vm1782_vm3, %v17423_v19  ;;  %v13520_v8 = vpop.f32.mrb[59].mxu1 }
 0xbeb   : > { %13630 = vmatprep.mubr.msk.f32.mxu1 %vm1782_vm3, %v7029_v47 }
 0xbed   : > { %v6818_v49 = vpop.f32.mrb[60].mxu1  ;;  %v17429_v59 = vld [vmem:[#allocation6 + $0x32] sm:$0xff] }
 0xbee   : > { %v7030_v16 = vld [vmem:[#allocation6 + $0x38] sm:$0xff]  ;;  %6986 = vst.msk [vmem:[#allocation6 + $0x48] sm:$0xff] %vm1782_vm3, %v6818_v49  ;;  %13801 = vmatprep.mubr.msk.f32.mxu0 %vm1782_vm3, %v17429_v59  ;;  %v13523_v29 = vpop.f32.mrb[61].mxu1 }
 0xbef   : > { %13631 = vmatmul.mubr.msk.f32.gmra.mrb[130].mxu1 %vm1782_vm3, %v7030_v16 }
 0xbf1   : > { %v6823_v48 = vpop.f32.mrb[62].mxu1  ;;  %v17435_v12 = vld [vmem:[#allocation6 + $0x3a] sm:$0xff] }
 0xbf2   : > { %v7031_v24 = vld [vmem:[#allocation6 + $0x40] sm:$0xff]  ;;  %6987 = vst.msk [vmem:[#allocation6 + $0x50] sm:$0xff] %vm1782_vm3, %v6823_v48  ;;  %13802 = vmatmul.mubr.msk.f32.gmra.mrb[62].mxu0 %vm1782_vm3, %v17435_v12  ;;  %v13526_v9 = vpop.f32.mrb[63].mxu1 }
 0xbf3   : > { %13633 = vmatprep.mubr.msk.f32.mxu1 %vm1782_vm3, %v7031_v24 }
 0xbf5   : > { %v6828_v40 = vpop.f32.mrb[64].mxu1  ;;  %v17441_v63 = vld [vmem:[#allocation6 + $0x42] sm:$0xff] }
 0xbf6   : > { %v7032_v45 = vld [vmem:[#allocation6 + $0x48] sm:$0xff]  ;;  %6988 = vst.msk [vmem:[#allocation6 + $0x58] sm:$0xff] %vm1782_vm3, %v6828_v40  ;;  %13804 = vmatprep.mubr.msk.f32.mxu0 %vm1782_vm3, %v17441_v63  ;;  %v13529_v55 = vpop.f32.mrb[65].mxu1 }
 0xbf7   : > { %13634 = vmatmul.mubr.msk.f32.gmra.mrb[132].mxu1 %vm1782_vm3, %v7032_v45 }
 0xbf9   : > { %v6833_v6 = vpop.f32.mrb[66].mxu1  ;;  %v17453_v53 = vld [vmem:[#allocation6 + $0x4a] sm:$0xff] }
 0xbfa   : > { %v7033_v23 = vld [vmem:[#allocation6 + $0x50] sm:$0xff]  ;;  %6989 = vst.msk [vmem:[#allocation6 + $0x60] sm:$0xff] %vm1782_vm3, %v6833_v6  ;;  %13805 = vmatmul.mubr.msk.f32.gmra.mrb[64].mxu0 %vm1782_vm3, %v17453_v53  ;;  %v13532_v46 = vpop.f32.mrb[67].mxu1 }
 0xbfb   : > { %13636 = vmatprep.mubr.msk.f32.mxu1 %vm1782_vm3, %v7033_v23 }
 0xbfd   : > { %v6838_v30 = vpop.f32.mrb[68].mxu1  ;;  %v17462_v18 = vld [vmem:[#allocation6 + $0x52] sm:$0xff] }
 0xbfe   : > { %v7034_v3 = vld [vmem:[#allocation6 + $0x58] sm:$0xff]  ;;  %6990 = vst.msk [vmem:[#allocation6 + $0x68] sm:$0xff] %vm1782_vm3, %v6838_v30  ;;  %13807 = vmatprep.mubr.msk.f32.mxu0 %vm1782_vm3, %v17462_v18  ;;  %v13535_v17 = vpop.f32.mrb[69].mxu1 }
 0xbff   : > { %13637 = vmatmul.mubr.msk.f32.gmra.mrb[134].mxu1 %vm1782_vm3, %v7034_v3 }
 0xc01   : > { %v6843_v50 = vpop.f32.mrb[70].mxu1  ;;  %v17468_v56 = vld [vmem:[#allocation6 + $0x5a] sm:$0xff] }
 0xc02   : > { %v7035_v41 = vld [vmem:[#allocation6 + $0x60] sm:$0xff]  ;;  %6991 = vst.msk [vmem:[#allocation6 + $0x70] sm:$0xff] %vm1782_vm3, %v6843_v50  ;;  %13808 = vmatmul.mubr.msk.f32.gmra.mrb[66].mxu0 %vm1782_vm3, %v17468_v56  ;;  %v13538_v35 = vpop.f32.mrb[71].mxu1 }
 0xc03   : > { %13639 = vmatprep.mubr.msk.f32.mxu1 %vm1782_vm3, %v7035_v41 }
 0xc05   : > { %v6848_v51 = vpop.f32.mrb[72].mxu1  ;;  %v17474_v52 = vld [vmem:[#allocation6 + $0x62] sm:$0xff] }
 0xc06   : > { %v7036_v10 = vld [vmem:[#allocation6 + $0x68] sm:$0xff]  ;;  %6992 = vst.msk [vmem:[#allocation6 + $0x78] sm:$0xff] %vm1782_vm3, %v6848_v51  ;;  %13810 = vmatprep.mubr.msk.f32.mxu0 %vm1782_vm3, %v17474_v52  ;;  %v13541_v34 = vpop.f32.mrb[73].mxu1 }
 0xc07   : > { %13640 = vmatmul.mubr.msk.f32.gmra.mrb[136].mxu1 %vm1782_vm3, %v7036_v10 }
 0xc09   : > { %v6853_v32 = vpop.f32.mrb[74].mxu1  ;;  %v17480_v15 = vld [vmem:[#allocation6 + $0x6a] sm:$0xff] }
 0xc0a   : > { %v7037_v58 = vld [vmem:[#allocation6 + $0x70] sm:$0xff]  ;;  %6993 = vst.msk [vmem:[#allocation6 + $0x80] sm:$0xff] %vm1782_vm3, %v6853_v32  ;;  %13811 = vmatmul.mubr.msk.f32.gmra.mrb[68].mxu0 %vm1782_vm3, %v17480_v15  ;;  %v13544_v26 = vpop.f32.mrb[75].mxu1 }
 0xc0b   : > { %13642 = vmatprep.mubr.msk.f32.mxu1 %vm1782_vm3, %v7037_v58 }
 0xc0d   : > { %v6858_v25 = vpop.f32.mrb[76].mxu1  ;;  %v17486_v27 = vld [vmem:[#allocation6 + $0x72] sm:$0xff] }
 0xc0e   : > { %v7038_v57 = vld [vmem:[#allocation6 + $0x78] sm:$0xff]  ;;  %6994 = vst.msk [vmem:[#allocation6 + $0x88] sm:$0xff] %vm1782_vm3, %v6858_v25  ;;  %13813 = vmatprep.mubr.msk.f32.mxu0 %vm1782_vm3, %v17486_v27  ;;  %v13547_v7 = vpop.f32.mrb[77].mxu1 }
 0xc0f   : > { %13643 = vmatmul.mubr.msk.f32.gmra.mrb[138].mxu1 %vm1782_vm3, %v7038_v57 }
 0xc11   : > { %v6863_v62 = vpop.f32.mrb[78].mxu1  ;;  %v17492_v39 = vld [vmem:[#allocation6 + $0x7a] sm:$0xff] }
 0xc12   : > { %v7039_v0 = vld [vmem:[#allocation6 + $0x80] sm:$0xff]  ;;  %6995 = vst.msk [vmem:[#allocation6 + $0x90] sm:$0xff] %vm1782_vm3, %v6863_v62  ;;  %13814 = vmatmul.mubr.msk.f32.gmra.mrb[70].mxu0 %vm1782_vm3, %v17492_v39  ;;  %v13550_v14 = vpop.f32.mrb[79].mxu1 }
 0xc13   : > { %13645 = vmatprep.mubr.msk.f32.mxu1 %vm1782_vm3, %v7039_v0 }
 0xc15   : > { %v6868_v22 = vpop.f32.mrb[80].mxu1  ;;  %v17498_v37 = vld [vmem:[#allocation6 + $0x82] sm:$0xff] }
 0xc16   : > { %v7040_v4 = vld [vmem:[#allocation6 + $0x88] sm:$0xff]  ;;  %6996 = vst.msk [vmem:[#allocation6 + $0x98] sm:$0xff] %vm1782_vm3, %v6868_v22  ;;  %13816 = vmatprep.mubr.msk.f32.mxu0 %vm1782_vm3, %v17498_v37  ;;  %v13553_v33 = vpop.f32.mrb[81].mxu1 }
 0xc17   : > { %13646 = vmatmul.mubr.msk.f32.gmra.mrb[140].mxu1 %vm1782_vm3, %v7040_v4 }
 0xc19   : > { %v6873_v38 = vpop.f32.mrb[82].mxu1  ;;  %v17504_v60 = vld [vmem:[#allocation6 + $0x8a] sm:$0xff] }
 0xc1a   : > { %v7041_v5 = vld [vmem:[#allocation6 + $0x90] sm:$0xff]  ;;  %6997 = vst.msk [vmem:[#allocation6 + $0xa0] sm:$0xff] %vm1782_vm3, %v6873_v38  ;;  %13817 = vmatmul.mubr.msk.f32.gmra.mrb[72].mxu0 %vm1782_vm3, %v17504_v60  ;;  %v13556_v44 = vpop.f32.mrb[83].mxu1 }
 0xc1b   : > { %13648 = vmatprep.mubr.msk.f32.mxu1 %vm1782_vm3, %v7041_v5 }
 0xc1d   : > { %v6878_v54 = vpop.f32.mrb[84].mxu1  ;;  %v17510_v11 = vld [vmem:[#allocation6 + $0x92] sm:$0xff] }
 0xc1e   : > { %v7042_v13 = vld [vmem:[#allocation6 + $0x98] sm:$0xff]  ;;  %6998 = vst.msk [vmem:[#allocation6 + $0xa8] sm:$0xff] %vm1782_vm3, %v6878_v54  ;;  %13819 = vmatprep.mubr.msk.f32.mxu0 %vm1782_vm3, %v17510_v11  ;;  %v13559_v28 = vpop.f32.mrb[85].mxu1 }
 0xc1f   : > { %13649 = vmatmul.mubr.msk.f32.gmra.mrb[142].mxu1 %vm1782_vm3, %v7042_v13 }
 0xc21   : > { %v6883_v43 = vpop.f32.mrb[86].mxu1  ;;  %v17516_v42 = vld [vmem:[#allocation6 + $0x9a] sm:$0xff] }
 0xc22   : > { %v7043_v47 = vld [vmem:[#allocation6 + $0xa0] sm:$0xff]  ;;  %6999 = vst.msk [vmem:[#allocation6 + $0xb0] sm:$0xff] %vm1782_vm3, %v6883_v43  ;;  %13820 = vmatmul.mubr.msk.f32.gmra.mrb[74].mxu0 %vm1782_vm3, %v17516_v42  ;;  %v13562_v8 = vpop.f32.mrb[87].mxu1 }
 0xc23   : > { %13651 = vmatprep.mubr.msk.f32.mxu1 %vm1782_vm3, %v7043_v47 }
 0xc25   : > { %v6888_v49 = vpop.f32.mrb[88].mxu1  ;;  %v17522_v16 = vld [vmem:[#allocation6 + $0xa2] sm:$0xff] }
 0xc26   : > { %v7044_v29 = vld [vmem:[#allocation6 + $0xa8] sm:$0xff]  ;;  %7000 = vst.msk [vmem:[#allocation6 + $0xb8] sm:$0xff] %vm1782_vm3, %v6888_v49  ;;  %13822 = vmatprep.mubr.msk.f32.mxu0 %vm1782_vm3, %v17522_v16  ;;  %v13565_v48 = vpop.f32.mrb[89].mxu1 }
 0xc27   : > { %13652 = vmatmul.mubr.msk.f32.gmra.mrb[144].mxu1 %vm1782_vm3, %v7044_v29 }
 0xc29   : > { %v6893_v24 = vpop.f32.mrb[90].mxu1  ;;  %v17528_v9 = vld [vmem:[#allocation6 + $0xaa] sm:$0xff] }
 0xc2a   : > { %v7045_v40 = vld [vmem:[#allocation6 + $0xb0] sm:$0xff]  ;;  %7001 = vst.msk [vmem:[#allocation6 + $0xc0] sm:$0xff] %vm1782_vm3, %v6893_v24  ;;  %13823 = vmatmul.mubr.msk.f32.gmra.mrb[76].mxu0 %vm1782_vm3, %v17528_v9  ;;  %v13568_v45 = vpop.f32.mrb[91].mxu1 }
 0xc2b   : > { %13654 = vmatprep.mubr.msk.f32.mxu1 %vm1782_vm3, %v7045_v40 }
 0xc2d   : > { %v6898_v55 = vpop.f32.mrb[92].mxu1  ;;  %v17534_v21 = vld [vmem:[#allocation6 + $0xb2] sm:$0xff] }
 0xc2e   : > { %v7046_v20 = vld [vmem:[#allocation6 + $0xb8] sm:$0xff]  ;;  %7002 = vst.msk [vmem:[#allocation6 + $0xc8] sm:$0xff] %vm1782_vm3, %v6898_v55  ;;  %13825 = vmatprep.mubr.msk.f32.mxu0 %vm1782_vm3, %v17534_v21  ;;  %v13571_v6 = vpop.f32.mrb[93].mxu1 }
 0xc2f   : > { %13655 = vmatmul.mubr.msk.f32.gmra.mrb[146].mxu1 %vm1782_vm3, %v7046_v20 }
 0xc31   : > { %v6903_v23 = vpop.f32.mrb[94].mxu1  ;;  %v17540_v46 = vld [vmem:[#allocation6 + $0xba] sm:$0xff] }
 0xc32   : > { %v7047_v30 = vld [vmem:[#allocation6 + $0xc0] sm:$0xff]  ;;  %7003 = vst.msk [vmem:[#allocation6 + $0xd0] sm:$0xff] %vm1782_vm3, %v6903_v23  ;;  %13826 = vmatmul.mubr.msk.f32.gmra.mrb[78].mxu0 %vm1782_vm3, %v17540_v46  ;;  %v13574_v3 = vpop.f32.mrb[95].mxu1 }
 0xc33   : > { %13657 = vmatprep.mubr.msk.f32.mxu1 %vm1782_vm3, %v7047_v30 }
 0xc35   : > { %v6908_v17 = vpop.f32.mrb[96].mxu1  ;;  %v17546_v50 = vld [vmem:[#allocation6 + $0xc2] sm:$0xff] }
 0xc36   : > { %v7048_v41 = vld [vmem:[#allocation6 + $0xc8] sm:$0xff]  ;;  %7004 = vst.msk [vmem:[#allocation6 + $0xd8] sm:$0xff] %vm1782_vm3, %v6908_v17  ;;  %13828 = vmatprep.mubr.msk.f32.mxu0 %vm1782_vm3, %v17546_v50  ;;  %v13577_v35 = vpop.f32.mrb[97].mxu1 }
 0xc37   : > { %13658 = vmatmul.mubr.msk.f32.gmra.mrb[148].mxu1 %vm1782_vm3, %v7048_v41 }
 0xc39   : > { %v6913_v51 = vpop.f32.mrb[98].mxu1  ;;  %v17552_v10 = vld [vmem:[#allocation6 + $0xca] sm:$0xff] }
 0xc3a   : > { %v7049_v34 = vld [vmem:[#allocation6 + $0xd0] sm:$0xff]  ;;  %7005 = vst.msk [vmem:[#allocation6 + $0xe0] sm:$0xff] %vm1782_vm3, %v6913_v51  ;;  %13829 = vmatmul.mubr.msk.f32.gmra.mrb[80].mxu0 %vm1782_vm3, %v17552_v10  ;;  %v13580_v32 = vpop.f32.mrb[99].mxu1  ;;  %v7450_v51 = vld [vmem:[#allocation6 + $0x1] sm:$0xff] }
 0xc3b   : > { %13660 = vmatprep.mubr.msk.f32.mxu1 %vm1782_vm3, %v7049_v34  ;;  %v7451_v32 = vld [vmem:[#allocation6 + $0x9] sm:$0xff] }
 0xc3d   : > { %v6918_v58 = vpop.f32.mrb[100].mxu1  ;;  %v17558_v26 = vld [vmem:[#allocation6 + $0xd2] sm:$0xff] }
 0xc3e   : > { %v7050_v25 = vld [vmem:[#allocation6 + $0xd8] sm:$0xff]  ;;  %7006 = vst.msk [vmem:[#allocation6 + $0xe8] sm:$0xff] %vm1782_vm3, %v6918_v58  ;;  %13831 = vmatprep.mubr.msk.f32.mxu0 %vm1782_vm3, %v17558_v26  ;;  %v13583_v57 = vpop.f32.mrb[101].mxu1 }
 0xc3f   : > { %13661 = vmatmul.mubr.msk.f32.gmra.mrb[150].mxu1 %vm1782_vm3, %v7050_v25  ;;  %v7452_v57 = vld [vmem:[#allocation6 + $0x11] sm:$0xff] }
 0xc41   : > { %v6923_v7 = vpop.f32.mrb[102].mxu1  ;;  %v17564_v62 = vld [vmem:[#allocation6 + $0xda] sm:$0xff] }
 0xc42   : > { %v7051_v0 = vld [vmem:[#allocation6 + $0xe0] sm:$0xff]  ;;  %7007 = vst.msk [vmem:[#allocation6 + $0xf0] sm:$0xff] %vm1782_vm3, %v6923_v7  ;;  %v13586_v14 = vpop.f32.mrb[103].mxu1  ;;  %13832 = vmatmul.mubr.msk.f32.gmra.mrb[82].mxu0 %vm1782_vm3, %v17564_v62 }
 0xc43   : > { %13663 = vmatprep.mubr.msk.f32.mxu1 %vm1782_vm3, %v7051_v0  ;;  %v7453_v0 = vld [vmem:[#allocation6 + $0x19] sm:$0xff] }
 0xc45   : > { %v6928_v22 = vpop.f32.mrb[104].mxu1  ;;  %v17570_v4 = vld [vmem:[#allocation6 + $0xe2] sm:$0xff] }
 0xc46   : > { %v7052_v33 = vld [vmem:[#allocation6 + $0xe8] sm:$0xff]  ;;  %7008 = vst.msk [vmem:[#allocation6 + $0xf8] sm:$0xff] %vm1782_vm3, %v6928_v22  ;;  %v13589_v38 = vpop.f32.mrb[105].mxu1  ;;  %13834 = vmatprep.mubr.msk.f32.mxu0 %vm1782_vm3, %v17570_v4 }
 0xc47   : > { %13664 = vmatmul.mubr.msk.f32.gmra.mrb[152].mxu1 %vm1782_vm3, %v7052_v33  ;;  %v7454_v38 = vld [vmem:[#allocation6 + $0x21] sm:$0xff] }
 0xc49   : > { %v6933_v5 = vpop.f32.mrb[106].mxu1  ;;  %v7053_v44 = vld [vmem:[#allocation6 + $0xf0] sm:$0xff] }
 0xc4a   : > { %v17576_v54 = vld [vmem:[#allocation6 + $0xea] sm:$0xff]  ;;  %7009 = vst.msk [vmem:[#allocation6 + $0x100] sm:$0xff] %vm1782_vm3, %v6933_v5  ;;  %v13592_v13 = vpop.f32.mrb[107].mxu1  ;;  %13666 = vmatprep.mubr.msk.f32.mxu1 %vm1782_vm3, %v7053_v44  ;;  %v9621_v5 = vld [vmem:[%s18239_s1 + $0x580] sm:$0xff] }
 0xc4b   : > { %13835 = vmatmul.mubr.msk.f32.gmra.mrb[84].mxu0 %vm1782_vm3, %v17576_v54  ;;  %v9622_v44 = vld [vmem:[%s18239_s1 + $0x588] sm:$0xff]  ;;  %v8731_v13 = vld [vmem:[#allocation6 + $0x13] sm:$0xff] }
 0xc4d   : > { %v6938_v28 = vpop.f32.mrb[108].mxu1  ;;  %v7054_v43 = vld [vmem:[#allocation6 + $0xf8] sm:$0xff] }
 0xc4e   : > { %v17582_v47 = vld [vmem:[#allocation6 + $0xf2] sm:$0xff]  ;;  %7010 = vst.msk [vmem:[#allocation6 + $0x108] sm:$0xff] %vm1782_vm3, %v6938_v28  ;;  %v13595_v8 = vpop.f32.mrb[109].mxu1  ;;  %13667 = vmatmul.mubr.msk.f32.gmra.mrb[154].mxu1 %vm1782_vm3, %v7054_v43  ;;  %v7455_v28 = vld [vmem:[#allocation6 + $0x29] sm:$0xff]  ;;  %v17630_v43 = vpack.c.bf16 %v9622_v44, %v9621_v5  ;;  %v8744_v5 = vld [vmem:[#allocation6 + $0x7b] sm:$0xff] }
 0xc4f   : > { %13837 = vmatprep.mubr.msk.f32.mxu0 %vm1782_vm3, %v17582_v47  ;;  %v7456_v8 = vld [vmem:[#allocation6 + $0x31] sm:$0xff]  ;;  %v8745_v44 = vld [vmem:[#allocation6 + $0x83] sm:$0xff] }
 0xc51   : > { %v6943_v49 = vpop.f32.mrb[110].mxu1  ;;  %v7055_v29 = vld [vmem:[#allocation6 + $0x100] sm:$0xff] }
 0xc52   : > { %v17588_v48 = vld [vmem:[#allocation6 + $0xfa] sm:$0xff]  ;;  %7011 = vst.msk [vmem:[#allocation6 + $0x110] sm:$0xff] %vm1782_vm3, %v6943_v49  ;;  %v13598_v24 = vpop.f32.mrb[111].mxu1  ;;  %13669 = vmatprep.mubr.msk.f32.mxu1 %vm1782_vm3, %v7055_v29  ;;  %v8733_v29 = vld [vmem:[#allocation6 + $0x23] sm:$0xff] }
 0xc53   : > { %13838 = vmatmul.mubr.msk.f32.gmra.mrb[86].mxu0 %vm1782_vm3, %v17588_v48  ;;  %v8732_v49 = vld [vmem:[#allocation6 + $0x1b] sm:$0xff] }
 0xc54   : > { %v7457_v24 = vld [vmem:[#allocation6 + $0x39] sm:$0xff] }
 0xc55   : > { %v6948_v40 = vpop.f32.mrb[112].mxu1  ;;  %v7056_v45 = vld [vmem:[#allocation6 + $0x108] sm:$0xff] }
 0xc56   : > { %v17594_v55 = vld [vmem:[#allocation6 + $0x102] sm:$0xff]  ;;  %7012 = vst.msk [vmem:[#allocation6 + $0x118] sm:$0xff] %vm1782_vm3, %v6948_v40  ;;  %v13601_v20 = vpop.f32.mrb[113].mxu1  ;;  %13670 = vmatmul.mubr.msk.f32.gmra.mrb[156].mxu1 %vm1782_vm3, %v7056_v45  ;;  %v8734_v45 = vld [vmem:[#allocation6 + $0x2b] sm:$0xff] }
 0xc57   : > { %13840 = vmatprep.mubr.msk.f32.mxu0 %vm1782_vm3, %v17594_v55  ;;  %v7458_v40 = vld [vmem:[#allocation6 + $0x41] sm:$0xff]  ;;  %v8735_v20 = vld [vmem:[#allocation6 + $0x33] sm:$0xff] }
 0xc59   : > { %v6953_v6 = vpop.f32.mrb[114].mxu1  ;;  %v7057_v23 = vld [vmem:[#allocation6 + $0x110] sm:$0xff] }
 0xc5a   : > { %v17600_v30 = vld [vmem:[#allocation6 + $0x10a] sm:$0xff]  ;;  %7013 = vst.msk [vmem:[#allocation6 + $0x120] sm:$0xff] %vm1782_vm3, %v6953_v6  ;;  %v13604_v3 = vpop.f32.mrb[115].mxu1  ;;  %13672 = vmatprep.mubr.msk.f32.mxu1 %vm1782_vm3, %v7057_v23 }
 0xc5b   : > { %13841 = vmatmul.mubr.msk.f32.gmra.mrb[88].mxu0 %vm1782_vm3, %v17600_v30  ;;  %v7459_v6 = vld [vmem:[#allocation6 + $0x49] sm:$0xff]  ;;  %v7460_v23 = vld [vmem:[#allocation6 + $0x51] sm:$0xff]  ;;  %v8736_v3 = vld [vmem:[#allocation6 + $0x3b] sm:$0xff] }
 0xc5d   : > { %v6958_v17 = vpop.f32.mrb[116].mxu1  ;;  %v7058_v41 = vld [vmem:[#allocation6 + $0x118] sm:$0x3f] }
 0xc5e   : > { %v17606_v35 = vld [vmem:[#allocation6 + $0x112] sm:$0xff]  ;;  %7014 = vst.msk [vmem:[#allocation6 + $0x128] sm:$0xff] %vm1782_vm3, %v6958_v17  ;;  %13673 = vmatmul.mubr.msk.f32.gmra.mrb[158].mxu1 %vm1782_vm3, %v7058_v41  ;;  %v13607_v34 = vpop.f32.mrb[117].mxu1  ;;  %v7462_v41 = vld [vmem:[#allocation6 + $0x61] sm:$0xff] }
 0xc5f   : > { %13843 = vmatprep.mubr.msk.f32.mxu0 %vm1782_vm3, %v17606_v35  ;;  %13679 = vmatprep.mubr.msk.f32.mxu1 %vm1782_vm3, %v7450_v51  ;;  %v7461_v17 = vld [vmem:[#allocation6 + $0x59] sm:$0xff]  ;;  %v8738_v51 = vld [vmem:[#allocation6 + $0x4b] sm:$0xff] }
 0xc60   : > { %v8739_v34 = vld [vmem:[#allocation6 + $0x53] sm:$0xff] }
 0xc61   : > { %v8337_v58 = vld [vmem:[#allocation6 + $0x11a] sm:$0xff]  ;;  %v6963_v25 = vpop.f32.mrb[118].mxu1 }
 0xc62   : > { %13680 = vmatmul.mubr.msk.f32.vlgmr.msra.gmra.mrb[124].mxu1 %vm1782_vm3, %v7451_v32  ;;  %13844 = vmatmul.mubr.msk.f32.gmra.mrb[90].mxu0 %vm1782_vm3, %v8337_v58  ;;  %7015 = vst.msk [vmem:[#allocation6 + $0x130] sm:$0xff] %vm1782_vm3, %v6963_v25  ;;  %v13610_v7 = vpop.f32.mrb[119].mxu1  ;;  %v7463_v32 = vld [vmem:[#allocation6 + $0x69] sm:$0xff]  ;;  %v7464_v58 = vld [vmem:[#allocation6 + $0x71] sm:$0xff]  ;;  %v8740_v25 = vld [vmem:[#allocation6 + $0x5b] sm:$0xff] }
 0xc63   : > { %13682 = vmatprep.mubr.msk.f32.mxu1 %vm1782_vm3, %v7452_v57  ;;  %14486 = vmatpush3.bf16.msra.mxu1 %v17272_v31  ;;  %v8741_v57 = vld [vmem:[#allocation6 + $0x63] sm:$0xff]  ;;  %v7465_v7 = vld [vmem:[#allocation6 + $0x79] sm:$0xff] }
 0xc65   : > { %v8338_v14 = vld [vmem:[#allocation6 + $0x122] sm:$0xff]  ;;  %v8339_v22 = vld [vmem:[#allocation6 + $0x12a] sm:$0x3f]  ;;  %v6968_v33 = vpop.f32.mrb[120].mxu1 }
 0xc66   : > { %13683 = vmatmul.mubr.msk.f32.gmra.mrb[126].mxu1 %vm1782_vm3, %v7453_v0  ;;  %13846 = vmatprep.mubr.msk.f32.mxu0 %vm1782_vm3, %v8338_v14  ;;  %7016 = vst.msk [vmem:[#allocation6 + $0x138] sm:$0xff] %vm1782_vm3, %v6968_v33  ;;  %v13613_v31 = vpop.f32.mrb[121].mxu1  ;;  %v7466_v0 = vld [vmem:[#allocation6 + $0x81] sm:$0xff]  ;;  %v8742_v14 = vld [vmem:[#allocation6 + $0x6b] sm:$0xff] }
 0xc67   : > { %13685 = vmatprep.mubr.msk.f32.mxu1 %vm1782_vm3, %v7454_v38  ;;  %13847 = vmatmul.mubr.msk.f32.gmra.mrb[92].mxu0 %vm1782_vm3, %v8339_v22  ;;  %v8743_v22 = vld [vmem:[#allocation6 + $0x73] sm:$0xff]  ;;  %v7467_v33 = vld [vmem:[#allocation6 + $0x89] sm:$0xff] }
 0xc68   : > { %13853 = vmatprep.mubr.msk.f32.mxu0 %vm1782_vm3, %v8731_v13  ;;  %v7468_v38 = vld [vmem:[#allocation6 + $0x91] sm:$0xff]  ;;  %v7469_v31 = vld [vmem:[#allocation6 + $0x99] sm:$0xff]  ;;  %v7470_v13 = vld [vmem:[#allocation6 + $0xa1] sm:$0xff] }
 0xc6a   : > { %13686 = vmatmul.mubr.msk.f32.gmra.mrb[128].mxu1 %vm1782_vm3, %v7455_v28  ;;  %v8746_v28 = vld [vmem:[#allocation6 + $0x8b] sm:$0xff] }
 0xc6b   : > { %13688 = vmatprep.mubr.msk.f32.mxu1 %vm1782_vm3, %v7456_v8  ;;  %13854 = vmatmul.mubr.msk.f32.vlgmr.msra.gmra.mrb[58].mxu0 %vm1782_vm3, %v8732_v49  ;;  %v8747_v8 = vld [vmem:[#allocation6 + $0x93] sm:$0xff]  ;;  %v7471_v49 = vld [vmem:[#allocation6 + $0xa9] sm:$0xff] }
 0xc6c   : > { %13856 = vmatprep.mubr.msk.f32.mxu0 %vm1782_vm3, %v8733_v29  ;;  %14472 = vmatpush3.bf16.msra.mxu0 %v17455_v61  ;;  %v8737_v61 = vld [vmem:[#allocation6 + $0x43] sm:$0xff]  ;;  %v7472_v29 = vld [vmem:[#allocation6 + $0xb1] sm:$0xff] }
 0xc6d   : > { %14474 = vmatprep.subr.bf16.mxu0 %v17630_v43 }
 0xc6e   : > { %13689 = vmatmul.mubr.msk.f32.gmra.mrb[130].mxu1 %vm1782_vm3, %v7457_v24  ;;  %v8748_v24 = vld [vmem:[#allocation6 + $0x9b] sm:$0xff] }
 0xc6f   : > { %13691 = vmatprep.mubr.msk.f32.mxu1 %vm1782_vm3, %v7458_v40  ;;  %13857 = vmatmul.mubr.msk.f32.gmra.mrb[60].mxu0 %vm1782_vm3, %v8734_v45  ;;  %v8749_v40 = vld [vmem:[#allocation6 + $0xa3] sm:$0xff]  ;;  %v7473_v45 = vld [vmem:[#allocation6 + $0xb9] sm:$0xff] }
 0xc70   : > { %13859 = vmatprep.mubr.msk.f32.mxu0 %vm1782_vm3, %v8735_v20  ;;  %v7474_v20 = vld [vmem:[#allocation6 + $0xc1] sm:$0xff] }
 0xc72   : > { %13692 = vmatmul.mubr.msk.f32.gmra.mrb[132].mxu1 %vm1782_vm3, %v7459_v6  ;;  %v8750_v6 = vld [vmem:[#allocation6 + $0xab] sm:$0xff] }
 0xc73   : > { %13694 = vmatprep.mubr.msk.f32.mxu1 %vm1782_vm3, %v7460_v23  ;;  %13860 = vmatmul.mubr.msk.f32.gmra.mrb[62].mxu0 %vm1782_vm3, %v8736_v3  ;;  %v8751_v23 = vld [vmem:[#allocation6 + $0xb3] sm:$0xff]  ;;  %v7475_v3 = vld [vmem:[#allocation6 + $0xc9] sm:$0xff] }
 0xc74   : > { %13862 = vmatprep.mubr.msk.f32.mxu0 %vm1782_vm3, %v8737_v61  ;;  %v7476_v61 = vld [vmem:[#allocation6 + $0xd1] sm:$0xff] }
 0xc76   : > { %13695 = vmatmul.mubr.msk.f32.gmra.mrb[134].mxu1 %vm1782_vm3, %v7461_v17  ;;  %v8752_v17 = vld [vmem:[#allocation6 + $0xbb] sm:$0xff] }
 0xc77   : > { %13697 = vmatprep.mubr.msk.f32.mxu1 %vm1782_vm3, %v7462_v41  ;;  %13863 = vmatmul.mubr.msk.f32.gmra.mrb[64].mxu0 %vm1782_vm3, %v8738_v51  ;;  %v8753_v41 = vld [vmem:[#allocation6 + $0xc3] sm:$0xff]  ;;  %v7477_v51 = vld [vmem:[#allocation6 + $0xd9] sm:$0xff] }
 0xc78   : > { %13865 = vmatprep.mubr.msk.f32.mxu0 %vm1782_vm3, %v8739_v34  ;;  %v7478_v34 = vld [vmem:[#allocation6 + $0xe1] sm:$0xff] }
 0xc7a   : > { %13698 = vmatmul.mubr.msk.f32.gmra.mrb[136].mxu1 %vm1782_vm3, %v7463_v32  ;;  %v8754_v32 = vld [vmem:[#allocation6 + $0xcb] sm:$0xff] }
 0xc7b   : > { %13700 = vmatprep.mubr.msk.f32.mxu1 %vm1782_vm3, %v7464_v58  ;;  %13866 = vmatmul.mubr.msk.f32.gmra.mrb[66].mxu0 %vm1782_vm3, %v8740_v25  ;;  %v8755_v58 = vld [vmem:[#allocation6 + $0xd3] sm:$0xff]  ;;  %v7479_v25 = vld [vmem:[#allocation6 + $0xe9] sm:$0xff] }
 0xc7c   : > { %13868 = vmatprep.mubr.msk.f32.mxu0 %vm1782_vm3, %v8741_v57  ;;  %v7480_v57 = vld [vmem:[#allocation6 + $0xf1] sm:$0xff] }
 0xc7e   : > { %13701 = vmatmul.mubr.msk.f32.gmra.mrb[138].mxu1 %vm1782_vm3, %v7465_v7  ;;  %v8756_v7 = vld [vmem:[#allocation6 + $0xdb] sm:$0xff] }
 0xc7f   : > { %13703 = vmatprep.mubr.msk.f32.mxu1 %vm1782_vm3, %v7466_v0  ;;  %13869 = vmatmul.mubr.msk.f32.gmra.mrb[68].mxu0 %vm1782_vm3, %v8742_v14  ;;  %v8757_v0 = vld [vmem:[#allocation6 + $0xe3] sm:$0xff]  ;;  %v7481_v14 = vld [vmem:[#allocation6 + $0xf9] sm:$0xff] }
 0xc80   : > { %13871 = vmatprep.mubr.msk.f32.mxu0 %vm1782_vm3, %v8743_v22  ;;  %v7482_v22 = vld [vmem:[#allocation6 + $0x101] sm:$0xff] }
 0xc82   : > { %13704 = vmatmul.mubr.msk.f32.gmra.mrb[140].mxu1 %vm1782_vm3, %v7467_v33  ;;  %v8758_v33 = vld [vmem:[#allocation6 + $0xeb] sm:$0xff] }
 0xc83   : > { %13706 = vmatprep.mubr.msk.f32.mxu1 %vm1782_vm3, %v7468_v38  ;;  %13872 = vmatmul.mubr.msk.f32.gmra.mrb[70].mxu0 %vm1782_vm3, %v8744_v5  ;;  %v8759_v38 = vld [vmem:[#allocation6 + $0xf3] sm:$0xff]  ;;  %v7483_v5 = vld [vmem:[#allocation6 + $0x109] sm:$0xff] }
 0xc84   : > { %13874 = vmatprep.mubr.msk.f32.mxu0 %vm1782_vm3, %v8745_v44  ;;  %v7484_v44 = vld [vmem:[#allocation6 + $0x111] sm:$0xff] }
 0xc86   : > { %13707 = vmatmul.mubr.msk.f32.gmra.mrb[142].mxu1 %vm1782_vm3, %v7469_v31  ;;  %v8760_v31 = vld [vmem:[#allocation6 + $0xfb] sm:$0xff] }
 0xc87   : > { %13709 = vmatprep.mubr.msk.f32.mxu1 %vm1782_vm3, %v7470_v13  ;;  %13875 = vmatmul.mubr.msk.f32.gmra.mrb[72].mxu0 %vm1782_vm3, %v8746_v28  ;;  %v8761_v13 = vld [vmem:[#allocation6 + $0x103] sm:$0xff]  ;;  %v7485_v28 = vld [vmem:[#allocation6 + $0x119] sm:$0x3f] }
 0xc88   : > { %13877 = vmatprep.mubr.msk.f32.mxu0 %vm1782_vm3, %v8747_v8  ;;  %v8762_v8 = vld [vmem:[#allocation6 + $0x10b] sm:$0xff] }
 0xc8a   : > { %13710 = vmatmul.mubr.msk.f32.gmra.mrb[144].mxu1 %vm1782_vm3, %v7471_v49  ;;  %v8763_v49 = vld [vmem:[#allocation6 + $0x113] sm:$0xff] }
 0xc8b   : > { %13712 = vmatprep.mubr.msk.f32.mxu1 %vm1782_vm3, %v7472_v29  ;;  %13878 = vmatmul.mubr.msk.f32.gmra.mrb[74].mxu0 %vm1782_vm3, %v8748_v24  ;;  %v8764_v29 = vld [vmem:[#allocation6 + $0x11b] sm:$0xff]  ;;  %v8765_v24 = vld [vmem:[#allocation6 + $0x123] sm:$0xff] }
 0xc8c   : > { %13880 = vmatprep.mubr.msk.f32.mxu0 %vm1782_vm3, %v8749_v40  ;;  %v10048_v40 = vld [vmem:[%s18239_s1 + $0x590] sm:$0xff] }
 0xc8e   : > { %13713 = vmatmul.mubr.msk.f32.gmra.mrb[146].mxu1 %vm1782_vm3, %v7473_v45  ;;  %v6973_v45 = vpop.f32.mrb[122].mxu1 }
 0xc8f   : > { %13715 = vmatprep.mubr.msk.f32.mxu1 %vm1782_vm3, %v7474_v20  ;;  %13881 = vmatmul.mubr.msk.f32.gmra.mrb[76].mxu0 %vm1782_vm3, %v8750_v6  ;;  %7017 = vst.msk [vmem:[#allocation6 + $0x140] sm:$0xf] %vm1795_vm4, %v6973_v45  ;;  %v9159_v6 = vld [vmem:[#allocation6 + $0x1c] sm:$0xff]  ;;  %v10029_v45 = vld [vmem:[#allocation6 + $0xad] sm:$0xff] }
 0xc90   : > { %13883 = vmatprep.mubr.msk.f32.mxu0 %vm1782_vm3, %v8751_v23  ;;  %v17733_v23 = vld [vmem:[#allocation6 + $0x2c] sm:$0xff] }
 0xc92   : > { %13716 = vmatmul.mubr.msk.f32.gmra.mrb[148].mxu1 %vm1782_vm3, %v7475_v3  ;;  %v9188_v3 = vld [vmem:[#allocation6 + $0x104] sm:$0xff] }
 0xc93   : > { %13718 = vmatprep.mubr.msk.f32.mxu1 %vm1782_vm3, %v7476_v61  ;;  %13884 = vmatmul.mubr.msk.f32.gmra.mrb[78].mxu0 %vm1782_vm3, %v8752_v17  ;;  %v9189_v61 = vld [vmem:[#allocation6 + $0x10c] sm:$0xff]  ;;  %v9192_v17 = vld [vmem:[#allocation6 + $0x124] sm:$0xff] }
 0xc94   : > { %13886 = vmatprep.mubr.msk.f32.mxu0 %vm1782_vm3, %v8753_v41  ;;  %v9193_v41 = vld [vmem:[#allocation6 + $0x12c] sm:$0x3f] }
 0xc96   : > { %13719 = vmatmul.mubr.msk.f32.gmra.mrb[150].mxu1 %vm1782_vm3, %v7477_v51  ;;  %v10475_v51 = vld [vmem:[%s18239_s1 + $0x5a0] sm:$0xff] }
 0xc97   : > { %13721 = vmatprep.mubr.msk.f32.mxu1 %vm1782_vm3, %v7478_v34  ;;  %13887 = vmatmul.mubr.msk.f32.gmra.mrb[80].mxu0 %vm1782_vm3, %v8754_v32  ;;  %v10476_v34 = vld [vmem:[%s18239_s1 + $0x5a8] sm:$0xff] }
 0xc98   : > { %13889 = vmatprep.mubr.msk.f32.mxu0 %vm1782_vm3, %v8755_v58  ;;  %v14481_v32 = vpack.c.bf16 %v10476_v34, %v10475_v51  ;;  %v10446_v34 = vld [vmem:[#allocation6 + $0x5e] sm:$0xff] }
 0xc9a   : > { %13722 = vmatmul.mubr.msk.f32.gmra.mrb[152].mxu1 %vm1782_vm3, %v7479_v25 }
 0xc9b   : > { %13724 = vmatprep.mubr.msk.f32.mxu1 %vm1782_vm3, %v7480_v57  ;;  %13890 = vmatmul.mubr.msk.f32.gmra.mrb[82].mxu0 %vm1782_vm3, %v8756_v7  ;;  %v9618_v57 = vld [vmem:[#allocation6 + $0x12c] sm:$0xff]  ;;  %v9619_v7 = vld [vmem:[#allocation6 + $0x134] sm:$0xff] }
 0xc9c   : > { %13892 = vmatprep.mubr.msk.f32.mxu0 %vm1782_vm3, %v8757_v0  ;;  %v9620_v0 = vld [vmem:[#allocation6 + $0x13c] sm:$0x3f] }
 0xc9e   : > { %13725 = vmatmul.mubr.msk.f32.gmra.mrb[154].mxu1 %vm1782_vm3, %v7481_v14  ;;  %v10012_v14 = vld [vmem:[#allocation6 + $0x25] sm:$0xff] }
 0xc9f   : > { %13727 = vmatprep.mubr.msk.f32.mxu1 %vm1782_vm3, %v7482_v22  ;;  %13893 = vmatmul.mubr.msk.f32.gmra.mrb[84].mxu0 %vm1782_vm3, %v8758_v33  ;;  %v10013_v22 = vld [vmem:[#allocation6 + $0x2d] sm:$0xff]  ;;  %v10014_v33 = vld [vmem:[#allocation6 + $0x35] sm:$0xff] }
 0xca0   : > { %13895 = vmatprep.mubr.msk.f32.mxu0 %vm1782_vm3, %v8759_v38  ;;  %v10015_v38 = vld [vmem:[#allocation6 + $0x3d] sm:$0xff] }
 0xca2   : > { %13728 = vmatmul.mubr.msk.f32.gmra.mrb[156].mxu1 %vm1782_vm3, %v7483_v5  ;;  %v10016_v5 = vld [vmem:[#allocation6 + $0x45] sm:$0xff] }
 0xca3   : > { %13730 = vmatprep.mubr.msk.f32.mxu1 %vm1782_vm3, %v7484_v44  ;;  %13896 = vmatmul.mubr.msk.f32.gmra.mrb[86].mxu0 %vm1782_vm3, %v8760_v31  ;;  %v10017_v44 = vld [vmem:[#allocation6 + $0x4d] sm:$0xff]  ;;  %v10018_v31 = vld [vmem:[#allocation6 + $0x55] sm:$0xff] }
 0xca4   : > { %13898 = vmatprep.mubr.msk.f32.mxu0 %vm1782_vm3, %v8761_v13  ;;  %v10019_v13 = vld [vmem:[#allocation6 + $0x5d] sm:$0xff] }
 0xca6   : > { %13731 = vmatmul.mubr.msk.f32.gmra.mrb[158].mxu1 %vm1782_vm3, %v7485_v28  ;;  %v10020_v28 = vld [vmem:[#allocation6 + $0x65] sm:$0xff] }
 0xca7   : > { %13740 = vmatprep.mubr.msk.f32.mxu1 %vm1782_vm3, %v17398_v2  ;;  %13899 = vmatmul.mubr.msk.f32.gmra.mrb[88].mxu0 %vm1782_vm3, %v8762_v8  ;;  %v8766_v2 = vld [vmem:[#allocation6 + $0x12b] sm:$0x3f] }
 0xca8   : > { %13901 = vmatprep.mubr.msk.f32.mxu0 %vm1782_vm3, %v8763_v49  ;;  %v10021_v8 = vld [vmem:[#allocation6 + $0x6d] sm:$0xff]  ;;  %v10022_v49 = vld [vmem:[#allocation6 + $0x75] sm:$0xff] }
 0xcaa   : > { %13741 = vmatmul.mubr.msk.f32.vlgmr.msra.gmra.mrb[126].mxu1 %vm1782_vm3, %v17410_v1  ;;  %v10049_v1 = vld [vmem:[%s18239_s1 + $0x598] sm:$0xff] }
 0xcab   : > { %13743 = vmatprep.mubr.msk.f32.mxu1 %vm1782_vm3, %v17417_v36  ;;  %13902 = vmatmul.mubr.msk.f32.gmra.mrb[90].mxu0 %vm1782_vm3, %v8764_v29  ;;  %v9158_v36 = vld [vmem:[#allocation6 + $0x14] sm:$0xff]  ;;  %v17717_v20 = vpack.c.bf16 %v10049_v1, %v10048_v40  ;;  %v10023_v29 = vld [vmem:[#allocation6 + $0x7d] sm:$0xff] }
 0xcac   : > { %13904 = vmatprep.mubr.msk.f32.mxu0 %vm1782_vm3, %v8765_v24  ;;  %v10024_v24 = vld [vmem:[#allocation6 + $0x85] sm:$0xff]  ;;  %v10026_v40 = vld [vmem:[#allocation6 + $0x95] sm:$0xff]  ;;  %v10027_v1 = vld [vmem:[#allocation6 + $0x9d] sm:$0xff] }
 0xcae   : > { %13744 = vmatmul.mubr.msk.f32.gmra.mrb[128].mxu1 %vm1782_vm3, %v17423_v19  ;;  %v13616_v19 = vpop.f32.mrb[123].mxu1 }
 0xcaf   : > { %13746 = vmatprep.mubr.msk.f32.mxu1 %vm1782_vm3, %v17429_v59  ;;  %13905 = vmatmul.mubr.msk.f32.gmra.mrb[92].mxu0 %vm1782_vm3, %v8766_v2  ;;  %v17725_v59 = vld [vmem:[#allocation6 + $0x24] sm:$0xff]  ;;  %v10025_v2 = vld [vmem:[#allocation6 + $0x8d] sm:$0xff] }
 0xcb0   : > { %13911 = vmatprep.mubr.msk.f32.mxu0 %vm1782_vm3, %v9158_v36  ;;  %v10028_v36 = vld [vmem:[#allocation6 + $0xa5] sm:$0xff]  ;;  %v10031_v19 = vld [vmem:[#allocation6 + $0xbd] sm:$0xff] }
 0xcb2   : > { %13747 = vmatmul.mubr.msk.f32.gmra.mrb[130].mxu1 %vm1782_vm3, %v17435_v12  ;;  %v17739_v12 = vld [vmem:[#allocation6 + $0x34] sm:$0xff] }
 0xcb3   : > { %13749 = vmatprep.mubr.msk.f32.mxu1 %vm1782_vm3, %v17441_v63  ;;  %13912 = vmatmul.mubr.msk.f32.vlgmr.msra.gmra.mrb[58].mxu0 %vm1782_vm3, %v9159_v6  ;;  %v17745_v63 = vld [vmem:[#allocation6 + $0x3c] sm:$0xff]  ;;  %v10032_v6 = vld [vmem:[#allocation6 + $0xc5] sm:$0xff] }
 0xcb4   : > { %13914 = vmatprep.mubr.msk.f32.mxu0 %vm1782_vm3, %v17725_v59  ;;  %14476 = vmatpush3.bf16.msra.mxu0 %v17630_v43  ;;  %v9184_v43 = vld [vmem:[#allocation6 + $0xe4] sm:$0xff] }
 0xcb5   : > { %14478 = vmatprep.subr.bf16.mxu0 %v17717_v20 }
 0xcb6   : > { %13750 = vmatmul.mubr.msk.f32.gmra.mrb[132].mxu1 %vm1782_vm3, %v17453_v53  ;;  %v17751_v53 = vld [vmem:[#allocation6 + $0x44] sm:$0xff] }
 0xcb7   : > { %13752 = vmatprep.mubr.msk.f32.mxu1 %vm1782_vm3, %v17462_v18  ;;  %13915 = vmatmul.mubr.msk.f32.gmra.mrb[60].mxu0 %vm1782_vm3, %v17733_v23  ;;  %v17757_v18 = vld [vmem:[#allocation6 + $0x4c] sm:$0xff] }
 0xcb8   : > { %13917 = vmatprep.mubr.msk.f32.mxu0 %vm1782_vm3, %v17739_v12 }
 0xcba   : > { %13753 = vmatmul.mubr.msk.f32.gmra.mrb[134].mxu1 %vm1782_vm3, %v17468_v56  ;;  %v17763_v56 = vld [vmem:[#allocation6 + $0x54] sm:$0xff] }
 0xcbb   : > { %13755 = vmatprep.mubr.msk.f32.mxu1 %vm1782_vm3, %v17474_v52  ;;  %13918 = vmatmul.mubr.msk.f32.gmra.mrb[62].mxu0 %vm1782_vm3, %v17745_v63  ;;  %v17769_v52 = vld [vmem:[#allocation6 + $0x5c] sm:$0xff] }
 0xcbc   : > { %13920 = vmatprep.mubr.msk.f32.mxu0 %vm1782_vm3, %v17751_v53 }
 0xcbe   : > { %13756 = vmatmul.mubr.msk.f32.gmra.mrb[136].mxu1 %vm1782_vm3, %v17480_v15  ;;  %v17775_v15 = vld [vmem:[#allocation6 + $0x64] sm:$0xff] }
 0xcbf   : > { %13758 = vmatprep.mubr.msk.f32.mxu1 %vm1782_vm3, %v17486_v27  ;;  %13921 = vmatmul.mubr.msk.f32.gmra.mrb[64].mxu0 %vm1782_vm3, %v17757_v18  ;;  %v17781_v27 = vld [vmem:[#allocation6 + $0x6c] sm:$0xff] }
 0xcc0   : > { %13923 = vmatprep.mubr.msk.f32.mxu0 %vm1782_vm3, %v17763_v56 }
 0xcc2   : > { %13759 = vmatmul.mubr.msk.f32.gmra.mrb[138].mxu1 %vm1782_vm3, %v17492_v39  ;;  %v17787_v39 = vld [vmem:[#allocation6 + $0x74] sm:$0xff] }
 0xcc3   : > { %13761 = vmatprep.mubr.msk.f32.mxu1 %vm1782_vm3, %v17498_v37  ;;  %13924 = vmatmul.mubr.msk.f32.gmra.mrb[66].mxu0 %vm1782_vm3, %v17769_v52  ;;  %v17793_v37 = vld [vmem:[#allocation6 + $0x7c] sm:$0xff] }
 0xcc4   : > { %13926 = vmatprep.mubr.msk.f32.mxu0 %vm1782_vm3, %v17775_v15 }
 0xcc6   : > { %13762 = vmatmul.mubr.msk.f32.gmra.mrb[140].mxu1 %vm1782_vm3, %v17504_v60  ;;  %v17799_v60 = vld [vmem:[#allocation6 + $0x84] sm:$0xff] }
 0xcc7   : > { %13764 = vmatprep.mubr.msk.f32.mxu1 %vm1782_vm3, %v17510_v11  ;;  %13927 = vmatmul.mubr.msk.f32.gmra.mrb[68].mxu0 %vm1782_vm3, %v17781_v27  ;;  %v17805_v11 = vld [vmem:[#allocation6 + $0x8c] sm:$0xff] }
 0xcc8   : > { %13929 = vmatprep.mubr.msk.f32.mxu0 %vm1782_vm3, %v17787_v39 }
 0xcca   : > { %13765 = vmatmul.mubr.msk.f32.gmra.mrb[142].mxu1 %vm1782_vm3, %v17516_v42  ;;  %v17811_v42 = vld [vmem:[#allocation6 + $0x94] sm:$0xff] }
 0xccb   : > { %13767 = vmatprep.mubr.msk.f32.mxu1 %vm1782_vm3, %v17522_v16  ;;  %13930 = vmatmul.mubr.msk.f32.gmra.mrb[70].mxu0 %vm1782_vm3, %v17793_v37  ;;  %v17817_v16 = vld [vmem:[#allocation6 + $0x9c] sm:$0xff] }
 0xccc   : > { %13932 = vmatprep.mubr.msk.f32.mxu0 %vm1782_vm3, %v17799_v60 }
 0xcce   : > { %13768 = vmatmul.mubr.msk.f32.gmra.mrb[144].mxu1 %vm1782_vm3, %v17528_v9  ;;  %v17823_v9 = vld [vmem:[#allocation6 + $0xa4] sm:$0xff] }
 0xccf   : > { %13770 = vmatprep.mubr.msk.f32.mxu1 %vm1782_vm3, %v17534_v21  ;;  %13933 = vmatmul.mubr.msk.f32.gmra.mrb[72].mxu0 %vm1782_vm3, %v17805_v11  ;;  %v17829_v21 = vld [vmem:[#allocation6 + $0xac] sm:$0xff] }
 0xcd0   : > { %13935 = vmatprep.mubr.msk.f32.mxu0 %vm1782_vm3, %v17811_v42 }
 0xcd2   : > { %13771 = vmatmul.mubr.msk.f32.gmra.mrb[146].mxu1 %vm1782_vm3, %v17540_v46  ;;  %v17835_v46 = vld [vmem:[#allocation6 + $0xb4] sm:$0xff] }
 0xcd3   : > { %13773 = vmatprep.mubr.msk.f32.mxu1 %vm1782_vm3, %v17546_v50  ;;  %13936 = vmatmul.mubr.msk.f32.gmra.mrb[74].mxu0 %vm1782_vm3, %v17817_v16  ;;  %v17841_v50 = vld [vmem:[#allocation6 + $0xbc] sm:$0xff] }
 0xcd4   : > { %13938 = vmatprep.mubr.msk.f32.mxu0 %vm1782_vm3, %v17823_v9 }
 0xcd6   : > { %13774 = vmatmul.mubr.msk.f32.gmra.mrb[148].mxu1 %vm1782_vm3, %v17552_v10  ;;  %v9180_v10 = vld [vmem:[#allocation6 + $0xc4] sm:$0xff] }
 0xcd7   : > { %13776 = vmatprep.mubr.msk.f32.mxu1 %vm1782_vm3, %v17558_v26  ;;  %13939 = vmatmul.mubr.msk.f32.gmra.mrb[76].mxu0 %vm1782_vm3, %v17829_v21  ;;  %v9181_v26 = vld [vmem:[#allocation6 + $0xcc] sm:$0xff] }
 0xcd8   : > { %13941 = vmatprep.mubr.msk.f32.mxu0 %vm1782_vm3, %v17835_v46 }
 0xcda   : > { %13777 = vmatmul.mubr.msk.f32.gmra.mrb[150].mxu1 %vm1782_vm3, %v17564_v62  ;;  %v9182_v62 = vld [vmem:[#allocation6 + $0xd4] sm:$0xff] }
 0xcdb   : > { %13779 = vmatprep.mubr.msk.f32.mxu1 %vm1782_vm3, %v17570_v4  ;;  %13942 = vmatmul.mubr.msk.f32.gmra.mrb[78].mxu0 %vm1782_vm3, %v17841_v50  ;;  %v9183_v4 = vld [vmem:[#allocation6 + $0xdc] sm:$0xff] }
 0xcdc   : > { %13944 = vmatprep.mubr.msk.f32.mxu0 %vm1782_vm3, %v9180_v10 }
 0xcde   : > { %13780 = vmatmul.mubr.msk.f32.gmra.mrb[152].mxu1 %vm1782_vm3, %v17576_v54  ;;  %v9185_v54 = vld [vmem:[#allocation6 + $0xec] sm:$0xff] }
 0xcdf   : > { %13782 = vmatprep.mubr.msk.f32.mxu1 %vm1782_vm3, %v17582_v47  ;;  %13945 = vmatmul.mubr.msk.f32.gmra.mrb[80].mxu0 %vm1782_vm3, %v9181_v26  ;;  %v9186_v47 = vld [vmem:[#allocation6 + $0xf4] sm:$0xff] }
 0xce0   : > { %13947 = vmatprep.mubr.msk.f32.mxu0 %vm1782_vm3, %v9182_v62 }
 0xce2   : > { %13783 = vmatmul.mubr.msk.f32.gmra.mrb[154].mxu1 %vm1782_vm3, %v17588_v48  ;;  %v7912_v48 = vld [vmem:[#allocation6 + $0x11a] sm:$0x3f] }
 0xce3   : > { %13785 = vmatprep.mubr.msk.f32.mxu1 %vm1782_vm3, %v17594_v55  ;;  %13948 = vmatmul.mubr.msk.f32.gmra.mrb[82].mxu0 %vm1782_vm3, %v9183_v4  ;;  %v9187_v55 = vld [vmem:[#allocation6 + $0xfc] sm:$0xff] }
 0xce4   : > { %13950 = vmatprep.mubr.msk.f32.mxu0 %vm1782_vm3, %v9184_v43 }
 0xce6   : > { %13786 = vmatmul.mubr.msk.f32.gmra.mrb[156].mxu1 %vm1782_vm3, %v17600_v30  ;;  %v9190_v30 = vld [vmem:[#allocation6 + $0x114] sm:$0xff] }
 0xce7   : > { %13788 = vmatprep.mubr.msk.f32.mxu1 %vm1782_vm3, %v17606_v35  ;;  %13951 = vmatmul.mubr.msk.f32.gmra.mrb[84].mxu0 %vm1782_vm3, %v9185_v54  ;;  %v9191_v35 = vld [vmem:[#allocation6 + $0x11c] sm:$0xff] }
 0xce8   : > { %13953 = vmatprep.mubr.msk.f32.mxu0 %vm1782_vm3, %v9186_v47 }
 0xcea   : > { %13789 = vmatmul.mubr.msk.f32.gmra.mrb[158].mxu1 %vm1782_vm3, %v7912_v48 }
 0xceb   : > { %13954 = vmatmul.mubr.msk.f32.gmra.mrb[86].mxu0 %vm1782_vm3, %v9187_v55 }
 0xcec   : > { %13956 = vmatprep.mubr.msk.f32.mxu0 %vm1782_vm3, %v9188_v3 }
 0xcef   : > { %13957 = vmatmul.mubr.msk.f32.gmra.mrb[88].mxu0 %vm1782_vm3, %v9189_v61 }
 0xcf0   : > { %13959 = vmatprep.mubr.msk.f32.mxu0 %vm1782_vm3, %v9190_v30 }
 0xcf3   : > { %13960 = vmatmul.mubr.msk.f32.gmra.mrb[90].mxu0 %vm1782_vm3, %v9191_v35 }
 0xcf4   : > { %13962 = vmatprep.mubr.msk.f32.mxu0 %vm1782_vm3, %v9192_v17 }
 0xcf7   : > { %13963 = vmatmul.mubr.msk.f32.gmra.mrb[92].mxu0 %vm1782_vm3, %v9193_v41 }
 0xcf8   : > { %13969 = vmatprep.mubr.msk.f32.mxu0 %vm1782_vm3, %v17725_v59  ;;  %v10033_v59 = vld [vmem:[#allocation6 + $0xcd] sm:$0xff] }
 0xcfb   : > { %13970 = vmatmul.mubr.msk.f32.vlgmr.msra.gmra.mrb[58].mxu0 %vm1782_vm3, %v17733_v23  ;;  %v10034_v23 = vld [vmem:[#allocation6 + $0xd5] sm:$0xff] }
 0xcfc   : > { %13972 = vmatprep.mubr.msk.f32.mxu0 %vm1782_vm3, %v17739_v12  ;;  %14480 = vmatpush3.bf16.msra.mxu0 %v17717_v20  ;;  %v10030_v20 = vld [vmem:[#allocation6 + $0xb5] sm:$0xff]  ;;  %v10035_v12 = vld [vmem:[#allocation6 + $0xdd] sm:$0xff] }
 0xcfd   : > { %14482 = vmatprep.subr.bf16.mxu0 %v14481_v32 }
 0xcff   : > { %13973 = vmatmul.mubr.msk.f32.gmra.mrb[60].mxu0 %vm1782_vm3, %v17745_v63  ;;  %v10036_v63 = vld [vmem:[#allocation6 + $0xe5] sm:$0xff] }
 0xd00   : > { %13975 = vmatprep.mubr.msk.f32.mxu0 %vm1782_vm3, %v17751_v53  ;;  %v10037_v53 = vld [vmem:[#allocation6 + $0xed] sm:$0xff] }
 0xd03   : > { %13976 = vmatmul.mubr.msk.f32.gmra.mrb[62].mxu0 %vm1782_vm3, %v17757_v18  ;;  %v10038_v18 = vld [vmem:[#allocation6 + $0xf5] sm:$0xff] }
 0xd04   : > { %13978 = vmatprep.mubr.msk.f32.mxu0 %vm1782_vm3, %v17763_v56  ;;  %v10039_v56 = vld [vmem:[#allocation6 + $0xfd] sm:$0xff] }
 0xd07   : > { %13979 = vmatmul.mubr.msk.f32.gmra.mrb[64].mxu0 %vm1782_vm3, %v17769_v52  ;;  %v10040_v52 = vld [vmem:[#allocation6 + $0x105] sm:$0xff] }
 0xd08   : > { %13981 = vmatprep.mubr.msk.f32.mxu0 %vm1782_vm3, %v17775_v15  ;;  %v10041_v15 = vld [vmem:[#allocation6 + $0x10d] sm:$0xff] }
 0xd0b   : > { %13982 = vmatmul.mubr.msk.f32.gmra.mrb[66].mxu0 %vm1782_vm3, %v17781_v27  ;;  %v10042_v27 = vld [vmem:[#allocation6 + $0x115] sm:$0xff] }
 0xd0c   : > { %13984 = vmatprep.mubr.msk.f32.mxu0 %vm1782_vm3, %v17787_v39 }
 0xd0f   : > { %13985 = vmatmul.mubr.msk.f32.gmra.mrb[68].mxu0 %vm1782_vm3, %v17793_v37 }
 0xd10   : > { %13987 = vmatprep.mubr.msk.f32.mxu0 %vm1782_vm3, %v17799_v60  ;;  %v10043_v60 = vld [vmem:[#allocation6 + $0x11d] sm:$0xff] }
 0xd13   : > { %13988 = vmatmul.mubr.msk.f32.gmra.mrb[70].mxu0 %vm1782_vm3, %v17805_v11  ;;  %v10044_v11 = vld [vmem:[#allocation6 + $0x125] sm:$0xff] }
 0xd14   : > { %13990 = vmatprep.mubr.msk.f32.mxu0 %vm1782_vm3, %v17811_v42 }
 0xd17   : > { %13991 = vmatmul.mubr.msk.f32.gmra.mrb[72].mxu0 %vm1782_vm3, %v17817_v16 }
 0xd18   : > { %13993 = vmatprep.mubr.msk.f32.mxu0 %vm1782_vm3, %v17823_v9  ;;  %v10045_v9 = vld [vmem:[#allocation6 + $0x12d] sm:$0xff] }
 0xd1b   : > { %13994 = vmatmul.mubr.msk.f32.gmra.mrb[74].mxu0 %vm1782_vm3, %v17829_v21  ;;  %v10046_v21 = vld [vmem:[#allocation6 + $0x135] sm:$0xff] }
 0xd1c   : > { %13996 = vmatprep.mubr.msk.f32.mxu0 %vm1782_vm3, %v17835_v46 }
 0xd1f   : > { %13997 = vmatmul.mubr.msk.f32.gmra.mrb[76].mxu0 %vm1782_vm3, %v17841_v50 }
 0xd20   : > { %13999 = vmatprep.mubr.msk.f32.mxu0 %vm1782_vm3, %v9180_v10  ;;  %v10047_v10 = vld [vmem:[#allocation6 + $0x13d] sm:$0x3f] }
 0xd23   : > { %14000 = vmatmul.mubr.msk.f32.gmra.mrb[78].mxu0 %vm1782_vm3, %v9181_v26  ;;  %v10439_v26 = vld [vmem:[#allocation6 + $0x26] sm:$0xff] }
 0xd24   : > { %14002 = vmatprep.mubr.msk.f32.mxu0 %vm1782_vm3, %v9182_v62 }
 0xd27   : > { %14003 = vmatmul.mubr.msk.f32.gmra.mrb[80].mxu0 %vm1782_vm3, %v9183_v4 }
 0xd28   : > { %14005 = vmatprep.mubr.msk.f32.mxu0 %vm1782_vm3, %v9184_v43  ;;  %v10440_v43 = vld [vmem:[#allocation6 + $0x2e] sm:$0xff] }
 0xd2b   : > { %14006 = vmatmul.mubr.msk.f32.gmra.mrb[82].mxu0 %vm1782_vm3, %v9185_v54  ;;  %v10441_v54 = vld [vmem:[#allocation6 + $0x36] sm:$0xff] }
 0xd2c   : > { %14008 = vmatprep.mubr.msk.f32.mxu0 %vm1782_vm3, %v9186_v47 }
 0xd2f   : > { %14009 = vmatmul.mubr.msk.f32.gmra.mrb[84].mxu0 %vm1782_vm3, %v9187_v55  ;;  %v10442_v55 = vld [vmem:[#allocation6 + $0x3e] sm:$0xff] }
 0xd30   : > { %14011 = vmatprep.mubr.msk.f32.mxu0 %vm1782_vm3, %v9188_v3  ;;  %v10443_v3 = vld [vmem:[#allocation6 + $0x46] sm:$0xff] }
 0xd33   : > { %14012 = vmatmul.mubr.msk.f32.gmra.mrb[86].mxu0 %vm1782_vm3, %v9189_v61 }
 0xd34   : > { %14014 = vmatprep.mubr.msk.f32.mxu0 %vm1782_vm3, %v9190_v30 }
 0xd35   : > { %v17932_v58 = vpop.f32.mrb[124].mxu1 }
 0xd36   : > { %v17934_v25 = vpop.f32.mrb[125].mxu1 }
 0xd37   : > { %14015 = vmatmul.mubr.msk.f32.gmra.mrb[88].mxu0 %vm1782_vm3, %v9191_v35  ;;  %v10444_v35 = vld [vmem:[#allocation6 + $0x4e] sm:$0xff] }
 0xd38   : > { %14017 = vmatprep.mubr.msk.f32.mxu0 %vm1782_vm3, %v9192_v17  ;;  %v10445_v17 = vld [vmem:[#allocation6 + $0x56] sm:$0xff] }
 0xd3b   : > { %14018 = vmatmul.mubr.msk.f32.gmra.mrb[90].mxu0 %vm1782_vm3, %v9618_v57 }
 0xd3c   : > { %14020 = vmatprep.mubr.msk.f32.mxu0 %vm1782_vm3, %v9619_v7 }
 0xd3f   : > { %14021 = vmatmul.mubr.msk.f32.gmra.mrb[92].mxu0 %vm1782_vm3, %v9620_v0  ;;  %v10448_v0 = vld [vmem:[#allocation6 + $0x6e] sm:$0xff] }
 0xd40   : > { %14027 = vmatprep.mubr.msk.f32.mxu0 %vm1782_vm3, %v10012_v14  ;;  %v10449_v14 = vld [vmem:[#allocation6 + $0x76] sm:$0xff] }
 0xd43   : > { %14028 = vmatmul.mubr.msk.f32.vlgmr.msra.gmra.mrb[58].mxu0 %vm1782_vm3, %v10013_v22 }
 0xd44   : > { %14030 = vmatprep.mubr.msk.f32.mxu0 %vm1782_vm3, %v10014_v33  ;;  %14484 = vmatpush3.bf16.msra.mxu0 %v14481_v32  ;;  %v10447_v32 = vld [vmem:[#allocation6 + $0x66] sm:$0xff] }
 0xd47   : > { %14031 = vmatmul.mubr.msk.f32.gmra.mrb[60].mxu0 %vm1782_vm3, %v10015_v38  ;;  %v10450_v38 = vld [vmem:[#allocation6 + $0x7e] sm:$0xff] }
 0xd48   : > { %14033 = vmatprep.mubr.msk.f32.mxu0 %vm1782_vm3, %v10016_v5  ;;  %v10451_v5 = vld [vmem:[#allocation6 + $0x86] sm:$0xff] }
 0xd4b   : > { %14034 = vmatmul.mubr.msk.f32.gmra.mrb[62].mxu0 %vm1782_vm3, %v10017_v44 }
 0xd4c   : > { %14036 = vmatprep.mubr.msk.f32.mxu0 %vm1782_vm3, %v10018_v31 }
 0xd4f   : > { %14037 = vmatmul.mubr.msk.f32.gmra.mrb[64].mxu0 %vm1782_vm3, %v10019_v13  ;;  %v10452_v13 = vld [vmem:[#allocation6 + $0x8e] sm:$0xff] }
 0xd50   : > { %14039 = vmatprep.mubr.msk.f32.mxu0 %vm1782_vm3, %v10020_v28  ;;  %v10453_v28 = vld [vmem:[#allocation6 + $0x96] sm:$0xff] }
 0xd53   : > { %14040 = vmatmul.mubr.msk.f32.gmra.mrb[66].mxu0 %vm1782_vm3, %v10021_v8 }
 0xd54   : > { %14042 = vmatprep.mubr.msk.f32.mxu0 %vm1782_vm3, %v10022_v49 }
 0xd57   : > { %14043 = vmatmul.mubr.msk.f32.gmra.mrb[68].mxu0 %vm1782_vm3, %v10023_v29  ;;  %v10454_v29 = vld [vmem:[#allocation6 + $0x9e] sm:$0xff] }
 0xd58   : > { %14045 = vmatprep.mubr.msk.f32.mxu0 %vm1782_vm3, %v10024_v24  ;;  %v10455_v24 = vld [vmem:[#allocation6 + $0xa6] sm:$0xff] }
 0xd5b   : > { %14046 = vmatmul.mubr.msk.f32.gmra.mrb[70].mxu0 %vm1782_vm3, %v10025_v2 }
 0xd5c   : > { %14048 = vmatprep.mubr.msk.f32.mxu0 %vm1782_vm3, %v10026_v40 }
 0xd5f   : > { %14049 = vmatmul.mubr.msk.f32.gmra.mrb[72].mxu0 %vm1782_vm3, %v10027_v1  ;;  %v10456_v1 = vld [vmem:[#allocation6 + $0xae] sm:$0xff] }
 0xd60   : > { %14051 = vmatprep.mubr.msk.f32.mxu0 %vm1782_vm3, %v10028_v36  ;;  %v10457_v36 = vld [vmem:[#allocation6 + $0xb6] sm:$0xff] }
 0xd63   : > { %14052 = vmatmul.mubr.msk.f32.gmra.mrb[74].mxu0 %vm1782_vm3, %v10029_v45 }
 0xd64   : > { %14054 = vmatprep.mubr.msk.f32.mxu0 %vm1782_vm3, %v10030_v20 }
 0xd67   : > { %14055 = vmatmul.mubr.msk.f32.gmra.mrb[76].mxu0 %vm1782_vm3, %v10031_v19  ;;  %v10458_v19 = vld [vmem:[#allocation6 + $0xbe] sm:$0xff] }
 0xd68   : > { %14057 = vmatprep.mubr.msk.f32.mxu0 %vm1782_vm3, %v10032_v6  ;;  %v10459_v6 = vld [vmem:[#allocation6 + $0xc6] sm:$0xff] }
 0xd6b   : > { %14058 = vmatmul.mubr.msk.f32.gmra.mrb[78].mxu0 %vm1782_vm3, %v10033_v59 }
 0xd6c   : > { %14060 = vmatprep.mubr.msk.f32.mxu0 %vm1782_vm3, %v10034_v23 }
 0xd6f   : > { %14061 = vmatmul.mubr.msk.f32.gmra.mrb[80].mxu0 %vm1782_vm3, %v10035_v12  ;;  %v10460_v12 = vld [vmem:[#allocation6 + $0xce] sm:$0xff] }
 0xd70   : > { %14063 = vmatprep.mubr.msk.f32.mxu0 %vm1782_vm3, %v10036_v63  ;;  %v10461_v63 = vld [vmem:[#allocation6 + $0xd6] sm:$0xff] }
 0xd73   : > { %14064 = vmatmul.mubr.msk.f32.gmra.mrb[82].mxu0 %vm1782_vm3, %v10037_v53 }
 0xd74   : > { %14066 = vmatprep.mubr.msk.f32.mxu0 %vm1782_vm3, %v10038_v18 }
 0xd77   : > { %14067 = vmatmul.mubr.msk.f32.gmra.mrb[84].mxu0 %vm1782_vm3, %v10039_v56  ;;  %v10462_v56 = vld [vmem:[#allocation6 + $0xde] sm:$0xff] }
 0xd78   : > { %14069 = vmatprep.mubr.msk.f32.mxu0 %vm1782_vm3, %v10040_v52  ;;  %v10463_v52 = vld [vmem:[#allocation6 + $0xe6] sm:$0xff] }
 0xd7b   : > { %14070 = vmatmul.mubr.msk.f32.gmra.mrb[86].mxu0 %vm1782_vm3, %v10041_v15 }
 0xd7c   : > { %14072 = vmatprep.mubr.msk.f32.mxu0 %vm1782_vm3, %v10042_v27 }
 0xd7d   : > { %v17972_v39 = vpop.f32.mrb[126].mxu1 }
 0xd7e   : > { %v17974_v37 = vpop.f32.mrb[127].mxu1 }
 0xd7f   : > { %14073 = vmatmul.mubr.msk.f32.gmra.mrb[88].mxu0 %vm1782_vm3, %v10043_v60  ;;  %v10464_v60 = vld [vmem:[#allocation6 + $0xee] sm:$0xff] }
 0xd80   : > { %14075 = vmatprep.mubr.msk.f32.mxu0 %vm1782_vm3, %v10044_v11  ;;  %v10465_v11 = vld [vmem:[#allocation6 + $0xf6] sm:$0xff] }
 0xd81   : > { %v17978_v42 = vpop.f32.mrb[128].mxu1 }
 0xd82   : > { %v17980_v16 = vpop.f32.mrb[129].mxu1 }
 0xd83   : > { %14076 = vmatmul.mubr.msk.f32.gmra.mrb[90].mxu0 %vm1782_vm3, %v10045_v9 }
 0xd84   : > { %14078 = vmatprep.mubr.msk.f32.mxu0 %vm1782_vm3, %v10046_v21 }
 0xd85   : > { %v17984_v46 = vpop.f32.mrb[130].mxu1 }
 0xd86   : > { %v17986_v50 = vpop.f32.mrb[131].mxu1 }
 0xd87   : > { %14079 = vmatmul.mubr.msk.f32.gmra.mrb[92].mxu0 %vm1782_vm3, %v10047_v10  ;;  %v10466_v10 = vld [vmem:[#allocation6 + $0xfe] sm:$0xff] }
 0xd88   : > { %14085 = vmatprep.mubr.msk.f32.mxu0 %vm1782_vm3, %v10439_v26  ;;  %v10467_v26 = vld [vmem:[#allocation6 + $0x106] sm:$0xff] }
 0xd89   : > { %v17990_v62 = vpop.f32.mrb[132].mxu1 }
 0xd8a   : > { %v17992_v4 = vpop.f32.mrb[133].mxu1 }
 0xd8b   : > { %14086 = vmatmul.mubr.msk.f32.vlgmr.msra.gmra.mrb[58].mxu0 %vm1782_vm3, %v10440_v43  ;;  %v10468_v43 = vld [vmem:[#allocation6 + $0x10e] sm:$0xff] }
 0xd8c   : > { %14088 = vmatprep.mubr.msk.f32.mxu0 %vm1782_vm3, %v10441_v54  ;;  %v10469_v54 = vld [vmem:[#allocation6 + $0x116] sm:$0xff] }
 0xd8d   : > { %v17996_v47 = vpop.f32.mrb[134].mxu1 }
 0xd8e   : > { %v17998_v48 = vpop.f32.mrb[135].mxu1 }
 0xd8f   : > { %14089 = vmatmul.mubr.msk.f32.gmra.mrb[60].mxu0 %vm1782_vm3, %v10442_v55  ;;  %v10470_v55 = vld [vmem:[#allocation6 + $0x11e] sm:$0xff] }
 0xd90   : > { %14091 = vmatprep.mubr.msk.f32.mxu0 %vm1782_vm3, %v10443_v3  ;;  %v10471_v3 = vld [vmem:[#allocation6 + $0x126] sm:$0xff] }
 0xd91   : > { %v18002_v61 = vpop.f32.mrb[136].mxu1 }
 0xd92   : > { %v18004_v30 = vpop.f32.mrb[137].mxu1 }
 0xd93   : > { %14092 = vmatmul.mubr.msk.f32.gmra.mrb[62].mxu0 %vm1782_vm3, %v10444_v35  ;;  %v10472_v35 = vld [vmem:[#allocation6 + $0x12e] sm:$0xff] }
 0xd94   : > { %14094 = vmatprep.mubr.msk.f32.mxu0 %vm1782_vm3, %v10445_v17  ;;  %v10473_v17 = vld [vmem:[#allocation6 + $0x136] sm:$0xff] }
 0xd95   : > { %v18008_v41 = vpop.f32.mrb[138].mxu1 }
 0xd96   : > { %v18010_v51 = vpop.f32.mrb[139].mxu1 }
 0xd97   : > { %14095 = vmatmul.mubr.msk.f32.gmra.mrb[64].mxu0 %vm1782_vm3, %v10446_v34  ;;  %v10474_v34 = vld [vmem:[#allocation6 + $0x13e] sm:$0x3f] }
 0xd98   : > { %14097 = vmatprep.mubr.msk.f32.mxu0 %vm1782_vm3, %v10447_v32  ;;  %v18084_v32 = vld [vmem:[%s18239_s1 + $0x5b5] ss:$0 sm:$0xff] }
 0xd99   : > { %v18014_v57 = vpop.f32.mrb[140].mxu1 }
 0xd9a   : > { %v18016_v7 = vpop.f32.mrb[141].mxu1 }
 0xd9b   : > { %14098 = vmatmul.mubr.msk.f32.gmra.mrb[66].mxu0 %vm1782_vm3, %v10448_v0  ;;  %v14506_v0 = vadd.f32 %v17932_v58, %v18084_v32 }
 0xd9c   : > { %14100 = vmatprep.mubr.msk.f32.mxu0 %vm1782_vm3, %v10449_v14  ;;  %v14508_v14 = vadd.f32 %v18084_v32, %v17934_v25  ;;  %v14514_v25 = vadd.f32 %v17978_v42, %v18084_v32  ;;  %v14520_v42 = vadd.f32 %v18084_v32, %v17986_v50 }
 0xd9d   : > { %v18020_v22 = vpop.f32.mrb[142].mxu1 }
 0xd9e   : > { %v18022_v33 = vpop.f32.mrb[143].mxu1 }
 0xd9f   : > { %14101 = vmatmul.mubr.msk.f32.gmra.mrb[68].mxu0 %vm1782_vm3, %v10450_v38 }
 0xda0   : > { %14103 = vmatprep.mubr.msk.f32.mxu0 %vm1782_vm3, %v10451_v5 }
 0xda1   : > { %v18026_v44 = vpop.f32.mrb[144].mxu1 }
 0xda2   : > { %v18028_v31 = vpop.f32.mrb[145].mxu1 }
 0xda3   : > { %14104 = vmatmul.mubr.msk.f32.gmra.mrb[70].mxu0 %vm1782_vm3, %v10452_v13 }
 0xda4   : > { %14106 = vmatprep.mubr.msk.f32.mxu0 %vm1782_vm3, %v10453_v28 }
 0xda5   : > { %v18032_v8 = vpop.f32.mrb[146].mxu1 }
 0xda6   : > { %v18034_v49 = vpop.f32.mrb[147].mxu1 }
 0xda7   : > { %14107 = vmatmul.mubr.msk.f32.gmra.mrb[72].mxu0 %vm1782_vm3, %v10454_v29  ;;  %v14510_v29 = vadd.f32 %v17972_v39, %v18084_v32 }
 0xda8   : > { %14109 = vmatprep.mubr.msk.f32.mxu0 %vm1782_vm3, %v10455_v24 }
 0xda9   : > { %v18038_v2 = vpop.f32.mrb[148].mxu1 }
 0xdaa   : > { %v18040_v40 = vpop.f32.mrb[149].mxu1 }
 0xdab   : > { %14110 = vmatmul.mubr.msk.f32.gmra.mrb[74].mxu0 %vm1782_vm3, %v10456_v1  ;;  %v14512_v1 = vadd.f32 %v18084_v32, %v17974_v37 }
 0xdac   : > { %14112 = vmatprep.mubr.msk.f32.mxu0 %vm1782_vm3, %v10457_v36 }
 0xdad   : > { %v18044_v45 = vpop.f32.mrb[150].mxu1 }
 0xdae   : > { %v18046_v20 = vpop.f32.mrb[151].mxu1 }
 0xdaf   : > { %14113 = vmatmul.mubr.msk.f32.gmra.mrb[76].mxu0 %vm1782_vm3, %v10458_v19 }
 0xdb0   : > { %14115 = vmatprep.mubr.msk.f32.mxu0 %vm1782_vm3, %v10459_v6 }
 0xdb1   : > { %v18050_v59 = vpop.f32.mrb[152].mxu1 }
 0xdb2   : > { %v18052_v23 = vpop.f32.mrb[153].mxu1 }
 0xdb3   : > { %14116 = vmatmul.mubr.msk.f32.gmra.mrb[78].mxu0 %vm1782_vm3, %v10460_v12 }
 0xdb4   : > { %14118 = vmatprep.mubr.msk.f32.mxu0 %vm1782_vm3, %v10461_v63 }
 0xdb5   : > { %v18056_v53 = vpop.f32.mrb[154].mxu1 }
 0xdb6   : > { %v18058_v18 = vpop.f32.mrb[155].mxu1 }
 0xdb7   : > { %14119 = vmatmul.mubr.msk.f32.gmra.mrb[80].mxu0 %vm1782_vm3, %v10462_v56 }
 0xdb8   : > { %14121 = vmatprep.mubr.msk.f32.mxu0 %vm1782_vm3, %v10463_v52 }
 0xdb9   : > { %v18062_v15 = vpop.f32.mrb[156].mxu1 }
 0xdba   : > { %v18064_v27 = vpop.f32.mrb[157].mxu1 }
 0xdbb   : > { %14122 = vmatmul.mubr.msk.f32.gmra.mrb[82].mxu0 %vm1782_vm3, %v10464_v60  ;;  %v14516_v60 = vadd.f32 %v18084_v32, %v17980_v16 }
 0xdbc   : > { %14124 = vmatprep.mubr.msk.f32.mxu0 %vm1782_vm3, %v10465_v11 }
 0xdbd   : > { %v18068_v9 = vpop.f32.mrb[158].mxu1 }
 0xdbe   : > { %v18070_v21 = vpop.f32.mrb[159].mxu1 }
 0xdbf   : > { %14125 = vmatmul.mubr.msk.f32.gmra.mrb[84].mxu0 %vm1782_vm3, %v10466_v10 }
 0xdc0   : > { %14127 = vmatprep.mubr.msk.f32.mxu0 %vm1782_vm3, %v10467_v26 }
 0xdc3   : > { %14128 = vmatmul.mubr.msk.f32.gmra.mrb[86].mxu0 %vm1782_vm3, %v10468_v43 }
 0xdc4   : > { %14130 = vmatprep.mubr.msk.f32.mxu0 %vm1782_vm3, %v10469_v54 }
 0xdc7   : > { %14131 = vmatmul.mubr.msk.f32.gmra.mrb[88].mxu0 %vm1782_vm3, %v10470_v55  ;;  %v14518_v55 = vadd.f32 %v17984_v46, %v18084_v32  ;;  %v14524_v46 = vadd.f32 %v18084_v32, %v17992_v4  ;;  %v14528_v4 = vadd.f32 %v18084_v32, %v17998_v48 }
 0xdc8   : > { %14133 = vmatprep.mubr.msk.f32.mxu0 %vm1782_vm3, %v10471_v3 }
 0xdcb   : > { %14134 = vmatmul.mubr.msk.f32.gmra.mrb[90].mxu0 %vm1782_vm3, %v10472_v35 }
 0xdcc   : > { %14136 = vmatprep.mubr.msk.f32.mxu0 %vm1782_vm3, %v10473_v17 }
 0xdcf   : > { %14137 = vmatmul.mubr.msk.f32.gmra.mrb[92].mxu0 %vm1782_vm3, %v10474_v34 }
 0xe5e   : > { %v14087_v38 = vpop.f32.mrb[58].mxu0 }
 0xe5f   : > { %v14507_v5 = vadd.f32 %v14506_v0, %v14087_v38  ;;  %v10651_v13 = vpop.f32.mrb[59].mxu0 }
 0xe60   : > { %v14509_v28 = vadd.f32 %v14508_v14, %v10651_v13 }
 0xe61   : > { %v10867_v24 = vsub.f32 0.0, %v14507_v5  ;;  %v14522_v5 = vadd.f32 %v17990_v62, %v18084_v32 }
 0xe62   : > { %v10866_v36 = vsub.f32 0.0, %v14509_v28  ;;  %v14090_v19 = vpop.f32.mrb[60].mxu0 }
 0xe63   : > { %v10904_v6 = vmul.f32 1.442695, %v10867_v24  ;;  %v14511_v12 = vadd.f32 %v14510_v29, %v14090_v19  ;;  %v10661_v63 = vpop.f32.mrb[61].mxu0 }
 0xe64   : > { %v10902_v58 = vmul.f32 1.442695, %v10866_v36  ;;  %v14513_v56 = vadd.f32 %v14512_v1, %v10661_v63 }
 0xe65   : > { %15071 = vpow2.f32 %v10904_v6  ;;  %v10869_v52 = vsub.f32 0.0, %v14511_v12 }
 0xe66   : > { %15073 = vpow2.f32 %v10902_v58  ;;  %v10868_v39 = vsub.f32 0.0, %v14513_v56  ;;  %v14093_v11 = vpop.f32.mrb[62].mxu0  ;;  %v14526_v58 = vadd.f32 %v17996_v47, %v18084_v32 }
 0xe67   : > { %v10908_v10 = vmul.f32 1.442695, %v10869_v52  ;;  %v14515_v37 = vadd.f32 %v14514_v25, %v14093_v11  ;;  %v10671_v26 = vpop.f32.mrb[63].mxu0 }
 0xe68   : > { %v10906_v43 = vmul.f32 1.442695, %v10868_v39  ;;  %v14517_v54 = vadd.f32 %v14516_v60, %v10671_v26 }
 0xe69   : > { %15075 = vpow2.f32 %v10908_v10  ;;  %v10871_v3 = vsub.f32 0.0, %v14515_v37 }
 0xe6a   : > { %15077 = vpow2.f32 %v10906_v43  ;;  %v10870_v35 = vsub.f32 0.0, %v14517_v54  ;;  %v14096_v17 = vpop.f32.mrb[64].mxu0  ;;  %v14530_v54 = vadd.f32 %v18002_v61, %v18084_v32 }
 0xe6b   : > { %v10912_v16 = vmul.f32 1.442695, %v10871_v3  ;;  %v14519_v34 = vadd.f32 %v14518_v55, %v14096_v17  ;;  %v10681_v0 = vpop.f32.mrb[65].mxu0  ;;  %v14532_v3 = vadd.f32 %v18084_v32, %v18004_v30 }
 0xe6c   : > { %v10910_v14 = vmul.f32 1.442695, %v10870_v35  ;;  %v14521_v38 = vadd.f32 %v14520_v42, %v10681_v0 }
 0xe6d   : > { %15079 = vpow2.f32 %v10912_v16  ;;  %v10873_v13 = vsub.f32 0.0, %v14519_v34 }
 0xe6e   : > { %15081 = vpow2.f32 %v10910_v14  ;;  %v10872_v28 = vsub.f32 0.0, %v14521_v38  ;;  %v14099_v29 = vpop.f32.mrb[66].mxu0 }
 0xe6f   : > { %v15072_v50 = vpop.eup %15071  ;;  %v10916_v24 = vmul.f32 1.442695, %v10873_v13  ;;  %v14523_v1 = vadd.f32 %v14522_v5, %v14099_v29  ;;  %v10691_v36 = vpop.f32.mrb[67].mxu0  ;;  %v14534_v13 = vadd.f32 %v18008_v41, %v18084_v32 }
 0xe70   : > { %v15074_v19 = vpop.eup %15073  ;;  %v10975_v6 = vadd.f32 1.0, %v15072_v50  ;;  %v10914_v12 = vmul.f32 1.442695, %v10872_v28  ;;  %v14525_v63 = vadd.f32 %v14524_v46, %v10691_v36  ;;  %v14536_v28 = vadd.f32 %v18084_v32, %v18010_v51 }
 0xe71   : > { %v10974_v62 = vadd.f32 1.0, %v15074_v19  ;;  %15083 = vpow2.f32 %v10916_v24  ;;  %v10875_v56 = vsub.f32 0.0, %v14523_v1 }
 0xe72   : > { %15085 = vrcp.f32 %v10975_v6  ;;  %v10874_v25 = vsub.f32 0.0, %v14525_v63  ;;  %v14102_v52 = vpop.f32.mrb[68].mxu0 }
 0xe73   : > { %v15076_v60 = vpop.eup %15075  ;;  %15087 = vrcp.f32 %v10974_v62  ;;  %v10920_v39 = vmul.f32 1.442695, %v10875_v56  ;;  %v14527_v11 = vadd.f32 %v14526_v58, %v14102_v52  ;;  %v10701_v10 = vpop.f32.mrb[69].mxu0  ;;  %v14538_v58 = vadd.f32 %v18014_v57, %v18084_v32 }
 0xe74   : > { %v15078_v37 = vpop.eup %15077  ;;  %v10977_v26 = vadd.f32 1.0, %v15076_v60  ;;  %15089 = vpow2.f32 %v10914_v12  ;;  %v10918_v43 = vmul.f32 1.442695, %v10874_v25  ;;  %v14529_v47 = vadd.f32 %v14528_v4, %v10701_v10 }
 0xe75   : > { %v10976_v55 = vadd.f32 1.0, %v15078_v37  ;;  %15091 = vpow2.f32 %v10920_v39  ;;  %v10877_v48 = vsub.f32 0.0, %v14527_v11  ;;  %v14540_v4 = vadd.f32 %v18084_v32, %v18016_v7 }
 0xe76   : > { %15093 = vrcp.f32 %v10977_v26  ;;  %v10876_v42 = vsub.f32 0.0, %v14529_v47  ;;  %v14105_v35 = vpop.f32.mrb[70].mxu0  ;;  %v14542_v7 = vadd.f32 %v18020_v22, %v18084_v32 }
 0xe77   : > { %v15080_v17 = vpop.eup %15079  ;;  %15095 = vrcp.f32 %v10976_v55  ;;  %v10924_v16 = vmul.f32 1.442695, %v10877_v48  ;;  %v14531_v34 = vadd.f32 %v14530_v54, %v14105_v35  ;;  %v10711_v0 = vpop.f32.mrb[71].mxu0 }
 0xe78   : > { %v15082_v14 = vpop.eup %15081  ;;  %v10979_v38 = vadd.f32 1.0, %v15080_v17  ;;  %15097 = vpow2.f32 %v10918_v43  ;;  %v10922_v5 = vmul.f32 1.442695, %v10876_v42  ;;  %v14533_v61 = vadd.f32 %v14532_v3, %v10711_v0 }
 0xe79   : > { %v10978_v46 = vadd.f32 1.0, %v15082_v14  ;;  %15099 = vpow2.f32 %v10924_v16  ;;  %v10879_v30 = vsub.f32 0.0, %v14531_v34  ;;  %v14544_v3 = vadd.f32 %v18084_v32, %v18022_v33 }
 0xe7a   : > { %15101 = vrcp.f32 %v10979_v38  ;;  %v10878_v29 = vsub.f32 0.0, %v14533_v61  ;;  %v14108_v50 = vpop.f32.mrb[72].mxu0  ;;  %v14546_v33 = vadd.f32 %v18026_v44, %v18084_v32 }
 0xe7b   : > { %v15084_v24 = vpop.eup %15083  ;;  %15103 = vrcp.f32 %v10978_v46  ;;  %v10928_v41 = vmul.f32 1.442695, %v10879_v30  ;;  %v14535_v1 = vadd.f32 %v14534_v13, %v14108_v50  ;;  %v10721_v36 = vpop.f32.mrb[73].mxu0 }
 0xe7c   : > { %v15086_v19 = vpop.eup %15085  ;;  %v10981_v6 = vadd.f32 1.0, %v15084_v24  ;;  %15105 = vpow2.f32 %v10922_v5  ;;  %v10926_v51 = vmul.f32 1.442695, %v10878_v29  ;;  %v14537_v12 = vadd.f32 %v14536_v28, %v10721_v36 }
 0xe7d   : > { %v15088_v63 = vpop.eup %15087  ;;  %11084 = vst.msk [vmem:[%s18122_s6 + $0x8] sm:$0xff] %vm11082_vm0, %v15086_v19  ;;  %15107 = vpow2.f32 %v10928_v41  ;;  %v10881_v62 = vsub.f32 0.0, %v14535_v1  ;;  %v14548_v28 = vadd.f32 %v18084_v32, %v18028_v31  ;;  %v14550_v31 = vadd.f32 %v18032_v8, %v18084_v32 }
 0xe7e   : > { %v15090_v56 = vpop.eup %15089  ;;  %11083 = vst.msk [vmem:[%s18122_s6] sm:$0xff] %vm11082_vm0, %v15088_v63  ;;  %15109 = vrcp.f32 %v10981_v6  ;;  %v10880_v25 = vsub.f32 0.0, %v14537_v12  ;;  %v14111_v52 = vpop.f32.mrb[74].mxu0 }
 0xe7f   : > { %v15092_v60 = vpop.eup %15091  ;;  %v10980_v39 = vadd.f32 1.0, %v15090_v56  ;;  %15111 = vpow2.f32 %v10926_v51  ;;  %v10932_v11 = vmul.f32 1.442695, %v10881_v62  ;;  %v14539_v57 = vadd.f32 %v14538_v58, %v14111_v52  ;;  %v10731_v10 = vpop.f32.mrb[75].mxu0 }
 0xe80   : > { %v15094_v37 = vpop.eup %15093  ;;  %v10983_v26 = vadd.f32 1.0, %v15092_v60  ;;  %v10930_v43 = vmul.f32 1.442695, %v10880_v25  ;;  %v14541_v47 = vadd.f32 %v14540_v4, %v10731_v10  ;;  %v14552_v62 = vadd.f32 %v18084_v32, %v18034_v49 }
 0xe81   : > { %v15096_v54 = vpop.eup %15095  ;;  %11086 = vst.msk [vmem:[%s18122_s6 + $0x18] sm:$0xff] %vm11082_vm0, %v15094_v37  ;;  %15113 = vrcp.f32 %v10980_v39  ;;  %v10883_v55 = vsub.f32 0.0, %v14539_v57  ;;  %v14554_v49 = vadd.f32 %v18038_v2, %v18084_v32 }
 0xe82   : > { %v15098_v48 = vpop.eup %15097  ;;  %11085 = vst.msk [vmem:[%s18122_s6 + $0x10] sm:$0xff] %vm11082_vm0, %v15096_v54  ;;  %15115 = vrcp.f32 %v10983_v26  ;;  %v10882_v42 = vsub.f32 0.0, %v14541_v47  ;;  %v14114_v35 = vpop.f32.mrb[76].mxu0  ;;  %v14556_v47 = vadd.f32 %v18084_v32, %v18040_v40  ;;  %v14558_v40 = vadd.f32 %v18044_v45, %v18084_v32 }
 0xe83   : > { %v15100_v17 = vpop.eup %15099  ;;  %v10982_v16 = vadd.f32 1.0, %v15098_v48  ;;  %15117 = vpow2.f32 %v10932_v11  ;;  %v10936_v34 = vmul.f32 1.442695, %v10883_v55  ;;  %v14543_v22 = vadd.f32 %v14542_v7, %v14114_v35  ;;  %v10741_v0 = vpop.f32.mrb[77].mxu0 }
 0xe84   : > { %v15102_v14 = vpop.eup %15101  ;;  %v10985_v38 = vadd.f32 1.0, %v15100_v17  ;;  %15119 = vpow2.f32 %v10930_v43  ;;  %v10934_v5 = vmul.f32 1.442695, %v10882_v42  ;;  %v14545_v61 = vadd.f32 %v14544_v3, %v10741_v0 }
 0xe85   : > { %v15104_v13 = vpop.eup %15103  ;;  %11088 = vst.msk [vmem:[%s18122_s6 + $0x28] sm:$0xff] %vm11082_vm0, %v15102_v14  ;;  %15121 = vrcp.f32 %v10982_v16  ;;  %v10885_v46 = vsub.f32 0.0, %v14543_v22 }
 0xe86   : > { %v15106_v30 = vpop.eup %15105  ;;  %11087 = vst.msk [vmem:[%s18122_s6 + $0x20] sm:$0xff] %vm11082_vm0, %v15104_v13  ;;  %15123 = vrcp.f32 %v10985_v38  ;;  %v10884_v29 = vsub.f32 0.0, %v14545_v61  ;;  %v14117_v50 = vpop.f32.mrb[78].mxu0  ;;  %v14560_v38 = vadd.f32 %v18084_v32, %v18046_v20  ;;  %v14562_v20 = vadd.f32 %v18050_v59, %v18084_v32 }
 0xe87   : > { %v15108_v24 = vpop.eup %15107  ;;  %v10984_v41 = vadd.f32 1.0, %v15106_v30  ;;  %15125 = vpow2.f32 %v10936_v34  ;;  %v10940_v1 = vmul.f32 1.442695, %v10885_v46  ;;  %v14547_v36 = vadd.f32 %v14546_v33, %v14117_v50  ;;  %v10751_v44 = vpop.f32.mrb[79].mxu0 }
 0xe88   : > { %v15110_v19 = vpop.eup %15109  ;;  %v10987_v6 = vadd.f32 1.0, %v15108_v24  ;;  %15127 = vpow2.f32 %v10934_v5  ;;  %v14549_v51 = vadd.f32 %v14548_v28, %v10751_v44  ;;  %v10938_v63 = vmul.f32 1.442695, %v10884_v29 }
 0xe89   : > { %v15112_v12 = vpop.eup %15111  ;;  %11090 = vst.msk [vmem:[%s18122_s6 + $0x38] sm:$0xff] %vm11082_vm0, %v15110_v19  ;;  %15129 = vrcp.f32 %v10984_v41  ;;  %v10887_v58 = vsub.f32 0.0, %v14547_v36  ;;  %v14564_v44 = vadd.f32 %v18084_v32, %v18052_v23 }
 0xe8a   : > { %15131 = vrcp.f32 %v10987_v6  ;;  %v10986_v56 = vadd.f32 1.0, %v15112_v12  ;;  %v10886_v4 = vsub.f32 0.0, %v14549_v51  ;;  %v14120_v25 = vpop.f32.mrb[80].mxu0 }
 0xe8b   : > { %v15114_v52 = vpop.eup %15113  ;;  %15133 = vpow2.f32 %v10940_v1  ;;  %v10944_v60 = vmul.f32 1.442695, %v10887_v58  ;;  %v14551_v39 = vadd.f32 %v14550_v31, %v14120_v25  ;;  %v10761_v11 = vpop.f32.mrb[81].mxu0 }
 0xe8c   : > { %v15116_v8 = vpop.eup %15115  ;;  %11089 = vst.msk [vmem:[%s18122_s6 + $0x30] sm:$0xff] %vm11082_vm0, %v15114_v52  ;;  %15135 = vrcp.f32 %v10986_v56  ;;  %v10942_v57 = vmul.f32 1.442695, %v10886_v4  ;;  %v14553_v10 = vadd.f32 %v14552_v62, %v10761_v11  ;;  %v14566_v62 = vadd.f32 %v18056_v53, %v18084_v32 }
 0xe8d   : > { %v15118_v37 = vpop.eup %15117  ;;  %11092 = vst.msk [vmem:[%s18122_s6 + $0x48] sm:$0xff] %vm11082_vm0, %v15116_v8  ;;  %15137 = vpow2.f32 %v10938_v63  ;;  %v10889_v26 = vsub.f32 0.0, %v14551_v39  ;;  %v14568_v11 = vadd.f32 %v18084_v32, %v18058_v18 }
 0xe8e   : > { %v15120_v43 = vpop.eup %15119  ;;  %v10989_v54 = vadd.f32 1.0, %v15118_v37  ;;  %15139 = vpow2.f32 %v10944_v60  ;;  %v10888_v7 = vsub.f32 0.0, %v14553_v10  ;;  %v14123_v55 = vpop.f32.mrb[82].mxu0 }
 0xe8f   : > { %v15122_v48 = vpop.eup %15121  ;;  %v10988_v3 = vadd.f32 1.0, %v15120_v43  ;;  %15141 = vpow2.f32 %v10942_v57  ;;  %v10948_v42 = vmul.f32 1.442695, %v10889_v26  ;;  %v14555_v35 = vadd.f32 %v14554_v49, %v14123_v55  ;;  %v10771_v2 = vpop.f32.mrb[83].mxu0 }
 0xe90   : > { %v15124_v17 = vpop.eup %15123  ;;  %11091 = vst.msk [vmem:[%s18122_s6 + $0x40] sm:$0xff] %vm11082_vm0, %v15122_v48  ;;  %15143 = vrcp.f32 %v10989_v54  ;;  %v10946_v16 = vmul.f32 1.442695, %v10888_v7  ;;  %v14557_v34 = vadd.f32 %v14556_v47, %v10771_v2  ;;  %v14570_v47 = vadd.f32 %v18062_v15, %v18084_v32 }
 0xe91   : > { %v15126_v22 = vpop.eup %15125  ;;  %11094 = vst.msk [vmem:[%s18122_s6 + $0x58] sm:$0xff] %vm11082_vm0, %v15124_v17  ;;  %15145 = vrcp.f32 %v10988_v3  ;;  %v10891_v0 = vsub.f32 0.0, %v14555_v35 }
 0xe92   : > { %v15128_v14 = vpop.eup %15127  ;;  %v10991_v5 = vadd.f32 1.0, %v15126_v22  ;;  %15147 = vpow2.f32 %v10948_v42  ;;  %v10890_v61 = vsub.f32 0.0, %v14557_v34  ;;  %v14126_v13 = vpop.f32.mrb[84].mxu0  ;;  %v14572_v42 = vadd.f32 %v18084_v32, %v18064_v27 }
 0xe93   : > { %v15130_v33 = vpop.eup %15129  ;;  %v10990_v46 = vadd.f32 1.0, %v15128_v14  ;;  %15149 = vpow2.f32 %v10946_v16  ;;  %v10952_v30 = vmul.f32 1.442695, %v10891_v0  ;;  %v14559_v28 = vadd.f32 %v14558_v40, %v14126_v13  ;;  %v10781_v45 = vpop.f32.mrb[85].mxu0 }
 0xe94   : > { %v15132_v29 = vpop.eup %15131  ;;  %11093 = vst.msk [vmem:[%s18122_s6 + $0x50] sm:$0xff] %vm11082_vm0, %v15130_v33  ;;  %15151 = vrcp.f32 %v10991_v5  ;;  %v10950_v50 = vmul.f32 1.442695, %v10890_v61  ;;  %v14561_v24 = vadd.f32 %v14560_v38, %v10781_v45  ;;  %v14574_v0 = vadd.f32 %v18068_v9, %v18084_v32 }
 0xe95   : > { %v15134_v41 = vpop.eup %15133  ;;  %11096 = vst.msk [vmem:[%s18122_s6 + $0x68] sm:$0xff] %vm11082_vm0, %v15132_v29  ;;  %15153 = vrcp.f32 %v10990_v46  ;;  %v10893_v1 = vsub.f32 0.0, %v14559_v28  ;;  %v14576_v33 = vadd.f32 %v18084_v32, %v18070_v21 }
 0xe96   : > { %v15136_v36 = vpop.eup %15135  ;;  %v10993_v19 = vadd.f32 1.0, %v15134_v41  ;;  %15155 = vpow2.f32 %v10952_v30  ;;  %v10892_v6 = vsub.f32 0.0, %v14561_v24  ;;  %v14129_v51 = vpop.f32.mrb[86].mxu0 }
 0xe97   : > { %v15138_v12 = vpop.eup %15137  ;;  %11095 = vst.msk [vmem:[%s18122_s6 + $0x60] sm:$0xff] %vm11082_vm0, %v15136_v36  ;;  %15157 = vpow2.f32 %v10950_v50  ;;  %v10956_v31 = vmul.f32 1.442695, %v10893_v1  ;;  %v14563_v63 = vadd.f32 %v14562_v20, %v14129_v51  ;;  %v10791_v58 = vpop.f32.mrb[87].mxu0 }
 0xe98   : > { %v15140_v59 = vpop.eup %15139  ;;  %15159 = vrcp.f32 %v10993_v19  ;;  %v10992_v56 = vadd.f32 1.0, %v15138_v12  ;;  %v14565_v4 = vadd.f32 %v14564_v44, %v10791_v58  ;;  %v10954_v52 = vmul.f32 1.442695, %v10892_v6 }
 0xe99   : > { %v15142_v23 = vpop.eup %15141  ;;  %v10995_v25 = vadd.f32 1.0, %v15140_v59  ;;  %15161 = vpow2.f32 %v10956_v31  ;;  %v10895_v60 = vsub.f32 0.0, %v14563_v63 }
 0xe9a   : > { %v15144_v39 = vpop.eup %15143  ;;  %15163 = vrcp.f32 %v10992_v56  ;;  %v10994_v8 = vadd.f32 1.0, %v15142_v23  ;;  %v10894_v57 = vsub.f32 0.0, %v14565_v4  ;;  %v14132_v10 = vpop.f32.mrb[88].mxu0 }
 0xe9b   : > { %v15146_v37 = vpop.eup %15145  ;;  %11098 = vst.msk [vmem:[%s18122_s6 + $0x78] sm:$0xff] %vm11082_vm0, %v15144_v39  ;;  %15165 = vrcp.f32 %v10995_v25  ;;  %v10960_v53 = vmul.f32 1.442695, %v10895_v60  ;;  %v14567_v49 = vadd.f32 %v14566_v62, %v14132_v10  ;;  %v10801_v26 = vpop.f32.mrb[89].mxu0 }
 0xe9c   : > { %v15148_v43 = vpop.eup %15147  ;;  %11097 = vst.msk [vmem:[%s18122_s6 + $0x70] sm:$0xff] %vm11082_vm0, %v15146_v37  ;;  %15167 = vrcp.f32 %v10994_v8  ;;  %v14569_v18 = vadd.f32 %v14568_v11, %v10801_v26  ;;  %v10958_v55 = vmul.f32 1.442695, %v10894_v57 }
 0xe9d   : > { %v15150_v54 = vpop.eup %15149  ;;  %v10997_v7 = vadd.f32 1.0, %v15148_v43  ;;  %15169 = vpow2.f32 %v10954_v52  ;;  %v10897_v48 = vsub.f32 0.0, %v14567_v49 }
 0xe9e   : > { %v15152_v3 = vpop.eup %15151  ;;  %v10996_v35 = vadd.f32 1.0, %v15150_v54  ;;  %15171 = vpow2.f32 %v10960_v53  ;;  %v10896_v2 = vsub.f32 0.0, %v14569_v18  ;;  %v14135_v17 = vpop.f32.mrb[90].mxu0 }
 0xe9f   : > { %v15154_v15 = vpop.eup %15153  ;;  %11100 = vst.msk [vmem:[%s18122_s6 + $0x88] sm:$0xff] %vm11082_vm0, %v15152_v3  ;;  %15173 = vrcp.f32 %v10997_v7  ;;  %v10964_v16 = vmul.f32 1.442695, %v10897_v48  ;;  %v14571_v34 = vadd.f32 %v14570_v47, %v14135_v17  ;;  %v10811_v22 = vpop.f32.mrb[91].mxu0 }
 0xea0   : > { %v15156_v40 = vpop.eup %15155  ;;  %11099 = vst.msk [vmem:[%s18122_s6 + $0x80] sm:$0xff] %vm11082_vm0, %v15154_v15  ;;  %15175 = vrcp.f32 %v10996_v35  ;;  %v14573_v27 = vadd.f32 %v14572_v42, %v10811_v22  ;;  %v10962_v5 = vmul.f32 1.442695, %v10896_v2 }
 0xea1   : > { %v15158_v14 = vpop.eup %15157  ;;  %v10999_v38 = vadd.f32 1.0, %v15156_v40  ;;  %15177 = vpow2.f32 %v10958_v55  ;;  %v10899_v61 = vsub.f32 0.0, %v14571_v34 }
 0xea2   : > { %v15160_v13 = vpop.eup %15159  ;;  %v10998_v46 = vadd.f32 1.0, %v15158_v14  ;;  %15179 = vpow2.f32 %v10964_v16  ;;  %v10898_v30 = vsub.f32 0.0, %v14573_v27  ;;  %v14138_v28 = vpop.f32.mrb[92].mxu0 }
 0xea3   : > { %v15162_v9 = vpop.eup %15161  ;;  %11102 = vst.msk [vmem:[%s18122_s6 + $0x98] sm:$0xff] %vm11082_vm0, %v15160_v13  ;;  %15181 = vrcp.f32 %v10999_v38  ;;  %v10968_v45 = vmul.f32 1.442695, %v10899_v61  ;;  %v14575_v29 = vadd.f32 %v14574_v0, %v14138_v28  ;;  %v10821_v50 = vpop.f32.mrb[93].mxu0 }
 0xea4   : > { %v15164_v24 = vpop.eup %15163  ;;  %15183 = vrcp.f32 %v10998_v46  ;;  %v11001_v41 = vadd.f32 1.0, %v15162_v9  ;;  %v10966_v20 = vmul.f32 1.442695, %v10898_v30  ;;  %v14577_v1 = vadd.f32 %v14576_v33, %v10821_v50 }
 0xea5   : > { %v15166_v21 = vpop.eup %15165  ;;  %11101 = vst.msk [vmem:[%s18122_s6 + $0x90] sm:$0xff] %vm11082_vm0, %v15164_v24  ;;  %15185 = vpow2.f32 %v10962_v5  ;;  %v10901_v32 = vsub.f32 0.0, %v14575_v29 }
 0xea6   : > { %v15168_v36 = vpop.eup %15167  ;;  %11104 = vst.msk [vmem:[%s18122_s6 + $0xa8] sm:$0xff] %vm11082_vm0, %v15166_v21  ;;  %15187 = vrcp.f32 %v11001_v41  ;;  %v10900_v44 = vsub.f32 0.0, %v14577_v1 }
 0xea7   : > { %v15170_v19 = vpop.eup %15169  ;;  %11103 = vst.msk [vmem:[%s18122_s6 + $0xa0] sm:$0xff] %vm11082_vm0, %v15168_v36  ;;  %15189 = vpow2.f32 %v10968_v45  ;;  %v10972_v6 = vmul.f32 1.442695, %v10901_v32 }
 0xea8   : > { %v15172_v51 = vpop.eup %15171  ;;  %v11000_v12 = vadd.f32 1.0, %v15170_v19  ;;  %15191 = vpow2.f32 %v10966_v20  ;;  %v10970_v31 = vmul.f32 1.442695, %v10900_v44 }
 0xea9   : > { %v15174_v63 = vpop.eup %15173  ;;  %v11003_v58 = vadd.f32 1.0, %v15172_v51  ;;  %15193 = vpow2.f32 %v10972_v6 }
 0xeaa   : > { %v15176_v59 = vpop.eup %15175  ;;  %11106 = vst.msk [vmem:[%s18122_s6 + $0xb8] sm:$0xff] %vm11082_vm0, %v15174_v63  ;;  %15195 = vrcp.f32 %v11000_v12 }
 0xeab   : > { %v15178_v62 = vpop.eup %15177  ;;  %11105 = vst.msk [vmem:[%s18122_s6 + $0xb0] sm:$0xff] %vm11082_vm0, %v15176_v59  ;;  %15197 = vrcp.f32 %v11003_v58 }
 0xeac   : > { %v15180_v56 = vpop.eup %15179  ;;  %v11002_v4 = vadd.f32 1.0, %v15178_v62  ;;  %15199 = vpow2.f32 %v10970_v31 }
 0xead   : > { %v15182_v23 = vpop.eup %15181  ;;  %v11005_v25 = vadd.f32 1.0, %v15180_v56 }
 0xeae   : > { %v15184_v52 = vpop.eup %15183  ;;  %11108 = vst.msk [vmem:[%s18122_s6 + $0xc8] sm:$0xff] %vm11082_vm0, %v15182_v23  ;;  %15201 = vrcp.f32 %v11002_v4 }
 0xeaf   : > { %v15186_v60 = vpop.eup %15185  ;;  %11107 = vst.msk [vmem:[%s18122_s6 + $0xc0] sm:$0xff] %vm11082_vm0, %v15184_v52  ;;  %15203 = vrcp.f32 %v11005_v25 }
 0xeb0   : > { %v15188_v39 = vpop.eup %15187  ;;  %v11004_v11 = vadd.f32 1.0, %v15186_v60 }
 0xeb1   : > { %v15190_v8 = vpop.eup %15189  ;;  %11110 = vst.msk [vmem:[%s18122_s6 + $0xd8] sm:$0xff] %vm11082_vm0, %v15188_v39 }
 0xeb2   : > { %v15192_v57 = vpop.eup %15191  ;;  %15205 = vrcp.f32 %v11004_v11  ;;  %v11007_v10 = vadd.f32 1.0, %v15190_v8 }
 0xeb3   : > { %v15194_v37 = vpop.eup %15193  ;;  %v11006_v53 = vadd.f32 1.0, %v15192_v57 }
 0xeb4   : > { %v15196_v49 = vpop.eup %15195  ;;  %15207 = vrcp.f32 %v11007_v10  ;;  %v11009_v26 = vadd.f32 1.0, %v15194_v37 }
 0xeb5   : > { %v15198_v43 = vpop.eup %15197  ;;  %11109 = vst.msk [vmem:[%s18122_s6 + $0xd0] sm:$0xff] %vm11082_vm0, %v15196_v49  ;;  %15209 = vrcp.f32 %v11006_v53 }
 0xeb6   : > { %v15200_v47 = vpop.eup %15199  ;;  %11112 = vst.msk [vmem:[%s18122_s6 + $0xe8] sm:$0xff] %vm11082_vm0, %v15198_v43  ;;  %15211 = vrcp.f32 %v11009_v26 }
 0xeb7   : > { %v11008_v18 = vadd.f32 1.0, %v15200_v47 }
 0xeb8   : > { %v15202_v54 = vpop.eup %15201 }
 0xeb9   : > { %v15204_v7 = vpop.eup %15203  ;;  %11111 = vst.msk [vmem:[%s18122_s6 + $0xe0] sm:$0xff] %vm11082_vm0, %v15202_v54  ;;  %15213 = vrcp.f32 %v11008_v18 }
 0xeba   : > { %11114 = vst.msk [vmem:[%s18122_s6 + $0xf8] sm:$0xff] %vm11082_vm0, %v15204_v7 }
 0xebc   : > { %v15206_v55 = vpop.eup %15205 }
 0xebd   : > { %11113 = vst.msk [vmem:[%s18122_s6 + $0xf0] sm:$0xff] %vm11082_vm0, %v15206_v55 }
 0xebe   : > { %v15208_v48 = vpop.eup %15207 }
 0xebf   : > { %v15210_v3 = vpop.eup %15209  ;;  %11116 = vst.msk [vmem:[%s18122_s6 + $0x108] sm:$0xff] %vm11082_vm0, %v15208_v48 }
 0xec0   : > { %v15212_v42 = vpop.eup %15211  ;;  %11115 = vst.msk [vmem:[%s18122_s6 + $0x100] sm:$0xff] %vm11082_vm0, %v15210_v3 }
 0xec1   : > { %11119 = vst.msk [vmem:[%s18122_s6 + $0x118] sm:$0x3f] %vm11118_vm1, %v15212_v42 }
 0xec3   : > { %v15214_v35 = vpop.eup %15213 }
 0xec4   : > { %11117 = vst.msk [vmem:[%s18122_s6 + $0x110] sm:$0xff] %vm11082_vm0, %v15214_v35 }
 0xec5 PF: > { %s13_s12 = sadd.s32 1, %s15230_s12  }
 0xec6   : > { %p10_p4 = scmp.ge.s32.totalorder %s13_s12, 4  }
 0xec8   :  { %12 = sbr.rel (!%p10_p4) target bundleno = 1 (0x1), region = 234 }

</bundles_post_ra>
